<compile_context>
chip_gen: v7x
topology: tpu7x:2x2x1
jax: 0.10.0
libtpu: 0.0.40
codegen_flags: <defaults>
</compile_context>

<pallas_src>
import functools

import jax
import jax.numpy as jnp
from jax import lax
from jax.experimental import pallas as pl
from jax.experimental.pallas import tpu as pltpu

LEAKY_SLOPE = 0.01          # torch.nn.LeakyReLU default
BN_EPS = 1e-5               # torch.nn.BatchNorm2d default
VMEM_LIMIT = 48 * 1024 * 1024   # < v7x 64 MiB physical, > v5e/v6e scoped default


def _round_up(x, m):
    return -(-x // m) * m


# ---------------------------------------------------------------------------
# Kernel 1: general tiled matmul  out = A @ B + bias (+ LeakyReLU)
#   A: (M, K) tiled over M (parallel) and K (reduction, f32 acc scratch).
#   B: (K, N) with N resident.  bias broadcast over rows (1,N) or cols (M,1).
# ---------------------------------------------------------------------------
def _mm_kernel(a_ref, b_ref, bias_ref, o_ref, acc_ref, *, act, k_steps):
    k = pl.program_id(1)

    @pl.when(k == 0)
    def _():
        acc_ref[...] = jnp.zeros_like(acc_ref)

    acc_ref[...] += jnp.dot(a_ref[...], b_ref[...],
                            preferred_element_type=jnp.float32)

    @pl.when(k == k_steps - 1)
    def _():
        r = acc_ref[...] + bias_ref[...]
        if act == "leaky_relu":
            r = jnp.maximum(r, LEAKY_SLOPE * r)
        o_ref[...] = r.astype(o_ref.dtype)


def matmul_bias_act(a, b, bias, *, act="none", bias_cols=True,
                    out_dtype=jnp.float32, compute_dtype=jnp.bfloat16):
    """out = a @ b + bias.  a:(M,K), b:(K,N), bias:(N,) if bias_cols else (M,)."""
    m, k = a.shape
    k2, n = b.shape
    assert k == k2
    # M tiling: big lane-friendly tiles (pad M rather than shrinking the tile).
    mp = _round_up(m, 8)
    if mp > 512:
        mt = 512
        mp = _round_up(mp, mt)
    else:
        mt = mp
    # K tiling: full K when small, 512 chunks otherwise (zero-padded).
    if k > 512:
        kt = 512
        kp = _round_up(k, kt)
    else:
        kt = k
        kp = k

    a_p = a if (mp, kp) == (m, k) else jnp.pad(a, ((0, mp - m), (0, kp - k)))
    b_p = b if kp == k else jnp.pad(b, ((0, kp - k), (0, 0)))

    if bias_cols:
        bias_arr = bias.reshape(1, n).astype(jnp.float32)
        bias_spec = pl.BlockSpec((1, n), lambda i, kk: (0, 0))
    else:
        bias_arr = bias if mp == m else jnp.pad(bias, ((0, mp - m),))
        bias_arr = bias_arr.reshape(mp, 1).astype(jnp.float32)
        bias_spec = pl.BlockSpec((mt, 1), lambda i, kk: (i, 0))

    grid = (mp // mt, kp // kt)
    out = pl.pallas_call(
        functools.partial(_mm_kernel, act=act, k_steps=grid[1]),
        out_shape=jax.ShapeDtypeStruct((mp, n), out_dtype),
        grid_spec=pltpu.PrefetchScalarGridSpec(
            num_scalar_prefetch=0,
            grid=grid,
            in_specs=[
                pl.BlockSpec((mt, kt), lambda i, kk: (i, kk)),
                pl.BlockSpec((kt, n), lambda i, kk: (kk, 0)),
                bias_spec,
            ],
            out_specs=pl.BlockSpec((mt, n), lambda i, kk: (i, 0)),
            scratch_shapes=[pltpu.VMEM((mt, n), jnp.float32)],
        ),
        compiler_params=pltpu.CompilerParams(
            dimension_semantics=("parallel", "arbitrary"),
            vmem_limit_bytes=VMEM_LIMIT),
    )(a_p.astype(compute_dtype), b_p.astype(compute_dtype), bias_arr)
    return out[:m]


# ---------------------------------------------------------------------------
# Kernel 2: 3x3 Conv2d (stride 1, pad 1) + bias + LeakyReLU, no im2col in HBM.
#   The activation is padded once to (H+3, W+2); each of the 9 taps is a
#   contiguous shifted window of the flattened padded slab.  grid = (batch,).
# ---------------------------------------------------------------------------
def _conv3x3_kernel(x_ref, w_ref, b_ref, o_ref, *, h, wp):
    x = x_ref[0]                                   # (Cin, (H+3)*Wp)
    cout = w_ref.shape[1]
    lo = h * wp
    acc = jnp.zeros((cout, lo), jnp.float32)
    for t in range(9):
        dy, dx = divmod(t, 3)
        off = dy * wp + dx
        acc = acc + jnp.dot(w_ref[t], x[:, off:off + lo],
                            preferred_element_type=jnp.float32)
    acc = acc + b_ref[...]                         # (Cout, 1) broadcast
    acc = jnp.maximum(acc, LEAKY_SLOPE * acc)      # LeakyReLU
    o_ref[0] = acc.astype(o_ref.dtype)


def conv2d_3x3_lrelu(x, weight, bias, compute_dtype):
    """x: (B, Cin, H, W) -> (B, Cout, H, W)."""
    b, cin, h, w = x.shape
    cout = weight.shape[0]
    wp = w + 2
    lp = (h + 3) * wp
    lo = h * wp
    # pad: 1 top / 2 bottom / 1 left / 1 right (extra bottom row keeps every
    # shifted window in-bounds after flattening).
    xp = jnp.pad(x, ((0, 0), (0, 0), (1, 2), (1, 1))).reshape(b, cin, lp)
    wt = jnp.transpose(weight.reshape(cout, cin, 9), (2, 0, 1))  # (9, Cout, Cin)
    # TODO(synk): tile over H row-bands (with halo) for large images; per-batch
    #             slabs fit VMEM comfortably at OCR line sizes.
    out = pl.pallas_call(
        functools.partial(_conv3x3_kernel, h=h, wp=wp),
        out_shape=jax.ShapeDtypeStruct((b, cout, lo), compute_dtype),
        grid_spec=pltpu.PrefetchScalarGridSpec(
            num_scalar_prefetch=0,
            grid=(b,),
            in_specs=[
                pl.BlockSpec((1, cin, lp), lambda i: (i, 0, 0)),
                pl.BlockSpec((9, cout, cin), lambda i: (0, 0, 0)),
                pl.BlockSpec((cout, 1), lambda i: (0, 0)),
            ],
            out_specs=pl.BlockSpec((1, cout, lo), lambda i: (i, 0, 0)),
        ),
        compiler_params=pltpu.CompilerParams(
            dimension_semantics=("parallel",),
            vmem_limit_bytes=VMEM_LIMIT),
    )(xp.astype(compute_dtype), wt.astype(compute_dtype),
      bias.reshape(cout, 1).astype(jnp.float32))
    # drop the 2 garbage columns per row introduced by the flattened windows
    return out.reshape(b, cout, h, wp)[:, :, :, :w]


# ---------------------------------------------------------------------------
# Kernel 3: BatchNorm2d with batch statistics, tiled two-pass.
# ---------------------------------------------------------------------------
def _bn_stats_kernel(x_ref, g_ref, b_ref, scale_ref, shift_ref,
                     sum_ref, sq_ref, *, count):
    bi = pl.program_id(0)
    mi = pl.program_id(1)

    @pl.when(jnp.logical_and(bi == 0, mi == 0))
    def _():
        sum_ref[...] = jnp.zeros_like(sum_ref)
        sq_ref[...] = jnp.zeros_like(sq_ref)

    x = x_ref[0].astype(jnp.float32)                               # (C, mt)
    sum_ref[...] += jnp.sum(x, axis=1, keepdims=True)
    sq_ref[...] += jnp.sum(x * x, axis=1, keepdims=True)

    @pl.when(jnp.logical_and(bi == pl.num_programs(0) - 1,
                             mi == pl.num_programs(1) - 1))
    def _():
        mean = sum_ref[...] / count
        var = jnp.maximum(sq_ref[...] / count - mean * mean, 0.0)  # biased (torch)
        scale = g_ref[...] * lax.rsqrt(var + BN_EPS)
        scale_ref[...] = scale
        shift_ref[...] = b_ref[...] - mean * scale


def _bn_apply_kernel(x_ref, scale_ref, shift_ref, o_ref):
    x = x_ref[0].astype(jnp.float32)
    o_ref[0] = (x * scale_ref[...] + shift_ref[...]).astype(o_ref.dtype)


def batchnorm2d(x, gamma, beta, compute_dtype):
    """x: (B, C, H, W) -> (B, C, H, W), batch statistics (training-mode BN)."""
    b, c, h, w = x.shape
    hw = h * w
    mt = hw
    for cand in (2048, 1024, 512, 256, 128):
        if hw > cand and hw % cand == 0:
            mt = cand
            break
    nm = hw // mt
    xf = x.reshape(b, c, hw)
    g = gamma.reshape(c, 1).astype(jnp.float32)
    be = beta.reshape(c, 1).astype(jnp.float32)

    scale, shift = pl.pallas_call(
        functools.partial(_bn_stats_kernel, count=float(b * hw)),
        out_shape=(jax.ShapeDtypeStruct((c, 1), jnp.float32),
                   jax.ShapeDtypeStruct((c, 1), jnp.float32)),
        grid_spec=pltpu.PrefetchScalarGridSpec(
            num_scalar_prefetch=0,
            grid=(b, nm),
            in_specs=[
                pl.BlockSpec((1, c, mt), lambda i, m: (i, 0, m)),
                pl.BlockSpec((c, 1), lambda i, m: (0, 0)),
                pl.BlockSpec((c, 1), lambda i, m: (0, 0)),
            ],
            out_specs=[pl.BlockSpec((c, 1), lambda i, m: (0, 0)),
                       pl.BlockSpec((c, 1), lambda i, m: (0, 0))],
            scratch_shapes=[pltpu.VMEM((c, 1), jnp.float32),
                            pltpu.VMEM((c, 1), jnp.float32)],
        ),
        compiler_params=pltpu.CompilerParams(
            dimension_semantics=("arbitrary", "arbitrary"),
            vmem_limit_bytes=VMEM_LIMIT),
    )(xf, g, be)

    out = pl.pallas_call(
        _bn_apply_kernel,
        out_shape=jax.ShapeDtypeStruct((b, c, hw), compute_dtype),
        grid_spec=pltpu.PrefetchScalarGridSpec(
            num_scalar_prefetch=0,
            grid=(b, nm),
            in_specs=[
                pl.BlockSpec((1, c, mt), lambda i, m: (i, 0, m)),
                pl.BlockSpec((c, 1), lambda i, m: (0, 0)),
                pl.BlockSpec((c, 1), lambda i, m: (0, 0)),
            ],
            out_specs=pl.BlockSpec((1, c, mt), lambda i, m: (i, 0, m)),
        ),
        compiler_params=pltpu.CompilerParams(
            dimension_semantics=("parallel", "parallel"),
            vmem_limit_bytes=VMEM_LIMIT),
    )(xf, scale, shift)
    return out.reshape(b, c, h, w)


# ---------------------------------------------------------------------------
# Kernel 4: bidirectional LSTM recurrence.  Single invocation: both directions
# merged, whole time axis resident, h/c as fori_loop carry, one writeback.
# ---------------------------------------------------------------------------
def _lstm_bidir_kernel(xp_ref, whh_ref, o_ref, *, seq_len, hdim):
    h4 = 4 * hdim
    bsz = xp_ref.shape[1]

    def cell(gates, c_prev):
        i = jax.nn.sigmoid(gates[:, 0 * hdim:1 * hdim])
        f = jax.nn.sigmoid(gates[:, 1 * hdim:2 * hdim])
        g = jnp.tanh(gates[:, 2 * hdim:3 * hdim])
        o = jax.nn.sigmoid(gates[:, 3 * hdim:4 * hdim])
        c = f * c_prev + i * g
        h = o * jnp.tanh(c)
        return h, c

    def step(t, carry):
        hf, cf, hb, cb = carry
        tb = seq_len - 1 - t
        xf = xp_ref[t]                             # (B, 8H)
        xb = xp_ref[tb]
        gf = xf[:, :h4] + jnp.dot(hf, whh_ref[0],
                                  preferred_element_type=jnp.float32)
        gb = xb[:, h4:] + jnp.dot(hb, whh_ref[1],
                                  preferred_element_type=jnp.float32)
        hf, cf = cell(gf, cf)
        hb, cb = cell(gb, cb)
        o_ref[t, 0, :, :] = hf
        o_ref[tb, 1, :, :] = hb
        return hf, cf, hb, cb

    z = jnp.zeros((bsz, hdim), jnp.float32)
    lax.fori_loop(0, seq_len, step, (z, z, z, z),
                  unroll=True if seq_len <= 32 else False)


def lstm_bidir_layer(x_seq, w_ih, w_hh, b_ih, b_hh, compute_dtype):
    """x_seq: (L, B, In); w_ih: (2,4H,In); w_hh: (2,4H,H) -> (L, B, 2H)."""
    l, bsz, in_dim = x_seq.shape
    h4 = w_ih.shape[1]
    hdim = h4 // 4

    # Hoisted input projection, (L*B, In) @ (In, 8H): result feeds the
    # recurrence after a free reshape (no transpose of the big tensor).
    w_cat = jnp.concatenate([w_ih[0], w_ih[1]], axis=0).T          # (In, 8H)
    b_cat = jnp.concatenate([b_ih[0] + b_hh[0], b_ih[1] + b_hh[1]], axis=0)
    pre = matmul_bias_act(x_seq.reshape(l * bsz, in_dim), w_cat, b_cat,
                          act="none", bias_cols=True,
                          compute_dtype=compute_dtype)             # (L*B, 8H) f32
    xproj = pre.reshape(l, bsz, 2 * h4)

    whh_t = jnp.transpose(w_hh, (0, 2, 1)).astype(jnp.float32)     # (2, H, 4H)

    out = pl.pallas_call(
        functools.partial(_lstm_bidir_kernel, seq_len=l, hdim=hdim),
        out_shape=jax.ShapeDtypeStruct((l, 2, bsz, hdim), jnp.float32),
        compiler_params=pltpu.CompilerParams(vmem_limit_bytes=VMEM_LIMIT),
    )(xproj, whh_t)
    # (L, 2, B, H) -> (L, B, 2H) with [forward, backward] feature order (torch).
    return jnp.transpose(out, (0, 2, 1, 3)).reshape(l, bsz, 2 * hdim)


def lstm_stack(x_seq, layers, compute_dtype):
    h = x_seq
    for (w_ih, w_hh, b_ih, b_hh) in layers:
        h = lstm_bidir_layer(h, w_ih, w_hh, b_ih, b_hh, compute_dtype)
    return h


# ---------------------------------------------------------------------------
# Output Conv1d head (kernel 3, pad 1) reusing the general matmul kernel.
# ---------------------------------------------------------------------------
def conv1d_k3(x_bcl, weight, bias, compute_dtype):
    b, c, l = x_bcl.shape
    o = weight.shape[0]
    xc = jnp.transpose(x_bcl, (1, 0, 2))                           # (C, B, L)
    x_pad = jnp.pad(xc, ((0, 0), (0, 0), (1, 1)))
    patches = jnp.stack([x_pad[:, :, k:k + l] for k in range(3)],
                        axis=1).reshape(c * 3, b * l)
    out = matmul_bias_act(weight.reshape(o, c * 3), patches, bias,
                          act="none", bias_cols=False,
                          compute_dtype=compute_dtype)             # (O, B*L)
    return jnp.transpose(out.reshape(o, b, l), (1, 0, 2))


# ---------------------------------------------------------------------------
# Full forward pass (Pallas path).
# ---------------------------------------------------------------------------
def net_vgg_lstm_forward(x_bhwc, params, cfg, compute_dtype=jnp.bfloat16):
    x = jnp.transpose(x_bhwc, (0, 3, 1, 2)).astype(compute_dtype)  # NCHW
    for convs, (gamma, beta), stride in zip(params["conv_blocks"],
                                            params["bn"], cfg["strides"]):
        for (weight, bias) in convs:                   # conv + LeakyReLU (x2)
            x = conv2d_3x3_lrelu(x, weight, bias, compute_dtype)
        sh, sw = stride
        b, c, h, w = x.shape
        x = jnp.max(x.reshape(b, c, h // sh, sh, w // sw, sw), axis=(3, 5))
        x = batchnorm2d(x, gamma, beta, compute_dtype)

    # torch.max(out, 2): collapse the height axis -> (B, C, L)
    feat = jnp.max(x, axis=2).astype(jnp.float32)

    # MultiscaleRecurrentBlock(scales=3, layers_per_scale=2)
    outputs = []
    scaled = feat
    for depth, layers in enumerate(params["scale_lstms"]):
        if depth != 0:
            bb, cc, ll = scaled.shape
            scaled = jnp.max(scaled.reshape(bb, cc, ll // 2, 2), axis=-1)
        out = lstm_stack(jnp.transpose(scaled, (2, 0, 1)), layers,
                         compute_dtype)                            # (Ls, B, C)
        out = jnp.transpose(out, (1, 2, 0))                        # (B, C, Ls)
        if depth != 0:
            out = jnp.repeat(out, 2 ** depth, axis=-1)             # nearest up
        outputs.append(out)
    summed = outputs[0]
    for o in outputs[1:]:
        summed = summed + o
    final = lstm_stack(jnp.transpose(summed, (2, 0, 1)),
                       params["final_lstm"], compute_dtype)
    final = jnp.transpose(final, (1, 2, 0))                        # (B, C, L)

    w_out, b_out = params["out_conv"]
    return conv1d_k3(final, w_out, b_out, compute_dtype)


# ---------------------------------------------------------------------------
# Pure-JAX reference (independent path: lax.conv / reduce_window / scan).
# ---------------------------------------------------------------------------
def _ref_lstm_dir(x_seq, w_ih, w_hh, b_ih, b_hh, reverse):
    hdim = w_hh.shape[1]
    bsz = x_seq.shape[1]

    def step(carry, x_t):
        h, c = carry
        gates = x_t @ w_ih.T + b_ih + h @ w_hh.T + b_hh
        i, f, g, o = jnp.split(gates, 4, axis=-1)
        c = jax.nn.sigmoid(f) * c + jax.nn.sigmoid(i) * jnp.tanh(g)
        h = jax.nn.sigmoid(o) * jnp.tanh(c)
        return (h, c), h

    init = (jnp.zeros((bsz, hdim), jnp.float32),
            jnp.zeros((bsz, hdim), jnp.float32))
    xs = x_seq[::-1] if reverse else x_seq
    _, hs = lax.scan(step, init, xs)
    return hs[::-1] if reverse else hs


def _ref_lstm_stack(x_seq, layers):
    h = x_seq
    for (w_ih, w_hh, b_ih, b_hh) in layers:
        fwd = _ref_lstm_dir(h, w_ih[0], w_hh[0], b_ih[0], b_hh[0], False)
        bwd = _ref_lstm_dir(h, w_ih[1], w_hh[1], b_ih[1], b_hh[1], True)
        h = jnp.concatenate([fwd, bwd], axis=-1)
    return h


def _ref_leaky(x):
    return jnp.where(x >= 0, x, LEAKY_SLOPE * x)


def _ref_bn(x, gamma, beta):
    mean = jnp.mean(x, axis=(0, 2, 3), keepdims=True)
    var = jnp.var(x, axis=(0, 2, 3), keepdims=True)
    return ((x - mean) / jnp.sqrt(var + BN_EPS) * gamma.reshape(1, -1, 1, 1)
            + beta.reshape(1, -1, 1, 1))


def net_vgg_lstm_ref(x_bhwc, params, cfg):
    x = jnp.transpose(x_bhwc, (0, 3, 1, 2)).astype(jnp.float32)
    for convs, (gamma, beta), stride in zip(params["conv_blocks"],
                                            params["bn"], cfg["strides"]):
        for (weight, bias) in convs:
            x = lax.conv_general_dilated(x, weight, (1, 1), "SAME",
                                         dimension_numbers=("NCHW", "OIHW", "NCHW"))
            x = _ref_leaky(x + bias.reshape(1, -1, 1, 1))
        x = lax.reduce_window(x, -jnp.inf, lax.max,
                              (1, 1, stride[0], stride[1]),
                              (1, 1, stride[0], stride[1]), "VALID")
        x = _ref_bn(x, gamma, beta)
    feat = jnp.max(x, axis=2)                                      # (B, C, L)

    outputs = []
    scaled = feat
    for depth, layers in enumerate(params["scale_lstms"]):
        if depth != 0:
            b, c, l = scaled.shape
            scaled = jnp.max(scaled.reshape(b, c, l // 2, 2), axis=-1)
        out = _ref_lstm_stack(jnp.transpose(scaled, (2, 0, 1)), layers)
        out = jnp.transpose(out, (1, 2, 0))
        if depth != 0:
            out = jnp.repeat(out, 2 ** depth, axis=-1)
        outputs.append(out)
    summed = outputs[0]
    for o in outputs[1:]:
        summed = summed + o
    final = _ref_lstm_stack(jnp.transpose(summed, (2, 0, 1)), params["final_lstm"])
    final = jnp.transpose(final, (1, 2, 0))

    w_out, b_out = params["out_conv"]
    x4 = final[:, :, None, :]
    w4 = w_out[:, :, None, :]
    out = lax.conv_general_dilated(x4, w4, (1, 1), "SAME",
                                   dimension_numbers=("NCHW", "OIHW", "NCHW"))
    return out[:, :, 0, :] + b_out.reshape(1, -1, 1)


# ---------------------------------------------------------------------------
# Config / parameter construction (mirrors VGG_conv_module with layers_2d=[]).
# ---------------------------------------------------------------------------
def build_cfg(in_channels, base_channels, conv_blocks, subsampling):
    channels, strides = [], []
    cin, sub_h = in_channels, 1
    for i in range(conv_blocks):
        cout = base_channels * 2 ** i
        stride = (2, 2) if sub_h < subsampling else (2, 1)
        sub_h *= stride[1]
        channels.append((cin, cout))
        strides.append(stride)
        cin = cout
    return {"channels": channels, "strides": strides, "rnn_channels": cin}


def init_params(key, cfg, num_classes, scales=3, layers_per_scale=2):
    keys = iter(jax.random.split(key, 256))

    def uniform(shape, bound):
        return jax.random.uniform(next(keys), shape, jnp.float32, -bound, bound)

    conv_blocks_p, bn_p = [], []
    for (cin, cout) in cfg["channels"]:
        convs, c_prev = [], cin
        for _ in range(2):                                     # layer_count = 2
            bound = 1.0 / jnp.sqrt(jnp.float32(c_prev * 9))
            convs.append((uniform((cout, c_prev, 3, 3), bound),
                          uniform((cout,), bound)))
            c_prev = cout
        conv_blocks_p.append(convs)
        bn_p.append((1.0 + 0.1 * jax.random.normal(next(keys), (cout,), jnp.float32),
                     0.1 * jax.random.normal(next(keys), (cout,), jnp.float32)))

    rnn_c = cfg["rnn_channels"]
    hdim = rnn_c // 2
    bound = 1.0 / jnp.sqrt(jnp.float32(hdim))

    def lstm_layer(in_dim):
        return (uniform((2, 4 * hdim, in_dim), bound),
                uniform((2, 4 * hdim, hdim), bound),
                uniform((2, 4 * hdim), bound),
                uniform((2, 4 * hdim), bound))

    scale_lstms = [[lstm_layer(rnn_c if layer == 0 else 2 * hdim)
                    for layer in range(layers_per_scale)]
                   for _ in range(scales)]
    final_lstm = [lstm_layer(rnn_c)]

    bound_o = 1.0 / jnp.sqrt(jnp.float32(rnn_c * 3))
    out_conv = (uniform((num_classes, rnn_c, 3), bound_o),
                uniform((num_classes,), bound_o))

    return {"conv_blocks": conv_blocks_p, "bn": bn_p,
            "scale_lstms": scale_lstms, "final_lstm": final_lstm,
            "out_conv": out_conv}


if __name__ == "__main__":
    # x = [B, H, W, C] (forward permutes to NCHW).  Small shapes consistent
    # with the module; W / subsampling gives the output sequence length.
    B, H_IN, W_IN, C_IN = 2, 16, 32, 3
    BASE_CHANNELS, CONV_BLOCKS, SUBSAMPLING = 8, 2, 4
    NUM_CLASSES = 10

    cfg = build_cfg(C_IN, BASE_CHANNELS, CONV_BLOCKS, SUBSAMPLING)

    key = jax.random.PRNGKey(0)
    k_x, k_p = jax.random.split(key)
    x = jax.random.normal(k_x, (B, H_IN, W_IN, C_IN), dtype=jnp.float32)
    params = init_params(k_p, cfg, NUM_CLASSES)

    ref = net_vgg_lstm_ref(x, params, cfg)
    seq_len = W_IN // SUBSAMPLING

    # 1) f32 Pallas path: tight correctness check against the pure-JAX ref.
    fwd_f32 = jax.jit(functools.partial(net_vgg_lstm_forward, cfg=cfg,
                                        compute_dtype=jnp.float32))
    out_f32 = jax.block_until_ready(fwd_f32(x, params))
    assert out_f32.shape == (B, NUM_CLASSES, seq_len), out_f32.shape
    diff_f32 = float(jnp.max(jnp.abs(out_f32 - ref)))
    assert diff_f32 < 2e-3, f"f32 path max abs diff = {diff_f32}"

    # 2) bf16 MXU path: the performance configuration (looser tolerance).
    fwd_bf16 = jax.jit(functools.partial(net_vgg_lstm_forward, cfg=cfg,
                                         compute_dtype=jnp.bfloat16))
    out_bf16 = jax.block_until_ready(fwd_bf16(x, params))
    assert out_bf16.shape == (B, NUM_CLASSES, seq_len), out_bf16.shape
    diff_bf16 = float(jnp.max(jnp.abs(out_bf16 - ref)))
    assert diff_bf16 < 1e-1, f"bf16 path max abs diff = {diff_bf16}"

    print("KERNEL_OK")
</pallas_src>

<mosaic_0001>
module attributes {stable_mosaic.version = 11 : i64} {
  func.func @_conv3x3_kernel(%arg0: i32, %arg1: memref<1x3x646xf32, #tpu.memory_space<vmem>>, %arg2: memref<9x8x3xf32, #tpu.memory_space<vmem>>, %arg3: memref<8x1xf32, #tpu.memory_space<vmem>>, %arg4: memref<1x8x544xf32, #tpu.memory_space<vmem>>) attributes {dimension_semantics = [#tpu.dimension_semantics<parallel>], iteration_bounds = array<i64: 2>, scalar_prefetch = 0 : i64, scratch_operands = 0 : i64, tpu.core_type = #tpu.core_type<tc>, window_params = [{transform_indices = @transform_0, window_bounds = array<i64: 1, 3, 646>}, {pipeline_mode = #tpu.pipeline_mode<synchronous>, transform_indices = @transform_1, window_bounds = array<i64: 9, 8, 3>}, {pipeline_mode = #tpu.pipeline_mode<synchronous>, transform_indices = @transform_2, window_bounds = array<i64: 8, 1>}, {transform_indices = @transform_3, window_bounds = array<i64: 1, 8, 544>}]} {
    %c0 = arith.constant 0 : index
    %c0_0 = arith.constant 0 : index
    %c0_1 = arith.constant 0 : index
    %0 = vector.load %arg1[%c0, %c0_0, %c0_1] : memref<1x3x646xf32, #tpu.memory_space<vmem>>, vector<1x3x646xf32>
    %1 = vector.shape_cast %0 : vector<1x3x646xf32> to vector<3x646xf32>
    %cst = arith.constant 0.000000e+00 : f32
    %2 = vector.broadcast %cst : f32 to vector<8x544xf32>
    %c0_2 = arith.constant 0 : index
    %c0_3 = arith.constant 0 : index
    %c0_4 = arith.constant 0 : index
    %3 = vector.load %arg2[%c0_2, %c0_3, %c0_4] : memref<9x8x3xf32, #tpu.memory_space<vmem>>, vector<1x8x3xf32>
    %4 = vector.shape_cast %3 : vector<1x8x3xf32> to vector<8x3xf32>
    %5 = vector.extract_strided_slice %1 {offsets = [0, 0], sizes = [3, 544], strides = [1, 1]} : vector<3x646xf32> to vector<3x544xf32>
    %cst_5 = arith.constant dense<0.000000e+00> : vector<8x544xf32>
    %6 = tpu.matmul %4, %5, %cst_5 {dimension_numbers = #tpu.dot_dimension_numbers<[1], [0], [0], [1], [0, 0, 1, 1], [], []>} : vector<8x3xf32>, vector<3x544xf32>, vector<8x544xf32> -> vector<8x544xf32>
    %7 = arith.addf %2, %6 : vector<8x544xf32>
    %c1 = arith.constant 1 : index
    %c0_6 = arith.constant 0 : index
    %c0_7 = arith.constant 0 : index
    %8 = vector.load %arg2[%c1, %c0_6, %c0_7] : memref<9x8x3xf32, #tpu.memory_space<vmem>>, vector<1x8x3xf32>
    %9 = vector.shape_cast %8 : vector<1x8x3xf32> to vector<8x3xf32>
    %10 = vector.extract_strided_slice %1 {offsets = [0, 1], sizes = [3, 544], strides = [1, 1]} : vector<3x646xf32> to vector<3x544xf32>
    %cst_8 = arith.constant dense<0.000000e+00> : vector<8x544xf32>
    %11 = tpu.matmul %9, %10, %cst_8 {dimension_numbers = #tpu.dot_dimension_numbers<[1], [0], [0], [1], [0, 0, 1, 1], [], []>} : vector<8x3xf32>, vector<3x544xf32>, vector<8x544xf32> -> vector<8x544xf32>
    %12 = arith.addf %7, %11 : vector<8x544xf32>
    %c2 = arith.constant 2 : index
    %c0_9 = arith.constant 0 : index
    %c0_10 = arith.constant 0 : index
    %13 = vector.load %arg2[%c2, %c0_9, %c0_10] : memref<9x8x3xf32, #tpu.memory_space<vmem>>, vector<1x8x3xf32>
    %14 = vector.shape_cast %13 : vector<1x8x3xf32> to vector<8x3xf32>
    %15 = vector.extract_strided_slice %1 {offsets = [0, 2], sizes = [3, 544], strides = [1, 1]} : vector<3x646xf32> to vector<3x544xf32>
    %cst_11 = arith.constant dense<0.000000e+00> : vector<8x544xf32>
    %16 = tpu.matmul %14, %15, %cst_11 {dimension_numbers = #tpu.dot_dimension_numbers<[1], [0], [0], [1], [0, 0, 1, 1], [], []>} : vector<8x3xf32>, vector<3x544xf32>, vector<8x544xf32> -> vector<8x544xf32>
    %17 = arith.addf %12, %16 : vector<8x544xf32>
    %c3 = arith.constant 3 : index
    %c0_12 = arith.constant 0 : index
    %c0_13 = arith.constant 0 : index
    %18 = vector.load %arg2[%c3, %c0_12, %c0_13] : memref<9x8x3xf32, #tpu.memory_space<vmem>>, vector<1x8x3xf32>
    %19 = vector.shape_cast %18 : vector<1x8x3xf32> to vector<8x3xf32>
    %20 = vector.extract_strided_slice %1 {offsets = [0, 34], sizes = [3, 544], strides = [1, 1]} : vector<3x646xf32> to vector<3x544xf32>
    %cst_14 = arith.constant dense<0.000000e+00> : vector<8x544xf32>
    %21 = tpu.matmul %19, %20, %cst_14 {dimension_numbers = #tpu.dot_dimension_numbers<[1], [0], [0], [1], [0, 0, 1, 1], [], []>} : vector<8x3xf32>, vector<3x544xf32>, vector<8x544xf32> -> vector<8x544xf32>
    %22 = arith.addf %17, %21 : vector<8x544xf32>
    %c4 = arith.constant 4 : index
    %c0_15 = arith.constant 0 : index
    %c0_16 = arith.constant 0 : index
    %23 = vector.load %arg2[%c4, %c0_15, %c0_16] : memref<9x8x3xf32, #tpu.memory_space<vmem>>, vector<1x8x3xf32>
    %24 = vector.shape_cast %23 : vector<1x8x3xf32> to vector<8x3xf32>
    %25 = vector.extract_strided_slice %1 {offsets = [0, 35], sizes = [3, 544], strides = [1, 1]} : vector<3x646xf32> to vector<3x544xf32>
    %cst_17 = arith.constant dense<0.000000e+00> : vector<8x544xf32>
    %26 = tpu.matmul %24, %25, %cst_17 {dimension_numbers = #tpu.dot_dimension_numbers<[1], [0], [0], [1], [0, 0, 1, 1], [], []>} : vector<8x3xf32>, vector<3x544xf32>, vector<8x544xf32> -> vector<8x544xf32>
    %27 = arith.addf %22, %26 : vector<8x544xf32>
    %c5 = arith.constant 5 : index
    %c0_18 = arith.constant 0 : index
    %c0_19 = arith.constant 0 : index
    %28 = vector.load %arg2[%c5, %c0_18, %c0_19] : memref<9x8x3xf32, #tpu.memory_space<vmem>>, vector<1x8x3xf32>
    %29 = vector.shape_cast %28 : vector<1x8x3xf32> to vector<8x3xf32>
    %30 = vector.extract_strided_slice %1 {offsets = [0, 36], sizes = [3, 544], strides = [1, 1]} : vector<3x646xf32> to vector<3x544xf32>
    %cst_20 = arith.constant dense<0.000000e+00> : vector<8x544xf32>
    %31 = tpu.matmul %29, %30, %cst_20 {dimension_numbers = #tpu.dot_dimension_numbers<[1], [0], [0], [1], [0, 0, 1, 1], [], []>} : vector<8x3xf32>, vector<3x544xf32>, vector<8x544xf32> -> vector<8x544xf32>
    %32 = arith.addf %27, %31 : vector<8x544xf32>
    %c6 = arith.constant 6 : index
    %c0_21 = arith.constant 0 : index
    %c0_22 = arith.constant 0 : index
    %33 = vector.load %arg2[%c6, %c0_21, %c0_22] : memref<9x8x3xf32, #tpu.memory_space<vmem>>, vector<1x8x3xf32>
    %34 = vector.shape_cast %33 : vector<1x8x3xf32> to vector<8x3xf32>
    %35 = vector.extract_strided_slice %1 {offsets = [0, 68], sizes = [3, 544], strides = [1, 1]} : vector<3x646xf32> to vector<3x544xf32>
    %cst_23 = arith.constant dense<0.000000e+00> : vector<8x544xf32>
    %36 = tpu.matmul %34, %35, %cst_23 {dimension_numbers = #tpu.dot_dimension_numbers<[1], [0], [0], [1], [0, 0, 1, 1], [], []>} : vector<8x3xf32>, vector<3x544xf32>, vector<8x544xf32> -> vector<8x544xf32>
    %37 = arith.addf %32, %36 : vector<8x544xf32>
    %c7 = arith.constant 7 : index
    %c0_24 = arith.constant 0 : index
    %c0_25 = arith.constant 0 : index
    %38 = vector.load %arg2[%c7, %c0_24, %c0_25] : memref<9x8x3xf32, #tpu.memory_space<vmem>>, vector<1x8x3xf32>
    %39 = vector.shape_cast %38 : vector<1x8x3xf32> to vector<8x3xf32>
    %40 = vector.extract_strided_slice %1 {offsets = [0, 69], sizes = [3, 544], strides = [1, 1]} : vector<3x646xf32> to vector<3x544xf32>
    %cst_26 = arith.constant dense<0.000000e+00> : vector<8x544xf32>
    %41 = tpu.matmul %39, %40, %cst_26 {dimension_numbers = #tpu.dot_dimension_numbers<[1], [0], [0], [1], [0, 0, 1, 1], [], []>} : vector<8x3xf32>, vector<3x544xf32>, vector<8x544xf32> -> vector<8x544xf32>
    %42 = arith.addf %37, %41 : vector<8x544xf32>
    %c8 = arith.constant 8 : index
    %c0_27 = arith.constant 0 : index
    %c0_28 = arith.constant 0 : index
    %43 = vector.load %arg2[%c8, %c0_27, %c0_28] : memref<9x8x3xf32, #tpu.memory_space<vmem>>, vector<1x8x3xf32>
    %44 = vector.shape_cast %43 : vector<1x8x3xf32> to vector<8x3xf32>
    %45 = vector.extract_strided_slice %1 {offsets = [0, 70], sizes = [3, 544], strides = [1, 1]} : vector<3x646xf32> to vector<3x544xf32>
    %cst_29 = arith.constant dense<0.000000e+00> : vector<8x544xf32>
    %46 = tpu.matmul %44, %45, %cst_29 {dimension_numbers = #tpu.dot_dimension_numbers<[1], [0], [0], [1], [0, 0, 1, 1], [], []>} : vector<8x3xf32>, vector<3x544xf32>, vector<8x544xf32> -> vector<8x544xf32>
    %47 = arith.addf %42, %46 : vector<8x544xf32>
    %c0_30 = arith.constant 0 : index
    %c0_31 = arith.constant 0 : index
    %48 = vector.load %arg3[%c0_30, %c0_31] : memref<8x1xf32, #tpu.memory_space<vmem>>, vector<8x1xf32>
    %49 = vector.broadcast %48 : vector<8x1xf32> to vector<8x544xf32>
    %50 = arith.addf %47, %49 : vector<8x544xf32>
    %cst_32 = arith.constant 0.00999999977 : f32
    %51 = vector.broadcast %cst_32 : f32 to vector<8x544xf32>
    %52 = arith.mulf %51, %50 : vector<8x544xf32>
    %53 = arith.maximumf %50, %52 : vector<8x544xf32>
    %c0_33 = arith.constant 0 : index
    %c0_34 = arith.constant 0 : index
    %c0_35 = arith.constant 0 : index
    %54 = vector.load %arg4[%c0_33, %c0_34, %c0_35] : memref<1x8x544xf32, #tpu.memory_space<vmem>>, vector<1x8x544xf32>
    %55 = vector.shape_cast %54 : vector<1x8x544xf32> to vector<8x544xf32>
    %56 = vector.shape_cast %53 : vector<8x544xf32> to vector<1x8x544xf32>
    tpu.vector_store %arg4[%c0_33, %c0_34, %c0_35], %56 {strides = array<i32>} : memref<1x8x544xf32, #tpu.memory_space<vmem>>, vector<1x8x544xf32>,
    return
  }
  func.func @transform_0(%arg0: i32) -> (i32, i32, i32) {
    %c0_i32 = arith.constant 0 : i32
    %c0_i32_0 = arith.constant 0 : i32
    %c0_i32_1 = arith.constant 0 : i32
    return %arg0, %c0_i32, %c0_i32_0 : i32, i32, i32
  }
  func.func @transform_1(%arg0: i32) -> (i32, i32, i32) {
    %c0_i32 = arith.constant 0 : i32
    %c0_i32_0 = arith.constant 0 : i32
    %c0_i32_1 = arith.constant 0 : i32
    %c0_i32_2 = arith.constant 0 : i32
    return %c0_i32, %c0_i32_0, %c0_i32_1 : i32, i32, i32
  }
  func.func @transform_2(%arg0: i32) -> (i32, i32) {
    %c0_i32 = arith.constant 0 : i32
    %c0_i32_0 = arith.constant 0 : i32
    %c0_i32_1 = arith.constant 0 : i32
    return %c0_i32, %c0_i32_0 : i32, i32
  }
  func.func @transform_3(%arg0: i32) -> (i32, i32, i32) {
    %c0_i32 = arith.constant 0 : i32
    %c0_i32_0 = arith.constant 0 : i32
    %c0_i32_1 = arith.constant 0 : i32
    return %arg0, %c0_i32, %c0_i32_0 : i32, i32, i32
  }
}

module attributes {stable_mosaic.version = 11 : i64} {
  func.func @_conv3x3_kernel(%arg0: i32, %arg1: memref<1x8x646xf32, #tpu.memory_space<vmem>>, %arg2: memref<9x8x8xf32, #tpu.memory_space<vmem>>, %arg3: memref<8x1xf32, #tpu.memory_space<vmem>>, %arg4: memref<1x8x544xf32, #tpu.memory_space<vmem>>) attributes {dimension_semantics = [#tpu.dimension_semantics<parallel>], iteration_bounds = array<i64: 2>, scalar_prefetch = 0 : i64, scratch_operands = 0 : i64, tpu.core_type = #tpu.core_type<tc>, window_params = [{transform_indices = @transform_0, window_bounds = array<i64: 1, 8, 646>}, {pipeline_mode = #tpu.pipeline_mode<synchronous>, transform_indices = @transform_1, window_bounds = array<i64: 9, 8, 8>}, {pipeline_mode = #tpu.pipeline_mode<synchronous>, transform_indices = @transform_2, window_bounds = array<i64: 8, 1>}, {transform_indices = @transform_3, window_bounds = array<i64: 1, 8, 544>}]} {
    %c0 = arith.constant 0 : index
    %c0_0 = arith.constant 0 : index
    %c0_1 = arith.constant 0 : index
    %0 = vector.load %arg1[%c0, %c0_0, %c0_1] : memref<1x8x646xf32, #tpu.memory_space<vmem>>, vector<1x8x646xf32>
    %1 = vector.shape_cast %0 : vector<1x8x646xf32> to vector<8x646xf32>
    %cst = arith.constant 0.000000e+00 : f32
    %2 = vector.broadcast %cst : f32 to vector<8x544xf32>
    %c0_2 = arith.constant 0 : index
    %c0_3 = arith.constant 0 : index
    %c0_4 = arith.constant 0 : index
    %3 = vector.load %arg2[%c0_2, %c0_3, %c0_4] : memref<9x8x8xf32, #tpu.memory_space<vmem>>, vector<1x8x8xf32>
    %4 = vector.shape_cast %3 : vector<1x8x8xf32> to vector<8x8xf32>
    %5 = vector.extract_strided_slice %1 {offsets = [0, 0], sizes = [8, 544], strides = [1, 1]} : vector<8x646xf32> to vector<8x544xf32>
    %cst_5 = arith.constant dense<0.000000e+00> : vector<8x544xf32>
    %6 = tpu.matmul %4, %5, %cst_5 {dimension_numbers = #tpu.dot_dimension_numbers<[1], [0], [0], [1], [0, 0, 1, 1], [], []>} : vector<8x8xf32>, vector<8x544xf32>, vector<8x544xf32> -> vector<8x544xf32>
    %7 = arith.addf %2, %6 : vector<8x544xf32>
    %c1 = arith.constant 1 : index
    %c0_6 = arith.constant 0 : index
    %c0_7 = arith.constant 0 : index
    %8 = vector.load %arg2[%c1, %c0_6, %c0_7] : memref<9x8x8xf32, #tpu.memory_space<vmem>>, vector<1x8x8xf32>
    %9 = vector.shape_cast %8 : vector<1x8x8xf32> to vector<8x8xf32>
    %10 = vector.extract_strided_slice %1 {offsets = [0, 1], sizes = [8, 544], strides = [1, 1]} : vector<8x646xf32> to vector<8x544xf32>
    %cst_8 = arith.constant dense<0.000000e+00> : vector<8x544xf32>
    %11 = tpu.matmul %9, %10, %cst_8 {dimension_numbers = #tpu.dot_dimension_numbers<[1], [0], [0], [1], [0, 0, 1, 1], [], []>} : vector<8x8xf32>, vector<8x544xf32>, vector<8x544xf32> -> vector<8x544xf32>
    %12 = arith.addf %7, %11 : vector<8x544xf32>
    %c2 = arith.constant 2 : index
    %c0_9 = arith.constant 0 : index
    %c0_10 = arith.constant 0 : index
    %13 = vector.load %arg2[%c2, %c0_9, %c0_10] : memref<9x8x8xf32, #tpu.memory_space<vmem>>, vector<1x8x8xf32>
    %14 = vector.shape_cast %13 : vector<1x8x8xf32> to vector<8x8xf32>
    %15 = vector.extract_strided_slice %1 {offsets = [0, 2], sizes = [8, 544], strides = [1, 1]} : vector<8x646xf32> to vector<8x544xf32>
    %cst_11 = arith.constant dense<0.000000e+00> : vector<8x544xf32>
    %16 = tpu.matmul %14, %15, %cst_11 {dimension_numbers = #tpu.dot_dimension_numbers<[1], [0], [0], [1], [0, 0, 1, 1], [], []>} : vector<8x8xf32>, vector<8x544xf32>, vector<8x544xf32> -> vector<8x544xf32>
    %17 = arith.addf %12, %16 : vector<8x544xf32>
    %c3 = arith.constant 3 : index
    %c0_12 = arith.constant 0 : index
    %c0_13 = arith.constant 0 : index
    %18 = vector.load %arg2[%c3, %c0_12, %c0_13] : memref<9x8x8xf32, #tpu.memory_space<vmem>>, vector<1x8x8xf32>
    %19 = vector.shape_cast %18 : vector<1x8x8xf32> to vector<8x8xf32>
    %20 = vector.extract_strided_slice %1 {offsets = [0, 34], sizes = [8, 544], strides = [1, 1]} : vector<8x646xf32> to vector<8x544xf32>
    %cst_14 = arith.constant dense<0.000000e+00> : vector<8x544xf32>
    %21 = tpu.matmul %19, %20, %cst_14 {dimension_numbers = #tpu.dot_dimension_numbers<[1], [0], [0], [1], [0, 0, 1, 1], [], []>} : vector<8x8xf32>, vector<8x544xf32>, vector<8x544xf32> -> vector<8x544xf32>
    %22 = arith.addf %17, %21 : vector<8x544xf32>
    %c4 = arith.constant 4 : index
    %c0_15 = arith.constant 0 : index
    %c0_16 = arith.constant 0 : index
    %23 = vector.load %arg2[%c4, %c0_15, %c0_16] : memref<9x8x8xf32, #tpu.memory_space<vmem>>, vector<1x8x8xf32>
    %24 = vector.shape_cast %23 : vector<1x8x8xf32> to vector<8x8xf32>
    %25 = vector.extract_strided_slice %1 {offsets = [0, 35], sizes = [8, 544], strides = [1, 1]} : vector<8x646xf32> to vector<8x544xf32>
    %cst_17 = arith.constant dense<0.000000e+00> : vector<8x544xf32>
    %26 = tpu.matmul %24, %25, %cst_17 {dimension_numbers = #tpu.dot_dimension_numbers<[1], [0], [0], [1], [0, 0, 1, 1], [], []>} : vector<8x8xf32>, vector<8x544xf32>, vector<8x544xf32> -> vector<8x544xf32>
    %27 = arith.addf %22, %26 : vector<8x544xf32>
    %c5 = arith.constant 5 : index
    %c0_18 = arith.constant 0 : index
    %c0_19 = arith.constant 0 : index
    %28 = vector.load %arg2[%c5, %c0_18, %c0_19] : memref<9x8x8xf32, #tpu.memory_space<vmem>>, vector<1x8x8xf32>
    %29 = vector.shape_cast %28 : vector<1x8x8xf32> to vector<8x8xf32>
    %30 = vector.extract_strided_slice %1 {offsets = [0, 36], sizes = [8, 544], strides = [1, 1]} : vector<8x646xf32> to vector<8x544xf32>
    %cst_20 = arith.constant dense<0.000000e+00> : vector<8x544xf32>
    %31 = tpu.matmul %29, %30, %cst_20 {dimension_numbers = #tpu.dot_dimension_numbers<[1], [0], [0], [1], [0, 0, 1, 1], [], []>} : vector<8x8xf32>, vector<8x544xf32>, vector<8x544xf32> -> vector<8x544xf32>
    %32 = arith.addf %27, %31 : vector<8x544xf32>
    %c6 = arith.constant 6 : index
    %c0_21 = arith.constant 0 : index
    %c0_22 = arith.constant 0 : index
    %33 = vector.load %arg2[%c6, %c0_21, %c0_22] : memref<9x8x8xf32, #tpu.memory_space<vmem>>, vector<1x8x8xf32>
    %34 = vector.shape_cast %33 : vector<1x8x8xf32> to vector<8x8xf32>
    %35 = vector.extract_strided_slice %1 {offsets = [0, 68], sizes = [8, 544], strides = [1, 1]} : vector<8x646xf32> to vector<8x544xf32>
    %cst_23 = arith.constant dense<0.000000e+00> : vector<8x544xf32>
    %36 = tpu.matmul %34, %35, %cst_23 {dimension_numbers = #tpu.dot_dimension_numbers<[1], [0], [0], [1], [0, 0, 1, 1], [], []>} : vector<8x8xf32>, vector<8x544xf32>, vector<8x544xf32> -> vector<8x544xf32>
    %37 = arith.addf %32, %36 : vector<8x544xf32>
    %c7 = arith.constant 7 : index
    %c0_24 = arith.constant 0 : index
    %c0_25 = arith.constant 0 : index
    %38 = vector.load %arg2[%c7, %c0_24, %c0_25] : memref<9x8x8xf32, #tpu.memory_space<vmem>>, vector<1x8x8xf32>
    %39 = vector.shape_cast %38 : vector<1x8x8xf32> to vector<8x8xf32>
    %40 = vector.extract_strided_slice %1 {offsets = [0, 69], sizes = [8, 544], strides = [1, 1]} : vector<8x646xf32> to vector<8x544xf32>
    %cst_26 = arith.constant dense<0.000000e+00> : vector<8x544xf32>
    %41 = tpu.matmul %39, %40, %cst_26 {dimension_numbers = #tpu.dot_dimension_numbers<[1], [0], [0], [1], [0, 0, 1, 1], [], []>} : vector<8x8xf32>, vector<8x544xf32>, vector<8x544xf32> -> vector<8x544xf32>
    %42 = arith.addf %37, %41 : vector<8x544xf32>
    %c8 = arith.constant 8 : index
    %c0_27 = arith.constant 0 : index
    %c0_28 = arith.constant 0 : index
    %43 = vector.load %arg2[%c8, %c0_27, %c0_28] : memref<9x8x8xf32, #tpu.memory_space<vmem>>, vector<1x8x8xf32>
    %44 = vector.shape_cast %43 : vector<1x8x8xf32> to vector<8x8xf32>
    %45 = vector.extract_strided_slice %1 {offsets = [0, 70], sizes = [8, 544], strides = [1, 1]} : vector<8x646xf32> to vector<8x544xf32>
    %cst_29 = arith.constant dense<0.000000e+00> : vector<8x544xf32>
    %46 = tpu.matmul %44, %45, %cst_29 {dimension_numbers = #tpu.dot_dimension_numbers<[1], [0], [0], [1], [0, 0, 1, 1], [], []>} : vector<8x8xf32>, vector<8x544xf32>, vector<8x544xf32> -> vector<8x544xf32>
    %47 = arith.addf %42, %46 : vector<8x544xf32>
    %c0_30 = arith.constant 0 : index
    %c0_31 = arith.constant 0 : index
    %48 = vector.load %arg3[%c0_30, %c0_31] : memref<8x1xf32, #tpu.memory_space<vmem>>, vector<8x1xf32>
    %49 = vector.broadcast %48 : vector<8x1xf32> to vector<8x544xf32>
    %50 = arith.addf %47, %49 : vector<8x544xf32>
    %cst_32 = arith.constant 0.00999999977 : f32
    %51 = vector.broadcast %cst_32 : f32 to vector<8x544xf32>
    %52 = arith.mulf %51, %50 : vector<8x544xf32>
    %53 = arith.maximumf %50, %52 : vector<8x544xf32>
    %c0_33 = arith.constant 0 : index
    %c0_34 = arith.constant 0 : index
    %c0_35 = arith.constant 0 : index
    %54 = vector.load %arg4[%c0_33, %c0_34, %c0_35] : memref<1x8x544xf32, #tpu.memory_space<vmem>>, vector<1x8x544xf32>
    %55 = vector.shape_cast %54 : vector<1x8x544xf32> to vector<8x544xf32>
    %56 = vector.shape_cast %53 : vector<8x544xf32> to vector<1x8x544xf32>
    tpu.vector_store %arg4[%c0_33, %c0_34, %c0_35], %56 {strides = array<i32>} : memref<1x8x544xf32, #tpu.memory_space<vmem>>, vector<1x8x544xf32>,
    return
  }
  func.func @transform_0(%arg0: i32) -> (i32, i32, i32) {
    %c0_i32 = arith.constant 0 : i32
    %c0_i32_0 = arith.constant 0 : i32
    %c0_i32_1 = arith.constant 0 : i32
    return %arg0, %c0_i32, %c0_i32_0 : i32, i32, i32
  }
  func.func @transform_1(%arg0: i32) -> (i32, i32, i32) {
    %c0_i32 = arith.constant 0 : i32
    %c0_i32_0 = arith.constant 0 : i32
    %c0_i32_1 = arith.constant 0 : i32
    %c0_i32_2 = arith.constant 0 : i32
    return %c0_i32, %c0_i32_0, %c0_i32_1 : i32, i32, i32
  }
  func.func @transform_2(%arg0: i32) -> (i32, i32) {
    %c0_i32 = arith.constant 0 : i32
    %c0_i32_0 = arith.constant 0 : i32
    %c0_i32_1 = arith.constant 0 : i32
    return %c0_i32, %c0_i32_0 : i32, i32
  }
  func.func @transform_3(%arg0: i32) -> (i32, i32, i32) {
    %c0_i32 = arith.constant 0 : i32
    %c0_i32_0 = arith.constant 0 : i32
    %c0_i32_1 = arith.constant 0 : i32
    return %arg0, %c0_i32, %c0_i32_0 : i32, i32, i32
  }
}

module attributes {stable_mosaic.version = 11 : i64} {
  func.func @_bn_stats_kernel(%arg0: i32, %arg1: i32, %arg2: memref<1x8x128xf32, #tpu.memory_space<vmem>>, %arg3: memref<8x1xf32, #tpu.memory_space<vmem>>, %arg4: memref<8x1xf32, #tpu.memory_space<vmem>>, %arg5: memref<8x1xf32, #tpu.memory_space<vmem>>, %arg6: memref<8x1xf32, #tpu.memory_space<vmem>>, %arg7: memref<8x1xf32, #tpu.memory_space<vmem>>, %arg8: memref<8x1xf32, #tpu.memory_space<vmem>>) attributes {dimension_semantics = [#tpu.dimension_semantics<arbitrary>, #tpu.dimension_semantics<arbitrary>], iteration_bounds = array<i64: 2, 1>, scalar_prefetch = 0 : i64, scratch_operands = 2 : i64, tpu.core_type = #tpu.core_type<tc>, window_params = [{transform_indices = @transform_0, window_bounds = array<i64: 1, 8, 128>}, {pipeline_mode = #tpu.pipeline_mode<synchronous>, transform_indices = @transform_1, window_bounds = array<i64: 8, 1>}, {pipeline_mode = #tpu.pipeline_mode<synchronous>, transform_indices = @transform_2, window_bounds = array<i64: 8, 1>}, {pipeline_mode = #tpu.pipeline_mode<synchronous>, transform_indices = @transform_3, window_bounds = array<i64: 8, 1>}, {pipeline_mode = #tpu.pipeline_mode<synchronous>, transform_indices = @transform_4, window_bounds = array<i64: 8, 1>}]} {
    %c0_i32 = arith.constant 0 : i32
    %0 = arith.cmpi eq, %arg0, %c0_i32 : i32
    %c0_i32_0 = arith.constant 0 : i32
    %1 = arith.cmpi eq, %arg1, %c0_i32_0 : i32
    %2 = arith.andi %0, %1 : i1
    %3 = arith.extui %2 : i1 to i32
    %c0_i32_1 = arith.constant 0 : i32
    %4 = arith.cmpi ne, %3, %c0_i32_1 : i32
    scf.if %4 {
      %cst_15 = arith.constant 0.000000e+00 : f32
      %23 = vector.broadcast %cst_15 : f32 to vector<8x1xf32>
      %c0_16 = arith.constant 0 : index
      %c0_17 = arith.constant 0 : index
      %24 = vector.load %arg7[%c0_16, %c0_17] : memref<8x1xf32, #tpu.memory_space<vmem>>, vector<8x1xf32>
      tpu.vector_store %arg7[%c0_16, %c0_17], %23 {strides = array<i32>} : memref<8x1xf32, #tpu.memory_space<vmem>>, vector<8x1xf32>,
      %cst_18 = arith.constant 0.000000e+00 : f32
      %25 = vector.broadcast %cst_18 : f32 to vector<8x1xf32>
      %c0_19 = arith.constant 0 : index
      %c0_20 = arith.constant 0 : index
      %26 = vector.load %arg8[%c0_19, %c0_20] : memref<8x1xf32, #tpu.memory_space<vmem>>, vector<8x1xf32>
      tpu.vector_store %arg8[%c0_19, %c0_20], %25 {strides = array<i32>} : memref<8x1xf32, #tpu.memory_space<vmem>>, vector<8x1xf32>,
    } else {
    }
    %c0 = arith.constant 0 : index
    %c0_2 = arith.constant 0 : index
    %c0_3 = arith.constant 0 : index
    %5 = vector.load %arg2[%c0, %c0_2, %c0_3] : memref<1x8x128xf32, #tpu.memory_space<vmem>>, vector<1x8x128xf32>
    %6 = vector.shape_cast %5 : vector<1x8x128xf32> to vector<8x128xf32>
    %c0_4 = arith.constant 0 : index
    %c0_5 = arith.constant 0 : index
    %7 = vector.load %arg7[%c0_4, %c0_5] : memref<8x1xf32, #tpu.memory_space<vmem>>, vector<8x1xf32>
    %cst = arith.constant dense<0.000000e+00> : vector<8xf32>
    %8 = vector.multi_reduction <add>, %6, %cst [1] : vector<8x128xf32> to vector<8xf32>
    %9 = vector.shape_cast %8 : vector<8xf32> to vector<8x1xf32>
    %10 = arith.addf %7, %9 : vector<8x1xf32>
    %c0_6 = arith.constant 0 : index
    %c0_7 = arith.constant 0 : index
    %11 = vector.load %arg7[%c0_6, %c0_7] : memref<8x1xf32, #tpu.memory_space<vmem>>, vector<8x1xf32>
    tpu.vector_store %arg7[%c0_6, %c0_7], %10 {strides = array<i32>} : memref<8x1xf32, #tpu.memory_space<vmem>>, vector<8x1xf32>,
    %c0_8 = arith.constant 0 : index
    %c0_9 = arith.constant 0 : index
    %12 = vector.load %arg8[%c0_8, %c0_9] : memref<8x1xf32, #tpu.memory_space<vmem>>, vector<8x1xf32>
    %13 = arith.mulf %6, %6 : vector<8x128xf32>
    %cst_10 = arith.constant dense<0.000000e+00> : vector<8xf32>
    %14 = vector.multi_reduction <add>, %13, %cst_10 [1] : vector<8x128xf32> to vector<8xf32>
    %15 = vector.shape_cast %14 : vector<8xf32> to vector<8x1xf32>
    %16 = arith.addf %12, %15 : vector<8x1xf32>
    %c0_11 = arith.constant 0 : index
    %c0_12 = arith.constant 0 : index
    %17 = vector.load %arg8[%c0_11, %c0_12] : memref<8x1xf32, #tpu.memory_space<vmem>>, vector<8x1xf32>
    tpu.vector_store %arg8[%c0_11, %c0_12], %16 {strides = array<i32>} : memref<8x1xf32, #tpu.memory_space<vmem>>, vector<8x1xf32>,
    %c1_i32 = arith.constant 1 : i32
    %18 = arith.cmpi eq, %arg0, %c1_i32 : i32
    %c0_i32_13 = arith.constant 0 : i32
    %19 = arith.cmpi eq, %arg1, %c0_i32_13 : i32
    %20 = arith.andi %18, %19 : i1
    %21 = arith.extui %20 : i1 to i32
    %c0_i32_14 = arith.constant 0 : i32
    %22 = arith.cmpi ne, %21, %c0_i32_14 : i32
    scf.if %22 {
      %c0_15 = arith.constant 0 : index
      %c0_16 = arith.constant 0 : index
      %23 = vector.load %arg7[%c0_15, %c0_16] : memref<8x1xf32, #tpu.memory_space<vmem>>, vector<8x1xf32>
      %cst_17 = arith.constant 2.560000e+02 : f32
      %24 = vector.broadcast %cst_17 : f32 to vector<8x1xf32>
      %25 = arith.divf %23, %24 : vector<8x1xf32>
      %c0_18 = arith.constant 0 : index
      %c0_19 = arith.constant 0 : index
      %26 = vector.load %arg8[%c0_18, %c0_19] : memref<8x1xf32, #tpu.memory_space<vmem>>, vector<8x1xf32>
      %cst_20 = arith.constant 2.560000e+02 : f32
      %27 = vector.broadcast %cst_20 : f32 to vector<8x1xf32>
      %28 = arith.divf %26, %27 : vector<8x1xf32>
      %29 = arith.mulf %25, %25 : vector<8x1xf32>
      %30 = arith.subf %28, %29 : vector<8x1xf32>
      %cst_21 = arith.constant 0.000000e+00 : f32
      %31 = vector.broadcast %cst_21 : f32 to vector<8x1xf32>
      %32 = arith.maximumf %30, %31 : vector<8x1xf32>
      %c0_22 = arith.constant 0 : index
      %c0_23 = arith.constant 0 : index
      %33 = vector.load %arg3[%c0_22, %c0_23] : memref<8x1xf32, #tpu.memory_space<vmem>>, vector<8x1xf32>
      %cst_24 = arith.constant 9.99999974E-6 : f32
      %34 = vector.broadcast %cst_24 : f32 to vector<8x1xf32>
      %35 = arith.addf %32, %34 : vector<8x1xf32>
      %36 = math.rsqrt %35 : vector<8x1xf32>
      %37 = arith.mulf %33, %36 : vector<8x1xf32>
      %c0_25 = arith.constant 0 : index
      %c0_26 = arith.constant 0 : index
      %38 = vector.load %arg5[%c0_25, %c0_26] : memref<8x1xf32, #tpu.memory_space<vmem>>, vector<8x1xf32>
      tpu.vector_store %arg5[%c0_25, %c0_26], %37 {strides = array<i32>} : memref<8x1xf32, #tpu.memory_space<vmem>>, vector<8x1xf32>,
      %c0_27 = arith.constant 0 : index
      %c0_28 = arith.constant 0 : index
      %39 = vector.load %arg4[%c0_27, %c0_28] : memref<8x1xf32, #tpu.memory_space<vmem>>, vector<8x1xf32>
      %40 = arith.mulf %25, %37 : vector<8x1xf32>
      %41 = arith.subf %39, %40 : vector<8x1xf32>
      %c0_29 = arith.constant 0 : index
      %c0_30 = arith.constant 0 : index
      %42 = vector.load %arg6[%c0_29, %c0_30] : memref<8x1xf32, #tpu.memory_space<vmem>>, vector<8x1xf32>
      tpu.vector_store %arg6[%c0_29, %c0_30], %41 {strides = array<i32>} : memref<8x1xf32, #tpu.memory_space<vmem>>, vector<8x1xf32>,
    } else {
    }
    return
  }
  func.func @transform_0(%arg0: i32, %arg1: i32) -> (i32, i32, i32) {
    %c0_i32 = arith.constant 0 : i32
    %c0_i32_0 = arith.constant 0 : i32
    return %arg0, %c0_i32, %arg1 : i32, i32, i32
  }
  func.func @transform_1(%arg0: i32, %arg1: i32) -> (i32, i32) {
    %c0_i32 = arith.constant 0 : i32
    %c0_i32_0 = arith.constant 0 : i32
    %c0_i32_1 = arith.constant 0 : i32
    return %c0_i32, %c0_i32_0 : i32, i32
  }
  func.func @transform_2(%arg0: i32, %arg1: i32) -> (i32, i32) {
    %c0_i32 = arith.constant 0 : i32
    %c0_i32_0 = arith.constant 0 : i32
    %c0_i32_1 = arith.constant 0 : i32
    return %c0_i32, %c0_i32_0 : i32, i32
  }
  func.func @transform_3(%arg0: i32, %arg1: i32) -> (i32, i32) {
    %c0_i32 = arith.constant 0 : i32
    %c0_i32_0 = arith.constant 0 : i32
    %c0_i32_1 = arith.constant 0 : i32
    return %c0_i32, %c0_i32_0 : i32, i32
  }
  func.func @transform_4(%arg0: i32, %arg1: i32) -> (i32, i32) {
    %c0_i32 = arith.constant 0 : i32
    %c0_i32_0 = arith.constant 0 : i32
    %c0_i32_1 = arith.constant 0 : i32
    return %c0_i32, %c0_i32_0 : i32, i32
  }
}

module attributes {stable_mosaic.version = 11 : i64} {
  func.func @_bn_apply_kernel(%arg0: i32, %arg1: i32, %arg2: memref<1x8x128xf32, #tpu.memory_space<vmem>>, %arg3: memref<8x1xf32, #tpu.memory_space<vmem>>, %arg4: memref<8x1xf32, #tpu.memory_space<vmem>>, %arg5: memref<1x8x128xf32, #tpu.memory_space<vmem>>) attributes {dimension_semantics = [#tpu.dimension_semantics<parallel>, #tpu.dimension_semantics<parallel>], iteration_bounds = array<i64: 2, 1>, scalar_prefetch = 0 : i64, scratch_operands = 0 : i64, tpu.core_type = #tpu.core_type<tc>, window_params = [{transform_indices = @transform_0, window_bounds = array<i64: 1, 8, 128>}, {pipeline_mode = #tpu.pipeline_mode<synchronous>, transform_indices = @transform_1, window_bounds = array<i64: 8, 1>}, {pipeline_mode = #tpu.pipeline_mode<synchronous>, transform_indices = @transform_2, window_bounds = array<i64: 8, 1>}, {transform_indices = @transform_3, window_bounds = array<i64: 1, 8, 128>}]} {
    %c0 = arith.constant 0 : index
    %c0_0 = arith.constant 0 : index
    %c0_1 = arith.constant 0 : index
    %0 = vector.load %arg2[%c0, %c0_0, %c0_1] : memref<1x8x128xf32, #tpu.memory_space<vmem>>, vector<1x8x128xf32>
    %1 = vector.shape_cast %0 : vector<1x8x128xf32> to vector<8x128xf32>
    %c0_2 = arith.constant 0 : index
    %c0_3 = arith.constant 0 : index
    %2 = vector.load %arg3[%c0_2, %c0_3] : memref<8x1xf32, #tpu.memory_space<vmem>>, vector<8x1xf32>
    %3 = vector.broadcast %2 : vector<8x1xf32> to vector<8x128xf32>
    %4 = arith.mulf %1, %3 : vector<8x128xf32>
    %c0_4 = arith.constant 0 : index
    %c0_5 = arith.constant 0 : index
    %5 = vector.load %arg4[%c0_4, %c0_5] : memref<8x1xf32, #tpu.memory_space<vmem>>, vector<8x1xf32>
    %6 = vector.broadcast %5 : vector<8x1xf32> to vector<8x128xf32>
    %7 = arith.addf %4, %6 : vector<8x128xf32>
    %c0_6 = arith.constant 0 : index
    %c0_7 = arith.constant 0 : index
    %c0_8 = arith.constant 0 : index
    %8 = vector.load %arg5[%c0_6, %c0_7, %c0_8] : memref<1x8x128xf32, #tpu.memory_space<vmem>>, vector<1x8x128xf32>
    %9 = vector.shape_cast %8 : vector<1x8x128xf32> to vector<8x128xf32>
    %10 = vector.shape_cast %7 : vector<8x128xf32> to vector<1x8x128xf32>
    tpu.vector_store %arg5[%c0_6, %c0_7, %c0_8], %10 {strides = array<i32>} : memref<1x8x128xf32, #tpu.memory_space<vmem>>, vector<1x8x128xf32>,
    return
  }
  func.func @transform_0(%arg0: i32, %arg1: i32) -> (i32, i32, i32) {
    %c0_i32 = arith.constant 0 : i32
    %c0_i32_0 = arith.constant 0 : i32
    return %arg0, %c0_i32, %arg1 : i32, i32, i32
  }
  func.func @transform_1(%arg0: i32, %arg1: i32) -> (i32, i32) {
    %c0_i32 = arith.constant 0 : i32
    %c0_i32_0 = arith.constant 0 : i32
    %c0_i32_1 = arith.constant 0 : i32
    return %c0_i32, %c0_i32_0 : i32, i32
  }
  func.func @transform_2(%arg0: i32, %arg1: i32) -> (i32, i32) {
    %c0_i32 = arith.constant 0 : i32
    %c0_i32_0 = arith.constant 0 : i32
    %c0_i32_1 = arith.constant 0 : i32
    return %c0_i32, %c0_i32_0 : i32, i32
  }
  func.func @transform_3(%arg0: i32, %arg1: i32) -> (i32, i32, i32) {
    %c0_i32 = arith.constant 0 : i32
    %c0_i32_0 = arith.constant 0 : i32
    return %arg0, %c0_i32, %arg1 : i32, i32, i32
  }
}

module attributes {stable_mosaic.version = 11 : i64} {
  func.func @_conv3x3_kernel(%arg0: i32, %arg1: memref<1x8x198xf32, #tpu.memory_space<vmem>>, %arg2: memref<9x16x8xf32, #tpu.memory_space<vmem>>, %arg3: memref<16x1xf32, #tpu.memory_space<vmem>>, %arg4: memref<1x16x144xf32, #tpu.memory_space<vmem>>) attributes {dimension_semantics = [#tpu.dimension_semantics<parallel>], iteration_bounds = array<i64: 2>, scalar_prefetch = 0 : i64, scratch_operands = 0 : i64, tpu.core_type = #tpu.core_type<tc>, window_params = [{transform_indices = @transform_0, window_bounds = array<i64: 1, 8, 198>}, {pipeline_mode = #tpu.pipeline_mode<synchronous>, transform_indices = @transform_1, window_bounds = array<i64: 9, 16, 8>}, {pipeline_mode = #tpu.pipeline_mode<synchronous>, transform_indices = @transform_2, window_bounds = array<i64: 16, 1>}, {transform_indices = @transform_3, window_bounds = array<i64: 1, 16, 144>}]} {
    %c0 = arith.constant 0 : index
    %c0_0 = arith.constant 0 : index
    %c0_1 = arith.constant 0 : index
    %0 = vector.load %arg1[%c0, %c0_0, %c0_1] : memref<1x8x198xf32, #tpu.memory_space<vmem>>, vector<1x8x198xf32>
    %1 = vector.shape_cast %0 : vector<1x8x198xf32> to vector<8x198xf32>
    %cst = arith.constant 0.000000e+00 : f32
    %2 = vector.broadcast %cst : f32 to vector<16x144xf32>
    %c0_2 = arith.constant 0 : index
    %c0_3 = arith.constant 0 : index
    %c0_4 = arith.constant 0 : index
    %3 = vector.load %arg2[%c0_2, %c0_3, %c0_4] : memref<9x16x8xf32, #tpu.memory_space<vmem>>, vector<1x16x8xf32>
    %4 = vector.shape_cast %3 : vector<1x16x8xf32> to vector<16x8xf32>
    %5 = vector.extract_strided_slice %1 {offsets = [0, 0], sizes = [8, 144], strides = [1, 1]} : vector<8x198xf32> to vector<8x144xf32>
    %cst_5 = arith.constant dense<0.000000e+00> : vector<16x144xf32>
    %6 = tpu.matmul %4, %5, %cst_5 {dimension_numbers = #tpu.dot_dimension_numbers<[1], [0], [0], [1], [0, 0, 1, 1], [], []>} : vector<16x8xf32>, vector<8x144xf32>, vector<16x144xf32> -> vector<16x144xf32>
    %7 = arith.addf %2, %6 : vector<16x144xf32>
    %c1 = arith.constant 1 : index
    %c0_6 = arith.constant 0 : index
    %c0_7 = arith.constant 0 : index
    %8 = vector.load %arg2[%c1, %c0_6, %c0_7] : memref<9x16x8xf32, #tpu.memory_space<vmem>>, vector<1x16x8xf32>
    %9 = vector.shape_cast %8 : vector<1x16x8xf32> to vector<16x8xf32>
    %10 = vector.extract_strided_slice %1 {offsets = [0, 1], sizes = [8, 144], strides = [1, 1]} : vector<8x198xf32> to vector<8x144xf32>
    %cst_8 = arith.constant dense<0.000000e+00> : vector<16x144xf32>
    %11 = tpu.matmul %9, %10, %cst_8 {dimension_numbers = #tpu.dot_dimension_numbers<[1], [0], [0], [1], [0, 0, 1, 1], [], []>} : vector<16x8xf32>, vector<8x144xf32>, vector<16x144xf32> -> vector<16x144xf32>
    %12 = arith.addf %7, %11 : vector<16x144xf32>
    %c2 = arith.constant 2 : index
    %c0_9 = arith.constant 0 : index
    %c0_10 = arith.constant 0 : index
    %13 = vector.load %arg2[%c2, %c0_9, %c0_10] : memref<9x16x8xf32, #tpu.memory_space<vmem>>, vector<1x16x8xf32>
    %14 = vector.shape_cast %13 : vector<1x16x8xf32> to vector<16x8xf32>
    %15 = vector.extract_strided_slice %1 {offsets = [0, 2], sizes = [8, 144], strides = [1, 1]} : vector<8x198xf32> to vector<8x144xf32>
    %cst_11 = arith.constant dense<0.000000e+00> : vector<16x144xf32>
    %16 = tpu.matmul %14, %15, %cst_11 {dimension_numbers = #tpu.dot_dimension_numbers<[1], [0], [0], [1], [0, 0, 1, 1], [], []>} : vector<16x8xf32>, vector<8x144xf32>, vector<16x144xf32> -> vector<16x144xf32>
    %17 = arith.addf %12, %16 : vector<16x144xf32>
    %c3 = arith.constant 3 : index
    %c0_12 = arith.constant 0 : index
    %c0_13 = arith.constant 0 : index
    %18 = vector.load %arg2[%c3, %c0_12, %c0_13] : memref<9x16x8xf32, #tpu.memory_space<vmem>>, vector<1x16x8xf32>
    %19 = vector.shape_cast %18 : vector<1x16x8xf32> to vector<16x8xf32>
    %20 = vector.extract_strided_slice %1 {offsets = [0, 18], sizes = [8, 144], strides = [1, 1]} : vector<8x198xf32> to vector<8x144xf32>
    %cst_14 = arith.constant dense<0.000000e+00> : vector<16x144xf32>
    %21 = tpu.matmul %19, %20, %cst_14 {dimension_numbers = #tpu.dot_dimension_numbers<[1], [0], [0], [1], [0, 0, 1, 1], [], []>} : vector<16x8xf32>, vector<8x144xf32>, vector<16x144xf32> -> vector<16x144xf32>
    %22 = arith.addf %17, %21 : vector<16x144xf32>
    %c4 = arith.constant 4 : index
    %c0_15 = arith.constant 0 : index
    %c0_16 = arith.constant 0 : index
    %23 = vector.load %arg2[%c4, %c0_15, %c0_16] : memref<9x16x8xf32, #tpu.memory_space<vmem>>, vector<1x16x8xf32>
    %24 = vector.shape_cast %23 : vector<1x16x8xf32> to vector<16x8xf32>
    %25 = vector.extract_strided_slice %1 {offsets = [0, 19], sizes = [8, 144], strides = [1, 1]} : vector<8x198xf32> to vector<8x144xf32>
    %cst_17 = arith.constant dense<0.000000e+00> : vector<16x144xf32>
    %26 = tpu.matmul %24, %25, %cst_17 {dimension_numbers = #tpu.dot_dimension_numbers<[1], [0], [0], [1], [0, 0, 1, 1], [], []>} : vector<16x8xf32>, vector<8x144xf32>, vector<16x144xf32> -> vector<16x144xf32>
    %27 = arith.addf %22, %26 : vector<16x144xf32>
    %c5 = arith.constant 5 : index
    %c0_18 = arith.constant 0 : index
    %c0_19 = arith.constant 0 : index
    %28 = vector.load %arg2[%c5, %c0_18, %c0_19] : memref<9x16x8xf32, #tpu.memory_space<vmem>>, vector<1x16x8xf32>
    %29 = vector.shape_cast %28 : vector<1x16x8xf32> to vector<16x8xf32>
    %30 = vector.extract_strided_slice %1 {offsets = [0, 20], sizes = [8, 144], strides = [1, 1]} : vector<8x198xf32> to vector<8x144xf32>
    %cst_20 = arith.constant dense<0.000000e+00> : vector<16x144xf32>
    %31 = tpu.matmul %29, %30, %cst_20 {dimension_numbers = #tpu.dot_dimension_numbers<[1], [0], [0], [1], [0, 0, 1, 1], [], []>} : vector<16x8xf32>, vector<8x144xf32>, vector<16x144xf32> -> vector<16x144xf32>
    %32 = arith.addf %27, %31 : vector<16x144xf32>
    %c6 = arith.constant 6 : index
    %c0_21 = arith.constant 0 : index
    %c0_22 = arith.constant 0 : index
    %33 = vector.load %arg2[%c6, %c0_21, %c0_22] : memref<9x16x8xf32, #tpu.memory_space<vmem>>, vector<1x16x8xf32>
    %34 = vector.shape_cast %33 : vector<1x16x8xf32> to vector<16x8xf32>
    %35 = vector.extract_strided_slice %1 {offsets = [0, 36], sizes = [8, 144], strides = [1, 1]} : vector<8x198xf32> to vector<8x144xf32>
    %cst_23 = arith.constant dense<0.000000e+00> : vector<16x144xf32>
    %36 = tpu.matmul %34, %35, %cst_23 {dimension_numbers = #tpu.dot_dimension_numbers<[1], [0], [0], [1], [0, 0, 1, 1], [], []>} : vector<16x8xf32>, vector<8x144xf32>, vector<16x144xf32> -> vector<16x144xf32>
    %37 = arith.addf %32, %36 : vector<16x144xf32>
    %c7 = arith.constant 7 : index
    %c0_24 = arith.constant 0 : index
    %c0_25 = arith.constant 0 : index
    %38 = vector.load %arg2[%c7, %c0_24, %c0_25] : memref<9x16x8xf32, #tpu.memory_space<vmem>>, vector<1x16x8xf32>
    %39 = vector.shape_cast %38 : vector<1x16x8xf32> to vector<16x8xf32>
    %40 = vector.extract_strided_slice %1 {offsets = [0, 37], sizes = [8, 144], strides = [1, 1]} : vector<8x198xf32> to vector<8x144xf32>
    %cst_26 = arith.constant dense<0.000000e+00> : vector<16x144xf32>
    %41 = tpu.matmul %39, %40, %cst_26 {dimension_numbers = #tpu.dot_dimension_numbers<[1], [0], [0], [1], [0, 0, 1, 1], [], []>} : vector<16x8xf32>, vector<8x144xf32>, vector<16x144xf32> -> vector<16x144xf32>
    %42 = arith.addf %37, %41 : vector<16x144xf32>
    %c8 = arith.constant 8 : index
    %c0_27 = arith.constant 0 : index
    %c0_28 = arith.constant 0 : index
    %43 = vector.load %arg2[%c8, %c0_27, %c0_28] : memref<9x16x8xf32, #tpu.memory_space<vmem>>, vector<1x16x8xf32>
    %44 = vector.shape_cast %43 : vector<1x16x8xf32> to vector<16x8xf32>
    %45 = vector.extract_strided_slice %1 {offsets = [0, 38], sizes = [8, 144], strides = [1, 1]} : vector<8x198xf32> to vector<8x144xf32>
    %cst_29 = arith.constant dense<0.000000e+00> : vector<16x144xf32>
    %46 = tpu.matmul %44, %45, %cst_29 {dimension_numbers = #tpu.dot_dimension_numbers<[1], [0], [0], [1], [0, 0, 1, 1], [], []>} : vector<16x8xf32>, vector<8x144xf32>, vector<16x144xf32> -> vector<16x144xf32>
    %47 = arith.addf %42, %46 : vector<16x144xf32>
    %c0_30 = arith.constant 0 : index
    %c0_31 = arith.constant 0 : index
    %48 = vector.load %arg3[%c0_30, %c0_31] : memref<16x1xf32, #tpu.memory_space<vmem>>, vector<16x1xf32>
    %49 = vector.broadcast %48 : vector<16x1xf32> to vector<16x144xf32>
    %50 = arith.addf %47, %49 : vector<16x144xf32>
    %cst_32 = arith.constant 0.00999999977 : f32
    %51 = vector.broadcast %cst_32 : f32 to vector<16x144xf32>
    %52 = arith.mulf %51, %50 : vector<16x144xf32>
    %53 = arith.maximumf %50, %52 : vector<16x144xf32>
    %c0_33 = arith.constant 0 : index
    %c0_34 = arith.constant 0 : index
    %c0_35 = arith.constant 0 : index
    %54 = vector.load %arg4[%c0_33, %c0_34, %c0_35] : memref<1x16x144xf32, #tpu.memory_space<vmem>>, vector<1x16x144xf32>
    %55 = vector.shape_cast %54 : vector<1x16x144xf32> to vector<16x144xf32>
    %56 = vector.shape_cast %53 : vector<16x144xf32> to vector<1x16x144xf32>
    tpu.vector_store %arg4[%c0_33, %c0_34, %c0_35], %56 {strides = array<i32>} : memref<1x16x144xf32, #tpu.memory_space<vmem>>, vector<1x16x144xf32>,
    return
  }
  func.func @transform_0(%arg0: i32) -> (i32, i32, i32) {
    %c0_i32 = arith.constant 0 : i32
    %c0_i32_0 = arith.constant 0 : i32
    %c0_i32_1 = arith.constant 0 : i32
    return %arg0, %c0_i32, %c0_i32_0 : i32, i32, i32
  }
  func.func @transform_1(%arg0: i32) -> (i32, i32, i32) {
    %c0_i32 = arith.constant 0 : i32
    %c0_i32_0 = arith.constant 0 : i32
    %c0_i32_1 = arith.constant 0 : i32
    %c0_i32_2 = arith.constant 0 : i32
    return %c0_i32, %c0_i32_0, %c0_i32_1 : i32, i32, i32
  }
  func.func @transform_2(%arg0: i32) -> (i32, i32) {
    %c0_i32 = arith.constant 0 : i32
    %c0_i32_0 = arith.constant 0 : i32
    %c0_i32_1 = arith.constant 0 : i32
    return %c0_i32, %c0_i32_0 : i32, i32
  }
  func.func @transform_3(%arg0: i32) -> (i32, i32, i32) {
    %c0_i32 = arith.constant 0 : i32
    %c0_i32_0 = arith.constant 0 : i32
    %c0_i32_1 = arith.constant 0 : i32
    return %arg0, %c0_i32, %c0_i32_0 : i32, i32, i32
  }
}

module attributes {stable_mosaic.version = 11 : i64} {
  func.func @_conv3x3_kernel(%arg0: i32, %arg1: memref<1x16x198xf32, #tpu.memory_space<vmem>>, %arg2: memref<9x16x16xf32, #tpu.memory_space<vmem>>, %arg3: memref<16x1xf32, #tpu.memory_space<vmem>>, %arg4: memref<1x16x144xf32, #tpu.memory_space<vmem>>) attributes {dimension_semantics = [#tpu.dimension_semantics<parallel>], iteration_bounds = array<i64: 2>, scalar_prefetch = 0 : i64, scratch_operands = 0 : i64, tpu.core_type = #tpu.core_type<tc>, window_params = [{transform_indices = @transform_0, window_bounds = array<i64: 1, 16, 198>}, {pipeline_mode = #tpu.pipeline_mode<synchronous>, transform_indices = @transform_1, window_bounds = array<i64: 9, 16, 16>}, {pipeline_mode = #tpu.pipeline_mode<synchronous>, transform_indices = @transform_2, window_bounds = array<i64: 16, 1>}, {transform_indices = @transform_3, window_bounds = array<i64: 1, 16, 144>}]} {
    %c0 = arith.constant 0 : index
    %c0_0 = arith.constant 0 : index
    %c0_1 = arith.constant 0 : index
    %0 = vector.load %arg1[%c0, %c0_0, %c0_1] : memref<1x16x198xf32, #tpu.memory_space<vmem>>, vector<1x16x198xf32>
    %1 = vector.shape_cast %0 : vector<1x16x198xf32> to vector<16x198xf32>
    %cst = arith.constant 0.000000e+00 : f32
    %2 = vector.broadcast %cst : f32 to vector<16x144xf32>
    %c0_2 = arith.constant 0 : index
    %c0_3 = arith.constant 0 : index
    %c0_4 = arith.constant 0 : index
    %3 = vector.load %arg2[%c0_2, %c0_3, %c0_4] : memref<9x16x16xf32, #tpu.memory_space<vmem>>, vector<1x16x16xf32>
    %4 = vector.shape_cast %3 : vector<1x16x16xf32> to vector<16x16xf32>
    %5 = vector.extract_strided_slice %1 {offsets = [0, 0], sizes = [16, 144], strides = [1, 1]} : vector<16x198xf32> to vector<16x144xf32>
    %cst_5 = arith.constant dense<0.000000e+00> : vector<16x144xf32>
    %6 = tpu.matmul %4, %5, %cst_5 {dimension_numbers = #tpu.dot_dimension_numbers<[1], [0], [0], [1], [0, 0, 1, 1], [], []>} : vector<16x16xf32>, vector<16x144xf32>, vector<16x144xf32> -> vector<16x144xf32>
    %7 = arith.addf %2, %6 : vector<16x144xf32>
    %c1 = arith.constant 1 : index
    %c0_6 = arith.constant 0 : index
    %c0_7 = arith.constant 0 : index
    %8 = vector.load %arg2[%c1, %c0_6, %c0_7] : memref<9x16x16xf32, #tpu.memory_space<vmem>>, vector<1x16x16xf32>
    %9 = vector.shape_cast %8 : vector<1x16x16xf32> to vector<16x16xf32>
    %10 = vector.extract_strided_slice %1 {offsets = [0, 1], sizes = [16, 144], strides = [1, 1]} : vector<16x198xf32> to vector<16x144xf32>
    %cst_8 = arith.constant dense<0.000000e+00> : vector<16x144xf32>
    %11 = tpu.matmul %9, %10, %cst_8 {dimension_numbers = #tpu.dot_dimension_numbers<[1], [0], [0], [1], [0, 0, 1, 1], [], []>} : vector<16x16xf32>, vector<16x144xf32>, vector<16x144xf32> -> vector<16x144xf32>
    %12 = arith.addf %7, %11 : vector<16x144xf32>
    %c2 = arith.constant 2 : index
    %c0_9 = arith.constant 0 : index
    %c0_10 = arith.constant 0 : index
    %13 = vector.load %arg2[%c2, %c0_9, %c0_10] : memref<9x16x16xf32, #tpu.memory_space<vmem>>, vector<1x16x16xf32>
    %14 = vector.shape_cast %13 : vector<1x16x16xf32> to vector<16x16xf32>
    %15 = vector.extract_strided_slice %1 {offsets = [0, 2], sizes = [16, 144], strides = [1, 1]} : vector<16x198xf32> to vector<16x144xf32>
    %cst_11 = arith.constant dense<0.000000e+00> : vector<16x144xf32>
    %16 = tpu.matmul %14, %15, %cst_11 {dimension_numbers = #tpu.dot_dimension_numbers<[1], [0], [0], [1], [0, 0, 1, 1], [], []>} : vector<16x16xf32>, vector<16x144xf32>, vector<16x144xf32> -> vector<16x144xf32>
    %17 = arith.addf %12, %16 : vector<16x144xf32>
    %c3 = arith.constant 3 : index
    %c0_12 = arith.constant 0 : index
    %c0_13 = arith.constant 0 : index
    %18 = vector.load %arg2[%c3, %c0_12, %c0_13] : memref<9x16x16xf32, #tpu.memory_space<vmem>>, vector<1x16x16xf32>
    %19 = vector.shape_cast %18 : vector<1x16x16xf32> to vector<16x16xf32>
    %20 = vector.extract_strided_slice %1 {offsets = [0, 18], sizes = [16, 144], strides = [1, 1]} : vector<16x198xf32> to vector<16x144xf32>
    %cst_14 = arith.constant dense<0.000000e+00> : vector<16x144xf32>
    %21 = tpu.matmul %19, %20, %cst_14 {dimension_numbers = #tpu.dot_dimension_numbers<[1], [0], [0], [1], [0, 0, 1, 1], [], []>} : vector<16x16xf32>, vector<16x144xf32>, vector<16x144xf32> -> vector<16x144xf32>
    %22 = arith.addf %17, %21 : vector<16x144xf32>
    %c4 = arith.constant 4 : index
    %c0_15 = arith.constant 0 : index
    %c0_16 = arith.constant 0 : index
    %23 = vector.load %arg2[%c4, %c0_15, %c0_16] : memref<9x16x16xf32, #tpu.memory_space<vmem>>, vector<1x16x16xf32>
    %24 = vector.shape_cast %23 : vector<1x16x16xf32> to vector<16x16xf32>
    %25 = vector.extract_strided_slice %1 {offsets = [0, 19], sizes = [16, 144], strides = [1, 1]} : vector<16x198xf32> to vector<16x144xf32>
    %cst_17 = arith.constant dense<0.000000e+00> : vector<16x144xf32>
    %26 = tpu.matmul %24, %25, %cst_17 {dimension_numbers = #tpu.dot_dimension_numbers<[1], [0], [0], [1], [0, 0, 1, 1], [], []>} : vector<16x16xf32>, vector<16x144xf32>, vector<16x144xf32> -> vector<16x144xf32>
    %27 = arith.addf %22, %26 : vector<16x144xf32>
    %c5 = arith.constant 5 : index
    %c0_18 = arith.constant 0 : index
    %c0_19 = arith.constant 0 : index
    %28 = vector.load %arg2[%c5, %c0_18, %c0_19] : memref<9x16x16xf32, #tpu.memory_space<vmem>>, vector<1x16x16xf32>
    %29 = vector.shape_cast %28 : vector<1x16x16xf32> to vector<16x16xf32>
    %30 = vector.extract_strided_slice %1 {offsets = [0, 20], sizes = [16, 144], strides = [1, 1]} : vector<16x198xf32> to vector<16x144xf32>
    %cst_20 = arith.constant dense<0.000000e+00> : vector<16x144xf32>
    %31 = tpu.matmul %29, %30, %cst_20 {dimension_numbers = #tpu.dot_dimension_numbers<[1], [0], [0], [1], [0, 0, 1, 1], [], []>} : vector<16x16xf32>, vector<16x144xf32>, vector<16x144xf32> -> vector<16x144xf32>
    %32 = arith.addf %27, %31 : vector<16x144xf32>
    %c6 = arith.constant 6 : index
    %c0_21 = arith.constant 0 : index
    %c0_22 = arith.constant 0 : index
    %33 = vector.load %arg2[%c6, %c0_21, %c0_22] : memref<9x16x16xf32, #tpu.memory_space<vmem>>, vector<1x16x16xf32>
    %34 = vector.shape_cast %33 : vector<1x16x16xf32> to vector<16x16xf32>
    %35 = vector.extract_strided_slice %1 {offsets = [0, 36], sizes = [16, 144], strides = [1, 1]} : vector<16x198xf32> to vector<16x144xf32>
    %cst_23 = arith.constant dense<0.000000e+00> : vector<16x144xf32>
    %36 = tpu.matmul %34, %35, %cst_23 {dimension_numbers = #tpu.dot_dimension_numbers<[1], [0], [0], [1], [0, 0, 1, 1], [], []>} : vector<16x16xf32>, vector<16x144xf32>, vector<16x144xf32> -> vector<16x144xf32>
    %37 = arith.addf %32, %36 : vector<16x144xf32>
    %c7 = arith.constant 7 : index
    %c0_24 = arith.constant 0 : index
    %c0_25 = arith.constant 0 : index
    %38 = vector.load %arg2[%c7, %c0_24, %c0_25] : memref<9x16x16xf32, #tpu.memory_space<vmem>>, vector<1x16x16xf32>
    %39 = vector.shape_cast %38 : vector<1x16x16xf32> to vector<16x16xf32>
    %40 = vector.extract_strided_slice %1 {offsets = [0, 37], sizes = [16, 144], strides = [1, 1]} : vector<16x198xf32> to vector<16x144xf32>
    %cst_26 = arith.constant dense<0.000000e+00> : vector<16x144xf32>
    %41 = tpu.matmul %39, %40, %cst_26 {dimension_numbers = #tpu.dot_dimension_numbers<[1], [0], [0], [1], [0, 0, 1, 1], [], []>} : vector<16x16xf32>, vector<16x144xf32>, vector<16x144xf32> -> vector<16x144xf32>
    %42 = arith.addf %37, %41 : vector<16x144xf32>
    %c8 = arith.constant 8 : index
    %c0_27 = arith.constant 0 : index
    %c0_28 = arith.constant 0 : index
    %43 = vector.load %arg2[%c8, %c0_27, %c0_28] : memref<9x16x16xf32, #tpu.memory_space<vmem>>, vector<1x16x16xf32>
    %44 = vector.shape_cast %43 : vector<1x16x16xf32> to vector<16x16xf32>
    %45 = vector.extract_strided_slice %1 {offsets = [0, 38], sizes = [16, 144], strides = [1, 1]} : vector<16x198xf32> to vector<16x144xf32>
    %cst_29 = arith.constant dense<0.000000e+00> : vector<16x144xf32>
    %46 = tpu.matmul %44, %45, %cst_29 {dimension_numbers = #tpu.dot_dimension_numbers<[1], [0], [0], [1], [0, 0, 1, 1], [], []>} : vector<16x16xf32>, vector<16x144xf32>, vector<16x144xf32> -> vector<16x144xf32>
    %47 = arith.addf %42, %46 : vector<16x144xf32>
    %c0_30 = arith.constant 0 : index
    %c0_31 = arith.constant 0 : index
    %48 = vector.load %arg3[%c0_30, %c0_31] : memref<16x1xf32, #tpu.memory_space<vmem>>, vector<16x1xf32>
    %49 = vector.broadcast %48 : vector<16x1xf32> to vector<16x144xf32>
    %50 = arith.addf %47, %49 : vector<16x144xf32>
    %cst_32 = arith.constant 0.00999999977 : f32
    %51 = vector.broadcast %cst_32 : f32 to vector<16x144xf32>
    %52 = arith.mulf %51, %50 : vector<16x144xf32>
    %53 = arith.maximumf %50, %52 : vector<16x144xf32>
    %c0_33 = arith.constant 0 : index
    %c0_34 = arith.constant 0 : index
    %c0_35 = arith.constant 0 : index
    %54 = vector.load %arg4[%c0_33, %c0_34, %c0_35] : memref<1x16x144xf32, #tpu.memory_space<vmem>>, vector<1x16x144xf32>
    %55 = vector.shape_cast %54 : vector<1x16x144xf32> to vector<16x144xf32>
    %56 = vector.shape_cast %53 : vector<16x144xf32> to vector<1x16x144xf32>
    tpu.vector_store %arg4[%c0_33, %c0_34, %c0_35], %56 {strides = array<i32>} : memref<1x16x144xf32, #tpu.memory_space<vmem>>, vector<1x16x144xf32>,
    return
  }
  func.func @transform_0(%arg0: i32) -> (i32, i32, i32) {
    %c0_i32 = arith.constant 0 : i32
    %c0_i32_0 = arith.constant 0 : i32
    %c0_i32_1 = arith.constant 0 : i32
    return %arg0, %c0_i32, %c0_i32_0 : i32, i32, i32
  }
  func.func @transform_1(%arg0: i32) -> (i32, i32, i32) {
    %c0_i32 = arith.constant 0 : i32
    %c0_i32_0 = arith.constant 0 : i32
    %c0_i32_1 = arith.constant 0 : i32
    %c0_i32_2 = arith.constant 0 : i32
    return %c0_i32, %c0_i32_0, %c0_i32_1 : i32, i32, i32
  }
  func.func @transform_2(%arg0: i32) -> (i32, i32) {
    %c0_i32 = arith.constant 0 : i32
    %c0_i32_0 = arith.constant 0 : i32
    %c0_i32_1 = arith.constant 0 : i32
    return %c0_i32, %c0_i32_0 : i32, i32
  }
  func.func @transform_3(%arg0: i32) -> (i32, i32, i32) {
    %c0_i32 = arith.constant 0 : i32
    %c0_i32_0 = arith.constant 0 : i32
    %c0_i32_1 = arith.constant 0 : i32
    return %arg0, %c0_i32, %c0_i32_0 : i32, i32, i32
  }
}

module attributes {stable_mosaic.version = 11 : i64} {
  func.func @_bn_stats_kernel(%arg0: i32, %arg1: i32, %arg2: memref<1x16x32xf32, #tpu.memory_space<vmem>>, %arg3: memref<16x1xf32, #tpu.memory_space<vmem>>, %arg4: memref<16x1xf32, #tpu.memory_space<vmem>>, %arg5: memref<16x1xf32, #tpu.memory_space<vmem>>, %arg6: memref<16x1xf32, #tpu.memory_space<vmem>>, %arg7: memref<16x1xf32, #tpu.memory_space<vmem>>, %arg8: memref<16x1xf32, #tpu.memory_space<vmem>>) attributes {dimension_semantics = [#tpu.dimension_semantics<arbitrary>, #tpu.dimension_semantics<arbitrary>], iteration_bounds = array<i64: 2, 1>, scalar_prefetch = 0 : i64, scratch_operands = 2 : i64, tpu.core_type = #tpu.core_type<tc>, window_params = [{transform_indices = @transform_0, window_bounds = array<i64: 1, 16, 32>}, {pipeline_mode = #tpu.pipeline_mode<synchronous>, transform_indices = @transform_1, window_bounds = array<i64: 16, 1>}, {pipeline_mode = #tpu.pipeline_mode<synchronous>, transform_indices = @transform_2, window_bounds = array<i64: 16, 1>}, {pipeline_mode = #tpu.pipeline_mode<synchronous>, transform_indices = @transform_3, window_bounds = array<i64: 16, 1>}, {pipeline_mode = #tpu.pipeline_mode<synchronous>, transform_indices = @transform_4, window_bounds = array<i64: 16, 1>}]} {
    %c0_i32 = arith.constant 0 : i32
    %0 = arith.cmpi eq, %arg0, %c0_i32 : i32
    %c0_i32_0 = arith.constant 0 : i32
    %1 = arith.cmpi eq, %arg1, %c0_i32_0 : i32
    %2 = arith.andi %0, %1 : i1
    %3 = arith.extui %2 : i1 to i32
    %c0_i32_1 = arith.constant 0 : i32
    %4 = arith.cmpi ne, %3, %c0_i32_1 : i32
    scf.if %4 {
      %cst_15 = arith.constant 0.000000e+00 : f32
      %23 = vector.broadcast %cst_15 : f32 to vector<16x1xf32>
      %c0_16 = arith.constant 0 : index
      %c0_17 = arith.constant 0 : index
      %24 = vector.load %arg7[%c0_16, %c0_17] : memref<16x1xf32, #tpu.memory_space<vmem>>, vector<16x1xf32>
      tpu.vector_store %arg7[%c0_16, %c0_17], %23 {strides = array<i32>} : memref<16x1xf32, #tpu.memory_space<vmem>>, vector<16x1xf32>,
      %cst_18 = arith.constant 0.000000e+00 : f32
      %25 = vector.broadcast %cst_18 : f32 to vector<16x1xf32>
      %c0_19 = arith.constant 0 : index
      %c0_20 = arith.constant 0 : index
      %26 = vector.load %arg8[%c0_19, %c0_20] : memref<16x1xf32, #tpu.memory_space<vmem>>, vector<16x1xf32>
      tpu.vector_store %arg8[%c0_19, %c0_20], %25 {strides = array<i32>} : memref<16x1xf32, #tpu.memory_space<vmem>>, vector<16x1xf32>,
    } else {
    }
    %c0 = arith.constant 0 : index
    %c0_2 = arith.constant 0 : index
    %c0_3 = arith.constant 0 : index
    %5 = vector.load %arg2[%c0, %c0_2, %c0_3] : memref<1x16x32xf32, #tpu.memory_space<vmem>>, vector<1x16x32xf32>
    %6 = vector.shape_cast %5 : vector<1x16x32xf32> to vector<16x32xf32>
    %c0_4 = arith.constant 0 : index
    %c0_5 = arith.constant 0 : index
    %7 = vector.load %arg7[%c0_4, %c0_5] : memref<16x1xf32, #tpu.memory_space<vmem>>, vector<16x1xf32>
    %cst = arith.constant dense<0.000000e+00> : vector<16xf32>
    %8 = vector.multi_reduction <add>, %6, %cst [1] : vector<16x32xf32> to vector<16xf32>
    %9 = vector.shape_cast %8 : vector<16xf32> to vector<16x1xf32>
    %10 = arith.addf %7, %9 : vector<16x1xf32>
    %c0_6 = arith.constant 0 : index
    %c0_7 = arith.constant 0 : index
    %11 = vector.load %arg7[%c0_6, %c0_7] : memref<16x1xf32, #tpu.memory_space<vmem>>, vector<16x1xf32>
    tpu.vector_store %arg7[%c0_6, %c0_7], %10 {strides = array<i32>} : memref<16x1xf32, #tpu.memory_space<vmem>>, vector<16x1xf32>,
    %c0_8 = arith.constant 0 : index
    %c0_9 = arith.constant 0 : index
    %12 = vector.load %arg8[%c0_8, %c0_9] : memref<16x1xf32, #tpu.memory_space<vmem>>, vector<16x1xf32>
    %13 = arith.mulf %6, %6 : vector<16x32xf32>
    %cst_10 = arith.constant dense<0.000000e+00> : vector<16xf32>
    %14 = vector.multi_reduction <add>, %13, %cst_10 [1] : vector<16x32xf32> to vector<16xf32>
    %15 = vector.shape_cast %14 : vector<16xf32> to vector<16x1xf32>
    %16 = arith.addf %12, %15 : vector<16x1xf32>
    %c0_11 = arith.constant 0 : index
    %c0_12 = arith.constant 0 : index
    %17 = vector.load %arg8[%c0_11, %c0_12] : memref<16x1xf32, #tpu.memory_space<vmem>>, vector<16x1xf32>
    tpu.vector_store %arg8[%c0_11, %c0_12], %16 {strides = array<i32>} : memref<16x1xf32, #tpu.memory_space<vmem>>, vector<16x1xf32>,
    %c1_i32 = arith.constant 1 : i32
    %18 = arith.cmpi eq, %arg0, %c1_i32 : i32
    %c0_i32_13 = arith.constant 0 : i32
    %19 = arith.cmpi eq, %arg1, %c0_i32_13 : i32
    %20 = arith.andi %18, %19 : i1
    %21 = arith.extui %20 : i1 to i32
    %c0_i32_14 = arith.constant 0 : i32
    %22 = arith.cmpi ne, %21, %c0_i32_14 : i32
    scf.if %22 {
      %c0_15 = arith.constant 0 : index
      %c0_16 = arith.constant 0 : index
      %23 = vector.load %arg7[%c0_15, %c0_16] : memref<16x1xf32, #tpu.memory_space<vmem>>, vector<16x1xf32>
      %cst_17 = arith.constant 6.400000e+01 : f32
      %24 = vector.broadcast %cst_17 : f32 to vector<16x1xf32>
      %25 = arith.divf %23, %24 : vector<16x1xf32>
      %c0_18 = arith.constant 0 : index
      %c0_19 = arith.constant 0 : index
      %26 = vector.load %arg8[%c0_18, %c0_19] : memref<16x1xf32, #tpu.memory_space<vmem>>, vector<16x1xf32>
      %cst_20 = arith.constant 6.400000e+01 : f32
      %27 = vector.broadcast %cst_20 : f32 to vector<16x1xf32>
      %28 = arith.divf %26, %27 : vector<16x1xf32>
      %29 = arith.mulf %25, %25 : vector<16x1xf32>
      %30 = arith.subf %28, %29 : vector<16x1xf32>
      %cst_21 = arith.constant 0.000000e+00 : f32
      %31 = vector.broadcast %cst_21 : f32 to vector<16x1xf32>
      %32 = arith.maximumf %30, %31 : vector<16x1xf32>
      %c0_22 = arith.constant 0 : index
      %c0_23 = arith.constant 0 : index
      %33 = vector.load %arg3[%c0_22, %c0_23] : memref<16x1xf32, #tpu.memory_space<vmem>>, vector<16x1xf32>
      %cst_24 = arith.constant 9.99999974E-6 : f32
      %34 = vector.broadcast %cst_24 : f32 to vector<16x1xf32>
      %35 = arith.addf %32, %34 : vector<16x1xf32>
      %36 = math.rsqrt %35 : vector<16x1xf32>
      %37 = arith.mulf %33, %36 : vector<16x1xf32>
      %c0_25 = arith.constant 0 : index
      %c0_26 = arith.constant 0 : index
      %38 = vector.load %arg5[%c0_25, %c0_26] : memref<16x1xf32, #tpu.memory_space<vmem>>, vector<16x1xf32>
      tpu.vector_store %arg5[%c0_25, %c0_26], %37 {strides = array<i32>} : memref<16x1xf32, #tpu.memory_space<vmem>>, vector<16x1xf32>,
      %c0_27 = arith.constant 0 : index
      %c0_28 = arith.constant 0 : index
      %39 = vector.load %arg4[%c0_27, %c0_28] : memref<16x1xf32, #tpu.memory_space<vmem>>, vector<16x1xf32>
      %40 = arith.mulf %25, %37 : vector<16x1xf32>
      %41 = arith.subf %39, %40 : vector<16x1xf32>
      %c0_29 = arith.constant 0 : index
      %c0_30 = arith.constant 0 : index
      %42 = vector.load %arg6[%c0_29, %c0_30] : memref<16x1xf32, #tpu.memory_space<vmem>>, vector<16x1xf32>
      tpu.vector_store %arg6[%c0_29, %c0_30], %41 {strides = array<i32>} : memref<16x1xf32, #tpu.memory_space<vmem>>, vector<16x1xf32>,
    } else {
    }
    return
  }
  func.func @transform_0(%arg0: i32, %arg1: i32) -> (i32, i32, i32) {
    %c0_i32 = arith.constant 0 : i32
    %c0_i32_0 = arith.constant 0 : i32
    return %arg0, %c0_i32, %arg1 : i32, i32, i32
  }
  func.func @transform_1(%arg0: i32, %arg1: i32) -> (i32, i32) {
    %c0_i32 = arith.constant 0 : i32
    %c0_i32_0 = arith.constant 0 : i32
    %c0_i32_1 = arith.constant 0 : i32
    return %c0_i32, %c0_i32_0 : i32, i32
  }
  func.func @transform_2(%arg0: i32, %arg1: i32) -> (i32, i32) {
    %c0_i32 = arith.constant 0 : i32
    %c0_i32_0 = arith.constant 0 : i32
    %c0_i32_1 = arith.constant 0 : i32
    return %c0_i32, %c0_i32_0 : i32, i32
  }
  func.func @transform_3(%arg0: i32, %arg1: i32) -> (i32, i32) {
    %c0_i32 = arith.constant 0 : i32
    %c0_i32_0 = arith.constant 0 : i32
    %c0_i32_1 = arith.constant 0 : i32
    return %c0_i32, %c0_i32_0 : i32, i32
  }
  func.func @transform_4(%arg0: i32, %arg1: i32) -> (i32, i32) {
    %c0_i32 = arith.constant 0 : i32
    %c0_i32_0 = arith.constant 0 : i32
    %c0_i32_1 = arith.constant 0 : i32
    return %c0_i32, %c0_i32_0 : i32, i32
  }
}

module attributes {stable_mosaic.version = 11 : i64} {
  func.func @_bn_apply_kernel(%arg0: i32, %arg1: i32, %arg2: memref<1x16x32xf32, #tpu.memory_space<vmem>>, %arg3: memref<16x1xf32, #tpu.memory_space<vmem>>, %arg4: memref<16x1xf32, #tpu.memory_space<vmem>>, %arg5: memref<1x16x32xf32, #tpu.memory_space<vmem>>) attributes {dimension_semantics = [#tpu.dimension_semantics<parallel>, #tpu.dimension_semantics<parallel>], iteration_bounds = array<i64: 2, 1>, scalar_prefetch = 0 : i64, scratch_operands = 0 : i64, tpu.core_type = #tpu.core_type<tc>, window_params = [{transform_indices = @transform_0, window_bounds = array<i64: 1, 16, 32>}, {pipeline_mode = #tpu.pipeline_mode<synchronous>, transform_indices = @transform_1, window_bounds = array<i64: 16, 1>}, {pipeline_mode = #tpu.pipeline_mode<synchronous>, transform_indices = @transform_2, window_bounds = array<i64: 16, 1>}, {transform_indices = @transform_3, window_bounds = array<i64: 1, 16, 32>}]} {
    %c0 = arith.constant 0 : index
    %c0_0 = arith.constant 0 : index
    %c0_1 = arith.constant 0 : index
    %0 = vector.load %arg2[%c0, %c0_0, %c0_1] : memref<1x16x32xf32, #tpu.memory_space<vmem>>, vector<1x16x32xf32>
    %1 = vector.shape_cast %0 : vector<1x16x32xf32> to vector<16x32xf32>
    %c0_2 = arith.constant 0 : index
    %c0_3 = arith.constant 0 : index
    %2 = vector.load %arg3[%c0_2, %c0_3] : memref<16x1xf32, #tpu.memory_space<vmem>>, vector<16x1xf32>
    %3 = vector.broadcast %2 : vector<16x1xf32> to vector<16x32xf32>
    %4 = arith.mulf %1, %3 : vector<16x32xf32>
    %c0_4 = arith.constant 0 : index
    %c0_5 = arith.constant 0 : index
    %5 = vector.load %arg4[%c0_4, %c0_5] : memref<16x1xf32, #tpu.memory_space<vmem>>, vector<16x1xf32>
    %6 = vector.broadcast %5 : vector<16x1xf32> to vector<16x32xf32>
    %7 = arith.addf %4, %6 : vector<16x32xf32>
    %c0_6 = arith.constant 0 : index
    %c0_7 = arith.constant 0 : index
    %c0_8 = arith.constant 0 : index
    %8 = vector.load %arg5[%c0_6, %c0_7, %c0_8] : memref<1x16x32xf32, #tpu.memory_space<vmem>>, vector<1x16x32xf32>
    %9 = vector.shape_cast %8 : vector<1x16x32xf32> to vector<16x32xf32>
    %10 = vector.shape_cast %7 : vector<16x32xf32> to vector<1x16x32xf32>
    tpu.vector_store %arg5[%c0_6, %c0_7, %c0_8], %10 {strides = array<i32>} : memref<1x16x32xf32, #tpu.memory_space<vmem>>, vector<1x16x32xf32>,
    return
  }
  func.func @transform_0(%arg0: i32, %arg1: i32) -> (i32, i32, i32) {
    %c0_i32 = arith.constant 0 : i32
    %c0_i32_0 = arith.constant 0 : i32
    return %arg0, %c0_i32, %arg1 : i32, i32, i32
  }
  func.func @transform_1(%arg0: i32, %arg1: i32) -> (i32, i32) {
    %c0_i32 = arith.constant 0 : i32
    %c0_i32_0 = arith.constant 0 : i32
    %c0_i32_1 = arith.constant 0 : i32
    return %c0_i32, %c0_i32_0 : i32, i32
  }
  func.func @transform_2(%arg0: i32, %arg1: i32) -> (i32, i32) {
    %c0_i32 = arith.constant 0 : i32
    %c0_i32_0 = arith.constant 0 : i32
    %c0_i32_1 = arith.constant 0 : i32
    return %c0_i32, %c0_i32_0 : i32, i32
  }
  func.func @transform_3(%arg0: i32, %arg1: i32) -> (i32, i32, i32) {
    %c0_i32 = arith.constant 0 : i32
    %c0_i32_0 = arith.constant 0 : i32
    return %arg0, %c0_i32, %arg1 : i32, i32, i32
  }
}

module attributes {stable_mosaic.version = 11 : i64} {
  func.func @_mm_kernel(%arg0: i32, %arg1: i32, %arg2: memref<8x16xf32, #tpu.memory_space<vmem>>, %arg3: memref<16x64xf32, #tpu.memory_space<vmem>>, %arg4: memref<1x64xf32, #tpu.memory_space<vmem>>, %arg5: memref<8x64xf32, #tpu.memory_space<vmem>>, %arg6: memref<8x64xf32, #tpu.memory_space<vmem>>) attributes {dimension_semantics = [#tpu.dimension_semantics<parallel>, #tpu.dimension_semantics<arbitrary>], iteration_bounds = array<i64: 1, 1>, scalar_prefetch = 0 : i64, scratch_operands = 1 : i64, tpu.core_type = #tpu.core_type<tc>, window_params = [{transform_indices = @transform_0, window_bounds = array<i64: 8, 16>}, {transform_indices = @transform_1, window_bounds = array<i64: 16, 64>}, {pipeline_mode = #tpu.pipeline_mode<synchronous>, transform_indices = @transform_2, window_bounds = array<i64: 1, 64>}, {transform_indices = @transform_3, window_bounds = array<i64: 8, 64>}]} {
    %c0_i32 = arith.constant 0 : i32
    %0 = arith.cmpi eq, %arg1, %c0_i32 : i32
    %1 = arith.extui %0 : i1 to i32
    %c0_i32_0 = arith.constant 0 : i32
    %2 = arith.cmpi ne, %1, %c0_i32_0 : i32
    scf.if %2 {
      %cst_10 = arith.constant 0.000000e+00 : f32
      %12 = vector.broadcast %cst_10 : f32 to vector<8x64xf32>
      %c0_11 = arith.constant 0 : index
      %c0_12 = arith.constant 0 : index
      %13 = vector.load %arg6[%c0_11, %c0_12] : memref<8x64xf32, #tpu.memory_space<vmem>>, vector<8x64xf32>
      tpu.vector_store %arg6[%c0_11, %c0_12], %12 {strides = array<i32>} : memref<8x64xf32, #tpu.memory_space<vmem>>, vector<8x64xf32>,
    } else {
    }
    %c0 = arith.constant 0 : index
    %c0_1 = arith.constant 0 : index
    %3 = vector.load %arg6[%c0, %c0_1] : memref<8x64xf32, #tpu.memory_space<vmem>>, vector<8x64xf32>
    %c0_2 = arith.constant 0 : index
    %c0_3 = arith.constant 0 : index
    %4 = vector.load %arg2[%c0_2, %c0_3] : memref<8x16xf32, #tpu.memory_space<vmem>>, vector<8x16xf32>
    %c0_4 = arith.constant 0 : index
    %c0_5 = arith.constant 0 : index
    %5 = vector.load %arg3[%c0_4, %c0_5] : memref<16x64xf32, #tpu.memory_space<vmem>>, vector<16x64xf32>
    %cst = arith.constant dense<0.000000e+00> : vector<8x64xf32>
    %6 = tpu.matmul %4, %5, %cst {dimension_numbers = #tpu.dot_dimension_numbers<[1], [0], [0], [1], [0, 0, 1, 1], [], []>} : vector<8x16xf32>, vector<16x64xf32>, vector<8x64xf32> -> vector<8x64xf32>
    %7 = arith.addf %3, %6 : vector<8x64xf32>
    %c0_6 = arith.constant 0 : index
    %c0_7 = arith.constant 0 : index
    %8 = vector.load %arg6[%c0_6, %c0_7] : memref<8x64xf32, #tpu.memory_space<vmem>>, vector<8x64xf32>
    tpu.vector_store %arg6[%c0_6, %c0_7], %7 {strides = array<i32>} : memref<8x64xf32, #tpu.memory_space<vmem>>, vector<8x64xf32>,
    %c0_i32_8 = arith.constant 0 : i32
    %9 = arith.cmpi eq, %arg1, %c0_i32_8 : i32
    %10 = arith.extui %9 : i1 to i32
    %c0_i32_9 = arith.constant 0 : i32
    %11 = arith.cmpi ne, %10, %c0_i32_9 : i32
    scf.if %11 {
      %c0_10 = arith.constant 0 : index
      %c0_11 = arith.constant 0 : index
      %12 = vector.load %arg6[%c0_10, %c0_11] : memref<8x64xf32, #tpu.memory_space<vmem>>, vector<8x64xf32>
      %c0_12 = arith.constant 0 : index
      %c0_13 = arith.constant 0 : index
      %13 = vector.load %arg4[%c0_12, %c0_13] : memref<1x64xf32, #tpu.memory_space<vmem>>, vector<1x64xf32>
      %14 = vector.broadcast %13 : vector<1x64xf32> to vector<8x64xf32>
      %15 = arith.addf %12, %14 : vector<8x64xf32>
      %c0_14 = arith.constant 0 : index
      %c0_15 = arith.constant 0 : index
      %16 = vector.load %arg5[%c0_14, %c0_15] : memref<8x64xf32, #tpu.memory_space<vmem>>, vector<8x64xf32>
      tpu.vector_store %arg5[%c0_14, %c0_15], %15 {strides = array<i32>} : memref<8x64xf32, #tpu.memory_space<vmem>>, vector<8x64xf32>,
    } else {
    }
    return
  }
  func.func @transform_0(%arg0: i32, %arg1: i32) -> (i32, i32) {
    %c0_i32 = arith.constant 0 : i32
    return %arg0, %arg1 : i32, i32
  }
  func.func @transform_1(%arg0: i32, %arg1: i32) -> (i32, i32) {
    %c0_i32 = arith.constant 0 : i32
    %c0_i32_0 = arith.constant 0 : i32
    return %arg1, %c0_i32 : i32, i32
  }
  func.func @transform_2(%arg0: i32, %arg1: i32) -> (i32, i32) {
    %c0_i32 = arith.constant 0 : i32
    %c0_i32_0 = arith.constant 0 : i32
    %c0_i32_1 = arith.constant 0 : i32
    return %c0_i32, %c0_i32_0 : i32, i32
  }
  func.func @transform_3(%arg0: i32, %arg1: i32) -> (i32, i32) {
    %c0_i32 = arith.constant 0 : i32
    %c0_i32_0 = arith.constant 0 : i32
    return %arg0, %c0_i32 : i32, i32
  }
}

module attributes {stable_mosaic.version = 11 : i64} {
  func.func @_lstm_bidir_kernel(%arg0: memref<4x2x64xf32, #tpu.memory_space<vmem>>, %arg1: memref<2x8x32xf32, #tpu.memory_space<vmem>>, %arg2: memref<4x2x2x8xf32, #tpu.memory_space<vmem>>) attributes {dimension_semantics = [], scalar_prefetch = 0 : i64, scratch_operands = 0 : i64, tpu.core_type = #tpu.core_type<tc>} {
    %cst = arith.constant 0.000000e+00 : f32
    %0 = vector.broadcast %cst : f32 to vector<2x8xf32>
    %c0_i32 = arith.constant 0 : i32
    %c3_i32 = arith.constant 3 : i32
    %1 = arith.subi %c3_i32, %c0_i32 : i32
    %2 = arith.index_cast %c0_i32 : i32 to index
    %c0 = arith.constant 0 : index
    %c0_0 = arith.constant 0 : index
    %3 = vector.load %arg0[%2, %c0, %c0_0] : memref<4x2x64xf32, #tpu.memory_space<vmem>>, vector<1x2x64xf32>
    %4 = vector.shape_cast %3 : vector<1x2x64xf32> to vector<2x64xf32>
    %5 = arith.index_cast %1 : i32 to index
    %c0_1 = arith.constant 0 : index
    %c0_2 = arith.constant 0 : index
    %6 = vector.load %arg0[%5, %c0_1, %c0_2] : memref<4x2x64xf32, #tpu.memory_space<vmem>>, vector<1x2x64xf32>
    %7 = vector.shape_cast %6 : vector<1x2x64xf32> to vector<2x64xf32>
    %8 = vector.extract_strided_slice %4 {offsets = [0, 0], sizes = [2, 32], strides = [1, 1]} : vector<2x64xf32> to vector<2x32xf32>
    %c0_3 = arith.constant 0 : index
    %c0_4 = arith.constant 0 : index
    %c0_5 = arith.constant 0 : index
    %9 = vector.load %arg1[%c0_3, %c0_4, %c0_5] : memref<2x8x32xf32, #tpu.memory_space<vmem>>, vector<1x8x32xf32>
    %10 = vector.shape_cast %9 : vector<1x8x32xf32> to vector<8x32xf32>
    %cst_6 = arith.constant dense<0.000000e+00> : vector<2x32xf32>
    %11 = tpu.matmul %0, %10, %cst_6 {dimension_numbers = #tpu.dot_dimension_numbers<[1], [0], [0], [1], [0, 0, 1, 1], [], []>} : vector<2x8xf32>, vector<8x32xf32>, vector<2x32xf32> -> vector<2x32xf32>
    %12 = arith.addf %8, %11 : vector<2x32xf32>
    %13 = vector.extract_strided_slice %7 {offsets = [0, 32], sizes = [2, 32], strides = [1, 1]} : vector<2x64xf32> to vector<2x32xf32>
    %c1 = arith.constant 1 : index
    %c0_7 = arith.constant 0 : index
    %c0_8 = arith.constant 0 : index
    %14 = vector.load %arg1[%c1, %c0_7, %c0_8] : memref<2x8x32xf32, #tpu.memory_space<vmem>>, vector<1x8x32xf32>
    %15 = vector.shape_cast %14 : vector<1x8x32xf32> to vector<8x32xf32>
    %cst_9 = arith.constant dense<0.000000e+00> : vector<2x32xf32>
    %16 = tpu.matmul %0, %15, %cst_9 {dimension_numbers = #tpu.dot_dimension_numbers<[1], [0], [0], [1], [0, 0, 1, 1], [], []>} : vector<2x8xf32>, vector<8x32xf32>, vector<2x32xf32> -> vector<2x32xf32>
    %17 = arith.addf %13, %16 : vector<2x32xf32>
    %18 = vector.extract_strided_slice %12 {offsets = [0, 0], sizes = [2, 8], strides = [1, 1]} : vector<2x32xf32> to vector<2x8xf32>
    %19 = arith.negf %18 : vector<2x8xf32>
    %20 = math.exp %19 : vector<2x8xf32>
    %cst_10 = arith.constant 1.000000e+00 : f32
    %21 = vector.broadcast %cst_10 : f32 to vector<2x8xf32>
    %22 = arith.addf %21, %20 : vector<2x8xf32>
    %23 = arith.divf %21, %22 : vector<2x8xf32>
    %24 = vector.extract_strided_slice %12 {offsets = [0, 8], sizes = [2, 8], strides = [1, 1]} : vector<2x32xf32> to vector<2x8xf32>
    %25 = arith.negf %24 : vector<2x8xf32>
    %26 = math.exp %25 : vector<2x8xf32>
    %cst_11 = arith.constant 1.000000e+00 : f32
    %27 = vector.broadcast %cst_11 : f32 to vector<2x8xf32>
    %28 = arith.addf %27, %26 : vector<2x8xf32>
    %29 = arith.divf %27, %28 : vector<2x8xf32>
    %30 = vector.extract_strided_slice %12 {offsets = [0, 16], sizes = [2, 8], strides = [1, 1]} : vector<2x32xf32> to vector<2x8xf32>
    %31 = math.tanh %30 : vector<2x8xf32>
    %32 = vector.extract_strided_slice %12 {offsets = [0, 24], sizes = [2, 8], strides = [1, 1]} : vector<2x32xf32> to vector<2x8xf32>
    %33 = arith.negf %32 : vector<2x8xf32>
    %34 = math.exp %33 : vector<2x8xf32>
    %cst_12 = arith.constant 1.000000e+00 : f32
    %35 = vector.broadcast %cst_12 : f32 to vector<2x8xf32>
    %36 = arith.addf %35, %34 : vector<2x8xf32>
    %37 = arith.divf %35, %36 : vector<2x8xf32>
    %38 = arith.mulf %29, %0 : vector<2x8xf32>
    %39 = arith.mulf %23, %31 : vector<2x8xf32>
    %40 = arith.addf %38, %39 : vector<2x8xf32>
    %41 = math.tanh %40 : vector<2x8xf32>
    %42 = arith.mulf %37, %41 : vector<2x8xf32>
    %43 = vector.extract_strided_slice %17 {offsets = [0, 0], sizes = [2, 8], strides = [1, 1]} : vector<2x32xf32> to vector<2x8xf32>
    %44 = arith.negf %43 : vector<2x8xf32>
    %45 = math.exp %44 : vector<2x8xf32>
    %cst_13 = arith.constant 1.000000e+00 : f32
    %46 = vector.broadcast %cst_13 : f32 to vector<2x8xf32>
    %47 = arith.addf %46, %45 : vector<2x8xf32>
    %48 = arith.divf %46, %47 : vector<2x8xf32>
    %49 = vector.extract_strided_slice %17 {offsets = [0, 8], sizes = [2, 8], strides = [1, 1]} : vector<2x32xf32> to vector<2x8xf32>
    %50 = arith.negf %49 : vector<2x8xf32>
    %51 = math.exp %50 : vector<2x8xf32>
    %cst_14 = arith.constant 1.000000e+00 : f32
    %52 = vector.broadcast %cst_14 : f32 to vector<2x8xf32>
    %53 = arith.addf %52, %51 : vector<2x8xf32>
    %54 = arith.divf %52, %53 : vector<2x8xf32>
    %55 = vector.extract_strided_slice %17 {offsets = [0, 16], sizes = [2, 8], strides = [1, 1]} : vector<2x32xf32> to vector<2x8xf32>
    %56 = math.tanh %55 : vector<2x8xf32>
    %57 = vector.extract_strided_slice %17 {offsets = [0, 24], sizes = [2, 8], strides = [1, 1]} : vector<2x32xf32> to vector<2x8xf32>
    %58 = arith.negf %57 : vector<2x8xf32>
    %59 = math.exp %58 : vector<2x8xf32>
    %cst_15 = arith.constant 1.000000e+00 : f32
    %60 = vector.broadcast %cst_15 : f32 to vector<2x8xf32>
    %61 = arith.addf %60, %59 : vector<2x8xf32>
    %62 = arith.divf %60, %61 : vector<2x8xf32>
    %63 = arith.mulf %54, %0 : vector<2x8xf32>
    %64 = arith.mulf %48, %56 : vector<2x8xf32>
    %65 = arith.addf %63, %64 : vector<2x8xf32>
    %66 = math.tanh %65 : vector<2x8xf32>
    %67 = arith.mulf %62, %66 : vector<2x8xf32>
    %68 = arith.index_cast %c0_i32 : i32 to index
    %c0_16 = arith.constant 0 : index
    %c0_17 = arith.constant 0 : index
    %c0_18 = arith.constant 0 : index
    %69 = vector.load %arg2[%68, %c0_16, %c0_17, %c0_18] : memref<4x2x2x8xf32, #tpu.memory_space<vmem>>, vector<1x1x2x8xf32>
    %70 = vector.shape_cast %69 : vector<1x1x2x8xf32> to vector<2x8xf32>
    %71 = vector.shape_cast %42 : vector<2x8xf32> to vector<1x1x2x8xf32>
    tpu.vector_store %arg2[%68, %c0_16, %c0_17, %c0_18], %71 {strides = array<i32>} : memref<4x2x2x8xf32, #tpu.memory_space<vmem>>, vector<1x1x2x8xf32>,
    %72 = arith.index_cast %1 : i32 to index
    %c1_19 = arith.constant 1 : index
    %c0_20 = arith.constant 0 : index
    %c0_21 = arith.constant 0 : index
    %73 = vector.load %arg2[%72, %c1_19, %c0_20, %c0_21] : memref<4x2x2x8xf32, #tpu.memory_space<vmem>>, vector<1x1x2x8xf32>
    %74 = vector.shape_cast %73 : vector<1x1x2x8xf32> to vector<2x8xf32>
    %75 = vector.shape_cast %67 : vector<2x8xf32> to vector<1x1x2x8xf32>
    tpu.vector_store %arg2[%72, %c1_19, %c0_20, %c0_21], %75 {strides = array<i32>} : memref<4x2x2x8xf32, #tpu.memory_space<vmem>>, vector<1x1x2x8xf32>,
    %c1_i32 = arith.constant 1 : i32
    %c3_i32_22 = arith.constant 3 : i32
    %76 = arith.subi %c3_i32_22, %c1_i32 : i32
    %77 = arith.index_cast %c1_i32 : i32 to index
    %c0_23 = arith.constant 0 : index
    %c0_24 = arith.constant 0 : index
    %78 = vector.load %arg0[%77, %c0_23, %c0_24] : memref<4x2x64xf32, #tpu.memory_space<vmem>>, vector<1x2x64xf32>
    %79 = vector.shape_cast %78 : vector<1x2x64xf32> to vector<2x64xf32>
    %80 = arith.index_cast %76 : i32 to index
    %c0_25 = arith.constant 0 : index
    %c0_26 = arith.constant 0 : index
    %81 = vector.load %arg0[%80, %c0_25, %c0_26] : memref<4x2x64xf32, #tpu.memory_space<vmem>>, vector<1x2x64xf32>
    %82 = vector.shape_cast %81 : vector<1x2x64xf32> to vector<2x64xf32>
    %83 = vector.extract_strided_slice %79 {offsets = [0, 0], sizes = [2, 32], strides = [1, 1]} : vector<2x64xf32> to vector<2x32xf32>
    %c0_27 = arith.constant 0 : index
    %c0_28 = arith.constant 0 : index
    %c0_29 = arith.constant 0 : index
    %84 = vector.load %arg1[%c0_27, %c0_28, %c0_29] : memref<2x8x32xf32, #tpu.memory_space<vmem>>, vector<1x8x32xf32>
    %85 = vector.shape_cast %84 : vector<1x8x32xf32> to vector<8x32xf32>
    %cst_30 = arith.constant dense<0.000000e+00> : vector<2x32xf32>
    %86 = tpu.matmul %42, %85, %cst_30 {dimension_numbers = #tpu.dot_dimension_numbers<[1], [0], [0], [1], [0, 0, 1, 1], [], []>} : vector<2x8xf32>, vector<8x32xf32>, vector<2x32xf32> -> vector<2x32xf32>
    %87 = arith.addf %83, %86 : vector<2x32xf32>
    %88 = vector.extract_strided_slice %82 {offsets = [0, 32], sizes = [2, 32], strides = [1, 1]} : vector<2x64xf32> to vector<2x32xf32>
    %c1_31 = arith.constant 1 : index
    %c0_32 = arith.constant 0 : index
    %c0_33 = arith.constant 0 : index
    %89 = vector.load %arg1[%c1_31, %c0_32, %c0_33] : memref<2x8x32xf32, #tpu.memory_space<vmem>>, vector<1x8x32xf32>
    %90 = vector.shape_cast %89 : vector<1x8x32xf32> to vector<8x32xf32>
    %cst_34 = arith.constant dense<0.000000e+00> : vector<2x32xf32>
    %91 = tpu.matmul %67, %90, %cst_34 {dimension_numbers = #tpu.dot_dimension_numbers<[1], [0], [0], [1], [0, 0, 1, 1], [], []>} : vector<2x8xf32>, vector<8x32xf32>, vector<2x32xf32> -> vector<2x32xf32>
    %92 = arith.addf %88, %91 : vector<2x32xf32>
    %93 = vector.extract_strided_slice %87 {offsets = [0, 0], sizes = [2, 8], strides = [1, 1]} : vector<2x32xf32> to vector<2x8xf32>
    %94 = arith.negf %93 : vector<2x8xf32>
    %95 = math.exp %94 : vector<2x8xf32>
    %cst_35 = arith.constant 1.000000e+00 : f32
    %96 = vector.broadcast %cst_35 : f32 to vector<2x8xf32>
    %97 = arith.addf %96, %95 : vector<2x8xf32>
    %98 = arith.divf %96, %97 : vector<2x8xf32>
    %99 = vector.extract_strided_slice %87 {offsets = [0, 8], sizes = [2, 8], strides = [1, 1]} : vector<2x32xf32> to vector<2x8xf32>
    %100 = arith.negf %99 : vector<2x8xf32>
    %101 = math.exp %100 : vector<2x8xf32>
    %cst_36 = arith.constant 1.000000e+00 : f32
    %102 = vector.broadcast %cst_36 : f32 to vector<2x8xf32>
    %103 = arith.addf %102, %101 : vector<2x8xf32>
    %104 = arith.divf %102, %103 : vector<2x8xf32>
    %105 = vector.extract_strided_slice %87 {offsets = [0, 16], sizes = [2, 8], strides = [1, 1]} : vector<2x32xf32> to vector<2x8xf32>
    %106 = math.tanh %105 : vector<2x8xf32>
    %107 = vector.extract_strided_slice %87 {offsets = [0, 24], sizes = [2, 8], strides = [1, 1]} : vector<2x32xf32> to vector<2x8xf32>
    %108 = arith.negf %107 : vector<2x8xf32>
    %109 = math.exp %108 : vector<2x8xf32>
    %cst_37 = arith.constant 1.000000e+00 : f32
    %110 = vector.broadcast %cst_37 : f32 to vector<2x8xf32>
    %111 = arith.addf %110, %109 : vector<2x8xf32>
    %112 = arith.divf %110, %111 : vector<2x8xf32>
    %113 = arith.mulf %104, %40 : vector<2x8xf32>
    %114 = arith.mulf %98, %106 : vector<2x8xf32>
    %115 = arith.addf %113, %114 : vector<2x8xf32>
    %116 = math.tanh %115 : vector<2x8xf32>
    %117 = arith.mulf %112, %116 : vector<2x8xf32>
    %118 = vector.extract_strided_slice %92 {offsets = [0, 0], sizes = [2, 8], strides = [1, 1]} : vector<2x32xf32> to vector<2x8xf32>
    %119 = arith.negf %118 : vector<2x8xf32>
    %120 = math.exp %119 : vector<2x8xf32>
    %cst_38 = arith.constant 1.000000e+00 : f32
    %121 = vector.broadcast %cst_38 : f32 to vector<2x8xf32>
    %122 = arith.addf %121, %120 : vector<2x8xf32>
    %123 = arith.divf %121, %122 : vector<2x8xf32>
    %124 = vector.extract_strided_slice %92 {offsets = [0, 8], sizes = [2, 8], strides = [1, 1]} : vector<2x32xf32> to vector<2x8xf32>
    %125 = arith.negf %124 : vector<2x8xf32>
    %126 = math.exp %125 : vector<2x8xf32>
    %cst_39 = arith.constant 1.000000e+00 : f32
    %127 = vector.broadcast %cst_39 : f32 to vector<2x8xf32>
    %128 = arith.addf %127, %126 : vector<2x8xf32>
    %129 = arith.divf %127, %128 : vector<2x8xf32>
    %130 = vector.extract_strided_slice %92 {offsets = [0, 16], sizes = [2, 8], strides = [1, 1]} : vector<2x32xf32> to vector<2x8xf32>
    %131 = math.tanh %130 : vector<2x8xf32>
    %132 = vector.extract_strided_slice %92 {offsets = [0, 24], sizes = [2, 8], strides = [1, 1]} : vector<2x32xf32> to vector<2x8xf32>
    %133 = arith.negf %132 : vector<2x8xf32>
    %134 = math.exp %133 : vector<2x8xf32>
    %cst_40 = arith.constant 1.000000e+00 : f32
    %135 = vector.broadcast %cst_40 : f32 to vector<2x8xf32>
    %136 = arith.addf %135, %134 : vector<2x8xf32>
    %137 = arith.divf %135, %136 : vector<2x8xf32>
    %138 = arith.mulf %129, %65 : vector<2x8xf32>
    %139 = arith.mulf %123, %131 : vector<2x8xf32>
    %140 = arith.addf %138, %139 : vector<2x8xf32>
    %141 = math.tanh %140 : vector<2x8xf32>
    %142 = arith.mulf %137, %141 : vector<2x8xf32>
    %143 = arith.index_cast %c1_i32 : i32 to index
    %c0_41 = arith.constant 0 : index
    %c0_42 = arith.constant 0 : index
    %c0_43 = arith.constant 0 : index
    %144 = vector.load %arg2[%143, %c0_41, %c0_42, %c0_43] : memref<4x2x2x8xf32, #tpu.memory_space<vmem>>, vector<1x1x2x8xf32>
    %145 = vector.shape_cast %144 : vector<1x1x2x8xf32> to vector<2x8xf32>
    %146 = vector.shape_cast %117 : vector<2x8xf32> to vector<1x1x2x8xf32>
    tpu.vector_store %arg2[%143, %c0_41, %c0_42, %c0_43], %146 {strides = array<i32>} : memref<4x2x2x8xf32, #tpu.memory_space<vmem>>, vector<1x1x2x8xf32>,
    %147 = arith.index_cast %76 : i32 to index
    %c1_44 = arith.constant 1 : index
    %c0_45 = arith.constant 0 : index
    %c0_46 = arith.constant 0 : index
    %148 = vector.load %arg2[%147, %c1_44, %c0_45, %c0_46] : memref<4x2x2x8xf32, #tpu.memory_space<vmem>>, vector<1x1x2x8xf32>
    %149 = vector.shape_cast %148 : vector<1x1x2x8xf32> to vector<2x8xf32>
    %150 = vector.shape_cast %142 : vector<2x8xf32> to vector<1x1x2x8xf32>
    tpu.vector_store %arg2[%147, %c1_44, %c0_45, %c0_46], %150 {strides = array<i32>} : memref<4x2x2x8xf32, #tpu.memory_space<vmem>>, vector<1x1x2x8xf32>,
    %c2_i32 = arith.constant 2 : i32
    %c3_i32_47 = arith.constant 3 : i32
    %151 = arith.subi %c3_i32_47, %c2_i32 : i32
    %152 = arith.index_cast %c2_i32 : i32 to index
    %c0_48 = arith.constant 0 : index
    %c0_49 = arith.constant 0 : index
    %153 = vector.load %arg0[%152, %c0_48, %c0_49] : memref<4x2x64xf32, #tpu.memory_space<vmem>>, vector<1x2x64xf32>
    %154 = vector.shape_cast %153 : vector<1x2x64xf32> to vector<2x64xf32>
    %155 = arith.index_cast %151 : i32 to index
    %c0_50 = arith.constant 0 : index
    %c0_51 = arith.constant 0 : index
    %156 = vector.load %arg0[%155, %c0_50, %c0_51] : memref<4x2x64xf32, #tpu.memory_space<vmem>>, vector<1x2x64xf32>
    %157 = vector.shape_cast %156 : vector<1x2x64xf32> to vector<2x64xf32>
    %158 = vector.extract_strided_slice %154 {offsets = [0, 0], sizes = [2, 32], strides = [1, 1]} : vector<2x64xf32> to vector<2x32xf32>
    %c0_52 = arith.constant 0 : index
    %c0_53 = arith.constant 0 : index
    %c0_54 = arith.constant 0 : index
    %159 = vector.load %arg1[%c0_52, %c0_53, %c0_54] : memref<2x8x32xf32, #tpu.memory_space<vmem>>, vector<1x8x32xf32>
    %160 = vector.shape_cast %159 : vector<1x8x32xf32> to vector<8x32xf32>
    %cst_55 = arith.constant dense<0.000000e+00> : vector<2x32xf32>
    %161 = tpu.matmul %117, %160, %cst_55 {dimension_numbers = #tpu.dot_dimension_numbers<[1], [0], [0], [1], [0, 0, 1, 1], [], []>} : vector<2x8xf32>, vector<8x32xf32>, vector<2x32xf32> -> vector<2x32xf32>
    %162 = arith.addf %158, %161 : vector<2x32xf32>
    %163 = vector.extract_strided_slice %157 {offsets = [0, 32], sizes = [2, 32], strides = [1, 1]} : vector<2x64xf32> to vector<2x32xf32>
    %c1_56 = arith.constant 1 : index
    %c0_57 = arith.constant 0 : index
    %c0_58 = arith.constant 0 : index
    %164 = vector.load %arg1[%c1_56, %c0_57, %c0_58] : memref<2x8x32xf32, #tpu.memory_space<vmem>>, vector<1x8x32xf32>
    %165 = vector.shape_cast %164 : vector<1x8x32xf32> to vector<8x32xf32>
    %cst_59 = arith.constant dense<0.000000e+00> : vector<2x32xf32>
    %166 = tpu.matmul %142, %165, %cst_59 {dimension_numbers = #tpu.dot_dimension_numbers<[1], [0], [0], [1], [0, 0, 1, 1], [], []>} : vector<2x8xf32>, vector<8x32xf32>, vector<2x32xf32> -> vector<2x32xf32>
    %167 = arith.addf %163, %166 : vector<2x32xf32>
    %168 = vector.extract_strided_slice %162 {offsets = [0, 0], sizes = [2, 8], strides = [1, 1]} : vector<2x32xf32> to vector<2x8xf32>
    %169 = arith.negf %168 : vector<2x8xf32>
    %170 = math.exp %169 : vector<2x8xf32>
    %cst_60 = arith.constant 1.000000e+00 : f32
    %171 = vector.broadcast %cst_60 : f32 to vector<2x8xf32>
    %172 = arith.addf %171, %170 : vector<2x8xf32>
    %173 = arith.divf %171, %172 : vector<2x8xf32>
    %174 = vector.extract_strided_slice %162 {offsets = [0, 8], sizes = [2, 8], strides = [1, 1]} : vector<2x32xf32> to vector<2x8xf32>
    %175 = arith.negf %174 : vector<2x8xf32>
    %176 = math.exp %175 : vector<2x8xf32>
    %cst_61 = arith.constant 1.000000e+00 : f32
    %177 = vector.broadcast %cst_61 : f32 to vector<2x8xf32>
    %178 = arith.addf %177, %176 : vector<2x8xf32>
    %179 = arith.divf %177, %178 : vector<2x8xf32>
    %180 = vector.extract_strided_slice %162 {offsets = [0, 16], sizes = [2, 8], strides = [1, 1]} : vector<2x32xf32> to vector<2x8xf32>
    %181 = math.tanh %180 : vector<2x8xf32>
    %182 = vector.extract_strided_slice %162 {offsets = [0, 24], sizes = [2, 8], strides = [1, 1]} : vector<2x32xf32> to vector<2x8xf32>
    %183 = arith.negf %182 : vector<2x8xf32>
    %184 = math.exp %183 : vector<2x8xf32>
    %cst_62 = arith.constant 1.000000e+00 : f32
    %185 = vector.broadcast %cst_62 : f32 to vector<2x8xf32>
    %186 = arith.addf %185, %184 : vector<2x8xf32>
    %187 = arith.divf %185, %186 : vector<2x8xf32>
    %188 = arith.mulf %179, %115 : vector<2x8xf32>
    %189 = arith.mulf %173, %181 : vector<2x8xf32>
    %190 = arith.addf %188, %189 : vector<2x8xf32>
    %191 = math.tanh %190 : vector<2x8xf32>
    %192 = arith.mulf %187, %191 : vector<2x8xf32>
    %193 = vector.extract_strided_slice %167 {offsets = [0, 0], sizes = [2, 8], strides = [1, 1]} : vector<2x32xf32> to vector<2x8xf32>
    %194 = arith.negf %193 : vector<2x8xf32>
    %195 = math.exp %194 : vector<2x8xf32>
    %cst_63 = arith.constant 1.000000e+00 : f32
    %196 = vector.broadcast %cst_63 : f32 to vector<2x8xf32>
    %197 = arith.addf %196, %195 : vector<2x8xf32>
    %198 = arith.divf %196, %197 : vector<2x8xf32>
    %199 = vector.extract_strided_slice %167 {offsets = [0, 8], sizes = [2, 8], strides = [1, 1]} : vector<2x32xf32> to vector<2x8xf32>
    %200 = arith.negf %199 : vector<2x8xf32>
    %201 = math.exp %200 : vector<2x8xf32>
    %cst_64 = arith.constant 1.000000e+00 : f32
    %202 = vector.broadcast %cst_64 : f32 to vector<2x8xf32>
    %203 = arith.addf %202, %201 : vector<2x8xf32>
    %204 = arith.divf %202, %203 : vector<2x8xf32>
    %205 = vector.extract_strided_slice %167 {offsets = [0, 16], sizes = [2, 8], strides = [1, 1]} : vector<2x32xf32> to vector<2x8xf32>
    %206 = math.tanh %205 : vector<2x8xf32>
    %207 = vector.extract_strided_slice %167 {offsets = [0, 24], sizes = [2, 8], strides = [1, 1]} : vector<2x32xf32> to vector<2x8xf32>
    %208 = arith.negf %207 : vector<2x8xf32>
    %209 = math.exp %208 : vector<2x8xf32>
    %cst_65 = arith.constant 1.000000e+00 : f32
    %210 = vector.broadcast %cst_65 : f32 to vector<2x8xf32>
    %211 = arith.addf %210, %209 : vector<2x8xf32>
    %212 = arith.divf %210, %211 : vector<2x8xf32>
    %213 = arith.mulf %204, %140 : vector<2x8xf32>
    %214 = arith.mulf %198, %206 : vector<2x8xf32>
    %215 = arith.addf %213, %214 : vector<2x8xf32>
    %216 = math.tanh %215 : vector<2x8xf32>
    %217 = arith.mulf %212, %216 : vector<2x8xf32>
    %218 = arith.index_cast %c2_i32 : i32 to index
    %c0_66 = arith.constant 0 : index
    %c0_67 = arith.constant 0 : index
    %c0_68 = arith.constant 0 : index
    %219 = vector.load %arg2[%218, %c0_66, %c0_67, %c0_68] : memref<4x2x2x8xf32, #tpu.memory_space<vmem>>, vector<1x1x2x8xf32>
    %220 = vector.shape_cast %219 : vector<1x1x2x8xf32> to vector<2x8xf32>
    %221 = vector.shape_cast %192 : vector<2x8xf32> to vector<1x1x2x8xf32>
    tpu.vector_store %arg2[%218, %c0_66, %c0_67, %c0_68], %221 {strides = array<i32>} : memref<4x2x2x8xf32, #tpu.memory_space<vmem>>, vector<1x1x2x8xf32>,
    %222 = arith.index_cast %151 : i32 to index
    %c1_69 = arith.constant 1 : index
    %c0_70 = arith.constant 0 : index
    %c0_71 = arith.constant 0 : index
    %223 = vector.load %arg2[%222, %c1_69, %c0_70, %c0_71] : memref<4x2x2x8xf32, #tpu.memory_space<vmem>>, vector<1x1x2x8xf32>
    %224 = vector.shape_cast %223 : vector<1x1x2x8xf32> to vector<2x8xf32>
    %225 = vector.shape_cast %217 : vector<2x8xf32> to vector<1x1x2x8xf32>
    tpu.vector_store %arg2[%222, %c1_69, %c0_70, %c0_71], %225 {strides = array<i32>} : memref<4x2x2x8xf32, #tpu.memory_space<vmem>>, vector<1x1x2x8xf32>,
    %c3_i32_72 = arith.constant 3 : i32
    %c3_i32_73 = arith.constant 3 : i32
    %226 = arith.subi %c3_i32_73, %c3_i32_72 : i32
    %227 = arith.index_cast %c3_i32_72 : i32 to index
    %c0_74 = arith.constant 0 : index
    %c0_75 = arith.constant 0 : index
    %228 = vector.load %arg0[%227, %c0_74, %c0_75] : memref<4x2x64xf32, #tpu.memory_space<vmem>>, vector<1x2x64xf32>
    %229 = vector.shape_cast %228 : vector<1x2x64xf32> to vector<2x64xf32>
    %230 = arith.index_cast %226 : i32 to index
    %c0_76 = arith.constant 0 : index
    %c0_77 = arith.constant 0 : index
    %231 = vector.load %arg0[%230, %c0_76, %c0_77] : memref<4x2x64xf32, #tpu.memory_space<vmem>>, vector<1x2x64xf32>
    %232 = vector.shape_cast %231 : vector<1x2x64xf32> to vector<2x64xf32>
    %233 = vector.extract_strided_slice %229 {offsets = [0, 0], sizes = [2, 32], strides = [1, 1]} : vector<2x64xf32> to vector<2x32xf32>
    %c0_78 = arith.constant 0 : index
    %c0_79 = arith.constant 0 : index
    %c0_80 = arith.constant 0 : index
    %234 = vector.load %arg1[%c0_78, %c0_79, %c0_80] : memref<2x8x32xf32, #tpu.memory_space<vmem>>, vector<1x8x32xf32>
    %235 = vector.shape_cast %234 : vector<1x8x32xf32> to vector<8x32xf32>
    %cst_81 = arith.constant dense<0.000000e+00> : vector<2x32xf32>
    %236 = tpu.matmul %192, %235, %cst_81 {dimension_numbers = #tpu.dot_dimension_numbers<[1], [0], [0], [1], [0, 0, 1, 1], [], []>} : vector<2x8xf32>, vector<8x32xf32>, vector<2x32xf32> -> vector<2x32xf32>
    %237 = arith.addf %233, %236 : vector<2x32xf32>
    %238 = vector.extract_strided_slice %232 {offsets = [0, 32], sizes = [2, 32], strides = [1, 1]} : vector<2x64xf32> to vector<2x32xf32>
    %c1_82 = arith.constant 1 : index
    %c0_83 = arith.constant 0 : index
    %c0_84 = arith.constant 0 : index
    %239 = vector.load %arg1[%c1_82, %c0_83, %c0_84] : memref<2x8x32xf32, #tpu.memory_space<vmem>>, vector<1x8x32xf32>
    %240 = vector.shape_cast %239 : vector<1x8x32xf32> to vector<8x32xf32>
    %cst_85 = arith.constant dense<0.000000e+00> : vector<2x32xf32>
    %241 = tpu.matmul %217, %240, %cst_85 {dimension_numbers = #tpu.dot_dimension_numbers<[1], [0], [0], [1], [0, 0, 1, 1], [], []>} : vector<2x8xf32>, vector<8x32xf32>, vector<2x32xf32> -> vector<2x32xf32>
    %242 = arith.addf %238, %241 : vector<2x32xf32>
    %243 = vector.extract_strided_slice %237 {offsets = [0, 0], sizes = [2, 8], strides = [1, 1]} : vector<2x32xf32> to vector<2x8xf32>
    %244 = arith.negf %243 : vector<2x8xf32>
    %245 = math.exp %244 : vector<2x8xf32>
    %cst_86 = arith.constant 1.000000e+00 : f32
    %246 = vector.broadcast %cst_86 : f32 to vector<2x8xf32>
    %247 = arith.addf %246, %245 : vector<2x8xf32>
    %248 = arith.divf %246, %247 : vector<2x8xf32>
    %249 = vector.extract_strided_slice %237 {offsets = [0, 8], sizes = [2, 8], strides = [1, 1]} : vector<2x32xf32> to vector<2x8xf32>
    %250 = arith.negf %249 : vector<2x8xf32>
    %251 = math.exp %250 : vector<2x8xf32>
    %cst_87 = arith.constant 1.000000e+00 : f32
    %252 = vector.broadcast %cst_87 : f32 to vector<2x8xf32>
    %253 = arith.addf %252, %251 : vector<2x8xf32>
    %254 = arith.divf %252, %253 : vector<2x8xf32>
    %255 = vector.extract_strided_slice %237 {offsets = [0, 16], sizes = [2, 8], strides = [1, 1]} : vector<2x32xf32> to vector<2x8xf32>
    %256 = math.tanh %255 : vector<2x8xf32>
    %257 = vector.extract_strided_slice %237 {offsets = [0, 24], sizes = [2, 8], strides = [1, 1]} : vector<2x32xf32> to vector<2x8xf32>
    %258 = arith.negf %257 : vector<2x8xf32>
    %259 = math.exp %258 : vector<2x8xf32>
    %cst_88 = arith.constant 1.000000e+00 : f32
    %260 = vector.broadcast %cst_88 : f32 to vector<2x8xf32>
    %261 = arith.addf %260, %259 : vector<2x8xf32>
    %262 = arith.divf %260, %261 : vector<2x8xf32>
    %263 = arith.mulf %254, %190 : vector<2x8xf32>
    %264 = arith.mulf %248, %256 : vector<2x8xf32>
    %265 = arith.addf %263, %264 : vector<2x8xf32>
    %266 = math.tanh %265 : vector<2x8xf32>
    %267 = arith.mulf %262, %266 : vector<2x8xf32>
    %268 = vector.extract_strided_slice %242 {offsets = [0, 0], sizes = [2, 8], strides = [1, 1]} : vector<2x32xf32> to vector<2x8xf32>
    %269 = arith.negf %268 : vector<2x8xf32>
    %270 = math.exp %269 : vector<2x8xf32>
    %cst_89 = arith.constant 1.000000e+00 : f32
    %271 = vector.broadcast %cst_89 : f32 to vector<2x8xf32>
    %272 = arith.addf %271, %270 : vector<2x8xf32>
    %273 = arith.divf %271, %272 : vector<2x8xf32>
    %274 = vector.extract_strided_slice %242 {offsets = [0, 8], sizes = [2, 8], strides = [1, 1]} : vector<2x32xf32> to vector<2x8xf32>
    %275 = arith.negf %274 : vector<2x8xf32>
    %276 = math.exp %275 : vector<2x8xf32>
    %cst_90 = arith.constant 1.000000e+00 : f32
    %277 = vector.broadcast %cst_90 : f32 to vector<2x8xf32>
    %278 = arith.addf %277, %276 : vector<2x8xf32>
    %279 = arith.divf %277, %278 : vector<2x8xf32>
    %280 = vector.extract_strided_slice %242 {offsets = [0, 16], sizes = [2, 8], strides = [1, 1]} : vector<2x32xf32> to vector<2x8xf32>
    %281 = math.tanh %280 : vector<2x8xf32>
    %282 = vector.extract_strided_slice %242 {offsets = [0, 24], sizes = [2, 8], strides = [1, 1]} : vector<2x32xf32> to vector<2x8xf32>
    %283 = arith.negf %282 : vector<2x8xf32>
    %284 = math.exp %283 : vector<2x8xf32>
    %cst_91 = arith.constant 1.000000e+00 : f32
    %285 = vector.broadcast %cst_91 : f32 to vector<2x8xf32>
    %286 = arith.addf %285, %284 : vector<2x8xf32>
    %287 = arith.divf %285, %286 : vector<2x8xf32>
    %288 = arith.mulf %279, %215 : vector<2x8xf32>
    %289 = arith.mulf %273, %281 : vector<2x8xf32>
    %290 = arith.addf %288, %289 : vector<2x8xf32>
    %291 = math.tanh %290 : vector<2x8xf32>
    %292 = arith.mulf %287, %291 : vector<2x8xf32>
    %293 = arith.index_cast %c3_i32_72 : i32 to index
    %c0_92 = arith.constant 0 : index
    %c0_93 = arith.constant 0 : index
    %c0_94 = arith.constant 0 : index
    %294 = vector.load %arg2[%293, %c0_92, %c0_93, %c0_94] : memref<4x2x2x8xf32, #tpu.memory_space<vmem>>, vector<1x1x2x8xf32>
    %295 = vector.shape_cast %294 : vector<1x1x2x8xf32> to vector<2x8xf32>
    %296 = vector.shape_cast %267 : vector<2x8xf32> to vector<1x1x2x8xf32>
    tpu.vector_store %arg2[%293, %c0_92, %c0_93, %c0_94], %296 {strides = array<i32>} : memref<4x2x2x8xf32, #tpu.memory_space<vmem>>, vector<1x1x2x8xf32>,
    %297 = arith.index_cast %226 : i32 to index
    %c1_95 = arith.constant 1 : index
    %c0_96 = arith.constant 0 : index
    %c0_97 = arith.constant 0 : index
    %298 = vector.load %arg2[%297, %c1_95, %c0_96, %c0_97] : memref<4x2x2x8xf32, #tpu.memory_space<vmem>>, vector<1x1x2x8xf32>
    %299 = vector.shape_cast %298 : vector<1x1x2x8xf32> to vector<2x8xf32>
    %300 = vector.shape_cast %292 : vector<2x8xf32> to vector<1x1x2x8xf32>
    tpu.vector_store %arg2[%297, %c1_95, %c0_96, %c0_97], %300 {strides = array<i32>} : memref<4x2x2x8xf32, #tpu.memory_space<vmem>>, vector<1x1x2x8xf32>,
    %c4_i32 = arith.constant 4 : i32
    return
  }
}

module attributes {stable_mosaic.version = 11 : i64} {
  func.func @_lstm_bidir_kernel(%arg0: memref<2x2x64xf32, #tpu.memory_space<vmem>>, %arg1: memref<2x8x32xf32, #tpu.memory_space<vmem>>, %arg2: memref<2x2x2x8xf32, #tpu.memory_space<vmem>>) attributes {dimension_semantics = [], scalar_prefetch = 0 : i64, scratch_operands = 0 : i64, tpu.core_type = #tpu.core_type<tc>} {
    %cst = arith.constant 0.000000e+00 : f32
    %0 = vector.broadcast %cst : f32 to vector<2x8xf32>
    %c0_i32 = arith.constant 0 : i32
    %c1_i32 = arith.constant 1 : i32
    %1 = arith.subi %c1_i32, %c0_i32 : i32
    %2 = arith.index_cast %c0_i32 : i32 to index
    %c0 = arith.constant 0 : index
    %c0_0 = arith.constant 0 : index
    %3 = vector.load %arg0[%2, %c0, %c0_0] : memref<2x2x64xf32, #tpu.memory_space<vmem>>, vector<1x2x64xf32>
    %4 = vector.shape_cast %3 : vector<1x2x64xf32> to vector<2x64xf32>
    %5 = arith.index_cast %1 : i32 to index
    %c0_1 = arith.constant 0 : index
    %c0_2 = arith.constant 0 : index
    %6 = vector.load %arg0[%5, %c0_1, %c0_2] : memref<2x2x64xf32, #tpu.memory_space<vmem>>, vector<1x2x64xf32>
    %7 = vector.shape_cast %6 : vector<1x2x64xf32> to vector<2x64xf32>
    %8 = vector.extract_strided_slice %4 {offsets = [0, 0], sizes = [2, 32], strides = [1, 1]} : vector<2x64xf32> to vector<2x32xf32>
    %c0_3 = arith.constant 0 : index
    %c0_4 = arith.constant 0 : index
    %c0_5 = arith.constant 0 : index
    %9 = vector.load %arg1[%c0_3, %c0_4, %c0_5] : memref<2x8x32xf32, #tpu.memory_space<vmem>>, vector<1x8x32xf32>
    %10 = vector.shape_cast %9 : vector<1x8x32xf32> to vector<8x32xf32>
    %cst_6 = arith.constant dense<0.000000e+00> : vector<2x32xf32>
    %11 = tpu.matmul %0, %10, %cst_6 {dimension_numbers = #tpu.dot_dimension_numbers<[1], [0], [0], [1], [0, 0, 1, 1], [], []>} : vector<2x8xf32>, vector<8x32xf32>, vector<2x32xf32> -> vector<2x32xf32>
    %12 = arith.addf %8, %11 : vector<2x32xf32>
    %13 = vector.extract_strided_slice %7 {offsets = [0, 32], sizes = [2, 32], strides = [1, 1]} : vector<2x64xf32> to vector<2x32xf32>
    %c1 = arith.constant 1 : index
    %c0_7 = arith.constant 0 : index
    %c0_8 = arith.constant 0 : index
    %14 = vector.load %arg1[%c1, %c0_7, %c0_8] : memref<2x8x32xf32, #tpu.memory_space<vmem>>, vector<1x8x32xf32>
    %15 = vector.shape_cast %14 : vector<1x8x32xf32> to vector<8x32xf32>
    %cst_9 = arith.constant dense<0.000000e+00> : vector<2x32xf32>
    %16 = tpu.matmul %0, %15, %cst_9 {dimension_numbers = #tpu.dot_dimension_numbers<[1], [0], [0], [1], [0, 0, 1, 1], [], []>} : vector<2x8xf32>, vector<8x32xf32>, vector<2x32xf32> -> vector<2x32xf32>
    %17 = arith.addf %13, %16 : vector<2x32xf32>
    %18 = vector.extract_strided_slice %12 {offsets = [0, 0], sizes = [2, 8], strides = [1, 1]} : vector<2x32xf32> to vector<2x8xf32>
    %19 = arith.negf %18 : vector<2x8xf32>
    %20 = math.exp %19 : vector<2x8xf32>
    %cst_10 = arith.constant 1.000000e+00 : f32
    %21 = vector.broadcast %cst_10 : f32 to vector<2x8xf32>
    %22 = arith.addf %21, %20 : vector<2x8xf32>
    %23 = arith.divf %21, %22 : vector<2x8xf32>
    %24 = vector.extract_strided_slice %12 {offsets = [0, 8], sizes = [2, 8], strides = [1, 1]} : vector<2x32xf32> to vector<2x8xf32>
    %25 = arith.negf %24 : vector<2x8xf32>
    %26 = math.exp %25 : vector<2x8xf32>
    %cst_11 = arith.constant 1.000000e+00 : f32
    %27 = vector.broadcast %cst_11 : f32 to vector<2x8xf32>
    %28 = arith.addf %27, %26 : vector<2x8xf32>
    %29 = arith.divf %27, %28 : vector<2x8xf32>
    %30 = vector.extract_strided_slice %12 {offsets = [0, 16], sizes = [2, 8], strides = [1, 1]} : vector<2x32xf32> to vector<2x8xf32>
    %31 = math.tanh %30 : vector<2x8xf32>
    %32 = vector.extract_strided_slice %12 {offsets = [0, 24], sizes = [2, 8], strides = [1, 1]} : vector<2x32xf32> to vector<2x8xf32>
    %33 = arith.negf %32 : vector<2x8xf32>
    %34 = math.exp %33 : vector<2x8xf32>
    %cst_12 = arith.constant 1.000000e+00 : f32
    %35 = vector.broadcast %cst_12 : f32 to vector<2x8xf32>
    %36 = arith.addf %35, %34 : vector<2x8xf32>
    %37 = arith.divf %35, %36 : vector<2x8xf32>
    %38 = arith.mulf %29, %0 : vector<2x8xf32>
    %39 = arith.mulf %23, %31 : vector<2x8xf32>
    %40 = arith.addf %38, %39 : vector<2x8xf32>
    %41 = math.tanh %40 : vector<2x8xf32>
    %42 = arith.mulf %37, %41 : vector<2x8xf32>
    %43 = vector.extract_strided_slice %17 {offsets = [0, 0], sizes = [2, 8], strides = [1, 1]} : vector<2x32xf32> to vector<2x8xf32>
    %44 = arith.negf %43 : vector<2x8xf32>
    %45 = math.exp %44 : vector<2x8xf32>
    %cst_13 = arith.constant 1.000000e+00 : f32
    %46 = vector.broadcast %cst_13 : f32 to vector<2x8xf32>
    %47 = arith.addf %46, %45 : vector<2x8xf32>
    %48 = arith.divf %46, %47 : vector<2x8xf32>
    %49 = vector.extract_strided_slice %17 {offsets = [0, 8], sizes = [2, 8], strides = [1, 1]} : vector<2x32xf32> to vector<2x8xf32>
    %50 = arith.negf %49 : vector<2x8xf32>
    %51 = math.exp %50 : vector<2x8xf32>
    %cst_14 = arith.constant 1.000000e+00 : f32
    %52 = vector.broadcast %cst_14 : f32 to vector<2x8xf32>
    %53 = arith.addf %52, %51 : vector<2x8xf32>
    %54 = arith.divf %52, %53 : vector<2x8xf32>
    %55 = vector.extract_strided_slice %17 {offsets = [0, 16], sizes = [2, 8], strides = [1, 1]} : vector<2x32xf32> to vector<2x8xf32>
    %56 = math.tanh %55 : vector<2x8xf32>
    %57 = vector.extract_strided_slice %17 {offsets = [0, 24], sizes = [2, 8], strides = [1, 1]} : vector<2x32xf32> to vector<2x8xf32>
    %58 = arith.negf %57 : vector<2x8xf32>
    %59 = math.exp %58 : vector<2x8xf32>
    %cst_15 = arith.constant 1.000000e+00 : f32
    %60 = vector.broadcast %cst_15 : f32 to vector<2x8xf32>
    %61 = arith.addf %60, %59 : vector<2x8xf32>
    %62 = arith.divf %60, %61 : vector<2x8xf32>
    %63 = arith.mulf %54, %0 : vector<2x8xf32>
    %64 = arith.mulf %48, %56 : vector<2x8xf32>
    %65 = arith.addf %63, %64 : vector<2x8xf32>
    %66 = math.tanh %65 : vector<2x8xf32>
    %67 = arith.mulf %62, %66 : vector<2x8xf32>
    %68 = arith.index_cast %c0_i32 : i32 to index
    %c0_16 = arith.constant 0 : index
    %c0_17 = arith.constant 0 : index
    %c0_18 = arith.constant 0 : index
    %69 = vector.load %arg2[%68, %c0_16, %c0_17, %c0_18] : memref<2x2x2x8xf32, #tpu.memory_space<vmem>>, vector<1x1x2x8xf32>
    %70 = vector.shape_cast %69 : vector<1x1x2x8xf32> to vector<2x8xf32>
    %71 = vector.shape_cast %42 : vector<2x8xf32> to vector<1x1x2x8xf32>
    tpu.vector_store %arg2[%68, %c0_16, %c0_17, %c0_18], %71 {strides = array<i32>} : memref<2x2x2x8xf32, #tpu.memory_space<vmem>>, vector<1x1x2x8xf32>,
    %72 = arith.index_cast %1 : i32 to index
    %c1_19 = arith.constant 1 : index
    %c0_20 = arith.constant 0 : index
    %c0_21 = arith.constant 0 : index
    %73 = vector.load %arg2[%72, %c1_19, %c0_20, %c0_21] : memref<2x2x2x8xf32, #tpu.memory_space<vmem>>, vector<1x1x2x8xf32>
    %74 = vector.shape_cast %73 : vector<1x1x2x8xf32> to vector<2x8xf32>
    %75 = vector.shape_cast %67 : vector<2x8xf32> to vector<1x1x2x8xf32>
    tpu.vector_store %arg2[%72, %c1_19, %c0_20, %c0_21], %75 {strides = array<i32>} : memref<2x2x2x8xf32, #tpu.memory_space<vmem>>, vector<1x1x2x8xf32>,
    %c1_i32_22 = arith.constant 1 : i32
    %c1_i32_23 = arith.constant 1 : i32
    %76 = arith.subi %c1_i32_23, %c1_i32_22 : i32
    %77 = arith.index_cast %c1_i32_22 : i32 to index
    %c0_24 = arith.constant 0 : index
    %c0_25 = arith.constant 0 : index
    %78 = vector.load %arg0[%77, %c0_24, %c0_25] : memref<2x2x64xf32, #tpu.memory_space<vmem>>, vector<1x2x64xf32>
    %79 = vector.shape_cast %78 : vector<1x2x64xf32> to vector<2x64xf32>
    %80 = arith.index_cast %76 : i32 to index
    %c0_26 = arith.constant 0 : index
    %c0_27 = arith.constant 0 : index
    %81 = vector.load %arg0[%80, %c0_26, %c0_27] : memref<2x2x64xf32, #tpu.memory_space<vmem>>, vector<1x2x64xf32>
    %82 = vector.shape_cast %81 : vector<1x2x64xf32> to vector<2x64xf32>
    %83 = vector.extract_strided_slice %79 {offsets = [0, 0], sizes = [2, 32], strides = [1, 1]} : vector<2x64xf32> to vector<2x32xf32>
    %c0_28 = arith.constant 0 : index
    %c0_29 = arith.constant 0 : index
    %c0_30 = arith.constant 0 : index
    %84 = vector.load %arg1[%c0_28, %c0_29, %c0_30] : memref<2x8x32xf32, #tpu.memory_space<vmem>>, vector<1x8x32xf32>
    %85 = vector.shape_cast %84 : vector<1x8x32xf32> to vector<8x32xf32>
    %cst_31 = arith.constant dense<0.000000e+00> : vector<2x32xf32>
    %86 = tpu.matmul %42, %85, %cst_31 {dimension_numbers = #tpu.dot_dimension_numbers<[1], [0], [0], [1], [0, 0, 1, 1], [], []>} : vector<2x8xf32>, vector<8x32xf32>, vector<2x32xf32> -> vector<2x32xf32>
    %87 = arith.addf %83, %86 : vector<2x32xf32>
    %88 = vector.extract_strided_slice %82 {offsets = [0, 32], sizes = [2, 32], strides = [1, 1]} : vector<2x64xf32> to vector<2x32xf32>
    %c1_32 = arith.constant 1 : index
    %c0_33 = arith.constant 0 : index
    %c0_34 = arith.constant 0 : index
    %89 = vector.load %arg1[%c1_32, %c0_33, %c0_34] : memref<2x8x32xf32, #tpu.memory_space<vmem>>, vector<1x8x32xf32>
    %90 = vector.shape_cast %89 : vector<1x8x32xf32> to vector<8x32xf32>
    %cst_35 = arith.constant dense<0.000000e+00> : vector<2x32xf32>
    %91 = tpu.matmul %67, %90, %cst_35 {dimension_numbers = #tpu.dot_dimension_numbers<[1], [0], [0], [1], [0, 0, 1, 1], [], []>} : vector<2x8xf32>, vector<8x32xf32>, vector<2x32xf32> -> vector<2x32xf32>
    %92 = arith.addf %88, %91 : vector<2x32xf32>
    %93 = vector.extract_strided_slice %87 {offsets = [0, 0], sizes = [2, 8], strides = [1, 1]} : vector<2x32xf32> to vector<2x8xf32>
    %94 = arith.negf %93 : vector<2x8xf32>
    %95 = math.exp %94 : vector<2x8xf32>
    %cst_36 = arith.constant 1.000000e+00 : f32
    %96 = vector.broadcast %cst_36 : f32 to vector<2x8xf32>
    %97 = arith.addf %96, %95 : vector<2x8xf32>
    %98 = arith.divf %96, %97 : vector<2x8xf32>
    %99 = vector.extract_strided_slice %87 {offsets = [0, 8], sizes = [2, 8], strides = [1, 1]} : vector<2x32xf32> to vector<2x8xf32>
    %100 = arith.negf %99 : vector<2x8xf32>
    %101 = math.exp %100 : vector<2x8xf32>
    %cst_37 = arith.constant 1.000000e+00 : f32
    %102 = vector.broadcast %cst_37 : f32 to vector<2x8xf32>
    %103 = arith.addf %102, %101 : vector<2x8xf32>
    %104 = arith.divf %102, %103 : vector<2x8xf32>
    %105 = vector.extract_strided_slice %87 {offsets = [0, 16], sizes = [2, 8], strides = [1, 1]} : vector<2x32xf32> to vector<2x8xf32>
    %106 = math.tanh %105 : vector<2x8xf32>
    %107 = vector.extract_strided_slice %87 {offsets = [0, 24], sizes = [2, 8], strides = [1, 1]} : vector<2x32xf32> to vector<2x8xf32>
    %108 = arith.negf %107 : vector<2x8xf32>
    %109 = math.exp %108 : vector<2x8xf32>
    %cst_38 = arith.constant 1.000000e+00 : f32
    %110 = vector.broadcast %cst_38 : f32 to vector<2x8xf32>
    %111 = arith.addf %110, %109 : vector<2x8xf32>
    %112 = arith.divf %110, %111 : vector<2x8xf32>
    %113 = arith.mulf %104, %40 : vector<2x8xf32>
    %114 = arith.mulf %98, %106 : vector<2x8xf32>
    %115 = arith.addf %113, %114 : vector<2x8xf32>
    %116 = math.tanh %115 : vector<2x8xf32>
    %117 = arith.mulf %112, %116 : vector<2x8xf32>
    %118 = vector.extract_strided_slice %92 {offsets = [0, 0], sizes = [2, 8], strides = [1, 1]} : vector<2x32xf32> to vector<2x8xf32>
    %119 = arith.negf %118 : vector<2x8xf32>
    %120 = math.exp %119 : vector<2x8xf32>
    %cst_39 = arith.constant 1.000000e+00 : f32
    %121 = vector.broadcast %cst_39 : f32 to vector<2x8xf32>
    %122 = arith.addf %121, %120 : vector<2x8xf32>
    %123 = arith.divf %121, %122 : vector<2x8xf32>
    %124 = vector.extract_strided_slice %92 {offsets = [0, 8], sizes = [2, 8], strides = [1, 1]} : vector<2x32xf32> to vector<2x8xf32>
    %125 = arith.negf %124 : vector<2x8xf32>
    %126 = math.exp %125 : vector<2x8xf32>
    %cst_40 = arith.constant 1.000000e+00 : f32
    %127 = vector.broadcast %cst_40 : f32 to vector<2x8xf32>
    %128 = arith.addf %127, %126 : vector<2x8xf32>
    %129 = arith.divf %127, %128 : vector<2x8xf32>
    %130 = vector.extract_strided_slice %92 {offsets = [0, 16], sizes = [2, 8], strides = [1, 1]} : vector<2x32xf32> to vector<2x8xf32>
    %131 = math.tanh %130 : vector<2x8xf32>
    %132 = vector.extract_strided_slice %92 {offsets = [0, 24], sizes = [2, 8], strides = [1, 1]} : vector<2x32xf32> to vector<2x8xf32>
    %133 = arith.negf %132 : vector<2x8xf32>
    %134 = math.exp %133 : vector<2x8xf32>
    %cst_41 = arith.constant 1.000000e+00 : f32
    %135 = vector.broadcast %cst_41 : f32 to vector<2x8xf32>
    %136 = arith.addf %135, %134 : vector<2x8xf32>
    %137 = arith.divf %135, %136 : vector<2x8xf32>
    %138 = arith.mulf %129, %65 : vector<2x8xf32>
    %139 = arith.mulf %123, %131 : vector<2x8xf32>
    %140 = arith.addf %138, %139 : vector<2x8xf32>
    %141 = math.tanh %140 : vector<2x8xf32>
    %142 = arith.mulf %137, %141 : vector<2x8xf32>
    %143 = arith.index_cast %c1_i32_22 : i32 to index
    %c0_42 = arith.constant 0 : index
    %c0_43 = arith.constant 0 : index
    %c0_44 = arith.constant 0 : index
    %144 = vector.load %arg2[%143, %c0_42, %c0_43, %c0_44] : memref<2x2x2x8xf32, #tpu.memory_space<vmem>>, vector<1x1x2x8xf32>
    %145 = vector.shape_cast %144 : vector<1x1x2x8xf32> to vector<2x8xf32>
    %146 = vector.shape_cast %117 : vector<2x8xf32> to vector<1x1x2x8xf32>
    tpu.vector_store %arg2[%143, %c0_42, %c0_43, %c0_44], %146 {strides = array<i32>} : memref<2x2x2x8xf32, #tpu.memory_space<vmem>>, vector<1x1x2x8xf32>,
    %147 = arith.index_cast %76 : i32 to index
    %c1_45 = arith.constant 1 : index
    %c0_46 = arith.constant 0 : index
    %c0_47 = arith.constant 0 : index
    %148 = vector.load %arg2[%147, %c1_45, %c0_46, %c0_47] : memref<2x2x2x8xf32, #tpu.memory_space<vmem>>, vector<1x1x2x8xf32>
    %149 = vector.shape_cast %148 : vector<1x1x2x8xf32> to vector<2x8xf32>
    %150 = vector.shape_cast %142 : vector<2x8xf32> to vector<1x1x2x8xf32>
    tpu.vector_store %arg2[%147, %c1_45, %c0_46, %c0_47], %150 {strides = array<i32>} : memref<2x2x2x8xf32, #tpu.memory_space<vmem>>, vector<1x1x2x8xf32>,
    %c2_i32 = arith.constant 2 : i32
    return
  }
}

module attributes {stable_mosaic.version = 11 : i64} {
  func.func @_mm_kernel(%arg0: i32, %arg1: i32, %arg2: memref<16x16xf32, #tpu.memory_space<vmem>>, %arg3: memref<16x64xf32, #tpu.memory_space<vmem>>, %arg4: memref<1x64xf32, #tpu.memory_space<vmem>>, %arg5: memref<16x64xf32, #tpu.memory_space<vmem>>, %arg6: memref<16x64xf32, #tpu.memory_space<vmem>>) attributes {dimension_semantics = [#tpu.dimension_semantics<parallel>, #tpu.dimension_semantics<arbitrary>], iteration_bounds = array<i64: 1, 1>, scalar_prefetch = 0 : i64, scratch_operands = 1 : i64, tpu.core_type = #tpu.core_type<tc>, window_params = [{transform_indices = @transform_0, window_bounds = array<i64: 16, 16>}, {transform_indices = @transform_1, window_bounds = array<i64: 16, 64>}, {pipeline_mode = #tpu.pipeline_mode<synchronous>, transform_indices = @transform_2, window_bounds = array<i64: 1, 64>}, {transform_indices = @transform_3, window_bounds = array<i64: 16, 64>}]} {
    %c0_i32 = arith.constant 0 : i32
    %0 = arith.cmpi eq, %arg1, %c0_i32 : i32
    %1 = arith.extui %0 : i1 to i32
    %c0_i32_0 = arith.constant 0 : i32
    %2 = arith.cmpi ne, %1, %c0_i32_0 : i32
    scf.if %2 {
      %cst_10 = arith.constant 0.000000e+00 : f32
      %12 = vector.broadcast %cst_10 : f32 to vector<16x64xf32>
      %c0_11 = arith.constant 0 : index
      %c0_12 = arith.constant 0 : index
      %13 = vector.load %arg6[%c0_11, %c0_12] : memref<16x64xf32, #tpu.memory_space<vmem>>, vector<16x64xf32>
      tpu.vector_store %arg6[%c0_11, %c0_12], %12 {strides = array<i32>} : memref<16x64xf32, #tpu.memory_space<vmem>>, vector<16x64xf32>,
    } else {
    }
    %c0 = arith.constant 0 : index
    %c0_1 = arith.constant 0 : index
    %3 = vector.load %arg6[%c0, %c0_1] : memref<16x64xf32, #tpu.memory_space<vmem>>, vector<16x64xf32>
    %c0_2 = arith.constant 0 : index
    %c0_3 = arith.constant 0 : index
    %4 = vector.load %arg2[%c0_2, %c0_3] : memref<16x16xf32, #tpu.memory_space<vmem>>, vector<16x16xf32>
    %c0_4 = arith.constant 0 : index
    %c0_5 = arith.constant 0 : index
    %5 = vector.load %arg3[%c0_4, %c0_5] : memref<16x64xf32, #tpu.memory_space<vmem>>, vector<16x64xf32>
    %cst = arith.constant dense<0.000000e+00> : vector<16x64xf32>
    %6 = tpu.matmul %4, %5, %cst {dimension_numbers = #tpu.dot_dimension_numbers<[1], [0], [0], [1], [0, 0, 1, 1], [], []>} : vector<16x16xf32>, vector<16x64xf32>, vector<16x64xf32> -> vector<16x64xf32>
    %7 = arith.addf %3, %6 : vector<16x64xf32>
    %c0_6 = arith.constant 0 : index
    %c0_7 = arith.constant 0 : index
    %8 = vector.load %arg6[%c0_6, %c0_7] : memref<16x64xf32, #tpu.memory_space<vmem>>, vector<16x64xf32>
    tpu.vector_store %arg6[%c0_6, %c0_7], %7 {strides = array<i32>} : memref<16x64xf32, #tpu.memory_space<vmem>>, vector<16x64xf32>,
    %c0_i32_8 = arith.constant 0 : i32
    %9 = arith.cmpi eq, %arg1, %c0_i32_8 : i32
    %10 = arith.extui %9 : i1 to i32
    %c0_i32_9 = arith.constant 0 : i32
    %11 = arith.cmpi ne, %10, %c0_i32_9 : i32
    scf.if %11 {
      %c0_10 = arith.constant 0 : index
      %c0_11 = arith.constant 0 : index
      %12 = vector.load %arg6[%c0_10, %c0_11] : memref<16x64xf32, #tpu.memory_space<vmem>>, vector<16x64xf32>
      %c0_12 = arith.constant 0 : index
      %c0_13 = arith.constant 0 : index
      %13 = vector.load %arg4[%c0_12, %c0_13] : memref<1x64xf32, #tpu.memory_space<vmem>>, vector<1x64xf32>
      %14 = vector.broadcast %13 : vector<1x64xf32> to vector<16x64xf32>
      %15 = arith.addf %12, %14 : vector<16x64xf32>
      %c0_14 = arith.constant 0 : index
      %c0_15 = arith.constant 0 : index
      %16 = vector.load %arg5[%c0_14, %c0_15] : memref<16x64xf32, #tpu.memory_space<vmem>>, vector<16x64xf32>
      tpu.vector_store %arg5[%c0_14, %c0_15], %15 {strides = array<i32>} : memref<16x64xf32, #tpu.memory_space<vmem>>, vector<16x64xf32>,
    } else {
    }
    return
  }
  func.func @transform_0(%arg0: i32, %arg1: i32) -> (i32, i32) {
    %c0_i32 = arith.constant 0 : i32
    return %arg0, %arg1 : i32, i32
  }
  func.func @transform_1(%arg0: i32, %arg1: i32) -> (i32, i32) {
    %c0_i32 = arith.constant 0 : i32
    %c0_i32_0 = arith.constant 0 : i32
    return %arg1, %c0_i32 : i32, i32
  }
  func.func @transform_2(%arg0: i32, %arg1: i32) -> (i32, i32) {
    %c0_i32 = arith.constant 0 : i32
    %c0_i32_0 = arith.constant 0 : i32
    %c0_i32_1 = arith.constant 0 : i32
    return %c0_i32, %c0_i32_0 : i32, i32
  }
  func.func @transform_3(%arg0: i32, %arg1: i32) -> (i32, i32) {
    %c0_i32 = arith.constant 0 : i32
    %c0_i32_0 = arith.constant 0 : i32
    return %arg0, %c0_i32 : i32, i32
  }
}

module attributes {stable_mosaic.version = 11 : i64} {
  func.func @_lstm_bidir_kernel(%arg0: memref<8x2x64xf32, #tpu.memory_space<vmem>>, %arg1: memref<2x8x32xf32, #tpu.memory_space<vmem>>, %arg2: memref<8x2x2x8xf32, #tpu.memory_space<vmem>>) attributes {dimension_semantics = [], scalar_prefetch = 0 : i64, scratch_operands = 0 : i64, tpu.core_type = #tpu.core_type<tc>} {
    %cst = arith.constant 0.000000e+00 : f32
    %0 = vector.broadcast %cst : f32 to vector<2x8xf32>
    %c0_i32 = arith.constant 0 : i32
    %c7_i32 = arith.constant 7 : i32
    %1 = arith.subi %c7_i32, %c0_i32 : i32
    %2 = arith.index_cast %c0_i32 : i32 to index
    %c0 = arith.constant 0 : index
    %c0_0 = arith.constant 0 : index
    %3 = vector.load %arg0[%2, %c0, %c0_0] : memref<8x2x64xf32, #tpu.memory_space<vmem>>, vector<1x2x64xf32>
    %4 = vector.shape_cast %3 : vector<1x2x64xf32> to vector<2x64xf32>
    %5 = arith.index_cast %1 : i32 to index
    %c0_1 = arith.constant 0 : index
    %c0_2 = arith.constant 0 : index
    %6 = vector.load %arg0[%5, %c0_1, %c0_2] : memref<8x2x64xf32, #tpu.memory_space<vmem>>, vector<1x2x64xf32>
    %7 = vector.shape_cast %6 : vector<1x2x64xf32> to vector<2x64xf32>
    %8 = vector.extract_strided_slice %4 {offsets = [0, 0], sizes = [2, 32], strides = [1, 1]} : vector<2x64xf32> to vector<2x32xf32>
    %c0_3 = arith.constant 0 : index
    %c0_4 = arith.constant 0 : index
    %c0_5 = arith.constant 0 : index
    %9 = vector.load %arg1[%c0_3, %c0_4, %c0_5] : memref<2x8x32xf32, #tpu.memory_space<vmem>>, vector<1x8x32xf32>
    %10 = vector.shape_cast %9 : vector<1x8x32xf32> to vector<8x32xf32>
    %cst_6 = arith.constant dense<0.000000e+00> : vector<2x32xf32>
    %11 = tpu.matmul %0, %10, %cst_6 {dimension_numbers = #tpu.dot_dimension_numbers<[1], [0], [0], [1], [0, 0, 1, 1], [], []>} : vector<2x8xf32>, vector<8x32xf32>, vector<2x32xf32> -> vector<2x32xf32>
    %12 = arith.addf %8, %11 : vector<2x32xf32>
    %13 = vector.extract_strided_slice %7 {offsets = [0, 32], sizes = [2, 32], strides = [1, 1]} : vector<2x64xf32> to vector<2x32xf32>
    %c1 = arith.constant 1 : index
    %c0_7 = arith.constant 0 : index
    %c0_8 = arith.constant 0 : index
    %14 = vector.load %arg1[%c1, %c0_7, %c0_8] : memref<2x8x32xf32, #tpu.memory_space<vmem>>, vector<1x8x32xf32>
    %15 = vector.shape_cast %14 : vector<1x8x32xf32> to vector<8x32xf32>
    %cst_9 = arith.constant dense<0.000000e+00> : vector<2x32xf32>
    %16 = tpu.matmul %0, %15, %cst_9 {dimension_numbers = #tpu.dot_dimension_numbers<[1], [0], [0], [1], [0, 0, 1, 1], [], []>} : vector<2x8xf32>, vector<8x32xf32>, vector<2x32xf32> -> vector<2x32xf32>
    %17 = arith.addf %13, %16 : vector<2x32xf32>
    %18 = vector.extract_strided_slice %12 {offsets = [0, 0], sizes = [2, 8], strides = [1, 1]} : vector<2x32xf32> to vector<2x8xf32>
    %19 = arith.negf %18 : vector<2x8xf32>
    %20 = math.exp %19 : vector<2x8xf32>
    %cst_10 = arith.constant 1.000000e+00 : f32
    %21 = vector.broadcast %cst_10 : f32 to vector<2x8xf32>
    %22 = arith.addf %21, %20 : vector<2x8xf32>
    %23 = arith.divf %21, %22 : vector<2x8xf32>
    %24 = vector.extract_strided_slice %12 {offsets = [0, 8], sizes = [2, 8], strides = [1, 1]} : vector<2x32xf32> to vector<2x8xf32>
    %25 = arith.negf %24 : vector<2x8xf32>
    %26 = math.exp %25 : vector<2x8xf32>
    %cst_11 = arith.constant 1.000000e+00 : f32
    %27 = vector.broadcast %cst_11 : f32 to vector<2x8xf32>
    %28 = arith.addf %27, %26 : vector<2x8xf32>
    %29 = arith.divf %27, %28 : vector<2x8xf32>
    %30 = vector.extract_strided_slice %12 {offsets = [0, 16], sizes = [2, 8], strides = [1, 1]} : vector<2x32xf32> to vector<2x8xf32>
    %31 = math.tanh %30 : vector<2x8xf32>
    %32 = vector.extract_strided_slice %12 {offsets = [0, 24], sizes = [2, 8], strides = [1, 1]} : vector<2x32xf32> to vector<2x8xf32>
    %33 = arith.negf %32 : vector<2x8xf32>
    %34 = math.exp %33 : vector<2x8xf32>
    %cst_12 = arith.constant 1.000000e+00 : f32
    %35 = vector.broadcast %cst_12 : f32 to vector<2x8xf32>
    %36 = arith.addf %35, %34 : vector<2x8xf32>
    %37 = arith.divf %35, %36 : vector<2x8xf32>
    %38 = arith.mulf %29, %0 : vector<2x8xf32>
    %39 = arith.mulf %23, %31 : vector<2x8xf32>
    %40 = arith.addf %38, %39 : vector<2x8xf32>
    %41 = math.tanh %40 : vector<2x8xf32>
    %42 = arith.mulf %37, %41 : vector<2x8xf32>
    %43 = vector.extract_strided_slice %17 {offsets = [0, 0], sizes = [2, 8], strides = [1, 1]} : vector<2x32xf32> to vector<2x8xf32>
    %44 = arith.negf %43 : vector<2x8xf32>
    %45 = math.exp %44 : vector<2x8xf32>
    %cst_13 = arith.constant 1.000000e+00 : f32
    %46 = vector.broadcast %cst_13 : f32 to vector<2x8xf32>
    %47 = arith.addf %46, %45 : vector<2x8xf32>
    %48 = arith.divf %46, %47 : vector<2x8xf32>
    %49 = vector.extract_strided_slice %17 {offsets = [0, 8], sizes = [2, 8], strides = [1, 1]} : vector<2x32xf32> to vector<2x8xf32>
    %50 = arith.negf %49 : vector<2x8xf32>
    %51 = math.exp %50 : vector<2x8xf32>
    %cst_14 = arith.constant 1.000000e+00 : f32
    %52 = vector.broadcast %cst_14 : f32 to vector<2x8xf32>
    %53 = arith.addf %52, %51 : vector<2x8xf32>
    %54 = arith.divf %52, %53 : vector<2x8xf32>
    %55 = vector.extract_strided_slice %17 {offsets = [0, 16], sizes = [2, 8], strides = [1, 1]} : vector<2x32xf32> to vector<2x8xf32>
    %56 = math.tanh %55 : vector<2x8xf32>
    %57 = vector.extract_strided_slice %17 {offsets = [0, 24], sizes = [2, 8], strides = [1, 1]} : vector<2x32xf32> to vector<2x8xf32>
    %58 = arith.negf %57 : vector<2x8xf32>
    %59 = math.exp %58 : vector<2x8xf32>
    %cst_15 = arith.constant 1.000000e+00 : f32
    %60 = vector.broadcast %cst_15 : f32 to vector<2x8xf32>
    %61 = arith.addf %60, %59 : vector<2x8xf32>
    %62 = arith.divf %60, %61 : vector<2x8xf32>
    %63 = arith.mulf %54, %0 : vector<2x8xf32>
    %64 = arith.mulf %48, %56 : vector<2x8xf32>
    %65 = arith.addf %63, %64 : vector<2x8xf32>
    %66 = math.tanh %65 : vector<2x8xf32>
    %67 = arith.mulf %62, %66 : vector<2x8xf32>
    %68 = arith.index_cast %c0_i32 : i32 to index
    %c0_16 = arith.constant 0 : index
    %c0_17 = arith.constant 0 : index
    %c0_18 = arith.constant 0 : index
    %69 = vector.load %arg2[%68, %c0_16, %c0_17, %c0_18] : memref<8x2x2x8xf32, #tpu.memory_space<vmem>>, vector<1x1x2x8xf32>
    %70 = vector.shape_cast %69 : vector<1x1x2x8xf32> to vector<2x8xf32>
    %71 = vector.shape_cast %42 : vector<2x8xf32> to vector<1x1x2x8xf32>
    tpu.vector_store %arg2[%68, %c0_16, %c0_17, %c0_18], %71 {strides = array<i32>} : memref<8x2x2x8xf32, #tpu.memory_space<vmem>>, vector<1x1x2x8xf32>,
    %72 = arith.index_cast %1 : i32 to index
    %c1_19 = arith.constant 1 : index
    %c0_20 = arith.constant 0 : index
    %c0_21 = arith.constant 0 : index
    %73 = vector.load %arg2[%72, %c1_19, %c0_20, %c0_21] : memref<8x2x2x8xf32, #tpu.memory_space<vmem>>, vector<1x1x2x8xf32>
    %74 = vector.shape_cast %73 : vector<1x1x2x8xf32> to vector<2x8xf32>
    %75 = vector.shape_cast %67 : vector<2x8xf32> to vector<1x1x2x8xf32>
    tpu.vector_store %arg2[%72, %c1_19, %c0_20, %c0_21], %75 {strides = array<i32>} : memref<8x2x2x8xf32, #tpu.memory_space<vmem>>, vector<1x1x2x8xf32>,
    %c1_i32 = arith.constant 1 : i32
    %c7_i32_22 = arith.constant 7 : i32
    %76 = arith.subi %c7_i32_22, %c1_i32 : i32
    %77 = arith.index_cast %c1_i32 : i32 to index
    %c0_23 = arith.constant 0 : index
    %c0_24 = arith.constant 0 : index
    %78 = vector.load %arg0[%77, %c0_23, %c0_24] : memref<8x2x64xf32, #tpu.memory_space<vmem>>, vector<1x2x64xf32>
    %79 = vector.shape_cast %78 : vector<1x2x64xf32> to vector<2x64xf32>
    %80 = arith.index_cast %76 : i32 to index
    %c0_25 = arith.constant 0 : index
    %c0_26 = arith.constant 0 : index
    %81 = vector.load %arg0[%80, %c0_25, %c0_26] : memref<8x2x64xf32, #tpu.memory_space<vmem>>, vector<1x2x64xf32>
    %82 = vector.shape_cast %81 : vector<1x2x64xf32> to vector<2x64xf32>
    %83 = vector.extract_strided_slice %79 {offsets = [0, 0], sizes = [2, 32], strides = [1, 1]} : vector<2x64xf32> to vector<2x32xf32>
    %c0_27 = arith.constant 0 : index
    %c0_28 = arith.constant 0 : index
    %c0_29 = arith.constant 0 : index
    %84 = vector.load %arg1[%c0_27, %c0_28, %c0_29] : memref<2x8x32xf32, #tpu.memory_space<vmem>>, vector<1x8x32xf32>
    %85 = vector.shape_cast %84 : vector<1x8x32xf32> to vector<8x32xf32>
    %cst_30 = arith.constant dense<0.000000e+00> : vector<2x32xf32>
    %86 = tpu.matmul %42, %85, %cst_30 {dimension_numbers = #tpu.dot_dimension_numbers<[1], [0], [0], [1], [0, 0, 1, 1], [], []>} : vector<2x8xf32>, vector<8x32xf32>, vector<2x32xf32> -> vector<2x32xf32>
    %87 = arith.addf %83, %86 : vector<2x32xf32>
    %88 = vector.extract_strided_slice %82 {offsets = [0, 32], sizes = [2, 32], strides = [1, 1]} : vector<2x64xf32> to vector<2x32xf32>
    %c1_31 = arith.constant 1 : index
    %c0_32 = arith.constant 0 : index
    %c0_33 = arith.constant 0 : index
    %89 = vector.load %arg1[%c1_31, %c0_32, %c0_33] : memref<2x8x32xf32, #tpu.memory_space<vmem>>, vector<1x8x32xf32>
    %90 = vector.shape_cast %89 : vector<1x8x32xf32> to vector<8x32xf32>
    %cst_34 = arith.constant dense<0.000000e+00> : vector<2x32xf32>
    %91 = tpu.matmul %67, %90, %cst_34 {dimension_numbers = #tpu.dot_dimension_numbers<[1], [0], [0], [1], [0, 0, 1, 1], [], []>} : vector<2x8xf32>, vector<8x32xf32>, vector<2x32xf32> -> vector<2x32xf32>
    %92 = arith.addf %88, %91 : vector<2x32xf32>
    %93 = vector.extract_strided_slice %87 {offsets = [0, 0], sizes = [2, 8], strides = [1, 1]} : vector<2x32xf32> to vector<2x8xf32>
    %94 = arith.negf %93 : vector<2x8xf32>
    %95 = math.exp %94 : vector<2x8xf32>
    %cst_35 = arith.constant 1.000000e+00 : f32
    %96 = vector.broadcast %cst_35 : f32 to vector<2x8xf32>
    %97 = arith.addf %96, %95 : vector<2x8xf32>
    %98 = arith.divf %96, %97 : vector<2x8xf32>
    %99 = vector.extract_strided_slice %87 {offsets = [0, 8], sizes = [2, 8], strides = [1, 1]} : vector<2x32xf32> to vector<2x8xf32>
    %100 = arith.negf %99 : vector<2x8xf32>
    %101 = math.exp %100 : vector<2x8xf32>
    %cst_36 = arith.constant 1.000000e+00 : f32
    %102 = vector.broadcast %cst_36 : f32 to vector<2x8xf32>
    %103 = arith.addf %102, %101 : vector<2x8xf32>
    %104 = arith.divf %102, %103 : vector<2x8xf32>
    %105 = vector.extract_strided_slice %87 {offsets = [0, 16], sizes = [2, 8], strides = [1, 1]} : vector<2x32xf32> to vector<2x8xf32>
    %106 = math.tanh %105 : vector<2x8xf32>
    %107 = vector.extract_strided_slice %87 {offsets = [0, 24], sizes = [2, 8], strides = [1, 1]} : vector<2x32xf32> to vector<2x8xf32>
    %108 = arith.negf %107 : vector<2x8xf32>
    %109 = math.exp %108 : vector<2x8xf32>
    %cst_37 = arith.constant 1.000000e+00 : f32
    %110 = vector.broadcast %cst_37 : f32 to vector<2x8xf32>
    %111 = arith.addf %110, %109 : vector<2x8xf32>
    %112 = arith.divf %110, %111 : vector<2x8xf32>
    %113 = arith.mulf %104, %40 : vector<2x8xf32>
    %114 = arith.mulf %98, %106 : vector<2x8xf32>
    %115 = arith.addf %113, %114 : vector<2x8xf32>
    %116 = math.tanh %115 : vector<2x8xf32>
    %117 = arith.mulf %112, %116 : vector<2x8xf32>
    %118 = vector.extract_strided_slice %92 {offsets = [0, 0], sizes = [2, 8], strides = [1, 1]} : vector<2x32xf32> to vector<2x8xf32>
    %119 = arith.negf %118 : vector<2x8xf32>
    %120 = math.exp %119 : vector<2x8xf32>
    %cst_38 = arith.constant 1.000000e+00 : f32
    %121 = vector.broadcast %cst_38 : f32 to vector<2x8xf32>
    %122 = arith.addf %121, %120 : vector<2x8xf32>
    %123 = arith.divf %121, %122 : vector<2x8xf32>
    %124 = vector.extract_strided_slice %92 {offsets = [0, 8], sizes = [2, 8], strides = [1, 1]} : vector<2x32xf32> to vector<2x8xf32>
    %125 = arith.negf %124 : vector<2x8xf32>
    %126 = math.exp %125 : vector<2x8xf32>
    %cst_39 = arith.constant 1.000000e+00 : f32
    %127 = vector.broadcast %cst_39 : f32 to vector<2x8xf32>
    %128 = arith.addf %127, %126 : vector<2x8xf32>
    %129 = arith.divf %127, %128 : vector<2x8xf32>
    %130 = vector.extract_strided_slice %92 {offsets = [0, 16], sizes = [2, 8], strides = [1, 1]} : vector<2x32xf32> to vector<2x8xf32>
    %131 = math.tanh %130 : vector<2x8xf32>
    %132 = vector.extract_strided_slice %92 {offsets = [0, 24], sizes = [2, 8], strides = [1, 1]} : vector<2x32xf32> to vector<2x8xf32>
    %133 = arith.negf %132 : vector<2x8xf32>
    %134 = math.exp %133 : vector<2x8xf32>
    %cst_40 = arith.constant 1.000000e+00 : f32
    %135 = vector.broadcast %cst_40 : f32 to vector<2x8xf32>
    %136 = arith.addf %135, %134 : vector<2x8xf32>
    %137 = arith.divf %135, %136 : vector<2x8xf32>
    %138 = arith.mulf %129, %65 : vector<2x8xf32>
    %139 = arith.mulf %123, %131 : vector<2x8xf32>
    %140 = arith.addf %138, %139 : vector<2x8xf32>
    %141 = math.tanh %140 : vector<2x8xf32>
    %142 = arith.mulf %137, %141 : vector<2x8xf32>
    %143 = arith.index_cast %c1_i32 : i32 to index
    %c0_41 = arith.constant 0 : index
    %c0_42 = arith.constant 0 : index
    %c0_43 = arith.constant 0 : index
    %144 = vector.load %arg2[%143, %c0_41, %c0_42, %c0_43] : memref<8x2x2x8xf32, #tpu.memory_space<vmem>>, vector<1x1x2x8xf32>
    %145 = vector.shape_cast %144 : vector<1x1x2x8xf32> to vector<2x8xf32>
    %146 = vector.shape_cast %117 : vector<2x8xf32> to vector<1x1x2x8xf32>
    tpu.vector_store %arg2[%143, %c0_41, %c0_42, %c0_43], %146 {strides = array<i32>} : memref<8x2x2x8xf32, #tpu.memory_space<vmem>>, vector<1x1x2x8xf32>,
    %147 = arith.index_cast %76 : i32 to index
    %c1_44 = arith.constant 1 : index
    %c0_45 = arith.constant 0 : index
    %c0_46 = arith.constant 0 : index
    %148 = vector.load %arg2[%147, %c1_44, %c0_45, %c0_46] : memref<8x2x2x8xf32, #tpu.memory_space<vmem>>, vector<1x1x2x8xf32>
    %149 = vector.shape_cast %148 : vector<1x1x2x8xf32> to vector<2x8xf32>
    %150 = vector.shape_cast %142 : vector<2x8xf32> to vector<1x1x2x8xf32>
    tpu.vector_store %arg2[%147, %c1_44, %c0_45, %c0_46], %150 {strides = array<i32>} : memref<8x2x2x8xf32, #tpu.memory_space<vmem>>, vector<1x1x2x8xf32>,
    %c2_i32 = arith.constant 2 : i32
    %c7_i32_47 = arith.constant 7 : i32
    %151 = arith.subi %c7_i32_47, %c2_i32 : i32
    %152 = arith.index_cast %c2_i32 : i32 to index
    %c0_48 = arith.constant 0 : index
    %c0_49 = arith.constant 0 : index
    %153 = vector.load %arg0[%152, %c0_48, %c0_49] : memref<8x2x64xf32, #tpu.memory_space<vmem>>, vector<1x2x64xf32>
    %154 = vector.shape_cast %153 : vector<1x2x64xf32> to vector<2x64xf32>
    %155 = arith.index_cast %151 : i32 to index
    %c0_50 = arith.constant 0 : index
    %c0_51 = arith.constant 0 : index
    %156 = vector.load %arg0[%155, %c0_50, %c0_51] : memref<8x2x64xf32, #tpu.memory_space<vmem>>, vector<1x2x64xf32>
    %157 = vector.shape_cast %156 : vector<1x2x64xf32> to vector<2x64xf32>
    %158 = vector.extract_strided_slice %154 {offsets = [0, 0], sizes = [2, 32], strides = [1, 1]} : vector<2x64xf32> to vector<2x32xf32>
    %c0_52 = arith.constant 0 : index
    %c0_53 = arith.constant 0 : index
    %c0_54 = arith.constant 0 : index
    %159 = vector.load %arg1[%c0_52, %c0_53, %c0_54] : memref<2x8x32xf32, #tpu.memory_space<vmem>>, vector<1x8x32xf32>
    %160 = vector.shape_cast %159 : vector<1x8x32xf32> to vector<8x32xf32>
    %cst_55 = arith.constant dense<0.000000e+00> : vector<2x32xf32>
    %161 = tpu.matmul %117, %160, %cst_55 {dimension_numbers = #tpu.dot_dimension_numbers<[1], [0], [0], [1], [0, 0, 1, 1], [], []>} : vector<2x8xf32>, vector<8x32xf32>, vector<2x32xf32> -> vector<2x32xf32>
    %162 = arith.addf %158, %161 : vector<2x32xf32>
    %163 = vector.extract_strided_slice %157 {offsets = [0, 32], sizes = [2, 32], strides = [1, 1]} : vector<2x64xf32> to vector<2x32xf32>
    %c1_56 = arith.constant 1 : index
    %c0_57 = arith.constant 0 : index
    %c0_58 = arith.constant 0 : index
    %164 = vector.load %arg1[%c1_56, %c0_57, %c0_58] : memref<2x8x32xf32, #tpu.memory_space<vmem>>, vector<1x8x32xf32>
    %165 = vector.shape_cast %164 : vector<1x8x32xf32> to vector<8x32xf32>
    %cst_59 = arith.constant dense<0.000000e+00> : vector<2x32xf32>
    %166 = tpu.matmul %142, %165, %cst_59 {dimension_numbers = #tpu.dot_dimension_numbers<[1], [0], [0], [1], [0, 0, 1, 1], [], []>} : vector<2x8xf32>, vector<8x32xf32>, vector<2x32xf32> -> vector<2x32xf32>
    %167 = arith.addf %163, %166 : vector<2x32xf32>
    %168 = vector.extract_strided_slice %162 {offsets = [0, 0], sizes = [2, 8], strides = [1, 1]} : vector<2x32xf32> to vector<2x8xf32>
    %169 = arith.negf %168 : vector<2x8xf32>
    %170 = math.exp %169 : vector<2x8xf32>
    %cst_60 = arith.constant 1.000000e+00 : f32
    %171 = vector.broadcast %cst_60 : f32 to vector<2x8xf32>
    %172 = arith.addf %171, %170 : vector<2x8xf32>
    %173 = arith.divf %171, %172 : vector<2x8xf32>
    %174 = vector.extract_strided_slice %162 {offsets = [0, 8], sizes = [2, 8], strides = [1, 1]} : vector<2x32xf32> to vector<2x8xf32>
    %175 = arith.negf %174 : vector<2x8xf32>
    %176 = math.exp %175 : vector<2x8xf32>
    %cst_61 = arith.constant 1.000000e+00 : f32
    %177 = vector.broadcast %cst_61 : f32 to vector<2x8xf32>
    %178 = arith.addf %177, %176 : vector<2x8xf32>
    %179 = arith.divf %177, %178 : vector<2x8xf32>
    %180 = vector.extract_strided_slice %162 {offsets = [0, 16], sizes = [2, 8], strides = [1, 1]} : vector<2x32xf32> to vector<2x8xf32>
    %181 = math.tanh %180 : vector<2x8xf32>
    %182 = vector.extract_strided_slice %162 {offsets = [0, 24], sizes = [2, 8], strides = [1, 1]} : vector<2x32xf32> to vector<2x8xf32>
    %183 = arith.negf %182 : vector<2x8xf32>
    %184 = math.exp %183 : vector<2x8xf32>
    %cst_62 = arith.constant 1.000000e+00 : f32
    %185 = vector.broadcast %cst_62 : f32 to vector<2x8xf32>
    %186 = arith.addf %185, %184 : vector<2x8xf32>
    %187 = arith.divf %185, %186 : vector<2x8xf32>
    %188 = arith.mulf %179, %115 : vector<2x8xf32>
    %189 = arith.mulf %173, %181 : vector<2x8xf32>
    %190 = arith.addf %188, %189 : vector<2x8xf32>
    %191 = math.tanh %190 : vector<2x8xf32>
    %192 = arith.mulf %187, %191 : vector<2x8xf32>
    %193 = vector.extract_strided_slice %167 {offsets = [0, 0], sizes = [2, 8], strides = [1, 1]} : vector<2x32xf32> to vector<2x8xf32>
    %194 = arith.negf %193 : vector<2x8xf32>
    %195 = math.exp %194 : vector<2x8xf32>
    %cst_63 = arith.constant 1.000000e+00 : f32
    %196 = vector.broadcast %cst_63 : f32 to vector<2x8xf32>
    %197 = arith.addf %196, %195 : vector<2x8xf32>
    %198 = arith.divf %196, %197 : vector<2x8xf32>
    %199 = vector.extract_strided_slice %167 {offsets = [0, 8], sizes = [2, 8], strides = [1, 1]} : vector<2x32xf32> to vector<2x8xf32>
    %200 = arith.negf %199 : vector<2x8xf32>
    %201 = math.exp %200 : vector<2x8xf32>
    %cst_64 = arith.constant 1.000000e+00 : f32
    %202 = vector.broadcast %cst_64 : f32 to vector<2x8xf32>
    %203 = arith.addf %202, %201 : vector<2x8xf32>
    %204 = arith.divf %202, %203 : vector<2x8xf32>
    %205 = vector.extract_strided_slice %167 {offsets = [0, 16], sizes = [2, 8], strides = [1, 1]} : vector<2x32xf32> to vector<2x8xf32>
    %206 = math.tanh %205 : vector<2x8xf32>
    %207 = vector.extract_strided_slice %167 {offsets = [0, 24], sizes = [2, 8], strides = [1, 1]} : vector<2x32xf32> to vector<2x8xf32>
    %208 = arith.negf %207 : vector<2x8xf32>
    %209 = math.exp %208 : vector<2x8xf32>
    %cst_65 = arith.constant 1.000000e+00 : f32
    %210 = vector.broadcast %cst_65 : f32 to vector<2x8xf32>
    %211 = arith.addf %210, %209 : vector<2x8xf32>
    %212 = arith.divf %210, %211 : vector<2x8xf32>
    %213 = arith.mulf %204, %140 : vector<2x8xf32>
    %214 = arith.mulf %198, %206 : vector<2x8xf32>
    %215 = arith.addf %213, %214 : vector<2x8xf32>
    %216 = math.tanh %215 : vector<2x8xf32>
    %217 = arith.mulf %212, %216 : vector<2x8xf32>
    %218 = arith.index_cast %c2_i32 : i32 to index
    %c0_66 = arith.constant 0 : index
    %c0_67 = arith.constant 0 : index
    %c0_68 = arith.constant 0 : index
    %219 = vector.load %arg2[%218, %c0_66, %c0_67, %c0_68] : memref<8x2x2x8xf32, #tpu.memory_space<vmem>>, vector<1x1x2x8xf32>
    %220 = vector.shape_cast %219 : vector<1x1x2x8xf32> to vector<2x8xf32>
    %221 = vector.shape_cast %192 : vector<2x8xf32> to vector<1x1x2x8xf32>
    tpu.vector_store %arg2[%218, %c0_66, %c0_67, %c0_68], %221 {strides = array<i32>} : memref<8x2x2x8xf32, #tpu.memory_space<vmem>>, vector<1x1x2x8xf32>,
    %222 = arith.index_cast %151 : i32 to index
    %c1_69 = arith.constant 1 : index
    %c0_70 = arith.constant 0 : index
    %c0_71 = arith.constant 0 : index
    %223 = vector.load %arg2[%222, %c1_69, %c0_70, %c0_71] : memref<8x2x2x8xf32, #tpu.memory_space<vmem>>, vector<1x1x2x8xf32>
    %224 = vector.shape_cast %223 : vector<1x1x2x8xf32> to vector<2x8xf32>
    %225 = vector.shape_cast %217 : vector<2x8xf32> to vector<1x1x2x8xf32>
    tpu.vector_store %arg2[%222, %c1_69, %c0_70, %c0_71], %225 {strides = array<i32>} : memref<8x2x2x8xf32, #tpu.memory_space<vmem>>, vector<1x1x2x8xf32>,
    %c3_i32 = arith.constant 3 : i32
    %c7_i32_72 = arith.constant 7 : i32
    %226 = arith.subi %c7_i32_72, %c3_i32 : i32
    %227 = arith.index_cast %c3_i32 : i32 to index
    %c0_73 = arith.constant 0 : index
    %c0_74 = arith.constant 0 : index
    %228 = vector.load %arg0[%227, %c0_73, %c0_74] : memref<8x2x64xf32, #tpu.memory_space<vmem>>, vector<1x2x64xf32>
    %229 = vector.shape_cast %228 : vector<1x2x64xf32> to vector<2x64xf32>
    %230 = arith.index_cast %226 : i32 to index
    %c0_75 = arith.constant 0 : index
    %c0_76 = arith.constant 0 : index
    %231 = vector.load %arg0[%230, %c0_75, %c0_76] : memref<8x2x64xf32, #tpu.memory_space<vmem>>, vector<1x2x64xf32>
    %232 = vector.shape_cast %231 : vector<1x2x64xf32> to vector<2x64xf32>
    %233 = vector.extract_strided_slice %229 {offsets = [0, 0], sizes = [2, 32], strides = [1, 1]} : vector<2x64xf32> to vector<2x32xf32>
    %c0_77 = arith.constant 0 : index
    %c0_78 = arith.constant 0 : index
    %c0_79 = arith.constant 0 : index
    %234 = vector.load %arg1[%c0_77, %c0_78, %c0_79] : memref<2x8x32xf32, #tpu.memory_space<vmem>>, vector<1x8x32xf32>
    %235 = vector.shape_cast %234 : vector<1x8x32xf32> to vector<8x32xf32>
    %cst_80 = arith.constant dense<0.000000e+00> : vector<2x32xf32>
    %236 = tpu.matmul %192, %235, %cst_80 {dimension_numbers = #tpu.dot_dimension_numbers<[1], [0], [0], [1], [0, 0, 1, 1], [], []>} : vector<2x8xf32>, vector<8x32xf32>, vector<2x32xf32> -> vector<2x32xf32>
    %237 = arith.addf %233, %236 : vector<2x32xf32>
    %238 = vector.extract_strided_slice %232 {offsets = [0, 32], sizes = [2, 32], strides = [1, 1]} : vector<2x64xf32> to vector<2x32xf32>
    %c1_81 = arith.constant 1 : index
    %c0_82 = arith.constant 0 : index
    %c0_83 = arith.constant 0 : index
    %239 = vector.load %arg1[%c1_81, %c0_82, %c0_83] : memref<2x8x32xf32, #tpu.memory_space<vmem>>, vector<1x8x32xf32>
    %240 = vector.shape_cast %239 : vector<1x8x32xf32> to vector<8x32xf32>
    %cst_84 = arith.constant dense<0.000000e+00> : vector<2x32xf32>
    %241 = tpu.matmul %217, %240, %cst_84 {dimension_numbers = #tpu.dot_dimension_numbers<[1], [0], [0], [1], [0, 0, 1, 1], [], []>} : vector<2x8xf32>, vector<8x32xf32>, vector<2x32xf32> -> vector<2x32xf32>
    %242 = arith.addf %238, %241 : vector<2x32xf32>
    %243 = vector.extract_strided_slice %237 {offsets = [0, 0], sizes = [2, 8], strides = [1, 1]} : vector<2x32xf32> to vector<2x8xf32>
    %244 = arith.negf %243 : vector<2x8xf32>
    %245 = math.exp %244 : vector<2x8xf32>
    %cst_85 = arith.constant 1.000000e+00 : f32
    %246 = vector.broadcast %cst_85 : f32 to vector<2x8xf32>
    %247 = arith.addf %246, %245 : vector<2x8xf32>
    %248 = arith.divf %246, %247 : vector<2x8xf32>
    %249 = vector.extract_strided_slice %237 {offsets = [0, 8], sizes = [2, 8], strides = [1, 1]} : vector<2x32xf32> to vector<2x8xf32>
    %250 = arith.negf %249 : vector<2x8xf32>
    %251 = math.exp %250 : vector<2x8xf32>
    %cst_86 = arith.constant 1.000000e+00 : f32
    %252 = vector.broadcast %cst_86 : f32 to vector<2x8xf32>
    %253 = arith.addf %252, %251 : vector<2x8xf32>
    %254 = arith.divf %252, %253 : vector<2x8xf32>
    %255 = vector.extract_strided_slice %237 {offsets = [0, 16], sizes = [2, 8], strides = [1, 1]} : vector<2x32xf32> to vector<2x8xf32>
    %256 = math.tanh %255 : vector<2x8xf32>
    %257 = vector.extract_strided_slice %237 {offsets = [0, 24], sizes = [2, 8], strides = [1, 1]} : vector<2x32xf32> to vector<2x8xf32>
    %258 = arith.negf %257 : vector<2x8xf32>
    %259 = math.exp %258 : vector<2x8xf32>
    %cst_87 = arith.constant 1.000000e+00 : f32
    %260 = vector.broadcast %cst_87 : f32 to vector<2x8xf32>
    %261 = arith.addf %260, %259 : vector<2x8xf32>
    %262 = arith.divf %260, %261 : vector<2x8xf32>
    %263 = arith.mulf %254, %190 : vector<2x8xf32>
    %264 = arith.mulf %248, %256 : vector<2x8xf32>
    %265 = arith.addf %263, %264 : vector<2x8xf32>
    %266 = math.tanh %265 : vector<2x8xf32>
    %267 = arith.mulf %262, %266 : vector<2x8xf32>
    %268 = vector.extract_strided_slice %242 {offsets = [0, 0], sizes = [2, 8], strides = [1, 1]} : vector<2x32xf32> to vector<2x8xf32>
    %269 = arith.negf %268 : vector<2x8xf32>
    %270 = math.exp %269 : vector<2x8xf32>
    %cst_88 = arith.constant 1.000000e+00 : f32
    %271 = vector.broadcast %cst_88 : f32 to vector<2x8xf32>
    %272 = arith.addf %271, %270 : vector<2x8xf32>
    %273 = arith.divf %271, %272 : vector<2x8xf32>
    %274 = vector.extract_strided_slice %242 {offsets = [0, 8], sizes = [2, 8], strides = [1, 1]} : vector<2x32xf32> to vector<2x8xf32>
    %275 = arith.negf %274 : vector<2x8xf32>
    %276 = math.exp %275 : vector<2x8xf32>
    %cst_89 = arith.constant 1.000000e+00 : f32
    %277 = vector.broadcast %cst_89 : f32 to vector<2x8xf32>
    %278 = arith.addf %277, %276 : vector<2x8xf32>
    %279 = arith.divf %277, %278 : vector<2x8xf32>
    %280 = vector.extract_strided_slice %242 {offsets = [0, 16], sizes = [2, 8], strides = [1, 1]} : vector<2x32xf32> to vector<2x8xf32>
    %281 = math.tanh %280 : vector<2x8xf32>
    %282 = vector.extract_strided_slice %242 {offsets = [0, 24], sizes = [2, 8], strides = [1, 1]} : vector<2x32xf32> to vector<2x8xf32>
    %283 = arith.negf %282 : vector<2x8xf32>
    %284 = math.exp %283 : vector<2x8xf32>
    %cst_90 = arith.constant 1.000000e+00 : f32
    %285 = vector.broadcast %cst_90 : f32 to vector<2x8xf32>
    %286 = arith.addf %285, %284 : vector<2x8xf32>
    %287 = arith.divf %285, %286 : vector<2x8xf32>
    %288 = arith.mulf %279, %215 : vector<2x8xf32>
    %289 = arith.mulf %273, %281 : vector<2x8xf32>
    %290 = arith.addf %288, %289 : vector<2x8xf32>
    %291 = math.tanh %290 : vector<2x8xf32>
    %292 = arith.mulf %287, %291 : vector<2x8xf32>
    %293 = arith.index_cast %c3_i32 : i32 to index
    %c0_91 = arith.constant 0 : index
    %c0_92 = arith.constant 0 : index
    %c0_93 = arith.constant 0 : index
    %294 = vector.load %arg2[%293, %c0_91, %c0_92, %c0_93] : memref<8x2x2x8xf32, #tpu.memory_space<vmem>>, vector<1x1x2x8xf32>
    %295 = vector.shape_cast %294 : vector<1x1x2x8xf32> to vector<2x8xf32>
    %296 = vector.shape_cast %267 : vector<2x8xf32> to vector<1x1x2x8xf32>
    tpu.vector_store %arg2[%293, %c0_91, %c0_92, %c0_93], %296 {strides = array<i32>} : memref<8x2x2x8xf32, #tpu.memory_space<vmem>>, vector<1x1x2x8xf32>,
    %297 = arith.index_cast %226 : i32 to index
    %c1_94 = arith.constant 1 : index
    %c0_95 = arith.constant 0 : index
    %c0_96 = arith.constant 0 : index
    %298 = vector.load %arg2[%297, %c1_94, %c0_95, %c0_96] : memref<8x2x2x8xf32, #tpu.memory_space<vmem>>, vector<1x1x2x8xf32>
    %299 = vector.shape_cast %298 : vector<1x1x2x8xf32> to vector<2x8xf32>
    %300 = vector.shape_cast %292 : vector<2x8xf32> to vector<1x1x2x8xf32>
    tpu.vector_store %arg2[%297, %c1_94, %c0_95, %c0_96], %300 {strides = array<i32>} : memref<8x2x2x8xf32, #tpu.memory_space<vmem>>, vector<1x1x2x8xf32>,
    %c4_i32 = arith.constant 4 : i32
    %c7_i32_97 = arith.constant 7 : i32
    %301 = arith.subi %c7_i32_97, %c4_i32 : i32
    %302 = arith.index_cast %c4_i32 : i32 to index
    %c0_98 = arith.constant 0 : index
    %c0_99 = arith.constant 0 : index
    %303 = vector.load %arg0[%302, %c0_98, %c0_99] : memref<8x2x64xf32, #tpu.memory_space<vmem>>, vector<1x2x64xf32>
    %304 = vector.shape_cast %303 : vector<1x2x64xf32> to vector<2x64xf32>
    %305 = arith.index_cast %301 : i32 to index
    %c0_100 = arith.constant 0 : index
    %c0_101 = arith.constant 0 : index
    %306 = vector.load %arg0[%305, %c0_100, %c0_101] : memref<8x2x64xf32, #tpu.memory_space<vmem>>, vector<1x2x64xf32>
    %307 = vector.shape_cast %306 : vector<1x2x64xf32> to vector<2x64xf32>
    %308 = vector.extract_strided_slice %304 {offsets = [0, 0], sizes = [2, 32], strides = [1, 1]} : vector<2x64xf32> to vector<2x32xf32>
    %c0_102 = arith.constant 0 : index
    %c0_103 = arith.constant 0 : index
    %c0_104 = arith.constant 0 : index
    %309 = vector.load %arg1[%c0_102, %c0_103, %c0_104] : memref<2x8x32xf32, #tpu.memory_space<vmem>>, vector<1x8x32xf32>
    %310 = vector.shape_cast %309 : vector<1x8x32xf32> to vector<8x32xf32>
    %cst_105 = arith.constant dense<0.000000e+00> : vector<2x32xf32>
    %311 = tpu.matmul %267, %310, %cst_105 {dimension_numbers = #tpu.dot_dimension_numbers<[1], [0], [0], [1], [0, 0, 1, 1], [], []>} : vector<2x8xf32>, vector<8x32xf32>, vector<2x32xf32> -> vector<2x32xf32>
    %312 = arith.addf %308, %311 : vector<2x32xf32>
    %313 = vector.extract_strided_slice %307 {offsets = [0, 32], sizes = [2, 32], strides = [1, 1]} : vector<2x64xf32> to vector<2x32xf32>
    %c1_106 = arith.constant 1 : index
    %c0_107 = arith.constant 0 : index
    %c0_108 = arith.constant 0 : index
    %314 = vector.load %arg1[%c1_106, %c0_107, %c0_108] : memref<2x8x32xf32, #tpu.memory_space<vmem>>, vector<1x8x32xf32>
    %315 = vector.shape_cast %314 : vector<1x8x32xf32> to vector<8x32xf32>
    %cst_109 = arith.constant dense<0.000000e+00> : vector<2x32xf32>
    %316 = tpu.matmul %292, %315, %cst_109 {dimension_numbers = #tpu.dot_dimension_numbers<[1], [0], [0], [1], [0, 0, 1, 1], [], []>} : vector<2x8xf32>, vector<8x32xf32>, vector<2x32xf32> -> vector<2x32xf32>
    %317 = arith.addf %313, %316 : vector<2x32xf32>
    %318 = vector.extract_strided_slice %312 {offsets = [0, 0], sizes = [2, 8], strides = [1, 1]} : vector<2x32xf32> to vector<2x8xf32>
    %319 = arith.negf %318 : vector<2x8xf32>
    %320 = math.exp %319 : vector<2x8xf32>
    %cst_110 = arith.constant 1.000000e+00 : f32
    %321 = vector.broadcast %cst_110 : f32 to vector<2x8xf32>
    %322 = arith.addf %321, %320 : vector<2x8xf32>
    %323 = arith.divf %321, %322 : vector<2x8xf32>
    %324 = vector.extract_strided_slice %312 {offsets = [0, 8], sizes = [2, 8], strides = [1, 1]} : vector<2x32xf32> to vector<2x8xf32>
    %325 = arith.negf %324 : vector<2x8xf32>
    %326 = math.exp %325 : vector<2x8xf32>
    %cst_111 = arith.constant 1.000000e+00 : f32
    %327 = vector.broadcast %cst_111 : f32 to vector<2x8xf32>
    %328 = arith.addf %327, %326 : vector<2x8xf32>
    %329 = arith.divf %327, %328 : vector<2x8xf32>
    %330 = vector.extract_strided_slice %312 {offsets = [0, 16], sizes = [2, 8], strides = [1, 1]} : vector<2x32xf32> to vector<2x8xf32>
    %331 = math.tanh %330 : vector<2x8xf32>
    %332 = vector.extract_strided_slice %312 {offsets = [0, 24], sizes = [2, 8], strides = [1, 1]} : vector<2x32xf32> to vector<2x8xf32>
    %333 = arith.negf %332 : vector<2x8xf32>
    %334 = math.exp %333 : vector<2x8xf32>
    %cst_112 = arith.constant 1.000000e+00 : f32
    %335 = vector.broadcast %cst_112 : f32 to vector<2x8xf32>
    %336 = arith.addf %335, %334 : vector<2x8xf32>
    %337 = arith.divf %335, %336 : vector<2x8xf32>
    %338 = arith.mulf %329, %265 : vector<2x8xf32>
    %339 = arith.mulf %323, %331 : vector<2x8xf32>
    %340 = arith.addf %338, %339 : vector<2x8xf32>
    %341 = math.tanh %340 : vector<2x8xf32>
    %342 = arith.mulf %337, %341 : vector<2x8xf32>
    %343 = vector.extract_strided_slice %317 {offsets = [0, 0], sizes = [2, 8], strides = [1, 1]} : vector<2x32xf32> to vector<2x8xf32>
    %344 = arith.negf %343 : vector<2x8xf32>
    %345 = math.exp %344 : vector<2x8xf32>
    %cst_113 = arith.constant 1.000000e+00 : f32
    %346 = vector.broadcast %cst_113 : f32 to vector<2x8xf32>
    %347 = arith.addf %346, %345 : vector<2x8xf32>
    %348 = arith.divf %346, %347 : vector<2x8xf32>
    %349 = vector.extract_strided_slice %317 {offsets = [0, 8], sizes = [2, 8], strides = [1, 1]} : vector<2x32xf32> to vector<2x8xf32>
    %350 = arith.negf %349 : vector<2x8xf32>
    %351 = math.exp %350 : vector<2x8xf32>
    %cst_114 = arith.constant 1.000000e+00 : f32
    %352 = vector.broadcast %cst_114 : f32 to vector<2x8xf32>
    %353 = arith.addf %352, %351 : vector<2x8xf32>
    %354 = arith.divf %352, %353 : vector<2x8xf32>
    %355 = vector.extract_strided_slice %317 {offsets = [0, 16], sizes = [2, 8], strides = [1, 1]} : vector<2x32xf32> to vector<2x8xf32>
    %356 = math.tanh %355 : vector<2x8xf32>
    %357 = vector.extract_strided_slice %317 {offsets = [0, 24], sizes = [2, 8], strides = [1, 1]} : vector<2x32xf32> to vector<2x8xf32>
    %358 = arith.negf %357 : vector<2x8xf32>
    %359 = math.exp %358 : vector<2x8xf32>
    %cst_115 = arith.constant 1.000000e+00 : f32
    %360 = vector.broadcast %cst_115 : f32 to vector<2x8xf32>
    %361 = arith.addf %360, %359 : vector<2x8xf32>
    %362 = arith.divf %360, %361 : vector<2x8xf32>
    %363 = arith.mulf %354, %290 : vector<2x8xf32>
    %364 = arith.mulf %348, %356 : vector<2x8xf32>
    %365 = arith.addf %363, %364 : vector<2x8xf32>
    %366 = math.tanh %365 : vector<2x8xf32>
    %367 = arith.mulf %362, %366 : vector<2x8xf32>
    %368 = arith.index_cast %c4_i32 : i32 to index
    %c0_116 = arith.constant 0 : index
    %c0_117 = arith.constant 0 : index
    %c0_118 = arith.constant 0 : index
    %369 = vector.load %arg2[%368, %c0_116, %c0_117, %c0_118] : memref<8x2x2x8xf32, #tpu.memory_space<vmem>>, vector<1x1x2x8xf32>
    %370 = vector.shape_cast %369 : vector<1x1x2x8xf32> to vector<2x8xf32>
    %371 = vector.shape_cast %342 : vector<2x8xf32> to vector<1x1x2x8xf32>
    tpu.vector_store %arg2[%368, %c0_116, %c0_117, %c0_118], %371 {strides = array<i32>} : memref<8x2x2x8xf32, #tpu.memory_space<vmem>>, vector<1x1x2x8xf32>,
    %372 = arith.index_cast %301 : i32 to index
    %c1_119 = arith.constant 1 : index
    %c0_120 = arith.constant 0 : index
    %c0_121 = arith.constant 0 : index
    %373 = vector.load %arg2[%372, %c1_119, %c0_120, %c0_121] : memref<8x2x2x8xf32, #tpu.memory_space<vmem>>, vector<1x1x2x8xf32>
    %374 = vector.shape_cast %373 : vector<1x1x2x8xf32> to vector<2x8xf32>
    %375 = vector.shape_cast %367 : vector<2x8xf32> to vector<1x1x2x8xf32>
    tpu.vector_store %arg2[%372, %c1_119, %c0_120, %c0_121], %375 {strides = array<i32>} : memref<8x2x2x8xf32, #tpu.memory_space<vmem>>, vector<1x1x2x8xf32>,
    %c5_i32 = arith.constant 5 : i32
    %c7_i32_122 = arith.constant 7 : i32
    %376 = arith.subi %c7_i32_122, %c5_i32 : i32
    %377 = arith.index_cast %c5_i32 : i32 to index
    %c0_123 = arith.constant 0 : index
    %c0_124 = arith.constant 0 : index
    %378 = vector.load %arg0[%377, %c0_123, %c0_124] : memref<8x2x64xf32, #tpu.memory_space<vmem>>, vector<1x2x64xf32>
    %379 = vector.shape_cast %378 : vector<1x2x64xf32> to vector<2x64xf32>
    %380 = arith.index_cast %376 : i32 to index
    %c0_125 = arith.constant 0 : index
    %c0_126 = arith.constant 0 : index
    %381 = vector.load %arg0[%380, %c0_125, %c0_126] : memref<8x2x64xf32, #tpu.memory_space<vmem>>, vector<1x2x64xf32>
    %382 = vector.shape_cast %381 : vector<1x2x64xf32> to vector<2x64xf32>
    %383 = vector.extract_strided_slice %379 {offsets = [0, 0], sizes = [2, 32], strides = [1, 1]} : vector<2x64xf32> to vector<2x32xf32>
    %c0_127 = arith.constant 0 : index
    %c0_128 = arith.constant 0 : index
    %c0_129 = arith.constant 0 : index
    %384 = vector.load %arg1[%c0_127, %c0_128, %c0_129] : memref<2x8x32xf32, #tpu.memory_space<vmem>>, vector<1x8x32xf32>
    %385 = vector.shape_cast %384 : vector<1x8x32xf32> to vector<8x32xf32>
    %cst_130 = arith.constant dense<0.000000e+00> : vector<2x32xf32>
    %386 = tpu.matmul %342, %385, %cst_130 {dimension_numbers = #tpu.dot_dimension_numbers<[1], [0], [0], [1], [0, 0, 1, 1], [], []>} : vector<2x8xf32>, vector<8x32xf32>, vector<2x32xf32> -> vector<2x32xf32>
    %387 = arith.addf %383, %386 : vector<2x32xf32>
    %388 = vector.extract_strided_slice %382 {offsets = [0, 32], sizes = [2, 32], strides = [1, 1]} : vector<2x64xf32> to vector<2x32xf32>
    %c1_131 = arith.constant 1 : index
    %c0_132 = arith.constant 0 : index
    %c0_133 = arith.constant 0 : index
    %389 = vector.load %arg1[%c1_131, %c0_132, %c0_133] : memref<2x8x32xf32, #tpu.memory_space<vmem>>, vector<1x8x32xf32>
    %390 = vector.shape_cast %389 : vector<1x8x32xf32> to vector<8x32xf32>
    %cst_134 = arith.constant dense<0.000000e+00> : vector<2x32xf32>
    %391 = tpu.matmul %367, %390, %cst_134 {dimension_numbers = #tpu.dot_dimension_numbers<[1], [0], [0], [1], [0, 0, 1, 1], [], []>} : vector<2x8xf32>, vector<8x32xf32>, vector<2x32xf32> -> vector<2x32xf32>
    %392 = arith.addf %388, %391 : vector<2x32xf32>
    %393 = vector.extract_strided_slice %387 {offsets = [0, 0], sizes = [2, 8], strides = [1, 1]} : vector<2x32xf32> to vector<2x8xf32>
    %394 = arith.negf %393 : vector<2x8xf32>
    %395 = math.exp %394 : vector<2x8xf32>
    %cst_135 = arith.constant 1.000000e+00 : f32
    %396 = vector.broadcast %cst_135 : f32 to vector<2x8xf32>
    %397 = arith.addf %396, %395 : vector<2x8xf32>
    %398 = arith.divf %396, %397 : vector<2x8xf32>
    %399 = vector.extract_strided_slice %387 {offsets = [0, 8], sizes = [2, 8], strides = [1, 1]} : vector<2x32xf32> to vector<2x8xf32>
    %400 = arith.negf %399 : vector<2x8xf32>
    %401 = math.exp %400 : vector<2x8xf32>
    %cst_136 = arith.constant 1.000000e+00 : f32
    %402 = vector.broadcast %cst_136 : f32 to vector<2x8xf32>
    %403 = arith.addf %402, %401 : vector<2x8xf32>
    %404 = arith.divf %402, %403 : vector<2x8xf32>
    %405 = vector.extract_strided_slice %387 {offsets = [0, 16], sizes = [2, 8], strides = [1, 1]} : vector<2x32xf32> to vector<2x8xf32>
    %406 = math.tanh %405 : vector<2x8xf32>
    %407 = vector.extract_strided_slice %387 {offsets = [0, 24], sizes = [2, 8], strides = [1, 1]} : vector<2x32xf32> to vector<2x8xf32>
    %408 = arith.negf %407 : vector<2x8xf32>
    %409 = math.exp %408 : vector<2x8xf32>
    %cst_137 = arith.constant 1.000000e+00 : f32
    %410 = vector.broadcast %cst_137 : f32 to vector<2x8xf32>
    %411 = arith.addf %410, %409 : vector<2x8xf32>
    %412 = arith.divf %410, %411 : vector<2x8xf32>
    %413 = arith.mulf %404, %340 : vector<2x8xf32>
    %414 = arith.mulf %398, %406 : vector<2x8xf32>
    %415 = arith.addf %413, %414 : vector<2x8xf32>
    %416 = math.tanh %415 : vector<2x8xf32>
    %417 = arith.mulf %412, %416 : vector<2x8xf32>
    %418 = vector.extract_strided_slice %392 {offsets = [0, 0], sizes = [2, 8], strides = [1, 1]} : vector<2x32xf32> to vector<2x8xf32>
    %419 = arith.negf %418 : vector<2x8xf32>
    %420 = math.exp %419 : vector<2x8xf32>
    %cst_138 = arith.constant 1.000000e+00 : f32
    %421 = vector.broadcast %cst_138 : f32 to vector<2x8xf32>
    %422 = arith.addf %421, %420 : vector<2x8xf32>
    %423 = arith.divf %421, %422 : vector<2x8xf32>
    %424 = vector.extract_strided_slice %392 {offsets = [0, 8], sizes = [2, 8], strides = [1, 1]} : vector<2x32xf32> to vector<2x8xf32>
    %425 = arith.negf %424 : vector<2x8xf32>
    %426 = math.exp %425 : vector<2x8xf32>
    %cst_139 = arith.constant 1.000000e+00 : f32
    %427 = vector.broadcast %cst_139 : f32 to vector<2x8xf32>
    %428 = arith.addf %427, %426 : vector<2x8xf32>
    %429 = arith.divf %427, %428 : vector<2x8xf32>
    %430 = vector.extract_strided_slice %392 {offsets = [0, 16], sizes = [2, 8], strides = [1, 1]} : vector<2x32xf32> to vector<2x8xf32>
    %431 = math.tanh %430 : vector<2x8xf32>
    %432 = vector.extract_strided_slice %392 {offsets = [0, 24], sizes = [2, 8], strides = [1, 1]} : vector<2x32xf32> to vector<2x8xf32>
    %433 = arith.negf %432 : vector<2x8xf32>
    %434 = math.exp %433 : vector<2x8xf32>
    %cst_140 = arith.constant 1.000000e+00 : f32
    %435 = vector.broadcast %cst_140 : f32 to vector<2x8xf32>
    %436 = arith.addf %435, %434 : vector<2x8xf32>
    %437 = arith.divf %435, %436 : vector<2x8xf32>
    %438 = arith.mulf %429, %365 : vector<2x8xf32>
    %439 = arith.mulf %423, %431 : vector<2x8xf32>
    %440 = arith.addf %438, %439 : vector<2x8xf32>
    %441 = math.tanh %440 : vector<2x8xf32>
    %442 = arith.mulf %437, %441 : vector<2x8xf32>
    %443 = arith.index_cast %c5_i32 : i32 to index
    %c0_141 = arith.constant 0 : index
    %c0_142 = arith.constant 0 : index
    %c0_143 = arith.constant 0 : index
    %444 = vector.load %arg2[%443, %c0_141, %c0_142, %c0_143] : memref<8x2x2x8xf32, #tpu.memory_space<vmem>>, vector<1x1x2x8xf32>
    %445 = vector.shape_cast %444 : vector<1x1x2x8xf32> to vector<2x8xf32>
    %446 = vector.shape_cast %417 : vector<2x8xf32> to vector<1x1x2x8xf32>
    tpu.vector_store %arg2[%443, %c0_141, %c0_142, %c0_143], %446 {strides = array<i32>} : memref<8x2x2x8xf32, #tpu.memory_space<vmem>>, vector<1x1x2x8xf32>,
    %447 = arith.index_cast %376 : i32 to index
    %c1_144 = arith.constant 1 : index
    %c0_145 = arith.constant 0 : index
    %c0_146 = arith.constant 0 : index
    %448 = vector.load %arg2[%447, %c1_144, %c0_145, %c0_146] : memref<8x2x2x8xf32, #tpu.memory_space<vmem>>, vector<1x1x2x8xf32>
    %449 = vector.shape_cast %448 : vector<1x1x2x8xf32> to vector<2x8xf32>
    %450 = vector.shape_cast %442 : vector<2x8xf32> to vector<1x1x2x8xf32>
    tpu.vector_store %arg2[%447, %c1_144, %c0_145, %c0_146], %450 {strides = array<i32>} : memref<8x2x2x8xf32, #tpu.memory_space<vmem>>, vector<1x1x2x8xf32>,
    %c6_i32 = arith.constant 6 : i32
    %c7_i32_147 = arith.constant 7 : i32
    %451 = arith.subi %c7_i32_147, %c6_i32 : i32
    %452 = arith.index_cast %c6_i32 : i32 to index
    %c0_148 = arith.constant 0 : index
    %c0_149 = arith.constant 0 : index
    %453 = vector.load %arg0[%452, %c0_148, %c0_149] : memref<8x2x64xf32, #tpu.memory_space<vmem>>, vector<1x2x64xf32>
    %454 = vector.shape_cast %453 : vector<1x2x64xf32> to vector<2x64xf32>
    %455 = arith.index_cast %451 : i32 to index
    %c0_150 = arith.constant 0 : index
    %c0_151 = arith.constant 0 : index
    %456 = vector.load %arg0[%455, %c0_150, %c0_151] : memref<8x2x64xf32, #tpu.memory_space<vmem>>, vector<1x2x64xf32>
    %457 = vector.shape_cast %456 : vector<1x2x64xf32> to vector<2x64xf32>
    %458 = vector.extract_strided_slice %454 {offsets = [0, 0], sizes = [2, 32], strides = [1, 1]} : vector<2x64xf32> to vector<2x32xf32>
    %c0_152 = arith.constant 0 : index
    %c0_153 = arith.constant 0 : index
    %c0_154 = arith.constant 0 : index
    %459 = vector.load %arg1[%c0_152, %c0_153, %c0_154] : memref<2x8x32xf32, #tpu.memory_space<vmem>>, vector<1x8x32xf32>
    %460 = vector.shape_cast %459 : vector<1x8x32xf32> to vector<8x32xf32>
    %cst_155 = arith.constant dense<0.000000e+00> : vector<2x32xf32>
    %461 = tpu.matmul %417, %460, %cst_155 {dimension_numbers = #tpu.dot_dimension_numbers<[1], [0], [0], [1], [0, 0, 1, 1], [], []>} : vector<2x8xf32>, vector<8x32xf32>, vector<2x32xf32> -> vector<2x32xf32>
    %462 = arith.addf %458, %461 : vector<2x32xf32>
    %463 = vector.extract_strided_slice %457 {offsets = [0, 32], sizes = [2, 32], strides = [1, 1]} : vector<2x64xf32> to vector<2x32xf32>
    %c1_156 = arith.constant 1 : index
    %c0_157 = arith.constant 0 : index
    %c0_158 = arith.constant 0 : index
    %464 = vector.load %arg1[%c1_156, %c0_157, %c0_158] : memref<2x8x32xf32, #tpu.memory_space<vmem>>, vector<1x8x32xf32>
    %465 = vector.shape_cast %464 : vector<1x8x32xf32> to vector<8x32xf32>
    %cst_159 = arith.constant dense<0.000000e+00> : vector<2x32xf32>
    %466 = tpu.matmul %442, %465, %cst_159 {dimension_numbers = #tpu.dot_dimension_numbers<[1], [0], [0], [1], [0, 0, 1, 1], [], []>} : vector<2x8xf32>, vector<8x32xf32>, vector<2x32xf32> -> vector<2x32xf32>
    %467 = arith.addf %463, %466 : vector<2x32xf32>
    %468 = vector.extract_strided_slice %462 {offsets = [0, 0], sizes = [2, 8], strides = [1, 1]} : vector<2x32xf32> to vector<2x8xf32>
    %469 = arith.negf %468 : vector<2x8xf32>
    %470 = math.exp %469 : vector<2x8xf32>
    %cst_160 = arith.constant 1.000000e+00 : f32
    %471 = vector.broadcast %cst_160 : f32 to vector<2x8xf32>
    %472 = arith.addf %471, %470 : vector<2x8xf32>
    %473 = arith.divf %471, %472 : vector<2x8xf32>
    %474 = vector.extract_strided_slice %462 {offsets = [0, 8], sizes = [2, 8], strides = [1, 1]} : vector<2x32xf32> to vector<2x8xf32>
    %475 = arith.negf %474 : vector<2x8xf32>
    %476 = math.exp %475 : vector<2x8xf32>
    %cst_161 = arith.constant 1.000000e+00 : f32
    %477 = vector.broadcast %cst_161 : f32 to vector<2x8xf32>
    %478 = arith.addf %477, %476 : vector<2x8xf32>
    %479 = arith.divf %477, %478 : vector<2x8xf32>
    %480 = vector.extract_strided_slice %462 {offsets = [0, 16], sizes = [2, 8], strides = [1, 1]} : vector<2x32xf32> to vector<2x8xf32>
    %481 = math.tanh %480 : vector<2x8xf32>
    %482 = vector.extract_strided_slice %462 {offsets = [0, 24], sizes = [2, 8], strides = [1, 1]} : vector<2x32xf32> to vector<2x8xf32>
    %483 = arith.negf %482 : vector<2x8xf32>
    %484 = math.exp %483 : vector<2x8xf32>
    %cst_162 = arith.constant 1.000000e+00 : f32
    %485 = vector.broadcast %cst_162 : f32 to vector<2x8xf32>
    %486 = arith.addf %485, %484 : vector<2x8xf32>
    %487 = arith.divf %485, %486 : vector<2x8xf32>
    %488 = arith.mulf %479, %415 : vector<2x8xf32>
    %489 = arith.mulf %473, %481 : vector<2x8xf32>
    %490 = arith.addf %488, %489 : vector<2x8xf32>
    %491 = math.tanh %490 : vector<2x8xf32>
    %492 = arith.mulf %487, %491 : vector<2x8xf32>
    %493 = vector.extract_strided_slice %467 {offsets = [0, 0], sizes = [2, 8], strides = [1, 1]} : vector<2x32xf32> to vector<2x8xf32>
    %494 = arith.negf %493 : vector<2x8xf32>
    %495 = math.exp %494 : vector<2x8xf32>
    %cst_163 = arith.constant 1.000000e+00 : f32
    %496 = vector.broadcast %cst_163 : f32 to vector<2x8xf32>
    %497 = arith.addf %496, %495 : vector<2x8xf32>
    %498 = arith.divf %496, %497 : vector<2x8xf32>
    %499 = vector.extract_strided_slice %467 {offsets = [0, 8], sizes = [2, 8], strides = [1, 1]} : vector<2x32xf32> to vector<2x8xf32>
    %500 = arith.negf %499 : vector<2x8xf32>
    %501 = math.exp %500 : vector<2x8xf32>
    %cst_164 = arith.constant 1.000000e+00 : f32
    %502 = vector.broadcast %cst_164 : f32 to vector<2x8xf32>
    %503 = arith.addf %502, %501 : vector<2x8xf32>
    %504 = arith.divf %502, %503 : vector<2x8xf32>
    %505 = vector.extract_strided_slice %467 {offsets = [0, 16], sizes = [2, 8], strides = [1, 1]} : vector<2x32xf32> to vector<2x8xf32>
    %506 = math.tanh %505 : vector<2x8xf32>
    %507 = vector.extract_strided_slice %467 {offsets = [0, 24], sizes = [2, 8], strides = [1, 1]} : vector<2x32xf32> to vector<2x8xf32>
    %508 = arith.negf %507 : vector<2x8xf32>
    %509 = math.exp %508 : vector<2x8xf32>
    %cst_165 = arith.constant 1.000000e+00 : f32
    %510 = vector.broadcast %cst_165 : f32 to vector<2x8xf32>
    %511 = arith.addf %510, %509 : vector<2x8xf32>
    %512 = arith.divf %510, %511 : vector<2x8xf32>
    %513 = arith.mulf %504, %440 : vector<2x8xf32>
    %514 = arith.mulf %498, %506 : vector<2x8xf32>
    %515 = arith.addf %513, %514 : vector<2x8xf32>
    %516 = math.tanh %515 : vector<2x8xf32>
    %517 = arith.mulf %512, %516 : vector<2x8xf32>
    %518 = arith.index_cast %c6_i32 : i32 to index
    %c0_166 = arith.constant 0 : index
    %c0_167 = arith.constant 0 : index
    %c0_168 = arith.constant 0 : index
    %519 = vector.load %arg2[%518, %c0_166, %c0_167, %c0_168] : memref<8x2x2x8xf32, #tpu.memory_space<vmem>>, vector<1x1x2x8xf32>
    %520 = vector.shape_cast %519 : vector<1x1x2x8xf32> to vector<2x8xf32>
    %521 = vector.shape_cast %492 : vector<2x8xf32> to vector<1x1x2x8xf32>
    tpu.vector_store %arg2[%518, %c0_166, %c0_167, %c0_168], %521 {strides = array<i32>} : memref<8x2x2x8xf32, #tpu.memory_space<vmem>>, vector<1x1x2x8xf32>,
    %522 = arith.index_cast %451 : i32 to index
    %c1_169 = arith.constant 1 : index
    %c0_170 = arith.constant 0 : index
    %c0_171 = arith.constant 0 : index
    %523 = vector.load %arg2[%522, %c1_169, %c0_170, %c0_171] : memref<8x2x2x8xf32, #tpu.memory_space<vmem>>, vector<1x1x2x8xf32>
    %524 = vector.shape_cast %523 : vector<1x1x2x8xf32> to vector<2x8xf32>
    %525 = vector.shape_cast %517 : vector<2x8xf32> to vector<1x1x2x8xf32>
    tpu.vector_store %arg2[%522, %c1_169, %c0_170, %c0_171], %525 {strides = array<i32>} : memref<8x2x2x8xf32, #tpu.memory_space<vmem>>, vector<1x1x2x8xf32>,
    %c7_i32_172 = arith.constant 7 : i32
    %c7_i32_173 = arith.constant 7 : i32
    %526 = arith.subi %c7_i32_173, %c7_i32_172 : i32
    %527 = arith.index_cast %c7_i32_172 : i32 to index
    %c0_174 = arith.constant 0 : index
    %c0_175 = arith.constant 0 : index
    %528 = vector.load %arg0[%527, %c0_174, %c0_175] : memref<8x2x64xf32, #tpu.memory_space<vmem>>, vector<1x2x64xf32>
    %529 = vector.shape_cast %528 : vector<1x2x64xf32> to vector<2x64xf32>
    %530 = arith.index_cast %526 : i32 to index
    %c0_176 = arith.constant 0 : index
    %c0_177 = arith.constant 0 : index
    %531 = vector.load %arg0[%530, %c0_176, %c0_177] : memref<8x2x64xf32, #tpu.memory_space<vmem>>, vector<1x2x64xf32>
    %532 = vector.shape_cast %531 : vector<1x2x64xf32> to vector<2x64xf32>
    %533 = vector.extract_strided_slice %529 {offsets = [0, 0], sizes = [2, 32], strides = [1, 1]} : vector<2x64xf32> to vector<2x32xf32>
    %c0_178 = arith.constant 0 : index
    %c0_179 = arith.constant 0 : index
    %c0_180 = arith.constant 0 : index
    %534 = vector.load %arg1[%c0_178, %c0_179, %c0_180] : memref<2x8x32xf32, #tpu.memory_space<vmem>>, vector<1x8x32xf32>
    %535 = vector.shape_cast %534 : vector<1x8x32xf32> to vector<8x32xf32>
    %cst_181 = arith.constant dense<0.000000e+00> : vector<2x32xf32>
    %536 = tpu.matmul %492, %535, %cst_181 {dimension_numbers = #tpu.dot_dimension_numbers<[1], [0], [0], [1], [0, 0, 1, 1], [], []>} : vector<2x8xf32>, vector<8x32xf32>, vector<2x32xf32> -> vector<2x32xf32>
    %537 = arith.addf %533, %536 : vector<2x32xf32>
    %538 = vector.extract_strided_slice %532 {offsets = [0, 32], sizes = [2, 32], strides = [1, 1]} : vector<2x64xf32> to vector<2x32xf32>
    %c1_182 = arith.constant 1 : index
    %c0_183 = arith.constant 0 : index
    %c0_184 = arith.constant 0 : index
    %539 = vector.load %arg1[%c1_182, %c0_183, %c0_184] : memref<2x8x32xf32, #tpu.memory_space<vmem>>, vector<1x8x32xf32>
    %540 = vector.shape_cast %539 : vector<1x8x32xf32> to vector<8x32xf32>
    %cst_185 = arith.constant dense<0.000000e+00> : vector<2x32xf32>
    %541 = tpu.matmul %517, %540, %cst_185 {dimension_numbers = #tpu.dot_dimension_numbers<[1], [0], [0], [1], [0, 0, 1, 1], [], []>} : vector<2x8xf32>, vector<8x32xf32>, vector<2x32xf32> -> vector<2x32xf32>
    %542 = arith.addf %538, %541 : vector<2x32xf32>
    %543 = vector.extract_strided_slice %537 {offsets = [0, 0], sizes = [2, 8], strides = [1, 1]} : vector<2x32xf32> to vector<2x8xf32>
    %544 = arith.negf %543 : vector<2x8xf32>
    %545 = math.exp %544 : vector<2x8xf32>
    %cst_186 = arith.constant 1.000000e+00 : f32
    %546 = vector.broadcast %cst_186 : f32 to vector<2x8xf32>
    %547 = arith.addf %546, %545 : vector<2x8xf32>
    %548 = arith.divf %546, %547 : vector<2x8xf32>
    %549 = vector.extract_strided_slice %537 {offsets = [0, 8], sizes = [2, 8], strides = [1, 1]} : vector<2x32xf32> to vector<2x8xf32>
    %550 = arith.negf %549 : vector<2x8xf32>
    %551 = math.exp %550 : vector<2x8xf32>
    %cst_187 = arith.constant 1.000000e+00 : f32
    %552 = vector.broadcast %cst_187 : f32 to vector<2x8xf32>
    %553 = arith.addf %552, %551 : vector<2x8xf32>
    %554 = arith.divf %552, %553 : vector<2x8xf32>
    %555 = vector.extract_strided_slice %537 {offsets = [0, 16], sizes = [2, 8], strides = [1, 1]} : vector<2x32xf32> to vector<2x8xf32>
    %556 = math.tanh %555 : vector<2x8xf32>
    %557 = vector.extract_strided_slice %537 {offsets = [0, 24], sizes = [2, 8], strides = [1, 1]} : vector<2x32xf32> to vector<2x8xf32>
    %558 = arith.negf %557 : vector<2x8xf32>
    %559 = math.exp %558 : vector<2x8xf32>
    %cst_188 = arith.constant 1.000000e+00 : f32
    %560 = vector.broadcast %cst_188 : f32 to vector<2x8xf32>
    %561 = arith.addf %560, %559 : vector<2x8xf32>
    %562 = arith.divf %560, %561 : vector<2x8xf32>
    %563 = arith.mulf %554, %490 : vector<2x8xf32>
    %564 = arith.mulf %548, %556 : vector<2x8xf32>
    %565 = arith.addf %563, %564 : vector<2x8xf32>
    %566 = math.tanh %565 : vector<2x8xf32>
    %567 = arith.mulf %562, %566 : vector<2x8xf32>
    %568 = vector.extract_strided_slice %542 {offsets = [0, 0], sizes = [2, 8], strides = [1, 1]} : vector<2x32xf32> to vector<2x8xf32>
    %569 = arith.negf %568 : vector<2x8xf32>
    %570 = math.exp %569 : vector<2x8xf32>
    %cst_189 = arith.constant 1.000000e+00 : f32
    %571 = vector.broadcast %cst_189 : f32 to vector<2x8xf32>
    %572 = arith.addf %571, %570 : vector<2x8xf32>
    %573 = arith.divf %571, %572 : vector<2x8xf32>
    %574 = vector.extract_strided_slice %542 {offsets = [0, 8], sizes = [2, 8], strides = [1, 1]} : vector<2x32xf32> to vector<2x8xf32>
    %575 = arith.negf %574 : vector<2x8xf32>
    %576 = math.exp %575 : vector<2x8xf32>
    %cst_190 = arith.constant 1.000000e+00 : f32
    %577 = vector.broadcast %cst_190 : f32 to vector<2x8xf32>
    %578 = arith.addf %577, %576 : vector<2x8xf32>
    %579 = arith.divf %577, %578 : vector<2x8xf32>
    %580 = vector.extract_strided_slice %542 {offsets = [0, 16], sizes = [2, 8], strides = [1, 1]} : vector<2x32xf32> to vector<2x8xf32>
    %581 = math.tanh %580 : vector<2x8xf32>
    %582 = vector.extract_strided_slice %542 {offsets = [0, 24], sizes = [2, 8], strides = [1, 1]} : vector<2x32xf32> to vector<2x8xf32>
    %583 = arith.negf %582 : vector<2x8xf32>
    %584 = math.exp %583 : vector<2x8xf32>
    %cst_191 = arith.constant 1.000000e+00 : f32
    %585 = vector.broadcast %cst_191 : f32 to vector<2x8xf32>
    %586 = arith.addf %585, %584 : vector<2x8xf32>
    %587 = arith.divf %585, %586 : vector<2x8xf32>
    %588 = arith.mulf %579, %515 : vector<2x8xf32>
    %589 = arith.mulf %573, %581 : vector<2x8xf32>
    %590 = arith.addf %588, %589 : vector<2x8xf32>
    %591 = math.tanh %590 : vector<2x8xf32>
    %592 = arith.mulf %587, %591 : vector<2x8xf32>
    %593 = arith.index_cast %c7_i32_172 : i32 to index
    %c0_192 = arith.constant 0 : index
    %c0_193 = arith.constant 0 : index
    %c0_194 = arith.constant 0 : index
    %594 = vector.load %arg2[%593, %c0_192, %c0_193, %c0_194] : memref<8x2x2x8xf32, #tpu.memory_space<vmem>>, vector<1x1x2x8xf32>
    %595 = vector.shape_cast %594 : vector<1x1x2x8xf32> to vector<2x8xf32>
    %596 = vector.shape_cast %567 : vector<2x8xf32> to vector<1x1x2x8xf32>
    tpu.vector_store %arg2[%593, %c0_192, %c0_193, %c0_194], %596 {strides = array<i32>} : memref<8x2x2x8xf32, #tpu.memory_space<vmem>>, vector<1x1x2x8xf32>,
    %597 = arith.index_cast %526 : i32 to index
    %c1_195 = arith.constant 1 : index
    %c0_196 = arith.constant 0 : index
    %c0_197 = arith.constant 0 : index
    %598 = vector.load %arg2[%597, %c1_195, %c0_196, %c0_197] : memref<8x2x2x8xf32, #tpu.memory_space<vmem>>, vector<1x1x2x8xf32>
    %599 = vector.shape_cast %598 : vector<1x1x2x8xf32> to vector<2x8xf32>
    %600 = vector.shape_cast %592 : vector<2x8xf32> to vector<1x1x2x8xf32>
    tpu.vector_store %arg2[%597, %c1_195, %c0_196, %c0_197], %600 {strides = array<i32>} : memref<8x2x2x8xf32, #tpu.memory_space<vmem>>, vector<1x1x2x8xf32>,
    %c8_i32 = arith.constant 8 : i32
    return
  }
}

module attributes {stable_mosaic.version = 11 : i64} {
  func.func @_mm_kernel(%arg0: i32, %arg1: i32, %arg2: memref<16x48xf32, #tpu.memory_space<vmem>>, %arg3: memref<48x16xf32, #tpu.memory_space<vmem>>, %arg4: memref<16x1xf32, #tpu.memory_space<vmem>>, %arg5: memref<16x16xf32, #tpu.memory_space<vmem>>, %arg6: memref<16x16xf32, #tpu.memory_space<vmem>>) attributes {dimension_semantics = [#tpu.dimension_semantics<parallel>, #tpu.dimension_semantics<arbitrary>], iteration_bounds = array<i64: 1, 1>, scalar_prefetch = 0 : i64, scratch_operands = 1 : i64, tpu.core_type = #tpu.core_type<tc>, window_params = [{transform_indices = @transform_0, window_bounds = array<i64: 16, 48>}, {transform_indices = @transform_1, window_bounds = array<i64: 48, 16>}, {transform_indices = @transform_2, window_bounds = array<i64: 16, 1>}, {transform_indices = @transform_3, window_bounds = array<i64: 16, 16>}]} {
    %c0_i32 = arith.constant 0 : i32
    %0 = arith.cmpi eq, %arg1, %c0_i32 : i32
    %1 = arith.extui %0 : i1 to i32
    %c0_i32_0 = arith.constant 0 : i32
    %2 = arith.cmpi ne, %1, %c0_i32_0 : i32
    scf.if %2 {
      %cst_10 = arith.constant 0.000000e+00 : f32
      %12 = vector.broadcast %cst_10 : f32 to vector<16x16xf32>
      %c0_11 = arith.constant 0 : index
      %c0_12 = arith.constant 0 : index
      %13 = vector.load %arg6[%c0_11, %c0_12] : memref<16x16xf32, #tpu.memory_space<vmem>>, vector<16x16xf32>
      tpu.vector_store %arg6[%c0_11, %c0_12], %12 {strides = array<i32>} : memref<16x16xf32, #tpu.memory_space<vmem>>, vector<16x16xf32>,
    } else {
    }
    %c0 = arith.constant 0 : index
    %c0_1 = arith.constant 0 : index
    %3 = vector.load %arg6[%c0, %c0_1] : memref<16x16xf32, #tpu.memory_space<vmem>>, vector<16x16xf32>
    %c0_2 = arith.constant 0 : index
    %c0_3 = arith.constant 0 : index
    %4 = vector.load %arg2[%c0_2, %c0_3] : memref<16x48xf32, #tpu.memory_space<vmem>>, vector<16x48xf32>
    %c0_4 = arith.constant 0 : index
    %c0_5 = arith.constant 0 : index
    %5 = vector.load %arg3[%c0_4, %c0_5] : memref<48x16xf32, #tpu.memory_space<vmem>>, vector<48x16xf32>
    %cst = arith.constant dense<0.000000e+00> : vector<16x16xf32>
    %6 = tpu.matmul %4, %5, %cst {dimension_numbers = #tpu.dot_dimension_numbers<[1], [0], [0], [1], [0, 0, 1, 1], [], []>} : vector<16x48xf32>, vector<48x16xf32>, vector<16x16xf32> -> vector<16x16xf32>
    %7 = arith.addf %3, %6 : vector<16x16xf32>
    %c0_6 = arith.constant 0 : index
    %c0_7 = arith.constant 0 : index
    %8 = vector.load %arg6[%c0_6, %c0_7] : memref<16x16xf32, #tpu.memory_space<vmem>>, vector<16x16xf32>
    tpu.vector_store %arg6[%c0_6, %c0_7], %7 {strides = array<i32>} : memref<16x16xf32, #tpu.memory_space<vmem>>, vector<16x16xf32>,
    %c0_i32_8 = arith.constant 0 : i32
    %9 = arith.cmpi eq, %arg1, %c0_i32_8 : i32
    %10 = arith.extui %9 : i1 to i32
    %c0_i32_9 = arith.constant 0 : i32
    %11 = arith.cmpi ne, %10, %c0_i32_9 : i32
    scf.if %11 {
      %c0_10 = arith.constant 0 : index
      %c0_11 = arith.constant 0 : index
      %12 = vector.load %arg6[%c0_10, %c0_11] : memref<16x16xf32, #tpu.memory_space<vmem>>, vector<16x16xf32>
      %c0_12 = arith.constant 0 : index
      %c0_13 = arith.constant 0 : index
      %13 = vector.load %arg4[%c0_12, %c0_13] : memref<16x1xf32, #tpu.memory_space<vmem>>, vector<16x1xf32>
      %14 = vector.broadcast %13 : vector<16x1xf32> to vector<16x16xf32>
      %15 = arith.addf %12, %14 : vector<16x16xf32>
      %c0_14 = arith.constant 0 : index
      %c0_15 = arith.constant 0 : index
      %16 = vector.load %arg5[%c0_14, %c0_15] : memref<16x16xf32, #tpu.memory_space<vmem>>, vector<16x16xf32>
      tpu.vector_store %arg5[%c0_14, %c0_15], %15 {strides = array<i32>} : memref<16x16xf32, #tpu.memory_space<vmem>>, vector<16x16xf32>,
    } else {
    }
    return
  }
  func.func @transform_0(%arg0: i32, %arg1: i32) -> (i32, i32) {
    %c0_i32 = arith.constant 0 : i32
    return %arg0, %arg1 : i32, i32
  }
  func.func @transform_1(%arg0: i32, %arg1: i32) -> (i32, i32) {
    %c0_i32 = arith.constant 0 : i32
    %c0_i32_0 = arith.constant 0 : i32
    return %arg1, %c0_i32 : i32, i32
  }
  func.func @transform_2(%arg0: i32, %arg1: i32) -> (i32, i32) {
    %c0_i32 = arith.constant 0 : i32
    %c0_i32_0 = arith.constant 0 : i32
    return %arg0, %c0_i32 : i32, i32
  }
  func.func @transform_3(%arg0: i32, %arg1: i32) -> (i32, i32) {
    %c0_i32 = arith.constant 0 : i32
    %c0_i32_0 = arith.constant 0 : i32
    return %arg0, %c0_i32 : i32, i32
  }
}

</mosaic_0001>

<bundles_post_ra>
// kernel: net_vgg_lstm_forward.24
= control target key start
LH: loop header
LB: loop body
LE: loop exit
PB: predicated region body
PF: predicated region fallthrough
CT: control target
= control target key end

     0   :  { %s2611_s12 = smov 0   ;;  %s2821_s0 = inlined_call_operand.vmem [shape: f32[2,8,646], index: 0, kind: input, shape index: {}]   ;;  %s2822_s1 = inlined_call_operand.vmem [shape: f32[9,8,8], index: 1, kind: input, shape index: {}]   ;;  %s2823_s2 = inlined_call_operand.vmem [shape: f32[8,1], index: 2, kind: input, shape index: {}]   ;;  %s2824_s3 = inlined_call_operand.vmem [shape: f32[2,8,544], index: 3, kind: output, shape index: {}]  }
   0x1 LB: > { %s2411_s13 = sadd.s32 4294967295, %s2578_s12   ;;  %p2415_p0 = scmp.ge.s32.totalorder %s2578_s12, 1  ;;  %s2578_s12 = sphi %s2611_s12, %s13_s12  }
   0x2   : > { %p137_p1 = scmp.lt.s32.totalorder %s2578_s12, 3 }
   0x4   : > { %p138_p2 = pnand %p2415_p0, %p137_p1 }
   0x5   : > { %p161_p3 = scmp.lt.s32.totalorder (!%p138_p2), %s2411_s13, 1  ;;  %v2580_v0 = vmov (!%p138_p2), 0.0   ;;  %s2581_s18 = smov (!%p138_p2), 127   ;;  %v2588_v6 = vmov (!%p138_p2), 0   ;;  %v2329_v7 = vld [vmem:[%s2823_s2] sm:$0xff] (!%p138_p2)  ;;  %vm194_vm0 = vcmask (!%p138_p2), 1039360  }
   0x6   : > { %141 = sbr.rel (%p138_p2) target bundleno = 433 (0x1b1), region = 32  ;;  %272 = vmatprep.mubr.f32.mxu0 (!%p138_p2), %v2580_v0  ;;  %343 = vmatprep.mubr.f32.mxu1 (!%p138_p2), %v2580_v0  ;;  %s2582_s19 = smov (!%p138_p2), 126   ;;  %v2418_v13 = vld [vmem:[%s2822_s1 + $0x8] sm:$0xff] (!%p138_p2)  ;;  %vm204_vm1 = vcmask (!%p138_p2), 64512   ;;  %vm2590_vm2 = vmmov (!%p138_p2), 0   ;;  %vm647_vm3 = vcmask (!%p138_p2), 1031168  }
   0x7   : > { %s2583_s20 = smov (!%p138_p2), 94   ;;  %s2584_s21 = smov (!%p138_p2), 93   ;;  %2571 = vset.pattern.permute.xlu0 (!%p138_p2), %v2588_v6  ;;  %v176_v22 = vld [vmem:[%s2822_s1] sm:$0xff] (!%p138_p2)  ;;  %v2425_v29 = vld [vmem:[%s2822_s1 + $0x10] sm:$0xff] (!%p138_p2)  ;;  %vm889_vm4 = vcmask (!%p138_p2), 769024   ;;  %v2429_v38 = vld [vmem:[%s2822_s1 + $0x18] sm:$0xff] (!%p138_p2) }
   0x8   : > { %s2585_s22 = smov (!%p138_p2), 92   ;;  %s2586_s23 = smov (!%p138_p2), 60   ;;  %vm1131_vm5 = vcmask (!%p138_p2), 760832   ;;  %v2433_v47 = vld [vmem:[%s2822_s1 + $0x20] sm:$0xff] (!%p138_p2)  ;;  %vm1373_vm6 = vcmask (!%p138_p2), 752640   ;;  %v2437_v55 = vld [vmem:[%s2822_s1 + $0x28] sm:$0xff] (!%p138_p2) }
   0x9   : > { %s2587_s24 = smov (!%p138_p2), 59   ;;  %s2589_s25 = smov (!%p138_p2), 58   ;;  %vm1615_vm7 = vcmask (!%p138_p2), 490496   ;;  %vm1857_vm8 = vcmask (!%p138_p2), 482304   ;;  %vm2099_vm9 = vcmask (!%p138_p2), 474112   ;;  %vm2354_vm10 = vcmask (!%p138_p2), 261120  }
   0xd   : > { %s2826_s13 = smov (!%p161_p3, %s2411_s13), 1 }
   0xe   : > { %s2550_s14 = smul.u32 48, %s2826_s13 }
  0x10   : > { %s165_s17 = scalar_lea.vmem %s2821_s0, %s2550_s14 }
  0x11   : > { %v2627_v1 = vld [vmem:[%s165_s17 + $0x8] sm:$0xff]  ;;  %v2629_v2 = vld [vmem:[%s165_s17] sm:$0xff]  ;;  %v2633_v3 = vld [vmem:[%s165_s17 + $0x10] sm:$0xff] }
  0x12   : > { %186 = vrot.lane.b32.xlu0 %v2627_v1, %s2581_s18  ;;  %184 = vrot.lane.b32.xlu1 %v2629_v2, %s2581_s18  ;;  %v2635_v4 = vld [vmem:[%s165_s17 + $0x18] sm:$0xff]  ;;  %v2639_v5 = vld [vmem:[%s165_s17 + $0x20] sm:$0xff] }
  0x16   : > { %188 = vrot.lane.b32.xlu0 %v2633_v3, %s2581_s18  ;;  %190 = vrot.lane.b32.xlu1 %v2635_v4, %s2581_s18 }
  0x1a   : > { %192 = vrot.lane.b32.xlu0 %v2639_v5, %s2581_s18  ;;  %639 = vrot.lane.b32.xlu1 %v2627_v1, %s2582_s19 }
  0x1e   : > { %641 = vrot.lane.b32.xlu0 %v2633_v3, %s2582_s19  ;;  %637 = vrot.lane.b32.xlu1 %v2629_v2, %s2582_s19 }
  0x22   : > { %643 = vrot.lane.b32.xlu0 %v2635_v4, %s2582_s19  ;;  %645 = vrot.lane.b32.xlu1 %v2639_v5, %s2582_s19 }
  0x26   : > { %881 = vrot.lane.b32.xlu0 %v2627_v1, %s2583_s20  ;;  %883 = vrot.lane.b32.xlu1 %v2633_v3, %s2583_s20 }
  0x2a   : > { %879 = vrot.lane.b32.xlu0 %v2629_v2, %s2583_s20  ;;  %885 = vrot.lane.b32.xlu1 %v2635_v4, %s2583_s20 }
  0x2e   : > { %887 = vrot.lane.b32.xlu0 %v2639_v5, %s2583_s20  ;;  %1123 = vrot.lane.b32.xlu1 %v2627_v1, %s2584_s21 }
  0x32   : > { %1125 = vrot.lane.b32.xlu0 %v2633_v3, %s2584_s21  ;;  %1121 = vrot.lane.b32.xlu1 %v2629_v2, %s2584_s21 }
  0x36   : > { %1127 = vrot.lane.b32.xlu0 %v2635_v4, %s2584_s21  ;;  %1129 = vrot.lane.b32.xlu1 %v2639_v5, %s2584_s21  ;;  %s2551_s21 = smul.u32 40, %s2826_s13 }
  0x3a   : > { %1365 = vrot.lane.b32.xlu0 %v2627_v1, %s2585_s22  ;;  %1367 = vrot.lane.b32.xlu1 %v2633_v3, %s2585_s22 }
  0x3e   : > { %1363 = vrot.lane.b32.xlu0 %v2629_v2, %s2585_s22  ;;  %1369 = vrot.lane.b32.xlu1 %v2635_v4, %s2585_s22 }
  0x42   : > { %1371 = vrot.lane.b32.xlu0 %v2639_v5, %s2585_s22  ;;  %1607 = vrot.lane.b32.xlu1 %v2627_v1, %s2586_s23 }
  0x46   : > { %1609 = vrot.lane.b32.xlu0 %v2633_v3, %s2586_s23  ;;  %1605 = vrot.lane.b32.xlu1 %v2629_v2, %s2586_s23 }
  0x4a   : > { %1611 = vrot.lane.b32.xlu0 %v2635_v4, %s2586_s23  ;;  %1613 = vrot.lane.b32.xlu1 %v2639_v5, %s2586_s23 }
  0x4e   : > { %1849 = vrot.lane.b32.xlu0 %v2627_v1, %s2587_s24  ;;  %1851 = vrot.lane.b32.xlu1 %v2633_v3, %s2587_s24 }
  0x52   : > { %1847 = vrot.lane.b32.xlu0 %v2629_v2, %s2587_s24  ;;  %1853 = vrot.lane.b32.xlu1 %v2635_v4, %s2587_s24 }
  0x56   : > { %1855 = vrot.lane.b32.xlu0 %v2639_v5, %s2587_s24  ;;  %2091 = vrot.lane.b32.xlu1 %v2627_v1, %s2589_s25  ;;  %s170_s24 = scalar_lea.vmem %s2824_s3, %s2551_s21 }
  0x5a   : > { %2093 = vrot.lane.b32.xlu0 %v2633_v3, %s2589_s25  ;;  %2089 = vrot.lane.b32.xlu1 %v2629_v2, %s2589_s25 }
  0x5e   : > { %2095 = vrot.lane.b32.xlu0 %v2635_v4, %s2589_s25  ;;  %2097 = vrot.lane.b32.xlu1 %v2639_v5, %s2589_s25 }
  0x62   : > { %2332 = vperm.xlu0 %2571, %v2329_v7  }
  0x84   : > { %v187_v8 = vpop.permute.xlu0 %186  ;;  %v185_v9 = vpop.permute.xlu1 %184 }
  0x85   : > { %v195_v14 = vsel %vm194_vm0, %v185_v9, %v187_v8 }
  0x88   : > { %v189_v10 = vpop.permute.xlu0 %188  ;;  %v191_v11 = vpop.permute.xlu1 %190 }
  0x89   : > { %v196_v12 = vsel %vm194_vm0, %v187_v8, %v189_v10  ;;  %v197_v18 = vsel %vm194_vm0, %v189_v10, %v191_v11 }
  0x8a   : > { %208 = vmatprep.subr.mxu0 %v196_v12 }
  0x8b   : > { %209 = vmatpush1.msra.mxu0 %v195_v14 }
  0x8c   : > { %v193_v15 = vpop.permute.xlu0 %192  ;;  %2419 = vmatmul.mubr.msk.f32.vlgmr.msra.gmra.mrb[0].mxu0 %vm204_vm1, %v2418_v13  ;;  %2473 = vmatprep.subr.mxu0 %v2580_v0  ;;  %v640_v16 = vpop.permute.xlu1 %639 }
  0x8d   : > { %2474 = vmatpush3.msra.mxu0 %v193_v15  ;;  %v198_v17 = vsel %vm194_vm0, %v191_v11, %v193_v15  ;;  %2475 = vmatprep.mubr.msk.f32.mxu0 %vm2590_vm2, %v2580_v0  ;;  %v2445_v11 = vld [vmem:[%s2822_s1 + $0x38] sm:$0xff] }
  0x8e   : > { %279 = vmatprep.subr.mxu1 %v198_v17  ;;  %423 = vmatprep.subr.mxu0 %v2627_v1  ;;  %v2441_v1 = vld [vmem:[%s2822_s1 + $0x30] sm:$0xff] }
  0x8f   : > { %280 = vmatpush1.msra.mxu1 %v197_v18 }
  0x90   : > { %v642_v19 = vpop.permute.xlu0 %641  ;;  %2420 = vmatmul.mubr.msk.f32.vlgmr.msra.gmra.mrb[0].mxu1 %vm204_vm1, %v2418_v13  ;;  %2476 = vmatmul.mubr.msk.f32.vlgmr.msra.gmra.mrb[2].mxu0 %vm204_vm1, %v2418_v13  ;;  %v638_v20 = vpop.permute.xlu1 %637 }
  0x91   : > { %424 = vmatpush1.msra.mxu0 %v2629_v2  ;;  %v649_v21 = vsel %vm647_vm3, %v640_v16, %v642_v19  ;;  %487 = vmatprep.mubr.f32.mxu0 %v2580_v0  ;;  %v648_v23 = vsel %vm647_vm3, %v638_v20, %v640_v16 }
  0x92   : > { %660 = vmatprep.subr.mxu0 %v649_v21  ;;  %494 = vmatprep.subr.mxu1 %v2635_v4  ;;  %v2449_v21 = vld [vmem:[%s2822_s1 + $0x40] sm:$0xff] }
  0x93   : > { %495 = vmatpush1.msra.mxu1 %v2633_v3  ;;  %558 = vmatprep.mubr.f32.mxu1 %v2580_v0 }
  0x94   : > { %v644_v24 = vpop.permute.xlu0 %643  ;;  %2422 = vmatmul.mubr.msk.f32.vlgmr.msra.gmra.mrb[0].mxu0 %vm204_vm1, %v176_v22  ;;  %v646_v25 = vpop.permute.xlu1 %645  ;;  %2478 = vmatprep.subr.mxu1 %v2580_v0 }
  0x95   : > { %661 = vmatpush1.msra.mxu0 %v648_v23  ;;  %724 = vmatprep.mubr.f32.mxu0 %v2580_v0  ;;  %v651_v28 = vsel %vm647_vm3, %v644_v24, %v646_v25  ;;  %v650_v30 = vsel %vm647_vm3, %v642_v19, %v644_v24 }
  0x96   : > { %2483 = vmatprep.subr.mxu0 %v2580_v0 }
  0x98   : > { %v882_v26 = vpop.permute.xlu0 %881  ;;  %2423 = vmatmul.mubr.msk.f32.vlgmr.msra.gmra.mrb[0].mxu1 %vm204_vm1, %v176_v22  ;;  %v884_v27 = vpop.permute.xlu1 %883 }
  0x99   : > { %2479 = vmatpush3.msra.mxu1 %v2639_v5  ;;  %2480 = vmatprep.mubr.msk.f32.mxu1 %vm2590_vm2, %v2580_v0  ;;  %v891_v33 = vsel %vm889_vm4, %v882_v26, %v884_v27 }
  0x9a   : > { %731 = vmatprep.subr.mxu1 %v651_v28 }
  0x9c   : > { %v880_v31 = vpop.permute.xlu0 %879  ;;  %2481 = vmatmul.mubr.msk.f32.vlgmr.msra.gmra.mrb[2].mxu1 %vm204_vm1, %v176_v22  ;;  %2426 = vmatmul.mubr.msk.f32.vlgmr.msra.gmra.mrb[0].mxu0 %vm204_vm1, %v2425_v29  ;;  %v886_v32 = vpop.permute.xlu1 %885 }
  0x9d   : > { %732 = vmatpush1.msra.mxu1 %v650_v30  ;;  %2484 = vmatpush3.msra.mxu0 %v646_v25  ;;  %v890_v34 = vsel %vm889_vm4, %v880_v31, %v882_v26  ;;  %v892_v39 = vsel %vm889_vm4, %v884_v27, %v886_v32 }
  0x9e   : > { %902 = vmatprep.subr.mxu0 %v891_v33  ;;  %795 = vmatprep.mubr.f32.mxu1 %v2580_v0 }
  0x9f   : > { %2485 = vmatprep.mubr.msk.f32.mxu0 %vm2590_vm2, %v2580_v0 }
  0xa0   : > { %v888_v35 = vpop.permute.xlu0 %887  ;;  %2427 = vmatmul.mubr.msk.f32.vlgmr.msra.gmra.mrb[0].mxu1 %vm204_vm1, %v2425_v29  ;;  %2486 = vmatmul.mubr.msk.f32.vlgmr.msra.gmra.mrb[4].mxu0 %vm204_vm1, %v2425_v29  ;;  %v1124_v36 = vpop.permute.xlu1 %1123 }
  0xa1   : > { %903 = vmatpush1.msra.mxu0 %v890_v34  ;;  %v893_v37 = vsel %vm889_vm4, %v886_v32, %v888_v35  ;;  %966 = vmatprep.mubr.f32.mxu0 %v2580_v0 }
  0xa2   : > { %973 = vmatprep.subr.mxu1 %v893_v37  ;;  %1037 = vmatprep.mubr.f32.mxu1 %v2580_v0 }
  0xa3   : > { %974 = vmatpush1.msra.mxu1 %v892_v39 }
  0xa4   : > { %v1126_v40 = vpop.permute.xlu0 %1125  ;;  %2430 = vmatmul.mubr.msk.f32.vlgmr.msra.gmra.mrb[0].mxu0 %vm204_vm1, %v2429_v38  ;;  %v1122_v41 = vpop.permute.xlu1 %1121  ;;  %2488 = vmatprep.subr.mxu1 %v2580_v0 }
  0xa5   : > { %v1132_v42 = vsel %vm1131_vm5, %v1122_v41, %v1124_v36  ;;  %v1133_v43 = vsel %vm1131_vm5, %v1124_v36, %v1126_v40  ;;  %1208 = vmatprep.mubr.f32.mxu0 %v2580_v0 }
  0xa6   : > { %1144 = vmatprep.subr.mxu0 %v1133_v43 }
  0xa7   : > { %1145 = vmatpush1.msra.mxu0 %v1132_v42 }
  0xa8   : > { %v1128_v44 = vpop.permute.xlu0 %1127  ;;  %2431 = vmatmul.mubr.msk.f32.vlgmr.msra.gmra.mrb[0].mxu1 %vm204_vm1, %v2429_v38  ;;  %v1130_v45 = vpop.permute.xlu1 %1129  ;;  %2493 = vmatprep.subr.mxu0 %v2580_v0 }
  0xa9   : > { %2489 = vmatpush3.msra.mxu1 %v888_v35  ;;  %v1135_v46 = vsel %vm1131_vm5, %v1128_v44, %v1130_v45  ;;  %2490 = vmatprep.mubr.msk.f32.mxu1 %vm2590_vm2, %v2580_v0  ;;  %v1134_v48 = vsel %vm1131_vm5, %v1126_v40, %v1128_v44 }
  0xaa   : > { %1215 = vmatprep.subr.mxu1 %v1135_v46 }
  0xac   : > { %v1366_v49 = vpop.permute.xlu0 %1365  ;;  %2491 = vmatmul.mubr.msk.f32.vlgmr.msra.gmra.mrb[4].mxu1 %vm204_vm1, %v2429_v38  ;;  %2434 = vmatmul.mubr.msk.f32.vlgmr.msra.gmra.mrb[0].mxu0 %vm204_vm1, %v2433_v47  ;;  %v1368_v50 = vpop.permute.xlu1 %1367 }
  0xad   : > { %1216 = vmatpush1.msra.mxu1 %v1134_v48  ;;  %2494 = vmatpush3.msra.mxu0 %v1130_v45  ;;  %v1375_v51 = vsel %vm1373_vm6, %v1366_v49, %v1368_v50 }
  0xae   : > { %1386 = vmatprep.subr.mxu0 %v1375_v51  ;;  %1279 = vmatprep.mubr.f32.mxu1 %v2580_v0 }
  0xaf   : > { %2495 = vmatprep.mubr.msk.f32.mxu0 %vm2590_vm2, %v2580_v0 }
  0xb0   : > { %v1364_v52 = vpop.permute.xlu0 %1363  ;;  %2435 = vmatmul.mubr.msk.f32.vlgmr.msra.gmra.mrb[0].mxu1 %vm204_vm1, %v2433_v47  ;;  %2496 = vmatmul.mubr.msk.f32.vlgmr.msra.gmra.mrb[6].mxu0 %vm204_vm1, %v2433_v47  ;;  %v1370_v53 = vpop.permute.xlu1 %1369 }
  0xb1   : > { %v1374_v54 = vsel %vm1373_vm6, %v1364_v52, %v1366_v49  ;;  %1450 = vmatprep.mubr.f32.mxu0 %v2580_v0  ;;  %1521 = vmatprep.mubr.f32.mxu1 %v2580_v0  ;;  %v1376_v59 = vsel %vm1373_vm6, %v1368_v50, %v1370_v53 }
  0xb2   : > { %1387 = vmatpush1.msra.mxu0 %v1374_v54 }
  0xb4   : > { %v1372_v56 = vpop.permute.xlu0 %1371  ;;  %2438 = vmatmul.mubr.msk.f32.vlgmr.msra.gmra.mrb[0].mxu0 %vm204_vm1, %v2437_v55  ;;  %v1608_v57 = vpop.permute.xlu1 %1607 }
  0xb5   : > { %v1377_v58 = vsel %vm1373_vm6, %v1370_v53, %v1372_v56  ;;  %1692 = vmatprep.mubr.f32.mxu0 %v2580_v0 }
  0xb6   : > { %1457 = vmatprep.subr.mxu1 %v1377_v58 }
  0xb7   : > { %1458 = vmatpush1.msra.mxu1 %v1376_v59 }
  0xb8   : > { %v1610_v60 = vpop.permute.xlu0 %1609  ;;  %2439 = vmatmul.mubr.msk.f32.vlgmr.msra.gmra.mrb[0].mxu1 %vm204_vm1, %v2437_v55  ;;  %2498 = vmatprep.subr.mxu1 %v2580_v0  ;;  %v1606_v61 = vpop.permute.xlu1 %1605 }
  0xb9   : > { %v1616_v62 = vsel %vm1615_vm7, %v1606_v61, %v1608_v57  ;;  %2499 = vmatpush3.msra.mxu1 %v1372_v56  ;;  %v1617_v63 = vsel %vm1615_vm7, %v1608_v57, %v1610_v60  ;;  %2500 = vmatprep.mubr.msk.f32.mxu1 %vm2590_vm2, %v2580_v0 }
  0xba   : > { %1628 = vmatprep.subr.mxu0 %v1617_v63 }
  0xbb   : > { %1629 = vmatpush1.msra.mxu0 %v1616_v62 }
  0xbc   : > { %v1612_v2 = vpop.permute.xlu0 %1611  ;;  %2501 = vmatmul.mubr.msk.f32.vlgmr.msra.gmra.mrb[6].mxu1 %vm204_vm1, %v2437_v55  ;;  %2442 = vmatmul.mubr.msk.f32.vlgmr.msra.gmra.mrb[0].mxu0 %vm204_vm1, %v2441_v1  ;;  %v1614_v3 = vpop.permute.xlu1 %1613 }
  0xbd   : > { %v1618_v4 = vsel %vm1615_vm7, %v1610_v60, %v1612_v2  ;;  %2503 = vmatprep.subr.mxu0 %v2580_v0  ;;  %v1619_v5 = vsel %vm1615_vm7, %v1612_v2, %v1614_v3  ;;  %2505 = vmatprep.mubr.msk.f32.mxu0 %vm2590_vm2, %v2580_v0 }
  0xbe   : > { %1699 = vmatprep.subr.mxu1 %v1619_v5  ;;  %2504 = vmatpush3.msra.mxu0 %v1614_v3 }
  0xbf   : > { %1700 = vmatpush1.msra.mxu1 %v1618_v4  ;;  %1763 = vmatprep.mubr.f32.mxu1 %v2580_v0 }
  0xc0   : > { %v1850_v6 = vpop.permute.xlu0 %1849  ;;  %2506 = vmatmul.mubr.msk.f32.vlgmr.msra.gmra.mrb[8].mxu0 %vm204_vm1, %v2441_v1  ;;  %v1852_v7 = vpop.permute.xlu1 %1851  ;;  %2443 = vmatmul.mubr.msk.f32.vlgmr.msra.gmra.mrb[0].mxu1 %vm204_vm1, %v2441_v1 }
  0xc1   : > { %v1859_v8 = vsel %vm1857_vm8, %v1850_v6, %v1852_v7  ;;  %1934 = vmatprep.mubr.f32.mxu0 %v2580_v0  ;;  %2005 = vmatprep.mubr.f32.mxu1 %v2580_v0 }
  0xc2   : > { %1870 = vmatprep.subr.mxu0 %v1859_v8 }
  0xc4   : > { %v1848_v9 = vpop.permute.xlu0 %1847  ;;  %v1854_v10 = vpop.permute.xlu1 %1853 }
  0xc5   : > { %v1858_v12 = vsel %vm1857_vm8, %v1848_v9, %v1850_v6  ;;  %v1860_v16 = vsel %vm1857_vm8, %v1852_v7, %v1854_v10 }
  0xc6   : > { %1871 = vmatpush1.msra.mxu0 %v1858_v12 }
  0xc7   : > { %2446 = vmatmul.mubr.msk.f32.vlgmr.msra.gmra.mrb[0].mxu0 %vm204_vm1, %v2445_v11 }
  0xc8   : > { %v1856_v13 = vpop.permute.xlu0 %1855  ;;  %v2092_v14 = vpop.permute.xlu1 %2091  ;;  %2176 = vmatprep.mubr.f32.mxu0 %v2580_v0 }
  0xc9   : > { %v1861_v15 = vsel %vm1857_vm8, %v1854_v10, %v1856_v13 }
  0xca   : > { %1941 = vmatprep.subr.mxu1 %v1861_v15 }
  0xcb   : > { %1942 = vmatpush1.msra.mxu1 %v1860_v16 }
  0xcc   : > { %v2094_v17 = vpop.permute.xlu0 %2093  ;;  %2447 = vmatmul.mubr.msk.f32.vlgmr.msra.gmra.mrb[0].mxu1 %vm204_vm1, %v2445_v11  ;;  %2508 = vmatprep.subr.mxu1 %v2580_v0  ;;  %v2090_v18 = vpop.permute.xlu1 %2089 }
  0xcd   : > { %v2100_v19 = vsel %vm2099_vm9, %v2090_v18, %v2092_v14  ;;  %2509 = vmatpush3.msra.mxu1 %v1856_v13  ;;  %v2101_v20 = vsel %vm2099_vm9, %v2092_v14, %v2094_v17  ;;  %2510 = vmatprep.mubr.msk.f32.mxu1 %vm2590_vm2, %v2580_v0 }
  0xce   : > { %2112 = vmatprep.subr.mxu0 %v2101_v20 }
  0xcf   : > { %2113 = vmatpush1.msra.mxu0 %v2100_v19 }
  0xd0   : > { %v2096_v22 = vpop.permute.xlu0 %2095  ;;  %2511 = vmatmul.mubr.msk.f32.vlgmr.msra.gmra.mrb[8].mxu1 %vm204_vm1, %v2445_v11  ;;  %2450 = vmatmul.mubr.msk.f32.vlgmr.msra.gmra.mrb[0].mxu0 %vm204_vm1, %v2449_v21  ;;  %v2098_v23 = vpop.permute.xlu1 %2097 }
  0xd1   : > { %v2102_v24 = vsel %vm2099_vm9, %v2094_v17, %v2096_v22  ;;  %v2103_v25 = vsel %vm2099_vm9, %v2096_v22, %v2098_v23  ;;  %2513 = vmatprep.subr.mxu0 %v2580_v0  ;;  %2247 = vmatprep.mubr.f32.mxu1 %v2580_v0 }
  0xd2   : > { %2183 = vmatprep.subr.mxu1 %v2103_v25  ;;  %2514 = vmatpush3.msra.mxu0 %v2098_v23 }
  0xd3   : > { %2184 = vmatpush1.msra.mxu1 %v2102_v24  ;;  %2515 = vmatprep.mubr.msk.f32.mxu0 %vm2590_vm2, %v2580_v0 }
  0xd4   : > { %2451 = vmatmul.mubr.msk.f32.vlgmr.msra.gmra.mrb[0].mxu1 %vm204_vm1, %v2449_v21  ;;  %2516 = vmatmul.mubr.msk.f32.vlgmr.msra.gmra.mrb[10].mxu0 %vm204_vm1, %v2449_v21 }
  0xe1   : > { %v2333_v45 = vpop.permute.xlu0 %2332 }
 0x163   : > { %v416_v26 = vpop.f32.mrb[2].mxu0 }
 0x164   : > { %v2477_v27 = vpop.f32.mrb[3].mxu0 }
 0x16f   : > { %v631_v28 = vpop.f32.mrb[2].mxu1 }
 0x170   : > { %v632_v29 = vadd.f32 %v631_v28, %v416_v26  ;;  %v2482_v30 = vpop.f32.mrb[3].mxu1 }
 0x173   : > { %v868_v31 = vpop.f32.mrb[4].mxu0 }
 0x174   : > { %v876_v32 = vadd.f32 %v868_v31, %v632_v29  ;;  %v2487_v33 = vpop.f32.mrb[5].mxu0 }
 0x17f   : > { %v1110_v34 = vpop.f32.mrb[4].mxu1 }
 0x180   : > { %v1118_v35 = vadd.f32 %v1110_v34, %v876_v32  ;;  %v2492_v36 = vpop.f32.mrb[5].mxu1 }
 0x183   : > { %v1352_v37 = vpop.f32.mrb[6].mxu0 }
 0x184   : > { %v1360_v38 = vadd.f32 %v1352_v37, %v1118_v35  ;;  %v2497_v39 = vpop.f32.mrb[7].mxu0 }
 0x18f   : > { %v1594_v0 = vpop.f32.mrb[6].mxu1 }
 0x190   : > { %v1602_v40 = vadd.f32 %v1594_v0, %v1360_v38  ;;  %v2502_v41 = vpop.f32.mrb[7].mxu1 }
 0x193   : > { %v1836_v42 = vpop.f32.mrb[8].mxu0 }
 0x194   : > { %v1844_v43 = vadd.f32 %v1836_v42, %v1602_v40  ;;  %v2507_v44 = vpop.f32.mrb[9].mxu0 }
 0x1a3   : > { %v2078_v46 = vpop.f32.mrb[8].mxu1  ;;  %v2178_v47 = vpop.f32.mrb[0].mxu0 }
 0x1a4   : > { %v2086_v48 = vadd.f32 %v2078_v46, %v1844_v43  ;;  %v2335_v49 = vadd.f32 %v2333_v45, %v2178_v47  ;;  %v2180_v50 = vpop.f32.mrb[1].mxu0  ;;  %v2512_v51 = vpop.f32.mrb[9].mxu1 }
 0x1a5   : > { %v2336_v52 = vadd.f32 %v2333_v45, %v2180_v50 }
 0x1a6   : > { %v2340_v53 = vmul.f32 0.01, %v2335_v49 }
 0x1a7   : > { %v2341_v54 = vmul.f32 0.01, %v2336_v52  ;;  %v2249_v55 = vpop.f32.mrb[0].mxu1  ;;  %v2320_v56 = vpop.f32.mrb[10].mxu0 }
 0x1a8   : > { %v2345_v57 = vmax.f32 %v2335_v49, %v2340_v53  ;;  %v2337_v58 = vadd.f32 %v2333_v45, %v2249_v55  ;;  %v2328_v59 = vadd.f32 %v2320_v56, %v2086_v48  ;;  %v2251_v60 = vpop.f32.mrb[1].mxu1  ;;  %v2517_v61 = vpop.f32.mrb[11].mxu0 }
 0x1a9   : > { %v2346_v62 = vmax.f32 %v2336_v52, %v2341_v54  ;;  %v2338_v63 = vadd.f32 %v2333_v45, %v2251_v60 }
 0x1aa   : > { %2350 = vst [vmem:[%s170_s24] sm:$0xff] %v2345_v57  ;;  %v2342_v1 = vmul.f32 0.01, %v2337_v58  ;;  %v2339_v2 = vadd.f32 %v2333_v45, %v2328_v59 }
 0x1ab   : > { %2351 = vst [vmem:[%s170_s24 + $0x8] sm:$0xff] %v2346_v62  ;;  %v2343_v3 = vmul.f32 0.01, %v2338_v63 }
 0x1ac   : > { %v2347_v4 = vmax.f32 %v2337_v58, %v2342_v1  ;;  %v2344_v5 = vmul.f32 0.01, %v2339_v2 }
 0x1ad   : > { %v2348_v6 = vmax.f32 %v2338_v63, %v2343_v3 }
 0x1ae   : > { %2352 = vst [vmem:[%s170_s24 + $0x10] sm:$0xff] %v2347_v4  ;;  %v2349_v7 = vmax.f32 %v2339_v2, %v2344_v5 }
 0x1af   : > { %2353 = vst [vmem:[%s170_s24 + $0x18] sm:$0xff] %v2348_v6 }
 0x1b0   : > { %2355 = vst.msk [vmem:[%s170_s24 + $0x20] sm:$0xff] %vm2354_vm10, %v2349_v7 }
 0x1b1 PF: > { %s13_s12 = sadd.s32 1, %s2578_s12  }
 0x1b2   : > { %p10_p4 = scmp.ge.s32.totalorder %s13_s12, 4  }
 0x1b4   :  { %12 = sbr.rel (!%p10_p4) target bundleno = 1 (0x1), region = 70 }

// kernel: net_vgg_lstm_forward.23
= control target key start
LH: loop header
LB: loop body
LE: loop exit
PB: predicated region body
PF: predicated region fallthrough
CT: control target
= control target key end

     0   :  { %s2707_s12 = smov 0   ;;  %s2954_s0 = inlined_call_operand.vmem [shape: f32[2,3,646], index: 0, kind: input, shape index: {}]   ;;  %s2955_s1 = inlined_call_operand.vmem [shape: f32[9,8,3], index: 1, kind: input, shape index: {}]   ;;  %s2956_s2 = inlined_call_operand.vmem [shape: f32[8,1], index: 2, kind: input, shape index: {}]   ;;  %s2957_s3 = inlined_call_operand.vmem [shape: f32[2,8,544], index: 3, kind: output, shape index: {}]  }
   0x1 LB: > { %s2460_s13 = sadd.s32 4294967295, %s2674_s12   ;;  %p2464_p0 = scmp.ge.s32.totalorder %s2674_s12, 1  ;;  %s2674_s12 = sphi %s2707_s12, %s13_s12  }
   0x2   : > { %p137_p1 = scmp.lt.s32.totalorder %s2674_s12, 3 }
   0x4   : > { %p138_p2 = pnand %p2464_p0, %p137_p1 }
   0x5   : > { %p161_p3 = scmp.lt.s32.totalorder (!%p138_p2), %s2460_s13, 1  ;;  %v2676_v0 = vmov (!%p138_p2), 0.0   ;;  %s2677_s18 = smov (!%p138_p2), 127   ;;  %v2684_v6 = vmov (!%p138_p2), 0   ;;  %v2378_v7 = vld [vmem:[%s2956_s2] sm:$0xff] (!%p138_p2)  ;;  %vm192_vm0 = vcmask (!%p138_p2), 1039360  }
   0x6   : > { %141 = sbr.rel (%p138_p2) target bundleno = 433 (0x1b1), region = 32  ;;  %347 = vmatprep.mubr.f32.mxu1 (!%p138_p2), %v2676_v0  ;;  %276 = vmatprep.mubr.f32.mxu0 (!%p138_p2), %v2676_v0  ;;  %s2678_s19 = smov (!%p138_p2), 126   ;;  %vm201_vm1 = vcmask (!%p138_p2), 1042432   ;;  %v2467_v14 = vld [vmem:[%s2955_s1 + $0x8] sm:$0xff] (!%p138_p2)  ;;  %vm197_vm2 = vcmask (!%p138_p2), 23552   ;;  %vm2686_vm3 = vmmov (!%p138_p2), 0  }
   0x7   : > { %s2679_s20 = smov (!%p138_p2), 94   ;;  %s2680_s21 = smov (!%p138_p2), 93   ;;  %2665 = vset.pattern.permute.xlu0 (!%p138_p2), %v2684_v6  ;;  %v174_v21 = vld [vmem:[%s2955_s1] sm:$0xff] (!%p138_p2)  ;;  %vm661_vm4 = vcmask (!%p138_p2), 1031168   ;;  %v2484_v30 = vld [vmem:[%s2955_s1 + $0x10] sm:$0xff] (!%p138_p2)  ;;  %vm908_vm5 = vcmask (!%p138_p2), 769024  }
   0x8   : > { %s2681_s22 = smov (!%p138_p2), 92   ;;  %s2682_s23 = smov (!%p138_p2), 60   ;;  %v2493_v37 = vld [vmem:[%s2955_s1 + $0x18] sm:$0xff] (!%p138_p2)  ;;  %vm1155_vm6 = vcmask (!%p138_p2), 760832   ;;  %v2502_v48 = vld [vmem:[%s2955_s1 + $0x20] sm:$0xff] (!%p138_p2)  ;;  %vm1402_vm7 = vcmask (!%p138_p2), 752640  }
   0x9   : > { %s2683_s24 = smov (!%p138_p2), 59   ;;  %s2685_s25 = smov (!%p138_p2), 58   ;;  %v2511_v58 = vld [vmem:[%s2955_s1 + $0x28] sm:$0xff] (!%p138_p2)  ;;  %vm1649_vm8 = vcmask (!%p138_p2), 490496   ;;  %vm1896_vm9 = vcmask (!%p138_p2), 482304   ;;  %vm2143_vm10 = vcmask (!%p138_p2), 474112  }
   0xa   : > { %vm2403_vm11 = vcmask (!%p138_p2), 261120  }
   0xd   : > { %s2959_s13 = smov (!%p161_p3, %s2460_s13), 1 }
   0xe   : > { %s2644_s14 = smul.u32 24, %s2959_s13 }
  0x10   : > { %s165_s17 = scalar_lea.vmem %s2954_s0, %s2644_s14 }
  0x11   : > { %v2723_v1 = vld [vmem:[%s165_s17 + $0x8] sm:$0x77]  ;;  %v2725_v2 = vld [vmem:[%s165_s17] sm:$0x77]  ;;  %v2733_v4 = vld [vmem:[%s165_s17 + $0x10] sm:$0x77] }
  0x12   : > { %186 = vrot.lane.b32.xlu0 %v2723_v1, %s2677_s18  ;;  %182 = vrot.lane.b32.xlu1 %v2725_v2, %s2677_s18  ;;  %v2731_v3 = vcombine.high %v2723_v1, %v2723_v1  ;;  %v2739_v5 = vcombine.high %v2725_v2, %v2725_v2 }
  0x16   : > { %190 = vrot.lane.b32.xlu0 %v2733_v4, %s2677_s18  ;;  %188 = vrot.lane.b32.xlu1 %v2731_v3, %s2677_s18 }
  0x1a   : > { %653 = vrot.lane.b32.xlu1 %v2739_v5, %s2678_s19  ;;  %184 = vrot.lane.b32.xlu0 %v2739_v5, %s2677_s18 }
  0x1e   : > { %651 = vrot.lane.b32.xlu1 %v2725_v2, %s2678_s19  ;;  %655 = vrot.lane.b32.xlu0 %v2723_v1, %s2678_s19 }
  0x22   : > { %659 = vrot.lane.b32.xlu1 %v2733_v4, %s2678_s19  ;;  %657 = vrot.lane.b32.xlu0 %v2731_v3, %s2678_s19 }
  0x26   : > { %902 = vrot.lane.b32.xlu1 %v2723_v1, %s2679_s20  ;;  %900 = vrot.lane.b32.xlu0 %v2739_v5, %s2679_s20 }
  0x2a   : > { %904 = vrot.lane.b32.xlu1 %v2731_v3, %s2679_s20  ;;  %898 = vrot.lane.b32.xlu0 %v2725_v2, %s2679_s20 }
  0x2e   : > { %1147 = vrot.lane.b32.xlu1 %v2739_v5, %s2680_s21  ;;  %906 = vrot.lane.b32.xlu0 %v2733_v4, %s2679_s20 }
  0x32   : > { %1145 = vrot.lane.b32.xlu1 %v2725_v2, %s2680_s21  ;;  %1149 = vrot.lane.b32.xlu0 %v2723_v1, %s2680_s21 }
  0x36   : > { %1153 = vrot.lane.b32.xlu1 %v2733_v4, %s2680_s21  ;;  %1151 = vrot.lane.b32.xlu0 %v2731_v3, %s2680_s21  ;;  %s2645_s21 = smul.u32 40, %s2959_s13 }
  0x3a   : > { %1396 = vrot.lane.b32.xlu1 %v2723_v1, %s2681_s22  ;;  %1394 = vrot.lane.b32.xlu0 %v2739_v5, %s2681_s22 }
  0x3e   : > { %1398 = vrot.lane.b32.xlu1 %v2731_v3, %s2681_s22  ;;  %1392 = vrot.lane.b32.xlu0 %v2725_v2, %s2681_s22 }
  0x42   : > { %1641 = vrot.lane.b32.xlu1 %v2739_v5, %s2682_s23  ;;  %1400 = vrot.lane.b32.xlu0 %v2733_v4, %s2681_s22 }
  0x46   : > { %1639 = vrot.lane.b32.xlu1 %v2725_v2, %s2682_s23  ;;  %1643 = vrot.lane.b32.xlu0 %v2723_v1, %s2682_s23 }
  0x4a   : > { %1647 = vrot.lane.b32.xlu1 %v2733_v4, %s2682_s23  ;;  %1645 = vrot.lane.b32.xlu0 %v2731_v3, %s2682_s23 }
  0x4e   : > { %1890 = vrot.lane.b32.xlu1 %v2723_v1, %s2683_s24  ;;  %1888 = vrot.lane.b32.xlu0 %v2739_v5, %s2683_s24 }
  0x52   : > { %1892 = vrot.lane.b32.xlu1 %v2731_v3, %s2683_s24  ;;  %1886 = vrot.lane.b32.xlu0 %v2725_v2, %s2683_s24 }
  0x56   : > { %2135 = vrot.lane.b32.xlu1 %v2739_v5, %s2685_s25  ;;  %1894 = vrot.lane.b32.xlu0 %v2733_v4, %s2683_s24  ;;  %s170_s24 = scalar_lea.vmem %s2957_s3, %s2645_s21 }
  0x5a   : > { %2133 = vrot.lane.b32.xlu1 %v2725_v2, %s2685_s25  ;;  %2137 = vrot.lane.b32.xlu0 %v2723_v1, %s2685_s25 }
  0x5e   : > { %2141 = vrot.lane.b32.xlu1 %v2733_v4, %s2685_s25  ;;  %2139 = vrot.lane.b32.xlu0 %v2731_v3, %s2685_s25 }
  0x62   : > { %2381 = vperm.xlu0 %2665, %v2378_v7  }
  0x84   : > { %v187_v8 = vpop.permute.xlu0 %186  ;;  %v183_v9 = vpop.permute.xlu1 %182 }
  0x88   : > { %v191_v10 = vpop.permute.xlu0 %190  ;;  %v189_v11 = vpop.permute.xlu1 %188 }
  0x89   : > { %v196_v12 = vsel %vm192_vm0, %v189_v11, %v191_v10  ;;  %v195_v13 = vsel %vm192_vm0, %v187_v8, %v189_v11 }
  0x8a   : > { %2471 = vmatprep.subr.msk.mxu1 %vm201_vm1, %v196_v12  ;;  %v2529_v12 = vld [vmem:[%s2955_s1 + $0x38] sm:$0xff] }
  0x8b   : > { %2472 = vmatpush1.msk.msra.mxu1 %vm201_vm1, %v195_v13 }
  0x8c   : > { %2473 = vmatmul.mubr.msk.f32.vlgmr.msra.gmra.mrb[0].mxu1 %vm197_vm2, %v2467_v14  ;;  %v654_v15 = vpop.permute.xlu1 %653  ;;  %v185_v16 = vpop.permute.xlu0 %184  ;;  %2479 = vmatprep.subr.msk.mxu1 %vm201_vm1, %v2731_v3 }
  0x8d   : > { %v194_v17 = vsel %vm192_vm0, %v185_v16, %v187_v8  ;;  %v193_v18 = vsel %vm192_vm0, %v183_v9, %v185_v16  ;;  %2480 = vmatpush1.msk.msra.mxu1 %vm201_vm1, %v2723_v1  ;;  %572 = vmatprep.mubr.f32.mxu1 %v2676_v0 }
  0x8e   : > { %2468 = vmatprep.subr.msk.mxu0 %vm201_vm1, %v194_v17  ;;  %2572 = vmatprep.subr.mxu1 %v2676_v0 }
  0x8f   : > { %2469 = vmatpush1.msk.msra.mxu0 %vm201_vm1, %v193_v18 }
  0x90   : > { %v652_v19 = vpop.permute.xlu1 %651  ;;  %2470 = vmatmul.mubr.msk.f32.vlgmr.msra.gmra.mrb[0].mxu0 %vm197_vm2, %v2467_v14  ;;  %2567 = vmatprep.subr.mxu0 %v2676_v0  ;;  %v656_v20 = vpop.permute.xlu0 %655 }
  0x91   : > { %2568 = vmatpush3.msk.msra.mxu0 %vm201_vm1, %v191_v10  ;;  %2569 = vmatprep.mubr.msk.f32.mxu0 %vm2686_vm3, %v2676_v0  ;;  %v663_v24 = vsel %vm661_vm4, %v654_v15, %v656_v20  ;;  %v662_v26 = vsel %vm661_vm4, %v652_v19, %v654_v15 }
  0x92   : > { %2476 = vmatprep.subr.msk.mxu0 %vm201_vm1, %v2739_v5  ;;  %v2520_v5 = vld [vmem:[%s2955_s1 + $0x30] sm:$0xff] }
  0x94   : > { %2481 = vmatmul.mubr.msk.f32.vlgmr.msra.gmra.mrb[0].mxu1 %vm197_vm2, %v174_v21  ;;  %v660_v22 = vpop.permute.xlu1 %659  ;;  %2570 = vmatmul.mubr.msk.f32.vlgmr.msra.gmra.mrb[2].mxu0 %vm197_vm2, %v2467_v14  ;;  %v658_v23 = vpop.permute.xlu0 %657 }
  0x95   : > { %2477 = vmatpush1.msk.msra.mxu0 %vm201_vm1, %v2725_v2  ;;  %v665_v25 = vsel %vm661_vm4, %v658_v23, %v660_v22  ;;  %2573 = vmatpush3.msk.msra.mxu1 %vm201_vm1, %v2733_v4  ;;  %v664_v27 = vsel %vm661_vm4, %v656_v20, %v658_v23 }
  0x96   : > { %2485 = vmatprep.subr.msk.mxu0 %vm201_vm1, %v663_v24  ;;  %2488 = vmatprep.subr.msk.mxu1 %vm201_vm1, %v665_v25 }
  0x97   : > { %501 = vmatprep.mubr.f32.mxu0 %v2676_v0  ;;  %2574 = vmatprep.mubr.msk.f32.mxu1 %vm2686_vm3, %v2676_v0 }
  0x98   : > { %2575 = vmatmul.mubr.msk.f32.vlgmr.msra.gmra.mrb[2].mxu1 %vm197_vm2, %v174_v21  ;;  %v903_v28 = vpop.permute.xlu1 %902  ;;  %2478 = vmatmul.mubr.msk.f32.vlgmr.msra.gmra.mrb[0].mxu0 %vm197_vm2, %v174_v21  ;;  %v901_v29 = vpop.permute.xlu0 %900  ;;  %v2538_v21 = vld [vmem:[%s2955_s1 + $0x40] sm:$0xff] }
  0x99   : > { %2486 = vmatpush1.msk.msra.mxu0 %vm201_vm1, %v662_v26  ;;  %2489 = vmatpush1.msk.msra.mxu1 %vm201_vm1, %v664_v27  ;;  %v910_v35 = vsel %vm908_vm5, %v901_v29, %v903_v28 }
  0x9a   : > { %814 = vmatprep.mubr.f32.mxu1 %v2676_v0  ;;  %743 = vmatprep.mubr.f32.mxu0 %v2676_v0 }
  0x9b   : > { %2577 = vmatprep.subr.mxu0 %v2676_v0 }
  0x9c   : > { %v905_v31 = vpop.permute.xlu1 %904  ;;  %2490 = vmatmul.mubr.msk.f32.vlgmr.msra.gmra.mrb[0].mxu1 %vm197_vm2, %v2484_v30  ;;  %v899_v32 = vpop.permute.xlu0 %898 }
  0x9d   : > { %1061 = vmatprep.mubr.f32.mxu1 %v2676_v0  ;;  %v911_v38 = vsel %vm908_vm5, %v903_v28, %v905_v31  ;;  %v909_v39 = vsel %vm908_vm5, %v899_v32, %v901_v29 }
  0xa0   : > { %v1148_v33 = vpop.permute.xlu1 %1147  ;;  %2487 = vmatmul.mubr.msk.f32.vlgmr.msra.gmra.mrb[0].mxu0 %vm197_vm2, %v2484_v30  ;;  %v907_v34 = vpop.permute.xlu0 %906 }
  0xa1   : > { %2578 = vmatpush3.msk.msra.mxu0 %vm201_vm1, %v660_v22  ;;  %v912_v36 = vsel %vm908_vm5, %v905_v31, %v907_v34  ;;  %2579 = vmatprep.mubr.msk.f32.mxu0 %vm2686_vm3, %v2676_v0 }
  0xa2   : > { %2494 = vmatprep.subr.msk.mxu0 %vm201_vm1, %v910_v35  ;;  %2497 = vmatprep.subr.msk.mxu1 %vm201_vm1, %v912_v36 }
  0xa3   : > { %2498 = vmatpush1.msk.msra.mxu1 %vm201_vm1, %v911_v38 }
  0xa4   : > { %v1146_v40 = vpop.permute.xlu1 %1145  ;;  %2580 = vmatmul.mubr.msk.f32.vlgmr.msra.gmra.mrb[4].mxu0 %vm197_vm2, %v2484_v30  ;;  %2499 = vmatmul.mubr.msk.f32.vlgmr.msra.gmra.mrb[0].mxu1 %vm197_vm2, %v2493_v37  ;;  %v1150_v41 = vpop.permute.xlu0 %1149 }
  0xa5   : > { %2495 = vmatpush1.msk.msra.mxu0 %vm201_vm1, %v909_v39  ;;  %2582 = vmatprep.subr.mxu1 %v2676_v0  ;;  %v1157_v42 = vsel %vm1155_vm6, %v1148_v33, %v1150_v41  ;;  %v1156_v43 = vsel %vm1155_vm6, %v1146_v40, %v1148_v33 }
  0xa6   : > { %2583 = vmatpush3.msk.msra.mxu1 %vm201_vm1, %v907_v34  ;;  %2503 = vmatprep.subr.msk.mxu0 %vm201_vm1, %v1157_v42 }
  0xa7   : > { %990 = vmatprep.mubr.f32.mxu0 %v2676_v0  ;;  %2584 = vmatprep.mubr.msk.f32.mxu1 %vm2686_vm3, %v2676_v0 }
  0xa8   : > { %v1154_v44 = vpop.permute.xlu1 %1153  ;;  %2496 = vmatmul.mubr.msk.f32.vlgmr.msra.gmra.mrb[0].mxu0 %vm197_vm2, %v2493_v37  ;;  %2585 = vmatmul.mubr.msk.f32.vlgmr.msra.gmra.mrb[4].mxu1 %vm197_vm2, %v2493_v37  ;;  %v1152_v45 = vpop.permute.xlu0 %1151 }
  0xa9   : > { %2504 = vmatpush1.msk.msra.mxu0 %vm201_vm1, %v1156_v43  ;;  %v1158_v46 = vsel %vm1155_vm6, %v1150_v41, %v1152_v45  ;;  %v1159_v47 = vsel %vm1155_vm6, %v1152_v45, %v1154_v44  ;;  %1237 = vmatprep.mubr.f32.mxu0 %v2676_v0 }
  0xaa   : > { %2506 = vmatprep.subr.msk.mxu1 %vm201_vm1, %v1159_v47  ;;  %1308 = vmatprep.mubr.f32.mxu1 %v2676_v0 }
  0xab   : > { %2507 = vmatpush1.msk.msra.mxu1 %vm201_vm1, %v1158_v46  ;;  %2587 = vmatprep.subr.mxu0 %v2676_v0 }
  0xac   : > { %v1397_v49 = vpop.permute.xlu1 %1396  ;;  %v1395_v50 = vpop.permute.xlu0 %1394  ;;  %2508 = vmatmul.mubr.msk.f32.vlgmr.msra.gmra.mrb[0].mxu1 %vm197_vm2, %v2502_v48 }
  0xad   : > { %1555 = vmatprep.mubr.f32.mxu1 %v2676_v0  ;;  %v1404_v53 = vsel %vm1402_vm7, %v1395_v50, %v1397_v49 }
  0xb0   : > { %v1399_v51 = vpop.permute.xlu1 %1398  ;;  %2505 = vmatmul.mubr.msk.f32.vlgmr.msra.gmra.mrb[0].mxu0 %vm197_vm2, %v2502_v48  ;;  %v1393_v52 = vpop.permute.xlu0 %1392 }
  0xb1   : > { %2588 = vmatpush3.msk.msra.mxu0 %vm201_vm1, %v1154_v44  ;;  %2589 = vmatprep.mubr.msk.f32.mxu0 %vm2686_vm3, %v2676_v0  ;;  %v1403_v54 = vsel %vm1402_vm7, %v1393_v52, %v1395_v50  ;;  %v1405_v59 = vsel %vm1402_vm7, %v1397_v49, %v1399_v51 }
  0xb2   : > { %2512 = vmatprep.subr.msk.mxu0 %vm201_vm1, %v1404_v53 }
  0xb4   : > { %v1642_v55 = vpop.permute.xlu1 %1641  ;;  %2590 = vmatmul.mubr.msk.f32.vlgmr.msra.gmra.mrb[6].mxu0 %vm197_vm2, %v2502_v48  ;;  %v1401_v56 = vpop.permute.xlu0 %1400 }
  0xb5   : > { %2513 = vmatpush1.msk.msra.mxu0 %vm201_vm1, %v1403_v54  ;;  %v1406_v57 = vsel %vm1402_vm7, %v1399_v51, %v1401_v56  ;;  %1484 = vmatprep.mubr.f32.mxu0 %v2676_v0 }
  0xb6   : > { %2515 = vmatprep.subr.msk.mxu1 %vm201_vm1, %v1406_v57 }
  0xb7   : > { %2516 = vmatpush1.msk.msra.mxu1 %vm201_vm1, %v1405_v59 }
  0xb8   : > { %v1640_v60 = vpop.permute.xlu1 %1639  ;;  %2514 = vmatmul.mubr.msk.f32.vlgmr.msra.gmra.mrb[0].mxu0 %vm197_vm2, %v2511_v58  ;;  %2517 = vmatmul.mubr.msk.f32.vlgmr.msra.gmra.mrb[0].mxu1 %vm197_vm2, %v2511_v58  ;;  %v1644_v61 = vpop.permute.xlu0 %1643 }
  0xb9   : > { %v1650_v62 = vsel %vm1649_vm8, %v1640_v60, %v1642_v55  ;;  %2592 = vmatprep.subr.mxu1 %v2676_v0  ;;  %v1651_v63 = vsel %vm1649_vm8, %v1642_v55, %v1644_v61  ;;  %2594 = vmatprep.mubr.msk.f32.mxu1 %vm2686_vm3, %v2676_v0 }
  0xba   : > { %2593 = vmatpush3.msk.msra.mxu1 %vm201_vm1, %v1401_v56  ;;  %2521 = vmatprep.subr.msk.mxu0 %vm201_vm1, %v1651_v63 }
  0xbb   : > { %2522 = vmatpush1.msk.msra.mxu0 %vm201_vm1, %v1650_v62  ;;  %1731 = vmatprep.mubr.f32.mxu0 %v2676_v0 }
  0xbc   : > { %v1648_v1 = vpop.permute.xlu1 %1647  ;;  %2595 = vmatmul.mubr.msk.f32.vlgmr.msra.gmra.mrb[6].mxu1 %vm197_vm2, %v2511_v58  ;;  %v1646_v2 = vpop.permute.xlu0 %1645  ;;  %2597 = vmatprep.subr.mxu0 %v2676_v0 }
  0xbd   : > { %v1652_v3 = vsel %vm1649_vm8, %v1644_v61, %v1646_v2  ;;  %v1653_v4 = vsel %vm1649_vm8, %v1646_v2, %v1648_v1  ;;  %1802 = vmatprep.mubr.f32.mxu1 %v2676_v0 }
  0xbe   : > { %2524 = vmatprep.subr.msk.mxu1 %vm201_vm1, %v1653_v4 }
  0xbf   : > { %2525 = vmatpush1.msk.msra.mxu1 %vm201_vm1, %v1652_v3 }
  0xc0   : > { %v1891_v6 = vpop.permute.xlu1 %1890  ;;  %2523 = vmatmul.mubr.msk.f32.vlgmr.msra.gmra.mrb[0].mxu0 %vm197_vm2, %v2520_v5  ;;  %v1889_v7 = vpop.permute.xlu0 %1888  ;;  %2526 = vmatmul.mubr.msk.f32.vlgmr.msra.gmra.mrb[0].mxu1 %vm197_vm2, %v2520_v5 }
  0xc1   : > { %2598 = vmatpush3.msk.msra.mxu0 %vm201_vm1, %v1648_v1  ;;  %v1898_v8 = vsel %vm1896_vm9, %v1889_v7, %v1891_v6  ;;  %2599 = vmatprep.mubr.msk.f32.mxu0 %vm2686_vm3, %v2676_v0 }
  0xc2   : > { %2530 = vmatprep.subr.msk.mxu0 %vm201_vm1, %v1898_v8  ;;  %2049 = vmatprep.mubr.f32.mxu1 %v2676_v0 }
  0xc4   : > { %v1893_v9 = vpop.permute.xlu1 %1892  ;;  %2600 = vmatmul.mubr.msk.f32.vlgmr.msra.gmra.mrb[8].mxu0 %vm197_vm2, %v2520_v5  ;;  %v1887_v10 = vpop.permute.xlu0 %1886 }
  0xc5   : > { %v1897_v11 = vsel %vm1896_vm9, %v1887_v10, %v1889_v7  ;;  %1978 = vmatprep.mubr.f32.mxu0 %v2676_v0  ;;  %v1899_v16 = vsel %vm1896_vm9, %v1891_v6, %v1893_v9 }
  0xc6   : > { %2531 = vmatpush1.msk.msra.mxu0 %vm201_vm1, %v1897_v11 }
  0xc8   : > { %v2136_v13 = vpop.permute.xlu1 %2135  ;;  %2532 = vmatmul.mubr.msk.f32.vlgmr.msra.gmra.mrb[0].mxu0 %vm197_vm2, %v2529_v12  ;;  %v1895_v14 = vpop.permute.xlu0 %1894 }
  0xc9   : > { %v1900_v15 = vsel %vm1896_vm9, %v1893_v9, %v1895_v14  ;;  %2225 = vmatprep.mubr.f32.mxu0 %v2676_v0 }
  0xca   : > { %2533 = vmatprep.subr.msk.mxu1 %vm201_vm1, %v1900_v15 }
  0xcb   : > { %2534 = vmatpush1.msk.msra.mxu1 %vm201_vm1, %v1899_v16 }
  0xcc   : > { %v2134_v17 = vpop.permute.xlu1 %2133  ;;  %2535 = vmatmul.mubr.msk.f32.vlgmr.msra.gmra.mrb[0].mxu1 %vm197_vm2, %v2529_v12  ;;  %2602 = vmatprep.subr.mxu1 %v2676_v0  ;;  %v2138_v18 = vpop.permute.xlu0 %2137 }
  0xcd   : > { %v2144_v19 = vsel %vm2143_vm10, %v2134_v17, %v2136_v13  ;;  %v2145_v20 = vsel %vm2143_vm10, %v2136_v13, %v2138_v18  ;;  %2603 = vmatpush3.msk.msra.mxu1 %vm201_vm1, %v1895_v14  ;;  %2604 = vmatprep.mubr.msk.f32.mxu1 %vm2686_vm3, %v2676_v0 }
  0xce   : > { %2539 = vmatprep.subr.msk.mxu0 %vm201_vm1, %v2145_v20 }
  0xcf   : > { %2540 = vmatpush1.msk.msra.mxu0 %vm201_vm1, %v2144_v19 }
  0xd0   : > { %v2142_v22 = vpop.permute.xlu1 %2141  ;;  %2605 = vmatmul.mubr.msk.f32.vlgmr.msra.gmra.mrb[8].mxu1 %vm197_vm2, %v2529_v12  ;;  %2541 = vmatmul.mubr.msk.f32.vlgmr.msra.gmra.mrb[0].mxu0 %vm197_vm2, %v2538_v21  ;;  %v2140_v23 = vpop.permute.xlu0 %2139 }
  0xd1   : > { %v2146_v24 = vsel %vm2143_vm10, %v2138_v18, %v2140_v23  ;;  %v2147_v25 = vsel %vm2143_vm10, %v2140_v23, %v2142_v22  ;;  %2607 = vmatprep.subr.mxu0 %v2676_v0  ;;  %2296 = vmatprep.mubr.f32.mxu1 %v2676_v0 }
  0xd2   : > { %2542 = vmatprep.subr.msk.mxu1 %vm201_vm1, %v2147_v25  ;;  %2608 = vmatpush3.msk.msra.mxu0 %vm201_vm1, %v2142_v22 }
  0xd3   : > { %2543 = vmatpush1.msk.msra.mxu1 %vm201_vm1, %v2146_v24  ;;  %2609 = vmatprep.mubr.msk.f32.mxu0 %vm2686_vm3, %v2676_v0 }
  0xd4   : > { %2544 = vmatmul.mubr.msk.f32.vlgmr.msra.gmra.mrb[0].mxu1 %vm197_vm2, %v2538_v21  ;;  %2610 = vmatmul.mubr.msk.f32.vlgmr.msra.gmra.mrb[10].mxu0 %vm197_vm2, %v2538_v21 }
  0xe1   : > { %v2382_v45 = vpop.permute.xlu0 %2381 }
 0x167   : > { %v420_v26 = vpop.f32.mrb[2].mxu0 }
 0x168   : > { %v2571_v27 = vpop.f32.mrb[3].mxu0 }
 0x16b   : > { %v645_v28 = vpop.f32.mrb[2].mxu1 }
 0x16c   : > { %v646_v29 = vadd.f32 %v645_v28, %v420_v26  ;;  %v2576_v30 = vpop.f32.mrb[3].mxu1 }
 0x177   : > { %v887_v31 = vpop.f32.mrb[4].mxu0 }
 0x178   : > { %v895_v32 = vadd.f32 %v887_v31, %v646_v29  ;;  %v2581_v33 = vpop.f32.mrb[5].mxu0 }
 0x17b   : > { %v1134_v34 = vpop.f32.mrb[4].mxu1 }
 0x17c   : > { %v1142_v35 = vadd.f32 %v1134_v34, %v895_v32  ;;  %v2586_v36 = vpop.f32.mrb[5].mxu1 }
 0x187   : > { %v1381_v37 = vpop.f32.mrb[6].mxu0 }
 0x188   : > { %v1389_v38 = vadd.f32 %v1381_v37, %v1142_v35  ;;  %v2591_v39 = vpop.f32.mrb[7].mxu0 }
 0x18f   : > { %v1628_v0 = vpop.f32.mrb[6].mxu1 }
 0x190   : > { %v1636_v40 = vadd.f32 %v1628_v0, %v1389_v38  ;;  %v2596_v41 = vpop.f32.mrb[7].mxu1 }
 0x197   : > { %v1875_v42 = vpop.f32.mrb[8].mxu0 }
 0x198   : > { %v1883_v43 = vadd.f32 %v1875_v42, %v1636_v40  ;;  %v2601_v44 = vpop.f32.mrb[9].mxu0 }
 0x1a3   : > { %v2122_v46 = vpop.f32.mrb[8].mxu1  ;;  %v2227_v47 = vpop.f32.mrb[0].mxu0 }
 0x1a4   : > { %v2130_v48 = vadd.f32 %v2122_v46, %v1883_v43  ;;  %v2384_v49 = vadd.f32 %v2382_v45, %v2227_v47  ;;  %v2229_v50 = vpop.f32.mrb[1].mxu0  ;;  %v2606_v51 = vpop.f32.mrb[9].mxu1 }
 0x1a5   : > { %v2385_v52 = vadd.f32 %v2382_v45, %v2229_v50 }
 0x1a6   : > { %v2389_v53 = vmul.f32 0.01, %v2384_v49 }
 0x1a7   : > { %v2390_v54 = vmul.f32 0.01, %v2385_v52  ;;  %v2298_v55 = vpop.f32.mrb[0].mxu1  ;;  %v2369_v56 = vpop.f32.mrb[10].mxu0 }
 0x1a8   : > { %v2394_v57 = vmax.f32 %v2384_v49, %v2389_v53  ;;  %v2386_v58 = vadd.f32 %v2382_v45, %v2298_v55  ;;  %v2377_v59 = vadd.f32 %v2369_v56, %v2130_v48  ;;  %v2300_v60 = vpop.f32.mrb[1].mxu1  ;;  %v2611_v61 = vpop.f32.mrb[11].mxu0 }
 0x1a9   : > { %v2395_v62 = vmax.f32 %v2385_v52, %v2390_v54  ;;  %v2387_v63 = vadd.f32 %v2382_v45, %v2300_v60 }
 0x1aa   : > { %2399 = vst [vmem:[%s170_s24] sm:$0xff] %v2394_v57  ;;  %v2391_v1 = vmul.f32 0.01, %v2386_v58  ;;  %v2388_v2 = vadd.f32 %v2382_v45, %v2377_v59 }
 0x1ab   : > { %2400 = vst [vmem:[%s170_s24 + $0x8] sm:$0xff] %v2395_v62  ;;  %v2392_v3 = vmul.f32 0.01, %v2387_v63 }
 0x1ac   : > { %v2396_v4 = vmax.f32 %v2386_v58, %v2391_v1  ;;  %v2393_v5 = vmul.f32 0.01, %v2388_v2 }
 0x1ad   : > { %v2397_v6 = vmax.f32 %v2387_v63, %v2392_v3 }
 0x1ae   : > { %2401 = vst [vmem:[%s170_s24 + $0x10] sm:$0xff] %v2396_v4  ;;  %v2398_v7 = vmax.f32 %v2388_v2, %v2393_v5 }
 0x1af   : > { %2402 = vst [vmem:[%s170_s24 + $0x18] sm:$0xff] %v2397_v6 }
 0x1b0   : > { %2404 = vst.msk [vmem:[%s170_s24 + $0x20] sm:$0xff] %vm2403_vm11, %v2398_v7 }
 0x1b1 PF: > { %s13_s12 = sadd.s32 1, %s2674_s12  }
 0x1b2   : > { %p10_p4 = scmp.ge.s32.totalorder %s13_s12, 4  }
 0x1b4   :  { %12 = sbr.rel (!%p10_p4) target bundleno = 1 (0x1), region = 70 }

// kernel: net_vgg_lstm_forward.25
= control target key start
LH: loop header
LB: loop body
LE: loop exit
PB: predicated region body
PF: predicated region fallthrough
CT: control target
= control target key end

     0   :  { %s378_s15 = smov 0   ;;  %s380_s16 = smov 0   ;;  %s430_s0 = inlined_call_operand.vmem [shape: f32[2,8,128], index: 0, kind: input, shape index: {}]   ;;  %s431_s1 = inlined_call_operand.vmem [shape: f32[8,1], index: 1, kind: input, shape index: {}]   ;;  %s432_s2 = inlined_call_operand.vmem [shape: f32[8,1], index: 2, kind: input, shape index: {}]   ;;  %s433_s3 = inlined_call_operand.vmem [shape: f32[8,1], index: 3, kind: output, shape index: {0}]   ;;  %s434_s4 = inlined_call_operand.vmem [shape: f32[8,1], index: 4, kind: output, shape index: {1}]  }
   0x1   :  { %s382_s17 = smov 0  }
   0x2 LB: > { %s27_s18 = sadd.s32 1, %s346_s16  ;;  %p293_p0 = scmp.ge.s32.totalorder %s350_s17, 1  ;;  %s350_s17 = sphi %s382_s17, %s15_s17   ;;  %s346_s16 = sphi %s380_s16, %s436_s16   ;;  %s342_s15 = sphi %s378_s15, %s435_s15  }
   0x3   : > { %p29_p1 = scmp.ge.s32.totalorder %s27_s18, 2  ;;  %p171_p2 = scmp.lt.s32.totalorder %s350_s17, 3 }
   0x5   : > { %s438_s18 = smov (%p29_p1, %s27_s18), 0  ;;  %p172_p3 = pnand %p293_p0, %p171_p2 }
   0x6   : > { %p194_p4 = scmp.lt.s32.totalorder (!%p172_p3), %s342_s15, 1  ;;  %p201_p5 = scmp.eq.s32.totalorder (!%p172_p3), %s342_s15, 0 }
   0x7   : > { %175 = sbr.rel (%p172_p3) target bundleno = 205 (0xcd), region = 32 }
   0xe   : > { %s195_s19 = scalar_select %p194_p4, %s342_s15, 1 }
   0xf   : > { %206 = sbr.rel (!%p201_p5) target bundleno = 22 (0x16), region = 36  ;;  %vm207_vm0 = vcmask (%p201_p5), 7168   ;;  %v352_v0 = vmov (%p201_p5), 0.0  }
  0x10   : > { %s294_s20 = sshll.u32 %s195_s19, 3  ;;  %208 = vst.msk [vmem:[#allocation2] sm:$0xff] (%p201_p5), %vm207_vm0, %v352_v0  ;;  %209 = vst.msk [vmem:[#allocation3] sm:$0xff] (%p201_p5), %vm207_vm0, %v352_v0 }
  0x11   : > { %s200_s23 = scalar_lea.vmem %s430_s0, %s294_s20 }
  0x16 PF: > { %v210_v1 = vld [vmem:[%s200_s23] sm:$0xff]  ;;  %p223_p6 = scmp.eq.s32.totalorder %s342_s15, 1  ;;  %vm215_vm1 = vcmask 7168  }
  0x17   : > { %212 = vadd.xlane.f32.xlu0 %v210_v1  ;;  %v218_v2 = vmul.f32 %v210_v1, %v210_v1  ;;  %v211_v3 = vld [vmem:[#allocation2] sm:$0xff]  ;;  %v217_v6 = vld [vmem:[#allocation3] sm:$0xff] }
  0x18   : > { %v236_v17 = vld [vmem:[%s431_s1] sm:$0xff] (%p223_p6) }
  0x19   : > { %v241_v20 = vld [vmem:[%s432_s2] sm:$0xff] (%p223_p6) }
  0x1b   : > { %219 = vadd.xlane.f32.xlu0 %v218_v2 }
  0xa4   : > { %v213_v4 = vpop.xlane.xlu0 %212 }
  0xa5   : > { %v214_v5 = vadd.f32 %v213_v4, %v211_v3  ;;  %227 = sbr.rel (!%p223_p6) target bundleno = 205 (0xcd), region = 40 }
  0xa7   : > { %216 = vst.msk [vmem:[#allocation2] sm:$0xff] %vm215_vm1, %v214_v5 }
  0xa8   : > { %v220_v7 = vpop.xlane.xlu0 %219 }
  0xa9   : > { %v221_v8 = vadd.f32 %v220_v7, %v217_v6 }
  0xab   : > { %222 = vst.msk [vmem:[#allocation3] sm:$0xff] %vm215_vm1, %v221_v8 }
  0xae   : > { %v228_v9 = vld [vmem:[#allocation2] sm:$0xff] }
  0xaf   : > { %v230_v11 = vmul.f32 0.00390625, %v228_v9 }
  0xb1   : > { %v233_v13 = vmul.f32 %v230_v11, %v230_v11 }
  0xb2   : > { %v231_v10 = vld [vmem:[#allocation3] sm:$0xff] }
  0xb3   : > { %v232_v12 = vmul.f32 0.00390625, %v231_v10 }
  0xb5   : > { %v234_v14 = vsub.f32 %v232_v12, %v233_v13 }
  0xb7   : > { %v235_v15 = vmax.f32 %v234_v14, 0.0 }
  0xb9   : > { %v237_v16 = vadd.f32 1e-05, %v235_v15 }
  0xbb   : > { %326 = vrsqrt.f32 %v237_v16 }
  0xc5   : > { %v327_v18 = vpop.eup %326 }
  0xc6   : > { %v239_v19 = vmul.f32 %v327_v18, %v236_v17 }
  0xc8   : > { %240 = vst.msk [vmem:[%s433_s3] sm:$0xff] %vm215_vm1, %v239_v19  ;;  %v242_v21 = vmul.f32 %v239_v19, %v230_v11 }
  0xca   : > { %v243_v22 = vsub.f32 %v241_v20, %v242_v21 }
  0xcc   : > { %244 = vst.msk [vmem:[%s434_s4] sm:$0xff] %vm215_vm1, %v243_v22 }
  0xcd PF: > { %s15_s17 = sadd.s32 1, %s350_s17   ;;  %s435_s15 = smov %s346_s16 }
  0xce   : > { %p12_p7 = scmp.ge.s32.totalorder %s15_s17, 4   ;;  %s436_s16 = smov %s438_s18 }
  0xd0   :  { %14 = sbr.rel (!%p12_p7) target bundleno = 2 (0x2), region = 74 }

// kernel: net_vgg_lstm_forward.26
= control target key start
LH: loop header
LB: loop body
LE: loop exit
PB: predicated region body
PF: predicated region fallthrough
CT: control target
= control target key end

     0   :  { %s367_s12 = smov 0   ;;  %s369_s13 = smov 0   ;;  %s399_s0 = inlined_call_operand.vmem [shape: f32[2,8,128], index: 0, kind: input, shape index: {}]   ;;  %s400_s1 = inlined_call_operand.vmem [shape: f32[8,1], index: 1, kind: input, shape index: {}]   ;;  %s401_s2 = inlined_call_operand.vmem [shape: f32[8,1], index: 2, kind: input, shape index: {}]   ;;  %s402_s3 = inlined_call_operand.vmem [shape: f32[2,8,128], index: 3, kind: output, shape index: {}]  }
   0x1   :  { %s371_s14 = smov 0  }
   0x2 LB: > { %s25_s15 = sadd.s32 1, %s340_s13  ;;  %p291_p0 = scmp.ge.s32.totalorder %s344_s14, 1  ;;  %s344_s14 = sphi %s371_s14, %s13_s14   ;;  %s340_s13 = sphi %s369_s13, %s404_s13   ;;  %s336_s12 = sphi %s367_s12, %s403_s12  }
   0x3   : > { %p27_p1 = scmp.ge.s32.totalorder %s25_s15, 2  ;;  %p155_p2 = scmp.lt.s32.totalorder %s344_s14, 3 }
   0x5   : > { %s406_s15 = smov (%p27_p1, %s25_s15), 0  ;;  %p156_p3 = pnand %p291_p0, %p155_p2 }
   0x6   : > { %v198_v0 = vld [vmem:[%s400_s1] sm:$0xff] (!%p156_p3)  ;;  %v346_v1 = vmov (!%p156_p3), 0   ;;  %p183_p4 = scmp.lt.s32.totalorder (!%p156_p3), %s336_s12, 1 }
   0x7   : > { %159 = sbr.rel (%p156_p3) target bundleno = 143 (0x8f), region = 32  ;;  %321 = vset.pattern.permute.xlu0 (!%p156_p3), %v346_v1  ;;  %v205_v2 = vld [vmem:[%s401_s2] sm:$0xff] (!%p156_p3) }
   0x8   : > { %201 = vperm.xlu0 (!%p156_p3), %321, %v198_v0  }
   0xc   : > { %208 = vperm.xlu0 (!%p156_p3), %321, %v205_v2  }
   0xe   : > { %s408_s12 = smov (!%p183_p4, %s336_s12), 1 }
   0xf   : > { %s292_s20 = sshll.u32 %s408_s12, 3 }
  0x10   : > { %s189_s23 = scalar_lea.vmem %s399_s0, %s292_s20  ;;  %s196_s26 = scalar_lea.vmem %s402_s3, %s292_s20 }
  0x11   : > { %v197_v4 = vld [vmem:[%s189_s23] sm:$0xff] }
  0x87   : > { %v202_v3 = vpop.permute.xlu0 %201 }
  0x88   : > { %v204_v5 = vmul.f32 %v202_v3, %v197_v4 }
  0x8b   : > { %v209_v6 = vpop.permute.xlu0 %208 }
  0x8c   : > { %v211_v7 = vadd.f32 %v209_v6, %v204_v5 }
  0x8e   : > { %212 = vst [vmem:[%s196_s26] sm:$0xff] %v211_v7 }
  0x8f PF: > { %s13_s14 = sadd.s32 1, %s344_s14   ;;  %s403_s12 = smov %s340_s13 }
  0x90   : > { %p10_p5 = scmp.ge.s32.totalorder %s13_s14, 4   ;;  %s404_s13 = smov %s406_s15 }
  0x92   :  { %12 = sbr.rel (!%p10_p5) target bundleno = 2 (0x2), region = 62 }

// kernel: net_vgg_lstm_forward.27
= control target key start
LH: loop header
LB: loop body
LE: loop exit
PB: predicated region body
PF: predicated region fallthrough
CT: control target
= control target key end

     0   :  { %s1264_s12 = smov 0   ;;  %s1390_s0 = inlined_call_operand.vmem [shape: f32[2,8,198], index: 0, kind: input, shape index: {}]   ;;  %s1391_s1 = inlined_call_operand.vmem [shape: f32[9,16,8], index: 1, kind: input, shape index: {}]   ;;  %s1392_s2 = inlined_call_operand.vmem [shape: f32[16,1], index: 2, kind: input, shape index: {}]   ;;  %s1393_s3 = inlined_call_operand.vmem [shape: f32[2,16,144], index: 3, kind: output, shape index: {}]  }
   0x1 LB: > { %s1125_s13 = sadd.s32 4294967295, %s1232_s12   ;;  %p1129_p0 = scmp.ge.s32.totalorder %s1232_s12, 1  ;;  %s1232_s12 = sphi %s1264_s12, %s13_s12  }
   0x2   : > { %p137_p1 = scmp.lt.s32.totalorder %s1232_s12, 3 }
   0x4   : > { %p138_p2 = pnand %p1129_p0, %p137_p1 }
   0x5   : > { %p161_p3 = scmp.lt.s32.totalorder (!%p138_p2), %s1125_s13, 1  ;;  %v1234_v0 = vmov (!%p138_p2), 0.0   ;;  %s1235_s18 = smov (!%p138_p2), 109   ;;  %v1041_v3 = vld [vmem:[%s1392_s2] sm:$0xff] (!%p138_p2)  ;;  %v1042_v4 = vld [vmem:[%s1392_s2 + $0x8] sm:$0xff] (!%p138_p2)  ;;  %v1243_v5 = vmov (!%p138_p2), 0  }
   0x6   : > { %141 = sbr.rel (%p138_p2) target bundleno = 396 (0x18c), region = 32  ;;  %259 = vmatprep.mubr.f32.mxu1 (!%p138_p2), %v1234_v0  ;;  %632 = vmatprep.mubr.f32.mxu0 (!%p138_p2), %v1234_v0  ;;  %s1236_s19 = smov (!%p138_p2), 127   ;;  %vm184_vm0 = vcmask (!%p138_p2), 1039360   ;;  %vm558_vm1 = vcmask (!%p138_p2), 891904   ;;  %v1134_v10 = vld [vmem:[%s1391_s1 + $0x10] sm:$0xff] (!%p138_p2)  ;;  %vm188_vm2 = vcmask (!%p138_p2), 64512  }
   0x7   : > { %s1237_s20 = smov (!%p138_p2), 108   ;;  %s1238_s21 = smov (!%p138_p2), 126   ;;  %1224 = vset.pattern.permute.xlu0 (!%p138_p2), %v1243_v5  ;;  %1225 = vset.pattern.permute.xlu1 (!%p138_p2), %v1243_v5  ;;  %v1148_v11 = vld [vmem:[%s1391_s1 + $0x40] sm:$0xff] (!%p138_p2)  ;;  %vm656_vm3 = vcmask (!%p138_p2), 883712   ;;  %v1135_v16 = vld [vmem:[%s1391_s1 + $0x18] sm:$0xff] (!%p138_p2)  ;;  %vm362_vm4 = vcmask (!%p138_p2), 1031168  }
   0x8   : > { %s1239_s22 = smov (!%p138_p2), 92   ;;  %s1240_s23 = smov (!%p138_p2), 110   ;;  %v173_v20 = vld [vmem:[%s1391_s1] sm:$0xff] (!%p138_p2)  ;;  %v1152_v21 = vld [vmem:[%s1391_s1 + $0x50] sm:$0xff] (!%p138_p2)  ;;  %vm754_vm5 = vcmask (!%p138_p2), 752640   ;;  %v174_v25 = vld [vmem:[%s1391_s1 + $0x8] sm:$0xff] (!%p138_p2) }
   0x9   : > { %s1241_s24 = smov (!%p138_p2), 91   ;;  %s1242_s25 = smov (!%p138_p2), 90   ;;  %v1153_v26 = vld [vmem:[%s1391_s1 + $0x58] sm:$0xff] (!%p138_p2)  ;;  %vm460_vm6 = vcmask (!%p138_p2), 900096   ;;  %v1140_v30 = vld [vmem:[%s1391_s1 + $0x20] sm:$0xff] (!%p138_p2)  ;;  %vm852_vm7 = vcmask (!%p138_p2), 744448  }
   0xa   : > { %v1156_v31 = vld [vmem:[%s1391_s1 + $0x60] sm:$0xff] (!%p138_p2)  ;;  %v1141_v35 = vld [vmem:[%s1391_s1 + $0x28] sm:$0xff] (!%p138_p2)  ;;  %vm950_vm8 = vcmask (!%p138_p2), 736256   ;;  %v1144_v38 = vld [vmem:[%s1391_s1 + $0x30] sm:$0xff] (!%p138_p2)  ;;  %vm1066_vm9 = vcmask (!%p138_p2), 130048  }
   0xb   : > { %v1157_v36 = vld [vmem:[%s1391_s1 + $0x68] sm:$0xff] (!%p138_p2)  ;;  %v1160_v39 = vld [vmem:[%s1391_s1 + $0x70] sm:$0xff] (!%p138_p2)  ;;  %v1145_v43 = vld [vmem:[%s1391_s1 + $0x38] sm:$0xff] (!%p138_p2) }
   0xc   : > { %v1161_v44 = vld [vmem:[%s1391_s1 + $0x78] sm:$0xff] (!%p138_p2)  ;;  %v1164_v45 = vld [vmem:[%s1391_s1 + $0x80] sm:$0xff] (!%p138_p2)  ;;  %v1149_v46 = vld [vmem:[%s1391_s1 + $0x48] sm:$0xff] (!%p138_p2) }
   0xd   : > { %s1395_s13 = smov (!%p161_p3, %s1125_s13), 1  ;;  %v1165_v47 = vld [vmem:[%s1391_s1 + $0x88] sm:$0xff] }
   0xe   : > { %s1170_s14 = sshll.u32 %s1395_s13, 4  ;;  %s1171_s16 = sshll.u32 %s1395_s13, 5 }
   0xf   : > { %s165_s17 = scalar_lea.vmem %s1390_s0, %s1170_s14 }
  0x10   : > { %v171_v1 = vld [vmem:[%s165_s17] sm:$0xff]  ;;  %v172_v2 = vld [vmem:[%s165_s17 + $0x8] sm:$0xff] }
  0x11   : > { %554 = vrot.lane.b32.xlu1 %v171_v1, %s1235_s18  ;;  %180 = vrot.lane.b32.xlu0 %v171_v1, %s1236_s19 }
  0x15   : > { %556 = vrot.lane.b32.xlu1 %v172_v2, %s1235_s18  ;;  %182 = vrot.lane.b32.xlu0 %v172_v2, %s1236_s19  ;;  %s170_s19 = scalar_lea.vmem %s1393_s3, %s1171_s16 }
  0x19   : > { %654 = vrot.lane.b32.xlu1 %v172_v2, %s1237_s20  ;;  %652 = vrot.lane.b32.xlu0 %v171_v1, %s1237_s20 }
  0x1d   : > { %360 = vrot.lane.b32.xlu1 %v172_v2, %s1238_s21  ;;  %358 = vrot.lane.b32.xlu0 %v171_v1, %s1238_s21 }
  0x21   : > { %752 = vrot.lane.b32.xlu1 %v172_v2, %s1239_s22  ;;  %750 = vrot.lane.b32.xlu0 %v171_v1, %s1239_s22 }
  0x25   : > { %458 = vrot.lane.b32.xlu1 %v172_v2, %s1240_s23  ;;  %456 = vrot.lane.b32.xlu0 %v171_v1, %s1240_s23 }
  0x29   : > { %850 = vrot.lane.b32.xlu1 %v172_v2, %s1241_s24  ;;  %848 = vrot.lane.b32.xlu0 %v171_v1, %s1241_s24 }
  0x2d   : > { %948 = vrot.lane.b32.xlu1 %v172_v2, %s1242_s25  ;;  %946 = vrot.lane.b32.xlu0 %v171_v1, %s1242_s25 }
  0x31   : > { %1045 = vperm.xlu0 %1224, %v1041_v3   ;;  %1050 = vperm.xlu1 %1225, %v1042_v4  }
  0x83   : > { %v555_v6 = vpop.permute.xlu1 %554  ;;  %v181_v7 = vpop.permute.xlu0 %180 }
  0x87   : > { %v1286_v8 = vpop.permute.xlu1 %556  ;;  %v183_v9 = vpop.permute.xlu0 %182 }
  0x88   : > { %195 = vmatprep.subr.mxu1 %v183_v9  ;;  %568 = vmatprep.subr.mxu0 %v1286_v8  ;;  %v185_v12 = vsel %vm184_vm0, %v181_v7, %v183_v9  ;;  %v1296_v13 = vsel %vm558_vm1, %v555_v6, %v1286_v8 }
  0x89   : > { %196 = vmatpush1.msra.mxu1 %v185_v12  ;;  %569 = vmatpush1.msra.mxu0 %v1296_v13 }
  0x8a   : > { %1136 = vmatmul.mubr.msk.f32.vlgmr.msra.gmra.mrb[0].mxu1 %vm188_vm2, %v1134_v10  ;;  %1150 = vmatmul.mubr.msk.f32.vlgmr.msra.gmra.mrb[0].mxu0 %vm188_vm2, %v1148_v11 }
  0x8b   : > { %v655_v14 = vpop.permute.xlu1 %654  ;;  %v653_v15 = vpop.permute.xlu0 %652  ;;  %278 = vmatprep.subr.mxu1 %v172_v2  ;;  %265 = vmatprep.mubr.f32.mxu1 %v1234_v0 }
  0x8c   : > { %v657_v17 = vsel %vm656_vm3, %v653_v15, %v655_v14  ;;  %666 = vmatprep.subr.mxu0 %v655_v14  ;;  %279 = vmatpush1.msra.mxu1 %v171_v1 }
  0x8d   : > { %667 = vmatpush1.msra.mxu0 %v657_v17  ;;  %730 = vmatprep.mubr.f32.mxu0 %v1234_v0 }
  0x8e   : > { %1137 = vmatmul.mubr.msk.f32.gmra.mrb[2].mxu1 %vm188_vm2, %v1135_v16 }
  0x8f   : > { %v361_v18 = vpop.permute.xlu1 %360  ;;  %v359_v19 = vpop.permute.xlu0 %358  ;;  %342 = vmatprep.mubr.f32.mxu1 %v1234_v0 }
  0x90   : > { %v363_v22 = vsel %vm362_vm4, %v359_v19, %v361_v18  ;;  %372 = vmatprep.subr.mxu1 %v361_v18 }
  0x92   : > { %1138 = vmatmul.mubr.msk.f32.vlgmr.msra.gmra.mrb[0].mxu1 %vm188_vm2, %v173_v20  ;;  %1154 = vmatmul.mubr.msk.f32.vlgmr.msra.gmra.mrb[0].mxu0 %vm188_vm2, %v1152_v21 }
  0x93   : > { %373 = vmatpush1.msra.mxu1 %v363_v22  ;;  %v753_v23 = vpop.permute.xlu1 %752  ;;  %v751_v24 = vpop.permute.xlu0 %750  ;;  %348 = vmatprep.mubr.f32.mxu1 %v1234_v0 }
  0x94   : > { %v755_v27 = vsel %vm754_vm5, %v751_v24, %v753_v23  ;;  %764 = vmatprep.subr.mxu0 %v753_v23  ;;  %736 = vmatprep.mubr.f32.mxu0 %v1234_v0 }
  0x95   : > { %765 = vmatpush1.msra.mxu0 %v755_v27 }
  0x96   : > { %1139 = vmatmul.mubr.msk.f32.gmra.mrb[2].mxu1 %vm188_vm2, %v174_v25  ;;  %1155 = vmatmul.mubr.msk.f32.gmra.mrb[2].mxu0 %vm188_vm2, %v1153_v26 }
  0x97   : > { %v459_v28 = vpop.permute.xlu1 %458  ;;  %v457_v29 = vpop.permute.xlu0 %456  ;;  %436 = vmatprep.mubr.f32.mxu1 %v1234_v0  ;;  %828 = vmatprep.mubr.f32.mxu0 %v1234_v0 }
  0x98   : > { %v461_v32 = vsel %vm460_vm6, %v457_v29, %v459_v28  ;;  %470 = vmatprep.subr.mxu1 %v459_v28 }
  0x9a   : > { %1142 = vmatmul.mubr.msk.f32.vlgmr.msra.gmra.mrb[0].mxu1 %vm188_vm2, %v1140_v30  ;;  %1158 = vmatmul.mubr.msk.f32.vlgmr.msra.gmra.mrb[0].mxu0 %vm188_vm2, %v1156_v31 }
  0x9b   : > { %471 = vmatpush1.msra.mxu1 %v461_v32  ;;  %v851_v33 = vpop.permute.xlu1 %850  ;;  %v849_v34 = vpop.permute.xlu0 %848  ;;  %442 = vmatprep.mubr.f32.mxu1 %v1234_v0 }
  0x9c   : > { %1172 = vmatprep.subr.mxu1 %v1286_v8  ;;  %v853_v37 = vsel %vm852_vm7, %v849_v34, %v851_v33  ;;  %862 = vmatprep.subr.mxu0 %v851_v33 }
  0x9d   : > { %834 = vmatprep.mubr.f32.mxu0 %v1234_v0  ;;  %863 = vmatpush1.msra.mxu0 %v853_v37 }
  0x9e   : > { %1143 = vmatmul.mubr.msk.f32.gmra.mrb[2].mxu1 %vm188_vm2, %v1141_v35  ;;  %1159 = vmatmul.mubr.msk.f32.gmra.mrb[2].mxu0 %vm188_vm2, %v1157_v36 }
  0x9f   : > { %534 = vmatprep.mubr.f32.mxu1 %v1234_v0  ;;  %926 = vmatprep.mubr.f32.mxu0 %v1234_v0  ;;  %v949_v40 = vpop.permute.xlu1 %948  ;;  %v947_v41 = vpop.permute.xlu0 %946 }
  0xa0   : > { %960 = vmatprep.subr.mxu0 %v949_v40  ;;  %v951_v42 = vsel %vm950_vm8, %v947_v41, %v949_v40 }
  0xa2   : > { %1146 = vmatmul.mubr.msk.f32.vlgmr.msra.gmra.mrb[0].mxu1 %vm188_vm2, %v1144_v38  ;;  %1162 = vmatmul.mubr.msk.f32.vlgmr.msra.gmra.mrb[0].mxu0 %vm188_vm2, %v1160_v39 }
  0xa3   : > { %1173 = vmatpush1.msra.mxu1 %v1296_v13  ;;  %540 = vmatprep.mubr.f32.mxu1 %v1234_v0 }
  0xa4   : > { %932 = vmatprep.mubr.f32.mxu0 %v1234_v0  ;;  %961 = vmatpush1.msra.mxu0 %v951_v42 }
  0xa6   : > { %1147 = vmatmul.mubr.msk.f32.gmra.mrb[2].mxu1 %vm188_vm2, %v1145_v43  ;;  %1163 = vmatmul.mubr.msk.f32.gmra.mrb[2].mxu0 %vm188_vm2, %v1161_v44 }
  0xa7   : > { %1024 = vmatprep.mubr.f32.mxu0 %v1234_v0  ;;  %638 = vmatprep.mubr.f32.mxu1 %v1234_v0 }
  0xaa   : > { %1166 = vmatmul.mubr.msk.f32.vlgmr.msra.gmra.mrb[0].mxu0 %vm188_vm2, %v1164_v45 }
  0xab   : > { %1030 = vmatprep.mubr.f32.mxu0 %v1234_v0 }
  0xae   : > { %1151 = vmatmul.mubr.msk.f32.vlgmr.msra.gmra.mrb[2].mxu1 %vm188_vm2, %v1149_v46  ;;  %1167 = vmatmul.mubr.msk.f32.gmra.mrb[2].mxu0 %vm188_vm2, %v1165_v47 }
  0xb0   : > { %v1046_v51 = vpop.permute.xlu0 %1045  ;;  %v1051_v56 = vpop.permute.xlu1 %1050 }
 0x175   : > { %v536_v48 = vpop.f32.mrb[0].mxu1 }
 0x176   : > { %v538_v49 = vpop.f32.mrb[1].mxu1 }
 0x17d   : > { %v1026_v50 = vpop.f32.mrb[0].mxu0 }
 0x17e   : > { %v1174_v52 = vadd.f32 %v1026_v50, %v536_v48  ;;  %v1028_v53 = vpop.f32.mrb[1].mxu0 }
 0x17f   : > { %v1175_v54 = vadd.f32 %v1028_v53, %v538_v49 }
 0x180   : > { %v1053_v55 = vadd.f32 %v1174_v52, %v1046_v51 }
 0x181   : > { %v1054_v57 = vadd.f32 %v1175_v54, %v1046_v51  ;;  %v640_v58 = vpop.f32.mrb[2].mxu1  ;;  %v1032_v59 = vpop.f32.mrb[2].mxu0 }
 0x182   : > { %v1057_v60 = vmul.f32 0.01, %v1053_v55  ;;  %v1176_v61 = vadd.f32 %v1032_v59, %v640_v58  ;;  %v642_v62 = vpop.f32.mrb[3].mxu1  ;;  %v1034_v63 = vpop.f32.mrb[3].mxu0 }
 0x183   : > { %v1058_v0 = vmul.f32 0.01, %v1054_v57  ;;  %v1177_v1 = vadd.f32 %v1034_v63, %v642_v62 }
 0x184   : > { %v1061_v2 = vmax.f32 %v1053_v55, %v1057_v60  ;;  %v1055_v3 = vadd.f32 %v1176_v61, %v1051_v56 }
 0x185   : > { %v1062_v4 = vmax.f32 %v1054_v57, %v1058_v0  ;;  %v1056_v5 = vadd.f32 %v1177_v1, %v1051_v56 }
 0x186   : > { %1065 = vst [vmem:[%s170_s19] sm:$0xff] %v1061_v2  ;;  %v1059_v6 = vmul.f32 0.01, %v1055_v3 }
 0x187   : > { %1067 = vst.msk [vmem:[%s170_s19 + $0x8] sm:$0xff] %vm1066_vm9, %v1062_v4  ;;  %v1060_v7 = vmul.f32 0.01, %v1056_v5 }
 0x188   : > { %v1063_v8 = vmax.f32 %v1055_v3, %v1059_v6 }
 0x189   : > { %v1064_v9 = vmax.f32 %v1056_v5, %v1060_v7 }
 0x18a   : > { %1068 = vst [vmem:[%s170_s19 + $0x10] sm:$0xff] %v1063_v8 }
 0x18b   : > { %1069 = vst.msk [vmem:[%s170_s19 + $0x18] sm:$0xff] %vm1066_vm9, %v1064_v9 }
 0x18c PF: > { %s13_s12 = sadd.s32 1, %s1232_s12  }
 0x18d   : > { %p10_p4 = scmp.ge.s32.totalorder %s13_s12, 4  }
 0x18f   :  { %12 = sbr.rel (!%p10_p4) target bundleno = 1 (0x1), region = 70 }

// kernel: net_vgg_lstm_forward.28
= control target key start
LH: loop header
LB: loop body
LE: loop exit
PB: predicated region body
PF: predicated region fallthrough
CT: control target
= control target key end

     0   :  { %s1439_s12 = smov 0   ;;  %s1599_s0 = inlined_call_operand.vmem [shape: f32[2,16,198], index: 0, kind: input, shape index: {}]   ;;  %s1600_s1 = inlined_call_operand.vmem [shape: f32[9,16,16], index: 1, kind: input, shape index: {}]   ;;  %s1601_s2 = inlined_call_operand.vmem [shape: f32[16,1], index: 2, kind: input, shape index: {}]   ;;  %s1602_s3 = inlined_call_operand.vmem [shape: f32[2,16,144], index: 3, kind: output, shape index: {}]  }
   0x1 LB: > { %s1184_s13 = sadd.s32 4294967295, %s1407_s12   ;;  %p1188_p0 = scmp.ge.s32.totalorder %s1407_s12, 1  ;;  %s1407_s12 = sphi %s1439_s12, %s13_s12  }
   0x2   : > { %p137_p1 = scmp.lt.s32.totalorder %s1407_s12, 3 }
   0x4   : > { %p138_p2 = pnand %p1188_p0, %p137_p1 }
   0x5   : > { %p161_p3 = scmp.lt.s32.totalorder (!%p138_p2), %s1184_s13, 1  ;;  %v1409_v5 = vmov (!%p138_p2), 0.0   ;;  %s1410_s18 = smov (!%p138_p2), 109   ;;  %v1101_v9 = vld [vmem:[%s1601_s2] sm:$0xff] (!%p138_p2)  ;;  %v1102_v10 = vld [vmem:[%s1601_s2 + $0x8] sm:$0xff] (!%p138_p2)  ;;  %v1418_v11 = vmov (!%p138_p2), 0  }
   0x6   : > { %141 = sbr.rel (%p138_p2) target bundleno = 405 (0x195), region = 32  ;;  %270 = vmatprep.mubr.f32.mxu1 (!%p138_p2), %v1409_v5  ;;  %664 = vmatprep.mubr.f32.mxu0 (!%p138_p2), %v1409_v5  ;;  %s1411_s19 = smov (!%p138_p2), 127   ;;  %vm192_vm0 = vcmask (!%p138_p2), 1039360   ;;  %vm587_vm1 = vcmask (!%p138_p2), 891904   ;;  %vm692_vm2 = vcmask (!%p138_p2), 883712   ;;  %v1193_v38 = vld [vmem:[%s1600_s1 + $0x10] sm:$0xff] (!%p138_p2) }
   0x7   : > { %s1412_s20 = smov (!%p138_p2), 108   ;;  %s1413_s21 = smov (!%p138_p2), 126   ;;  %1399 = vset.pattern.permute.xlu0 (!%p138_p2), %v1418_v11  ;;  %1400 = vset.pattern.permute.xlu1 (!%p138_p2), %v1418_v11  ;;  %vm199_vm3 = vcmask (!%p138_p2), 130048   ;;  %v1207_v39 = vld [vmem:[%s1600_s1 + $0x40] sm:$0xff] (!%p138_p2)  ;;  %vm377_vm4 = vcmask (!%p138_p2), 1031168   ;;  %v1194_v50 = vld [vmem:[%s1600_s1 + $0x18] sm:$0xff] (!%p138_p2) }
   0x8   : > { %s1414_s22 = smov (!%p138_p2), 92   ;;  %s1415_s23 = smov (!%p138_p2), 110   ;;  %vm797_vm5 = vcmask (!%p138_p2), 752640   ;;  %v175_v61 = vld [vmem:[%s1600_s1] sm:$0xff] (!%p138_p2)  ;;  %v1211_v62 = vld [vmem:[%s1600_s1 + $0x50] sm:$0xff] (!%p138_p2)  ;;  %vm482_vm6 = vcmask (!%p138_p2), 900096  }
   0x9   : > { %s1416_s24 = smov (!%p138_p2), 91   ;;  %s1417_s25 = smov (!%p138_p2), 90   ;;  %vm902_vm7 = vcmask (!%p138_p2), 744448   ;;  %vm1007_vm8 = vcmask (!%p138_p2), 736256  }
   0xd   : > { %s1604_s13 = smov (!%p161_p3, %s1184_s13), 1 }
   0xe   : > { %s1229_s14 = sshll.u32 %s1604_s13, 5 }
   0xf   : > { %s165_s17 = scalar_lea.vmem %s1599_s0, %s1229_s14 }
  0x10   : > { %v1455_v0 = vld [vmem:[%s165_s17] sm:$0xff]  ;;  %v1457_v1 = vld [vmem:[%s165_s17 + $0x8] sm:$0xff]  ;;  %v1459_v2 = vld [vmem:[%s165_s17 + $0x10] sm:$0xff] }
  0x11   : > { %v1329_v3 = vpack.i.bf16 %v1457_v1, %v1455_v0  ;;  %v1463_v4 = vld [vmem:[%s165_s17 + $0x18] sm:$0xff]  ;;  %v1237_v8 = vpack.c.bf16 %v1459_v2, %v1455_v0 }
  0x12   : > { %v1334_v6 = vpack.i.bf16 %v1463_v4, %v1459_v2  ;;  %v1235_v7 = vpack.c.bf16 %v1463_v4, %v1457_v1 }
  0x13   : > { %1330 = vrot.lane.b32.xlu1 %v1329_v3, %s1410_s18  ;;  %1320 = vrot.lane.b32.xlu0 %v1329_v3, %s1411_s19 }
  0x17   : > { %1335 = vrot.lane.b32.xlu1 %v1334_v6, %s1410_s18  ;;  %1325 = vrot.lane.b32.xlu0 %v1334_v6, %s1411_s19 }
  0x1b   : > { %1345 = vrot.lane.b32.xlu1 %v1334_v6, %s1412_s20  ;;  %1340 = vrot.lane.b32.xlu0 %v1329_v3, %s1412_s20  ;;  %s170_s20 = scalar_lea.vmem %s1602_s3, %s1229_s14 }
  0x1f   : > { %1355 = vrot.lane.b32.xlu1 %v1334_v6, %s1413_s21  ;;  %1350 = vrot.lane.b32.xlu0 %v1329_v3, %s1413_s21 }
  0x23   : > { %1365 = vrot.lane.b32.xlu1 %v1334_v6, %s1414_s22  ;;  %1360 = vrot.lane.b32.xlu0 %v1329_v3, %s1414_s22 }
  0x27   : > { %1375 = vrot.lane.b32.xlu1 %v1334_v6, %s1415_s23  ;;  %1370 = vrot.lane.b32.xlu0 %v1329_v3, %s1415_s23 }
  0x2b   : > { %1385 = vrot.lane.b32.xlu1 %v1334_v6, %s1416_s24  ;;  %1380 = vrot.lane.b32.xlu0 %v1329_v3, %s1416_s24 }
  0x2f   : > { %1395 = vrot.lane.b32.xlu1 %v1334_v6, %s1417_s25  ;;  %1390 = vrot.lane.b32.xlu0 %v1329_v3, %s1417_s25 }
  0x33   : > { %1105 = vperm.xlu0 %1399, %v1101_v9   ;;  %1110 = vperm.xlu1 %1400, %v1102_v10   ;;  %v176_v10 = vld [vmem:[%s1600_s1 + $0x8] sm:$0xff] }
  0x85   : > { %v1331_v12 = vpop.permute.xlu1 %1330  ;;  %v1321_v13 = vpop.permute.xlu0 %1320 }
  0x86   : > { %v1333_v14 = vunpack.i.h.bf16 %v1331_v12  ;;  %v1332_v15 = vunpack.i.l.bf16 %v1331_v12  ;;  %v1323_v16 = vunpack.i.h.bf16 %v1321_v13  ;;  %v1322_v17 = vunpack.i.l.bf16 %v1321_v13 }
  0x88   : > { %v193_v24 = vsel %vm192_vm0, %v1322_v17, %v1323_v16  ;;  %v588_v25 = vsel %vm587_vm1, %v1332_v15, %v1333_v14 }
  0x89   : > { %v1336_v18 = vpop.permute.xlu1 %1335  ;;  %v1326_v19 = vpop.permute.xlu0 %1325 }
  0x8a   : > { %v1338_v20 = vunpack.i.h.bf16 %v1336_v18  ;;  %v1337_v21 = vunpack.i.l.bf16 %v1336_v18  ;;  %v1328_v22 = vunpack.i.h.bf16 %v1326_v19  ;;  %v1327_v23 = vunpack.i.l.bf16 %v1326_v19 }
  0x8c   : > { %v1231_v26 = vpack.c.bf16 %v1328_v22, %v1323_v16  ;;  %v1479_v27 = vpack.c.bf16 %v1338_v20, %v1333_v14  ;;  %v194_v28 = vsel %vm192_vm0, %v1327_v23, %v1328_v22  ;;  %v589_v29 = vsel %vm587_vm1, %v1337_v21, %v1338_v20  ;;  %v1212_v14 = vld [vmem:[%s1600_s1 + $0x58] sm:$0xff]  ;;  %v1199_v22 = vld [vmem:[%s1600_s1 + $0x20] sm:$0xff] }
  0x8d   : > { %v1346_v30 = vpop.permute.xlu1 %1345  ;;  %v1341_v31 = vpop.permute.xlu0 %1340  ;;  %v1233_v32 = vpack.c.bf16 %v194_v28, %v193_v24  ;;  %v1481_v33 = vpack.c.bf16 %v589_v29, %v588_v25 }
  0x8e   : > { %v1348_v34 = vunpack.i.h.bf16 %v1346_v30  ;;  %v1347_v35 = vunpack.i.l.bf16 %v1346_v30  ;;  %v1343_v36 = vunpack.i.h.bf16 %v1341_v31  ;;  %v1342_v37 = vunpack.i.l.bf16 %v1341_v31  ;;  %1232 = vmatprep.subr.bf16.mxu1 %v1231_v26  ;;  %1248 = vmatprep.subr.bf16.mxu0 %v1479_v27  ;;  %v1215_v26 = vld [vmem:[%s1600_s1 + $0x60] sm:$0xff] }
  0x8f   : > { %1234 = vmatpush1.bf16.msra.mxu1 %v1233_v32  ;;  %1250 = vmatpush1.bf16.msra.mxu0 %v1481_v33 }
  0x90   : > { %v694_v40 = vsel %vm692_vm2, %v1347_v35, %v1348_v34  ;;  %v1251_v41 = vpack.c.bf16 %v1348_v34, %v1343_v36  ;;  %v693_v42 = vsel %vm692_vm2, %v1342_v37, %v1343_v36  ;;  %1236 = vmatprep.subr.bf16.mxu1 %v1235_v7  ;;  %v1200_v36 = vld [vmem:[%s1600_s1 + $0x28] sm:$0xff] }
  0x91   : > { %v1253_v43 = vpack.c.bf16 %v694_v40, %v693_v42  ;;  %v1356_v44 = vpop.permute.xlu1 %1355  ;;  %v1351_v45 = vpop.permute.xlu0 %1350  ;;  %v1219_v42 = vld [vmem:[%s1600_s1 + $0x70] sm:$0xff] }
  0x92   : > { %v1358_v46 = vunpack.i.h.bf16 %v1356_v44  ;;  %v1357_v47 = vunpack.i.l.bf16 %v1356_v44  ;;  %v1353_v48 = vunpack.i.h.bf16 %v1351_v45  ;;  %v1352_v49 = vunpack.i.l.bf16 %v1351_v45  ;;  %1195 = vmatmul.mubr.msk.f32.vlgmr.msra.gmra.mrb[0].mxu1 %vm199_vm3, %v1193_v38  ;;  %1209 = vmatmul.mubr.msk.f32.vlgmr.msra.gmra.mrb[0].mxu0 %vm199_vm3, %v1207_v39  ;;  %v1216_v38 = vld [vmem:[%s1600_s1 + $0x68] sm:$0xff]  ;;  %v1220_v44 = vld [vmem:[%s1600_s1 + $0x78] sm:$0xff] }
  0x93   : > { %1252 = vmatprep.subr.bf16.mxu0 %v1251_v41  ;;  %1238 = vmatpush1.bf16.msra.mxu1 %v1237_v8  ;;  %v1208_v45 = vld [vmem:[%s1600_s1 + $0x48] sm:$0xff] }
  0x94   : > { %v379_v51 = vsel %vm377_vm4, %v1357_v47, %v1358_v46  ;;  %v1239_v52 = vpack.c.bf16 %v1358_v46, %v1353_v48  ;;  %v378_v53 = vsel %vm377_vm4, %v1352_v49, %v1353_v48  ;;  %1254 = vmatpush1.bf16.msra.mxu0 %v1253_v43  ;;  %276 = vmatprep.mubr.f32.mxu1 %v1409_v5  ;;  %v1204_v43 = vld [vmem:[%s1600_s1 + $0x38] sm:$0xff]  ;;  %v1224_v46 = vld [vmem:[%s1600_s1 + $0x88] sm:$0xff] }
  0x95   : > { %v1366_v54 = vpop.permute.xlu1 %1365  ;;  %v1361_v55 = vpop.permute.xlu0 %1360  ;;  %769 = vmatprep.mubr.f32.mxu0 %v1409_v5  ;;  %v1241_v60 = vpack.c.bf16 %v379_v51, %v378_v53 }
  0x96   : > { %v1368_v56 = vunpack.i.h.bf16 %v1366_v54  ;;  %v1367_v57 = vunpack.i.l.bf16 %v1366_v54  ;;  %v1363_v58 = vunpack.i.h.bf16 %v1361_v55  ;;  %v1362_v59 = vunpack.i.l.bf16 %v1361_v55  ;;  %1196 = vmatmul.mubr.msk.f32.gmra.mrb[2].mxu1 %vm199_vm3, %v1194_v50  ;;  %1240 = vmatprep.subr.bf16.mxu1 %v1239_v52 }
  0x97   : > { %353 = vmatprep.mubr.f32.mxu1 %v1409_v5 }
  0x98   : > { %v799_v63 = vsel %vm797_vm5, %v1367_v57, %v1368_v56  ;;  %v1255_v0 = vpack.c.bf16 %v1368_v56, %v1363_v58  ;;  %v798_v1 = vsel %vm797_vm5, %v1362_v59, %v1363_v58 }
  0x99   : > { %v1257_v2 = vpack.c.bf16 %v799_v63, %v798_v1  ;;  %v1376_v3 = vpop.permute.xlu1 %1375  ;;  %v1371_v4 = vpop.permute.xlu0 %1370 }
  0x9a   : > { %v1378_v6 = vunpack.i.h.bf16 %v1376_v3  ;;  %v1377_v7 = vunpack.i.l.bf16 %v1376_v3  ;;  %v1373_v8 = vunpack.i.h.bf16 %v1371_v4  ;;  %v1372_v9 = vunpack.i.l.bf16 %v1371_v4  ;;  %1197 = vmatmul.mubr.msk.f32.vlgmr.msra.gmra.mrb[0].mxu1 %vm199_vm3, %v175_v61  ;;  %1213 = vmatmul.mubr.msk.f32.vlgmr.msra.gmra.mrb[0].mxu0 %vm199_vm3, %v1211_v62 }
  0x9b   : > { %1242 = vmatpush1.bf16.msra.mxu1 %v1241_v60  ;;  %1256 = vmatprep.subr.bf16.mxu0 %v1255_v0 }
  0x9c   : > { %v484_v11 = vsel %vm482_vm6, %v1377_v7, %v1378_v6  ;;  %v1243_v12 = vpack.c.bf16 %v1378_v6, %v1373_v8  ;;  %v483_v13 = vsel %vm482_vm6, %v1372_v9, %v1373_v8  ;;  %1258 = vmatpush1.bf16.msra.mxu0 %v1257_v2  ;;  %359 = vmatprep.mubr.f32.mxu1 %v1409_v5 }
  0x9d   : > { %v1386_v15 = vpop.permute.xlu1 %1385  ;;  %v1381_v16 = vpop.permute.xlu0 %1380  ;;  %775 = vmatprep.mubr.f32.mxu0 %v1409_v5  ;;  %v1245_v21 = vpack.c.bf16 %v484_v11, %v483_v13 }
  0x9e   : > { %v1388_v17 = vunpack.i.h.bf16 %v1386_v15  ;;  %v1387_v18 = vunpack.i.l.bf16 %v1386_v15  ;;  %v1383_v19 = vunpack.i.h.bf16 %v1381_v16  ;;  %v1382_v20 = vunpack.i.l.bf16 %v1381_v16  ;;  %1198 = vmatmul.mubr.msk.f32.gmra.mrb[2].mxu1 %vm199_vm3, %v176_v10  ;;  %1244 = vmatprep.subr.bf16.mxu1 %v1243_v12 }
  0x9f   : > { %1214 = vmatmul.mubr.msk.f32.gmra.mrb[2].mxu0 %vm199_vm3, %v1212_v14  ;;  %454 = vmatprep.mubr.f32.mxu1 %v1409_v5 }
  0xa0   : > { %v904_v23 = vsel %vm902_vm7, %v1387_v18, %v1388_v17  ;;  %v1259_v24 = vpack.c.bf16 %v1388_v17, %v1383_v19  ;;  %v903_v25 = vsel %vm902_vm7, %v1382_v20, %v1383_v19  ;;  %874 = vmatprep.mubr.f32.mxu0 %v1409_v5 }
  0xa1   : > { %v1261_v28 = vpack.c.bf16 %v904_v23, %v903_v25  ;;  %v1396_v29 = vpop.permute.xlu1 %1395  ;;  %v1391_v30 = vpop.permute.xlu0 %1390 }
  0xa2   : > { %1201 = vmatmul.mubr.msk.f32.vlgmr.msra.gmra.mrb[0].mxu1 %vm199_vm3, %v1199_v22  ;;  %1260 = vmatprep.subr.bf16.mxu0 %v1259_v24  ;;  %v1398_v31 = vunpack.i.h.bf16 %v1396_v29  ;;  %v1397_v32 = vunpack.i.l.bf16 %v1396_v29  ;;  %v1393_v34 = vunpack.i.h.bf16 %v1391_v30  ;;  %v1392_v35 = vunpack.i.l.bf16 %v1391_v30 }
  0xa3   : > { %1246 = vmatpush1.bf16.msra.mxu1 %v1245_v21  ;;  %1217 = vmatmul.mubr.msk.f32.vlgmr.msra.gmra.mrb[0].mxu0 %vm199_vm3, %v1215_v26 }
  0xa4   : > { %1267 = vmatprep.subr.bf16.mxu1 %v1479_v27  ;;  %1262 = vmatpush1.bf16.msra.mxu0 %v1261_v28  ;;  %v1263_v37 = vpack.c.bf16 %v1398_v31, %v1393_v34  ;;  %v1009_v39 = vsel %vm1007_vm8, %v1397_v32, %v1398_v31  ;;  %v1008_v40 = vsel %vm1007_vm8, %v1392_v35, %v1393_v34  ;;  %v1203_v27 = vld [vmem:[%s1600_s1 + $0x30] sm:$0xff] }
  0xa5   : > { %460 = vmatprep.mubr.f32.mxu1 %v1409_v5  ;;  %880 = vmatprep.mubr.f32.mxu0 %v1409_v5  ;;  %v1265_v41 = vpack.c.bf16 %v1009_v39, %v1008_v40 }
  0xa6   : > { %1202 = vmatmul.mubr.msk.f32.gmra.mrb[2].mxu1 %vm199_vm3, %v1200_v36  ;;  %1264 = vmatprep.subr.bf16.mxu0 %v1263_v37 }
  0xa7   : > { %1218 = vmatmul.mubr.msk.f32.gmra.mrb[2].mxu0 %vm199_vm3, %v1216_v38  ;;  %559 = vmatprep.mubr.f32.mxu1 %v1409_v5 }
  0xa8   : > { %979 = vmatprep.mubr.f32.mxu0 %v1409_v5 }
  0xaa   : > { %1205 = vmatmul.mubr.msk.f32.vlgmr.msra.gmra.mrb[0].mxu1 %vm199_vm3, %v1203_v27 }
  0xab   : > { %1268 = vmatpush1.bf16.msra.mxu1 %v1481_v33  ;;  %1221 = vmatmul.mubr.msk.f32.vlgmr.msra.gmra.mrb[0].mxu0 %vm199_vm3, %v1219_v42  ;;  %v1223_v33 = vld [vmem:[%s1600_s1 + $0x80] sm:$0xff] }
  0xac   : > { %1266 = vmatpush1.bf16.msra.mxu0 %v1265_v41  ;;  %565 = vmatprep.mubr.f32.mxu1 %v1409_v5 }
  0xad   : > { %985 = vmatprep.mubr.f32.mxu0 %v1409_v5 }
  0xae   : > { %1206 = vmatmul.mubr.msk.f32.gmra.mrb[2].mxu1 %vm199_vm3, %v1204_v43 }
  0xaf   : > { %1222 = vmatmul.mubr.msk.f32.gmra.mrb[2].mxu0 %vm199_vm3, %v1220_v44  ;;  %670 = vmatprep.mubr.f32.mxu1 %v1409_v5 }
  0xb0   : > { %1084 = vmatprep.mubr.f32.mxu0 %v1409_v5 }
  0xb2   : > { %v1106_v50 = vpop.permute.xlu0 %1105  ;;  %v1111_v56 = vpop.permute.xlu1 %1110 }
  0xb3   : > { %1225 = vmatmul.mubr.msk.f32.vlgmr.msra.gmra.mrb[0].mxu0 %vm199_vm3, %v1223_v33 }
  0xb4   : > { %1090 = vmatprep.mubr.f32.mxu0 %v1409_v5 }
  0xb6   : > { %1210 = vmatmul.mubr.msk.f32.vlgmr.msra.gmra.mrb[2].mxu1 %vm199_vm3, %v1208_v45 }
  0xb7   : > { %1226 = vmatmul.mubr.msk.f32.gmra.mrb[2].mxu0 %vm199_vm3, %v1224_v46 }
 0x17d   : > { %v561_v47 = vpop.f32.mrb[0].mxu1 }
 0x17e   : > { %v563_v48 = vpop.f32.mrb[1].mxu1 }
 0x186   : > { %v1086_v49 = vpop.f32.mrb[0].mxu0 }
 0x187   : > { %v1269_v51 = vadd.f32 %v1086_v49, %v561_v47  ;;  %v1088_v52 = vpop.f32.mrb[1].mxu0 }
 0x188   : > { %v1270_v53 = vadd.f32 %v1088_v52, %v563_v48 }
 0x189   : > { %v1113_v54 = vadd.f32 %v1269_v51, %v1106_v50  ;;  %v672_v55 = vpop.f32.mrb[2].mxu1 }
 0x18a   : > { %v1114_v5 = vadd.f32 %v1270_v53, %v1106_v50  ;;  %v1092_v57 = vpop.f32.mrb[2].mxu0  ;;  %v674_v58 = vpop.f32.mrb[3].mxu1 }
 0x18b   : > { %v1117_v59 = vmul.f32 0.01, %v1113_v54  ;;  %v1271_v60 = vadd.f32 %v1092_v57, %v672_v55  ;;  %v1094_v61 = vpop.f32.mrb[3].mxu0 }
 0x18c   : > { %v1118_v62 = vmul.f32 0.01, %v1114_v5  ;;  %v1272_v63 = vadd.f32 %v1094_v61, %v674_v58 }
 0x18d   : > { %v1121_v0 = vmax.f32 %v1113_v54, %v1117_v59  ;;  %v1115_v1 = vadd.f32 %v1271_v60, %v1111_v56 }
 0x18e   : > { %v1122_v2 = vmax.f32 %v1114_v5, %v1118_v62  ;;  %v1116_v3 = vadd.f32 %v1272_v63, %v1111_v56 }
 0x18f   : > { %1125 = vst [vmem:[%s170_s20] sm:$0xff] %v1121_v0  ;;  %v1119_v4 = vmul.f32 0.01, %v1115_v1 }
 0x190   : > { %1126 = vst.msk [vmem:[%s170_s20 + $0x8] sm:$0xff] %vm199_vm3, %v1122_v2  ;;  %v1120_v6 = vmul.f32 0.01, %v1116_v3 }
 0x191   : > { %v1123_v7 = vmax.f32 %v1115_v1, %v1119_v4 }
 0x192   : > { %v1124_v8 = vmax.f32 %v1116_v3, %v1120_v6 }
 0x193   : > { %1127 = vst [vmem:[%s170_s20 + $0x10] sm:$0xff] %v1123_v7 }
 0x194   : > { %1128 = vst.msk [vmem:[%s170_s20 + $0x18] sm:$0xff] %vm199_vm3, %v1124_v8 }
 0x195 PF: > { %s13_s12 = sadd.s32 1, %s1407_s12  }
 0x196   : > { %p10_p4 = scmp.ge.s32.totalorder %s13_s12, 4  }
 0x198   :  { %12 = sbr.rel (!%p10_p4) target bundleno = 1 (0x1), region = 70 }

// kernel: net_vgg_lstm_forward.29
= control target key start
LH: loop header
LB: loop body
LE: loop exit
PB: predicated region body
PF: predicated region fallthrough
CT: control target
= control target key end

     0   :  { %s423_s15 = smov 0   ;;  %s425_s16 = smov 0   ;;  %s493_s0 = inlined_call_operand.vmem [shape: f32[2,16,32], index: 0, kind: input, shape index: {}]   ;;  %s494_s1 = inlined_call_operand.vmem [shape: f32[16,1], index: 1, kind: input, shape index: {}]   ;;  %s495_s2 = inlined_call_operand.vmem [shape: f32[16,1], index: 2, kind: input, shape index: {}]   ;;  %s496_s3 = inlined_call_operand.vmem [shape: f32[16,1], index: 3, kind: output, shape index: {0}]   ;;  %s497_s4 = inlined_call_operand.vmem [shape: f32[16,1], index: 4, kind: output, shape index: {1}]  }
   0x1   :  { %s427_s17 = smov 0  }
   0x2 LB: > { %s27_s18 = sadd.s32 1, %s391_s16  ;;  %p334_p0 = scmp.ge.s32.totalorder %s395_s17, 1  ;;  %s395_s17 = sphi %s427_s17, %s15_s17   ;;  %s391_s16 = sphi %s425_s16, %s499_s16   ;;  %s387_s15 = sphi %s423_s15, %s498_s15  }
   0x3   : > { %p29_p1 = scmp.ge.s32.totalorder %s27_s18, 2  ;;  %p172_p2 = scmp.lt.s32.totalorder %s395_s17, 3 }
   0x5   : > { %s501_s18 = smov (%p29_p1, %s27_s18), 0  ;;  %p173_p3 = pnand %p334_p0, %p172_p2 }
   0x6   : > { %p196_p4 = scmp.lt.s32.totalorder (!%p173_p3), %s387_s15, 1  ;;  %p204_p5 = scmp.eq.s32.totalorder (!%p173_p3), %s387_s15, 0 }
   0x7   : > { %176 = sbr.rel (%p173_p3) target bundleno = 208 (0xd0), region = 32 }
   0xe   : > { %s197_s19 = scalar_select %p196_p4, %s387_s15, 1 }
   0xf   : > { %209 = sbr.rel (!%p204_p5) target bundleno = 22 (0x16), region = 36  ;;  %vm210_vm0 = vcmask (%p204_p5), 7168   ;;  %v397_v0 = vmov (%p204_p5), 0.0  }
  0x10   : > { %s341_s20 = sshll.u32 %s197_s19, 4  ;;  %211 = vst.msk [vmem:[#allocation2] sm:$0xff] (%p204_p5), %vm210_vm0, %v397_v0  ;;  %212 = vst.msk [vmem:[#allocation2 + $0x8] sm:$0xff] (%p204_p5), %vm210_vm0, %v397_v0 }
  0x11   : > { %s203_s23 = scalar_lea.vmem %s493_s0, %s341_s20  ;;  %213 = vst.msk [vmem:[#allocation3] sm:$0xff] (%p204_p5), %vm210_vm0, %v397_v0  ;;  %214 = vst.msk [vmem:[#allocation3 + $0x8] sm:$0xff] (%p204_p5), %vm210_vm0, %v397_v0 }
  0x16 PF: > { %v215_v1 = vld [vmem:[%s203_s23] sm:$0xff]  ;;  %vm219_vm1 = vcmask 261120   ;;  %v216_v2 = vld [vmem:[%s203_s23 + $0x8] sm:$0xff]  ;;  %p245_p6 = scmp.eq.s32.totalorder %s387_s15, 1  ;;  %vm228_vm2 = vcmask 7168  }
  0x17   : > { %v233_v3 = vmul.f32 %v215_v1, %v215_v1  ;;  %v220_v4 = vsel %vm219_vm1, %v215_v1, 0.0  ;;  %v234_v5 = vmul.f32 %v216_v2, %v216_v2  ;;  %v223_v7 = vsel %vm219_vm1, %v216_v2, 0.0  ;;  %v217_v9 = vld [vmem:[#allocation2] sm:$0xff]  ;;  %v218_v14 = vld [vmem:[#allocation2 + $0x8] sm:$0xff] }
  0x18   : > { %221 = vadd.xlane.f32.xlu0 %v220_v4  ;;  %v231_v10 = vld [vmem:[#allocation3] sm:$0xff]  ;;  %v232_v16 = vld [vmem:[#allocation3 + $0x8] sm:$0xff]  ;;  %v265_v37 = vld [vmem:[%s494_s1] sm:$0xff] (%p245_p6) }
  0x19   : > { %v235_v6 = vsel %vm219_vm1, %v233_v3, 0.0  ;;  %v238_v8 = vsel %vm219_vm1, %v234_v5, 0.0  ;;  %v266_v38 = vld [vmem:[%s494_s1 + $0x8] sm:$0xff] (%p245_p6)  ;;  %v275_v43 = vld [vmem:[%s495_s2] sm:$0xff] (%p245_p6) }
  0x1a   : > { %236 = vadd.xlane.f32.xlu1 %v235_v6  ;;  %v276_v45 = vld [vmem:[%s495_s2 + $0x8] sm:$0xff] (%p245_p6) }
  0x1c   : > { %224 = vadd.xlane.f32.xlu0 %v223_v7 }
  0x1e   : > { %239 = vadd.xlane.f32.xlu1 %v238_v8 }
  0xa5   : > { %v222_v11 = vpop.xlane.xlu0 %221 }
  0xa6   : > { %v226_v12 = vadd.f32 %v222_v11, %v217_v9 }
  0xa7   : > { %v237_v13 = vpop.xlane.xlu1 %236 }
  0xa8   : > { %v241_v15 = vadd.f32 %v237_v13, %v231_v10  ;;  %229 = vst.msk [vmem:[#allocation2] sm:$0xff] %vm228_vm2, %v226_v12  ;;  %249 = sbr.rel (!%p245_p6) target bundleno = 208 (0xd0), region = 40 }
  0xa9   : > { %v225_v17 = vpop.xlane.xlu0 %224 }
  0xaa   : > { %243 = vst.msk [vmem:[#allocation3] sm:$0xff] %vm228_vm2, %v241_v15  ;;  %v227_v18 = vadd.f32 %v225_v17, %v218_v14 }
  0xab   : > { %v240_v19 = vpop.xlane.xlu1 %239 }
  0xac   : > { %v242_v20 = vadd.f32 %v240_v19, %v232_v16  ;;  %230 = vst.msk [vmem:[#allocation2 + $0x8] sm:$0xff] %vm228_vm2, %v227_v18 }
  0xae   : > { %244 = vst.msk [vmem:[#allocation3 + $0x8] sm:$0xff] %vm228_vm2, %v242_v20 }
  0xaf   : > { %v250_v21 = vld [vmem:[#allocation2] sm:$0xff] }
  0xb0   : > { %v253_v23 = vmul.f32 0.015625, %v250_v21 }
  0xb1   : > { %v255_v22 = vld [vmem:[#allocation3] sm:$0xff] }
  0xb2   : > { %v257_v24 = vmul.f32 0.015625, %v255_v22  ;;  %v259_v29 = vmul.f32 %v253_v23, %v253_v23 }
  0xb3   : > { %v251_v25 = vld [vmem:[#allocation2 + $0x8] sm:$0xff] }
  0xb4   : > { %v254_v27 = vmul.f32 0.015625, %v251_v25  ;;  %v261_v31 = vsub.f32 %v257_v24, %v259_v29 }
  0xb5   : > { %v256_v26 = vld [vmem:[#allocation3 + $0x8] sm:$0xff] }
  0xb6   : > { %v258_v28 = vmul.f32 0.015625, %v256_v26  ;;  %v260_v30 = vmul.f32 %v254_v27, %v254_v27  ;;  %v263_v33 = vmax.f32 %v261_v31, 0.0 }
  0xb8   : > { %v262_v32 = vsub.f32 %v258_v28, %v260_v30  ;;  %v267_v35 = vadd.f32 1e-05, %v263_v33 }
  0xba   : > { %v264_v34 = vmax.f32 %v262_v32, 0.0  ;;  %369 = vrsqrt.f32 %v267_v35 }
  0xbc   : > { %v268_v36 = vadd.f32 1e-05, %v264_v34 }
  0xbe   : > { %371 = vrsqrt.f32 %v268_v36 }
  0xc4   : > { %v370_v39 = vpop.eup %369 }
  0xc5   : > { %v271_v41 = vmul.f32 %v370_v39, %v265_v37 }
  0xc7   : > { %273 = vst.msk [vmem:[%s496_s3] sm:$0xff] %vm228_vm2, %v271_v41  ;;  %v277_v44 = vmul.f32 %v271_v41, %v253_v23 }
  0xc8   : > { %v372_v40 = vpop.eup %371 }
  0xc9   : > { %v272_v42 = vmul.f32 %v372_v40, %v266_v38  ;;  %v279_v47 = vsub.f32 %v275_v43, %v277_v44 }
  0xcb   : > { %274 = vst.msk [vmem:[%s496_s3 + $0x8] sm:$0xff] %vm228_vm2, %v272_v42  ;;  %v278_v46 = vmul.f32 %v272_v42, %v254_v27  ;;  %281 = vst.msk [vmem:[%s497_s4] sm:$0xff] %vm228_vm2, %v279_v47 }
  0xcd   : > { %v280_v48 = vsub.f32 %v276_v45, %v278_v46 }
  0xcf   : > { %282 = vst.msk [vmem:[%s497_s4 + $0x8] sm:$0xff] %vm228_vm2, %v280_v48 }
  0xd0 PF: > { %s15_s17 = sadd.s32 1, %s395_s17   ;;  %s498_s15 = smov %s391_s16 }
  0xd1   : > { %p12_p7 = scmp.ge.s32.totalorder %s15_s17, 4   ;;  %s499_s16 = smov %s501_s18 }
  0xd3   :  { %14 = sbr.rel (!%p12_p7) target bundleno = 2 (0x2), region = 74 }

// kernel: net_vgg_lstm_forward.30
= control target key start
LH: loop header
LB: loop body
LE: loop exit
PB: predicated region body
PF: predicated region fallthrough
CT: control target
= control target key end

     0   :  { %s403_s12 = smov 0   ;;  %s405_s13 = smov 0   ;;  %s448_s0 = inlined_call_operand.vmem [shape: f32[2,16,32], index: 0, kind: input, shape index: {}]   ;;  %s449_s1 = inlined_call_operand.vmem [shape: f32[16,1], index: 1, kind: input, shape index: {}]   ;;  %s450_s2 = inlined_call_operand.vmem [shape: f32[16,1], index: 2, kind: input, shape index: {}]   ;;  %s451_s3 = inlined_call_operand.vmem [shape: f32[2,16,32], index: 3, kind: output, shape index: {}]  }
   0x1   :  { %s407_s14 = smov 0  }
   0x2 LB: > { %s25_s15 = sadd.s32 1, %s376_s13  ;;  %p322_p0 = scmp.ge.s32.totalorder %s380_s14, 1  ;;  %s380_s14 = sphi %s407_s14, %s13_s14   ;;  %s376_s13 = sphi %s405_s13, %s453_s13   ;;  %s372_s12 = sphi %s403_s12, %s452_s12  }
   0x3   : > { %p27_p1 = scmp.ge.s32.totalorder %s25_s15, 2  ;;  %p156_p2 = scmp.lt.s32.totalorder %s380_s14, 3 }
   0x5   : > { %s455_s15 = smov (%p27_p1, %s25_s15), 0  ;;  %p157_p3 = pnand %p322_p0, %p156_p2 }
   0x6   : > { %v218_v0 = vld [vmem:[%s450_s2] sm:$0xff] (!%p157_p3)  ;;  %v382_v2 = vmov (!%p157_p3), 0   ;;  %v219_v3 = vld [vmem:[%s450_s2 + $0x8] sm:$0xff] (!%p157_p3)  ;;  %p186_p4 = scmp.lt.s32.totalorder (!%p157_p3), %s372_s12, 1  ;;  %vm232_vm0 = vcmask (!%p157_p3), 261120  }
   0x7   : > { %160 = sbr.rel (%p157_p3) target bundleno = 145 (0x91), region = 32  ;;  %v204_v1 = vld [vmem:[%s449_s1] sm:$0xff] (!%p157_p3)  ;;  %357 = vset.pattern.permute.xlu1 (!%p157_p3), %v382_v2  ;;  %356 = vset.pattern.permute.xlu0 (!%p157_p3), %v382_v2  ;;  %v205_v4 = vld [vmem:[%s449_s1 + $0x8] sm:$0xff] (!%p157_p3) }
   0x8   : > { %222 = vperm.xlu1 (!%p157_p3), %357, %v218_v0   ;;  %208 = vperm.xlu0 (!%p157_p3), %356, %v204_v1  }
   0xc   : > { %227 = vperm.xlu1 (!%p157_p3), %357, %v219_v3   ;;  %213 = vperm.xlu0 (!%p157_p3), %356, %v205_v4  }
   0xe   : > { %s457_s12 = smov (!%p186_p4, %s372_s12), 1 }
   0xf   : > { %s329_s24 = sshll.u32 %s457_s12, 4 }
  0x10   : > { %s193_s27 = scalar_lea.vmem %s448_s0, %s329_s24  ;;  %s201_s30 = scalar_lea.vmem %s451_s3, %s329_s24 }
  0x11   : > { %v202_v5 = vld [vmem:[%s193_s27] sm:$0xff]  ;;  %v203_v9 = vld [vmem:[%s193_s27 + $0x8] sm:$0xff] }
  0x87   : > { %v223_v6 = vpop.permute.xlu1 %222  ;;  %v209_v7 = vpop.permute.xlu0 %208 }
  0x88   : > { %v216_v8 = vmul.f32 %v209_v7, %v202_v5 }
  0x8a   : > { %v230_v10 = vadd.f32 %v223_v6, %v216_v8 }
  0x8b   : > { %v214_v11 = vpop.permute.xlu0 %213  ;;  %v228_v13 = vpop.permute.xlu1 %227 }
  0x8c   : > { %233 = vst.msk [vmem:[%s201_s30] sm:$0xff] %vm232_vm0, %v230_v10  ;;  %v217_v12 = vmul.f32 %v214_v11, %v203_v9 }
  0x8e   : > { %v231_v14 = vadd.f32 %v228_v13, %v217_v12 }
  0x90   : > { %234 = vst.msk [vmem:[%s201_s30 + $0x8] sm:$0xff] %vm232_vm0, %v231_v14 }
  0x91 PF: > { %s13_s14 = sadd.s32 1, %s380_s14   ;;  %s452_s12 = smov %s376_s13 }
  0x92   : > { %p10_p5 = scmp.ge.s32.totalorder %s13_s14, 4   ;;  %s453_s13 = smov %s455_s15 }
  0x94   :  { %12 = sbr.rel (!%p10_p5) target bundleno = 2 (0x2), region = 62 }

// kernel: net_vgg_lstm_forward.35
= control target key start
LH: loop header
LB: loop body
LE: loop exit
PB: predicated region body
PF: predicated region fallthrough
CT: control target
= control target key end

     0   :  { %vm18_vm0 = vcmask 523264   ;;  %v136_v0 = vmov 0.0|0.0   ;;  %v137_v3 = vmov 0.0   ;;  %vm138_vm1 = vmmov 0   ;;  %s177_s1 = inlined_call_operand.vmem [shape: f32[16,64], index: 1, kind: input, shape index: {}]   ;;  %s178_s0 = inlined_call_operand.vmem [shape: f32[8,16], index: 0, kind: input, shape index: {}]   ;;  %s179_s2 = inlined_call_operand.vmem [shape: f32[1,64], index: 2, kind: input, shape index: {}]   ;;  %s180_s3 = inlined_call_operand.vmem [shape: f32[8,64], index: 3, kind: output, shape index: {}]  }
   0x1   :  { %130 = vmatprep.subr.bf16.mxu0 %v136_v0  ;;  %v22_v1 = vld [vmem:[%s177_s1] sm:$0xff]  ;;  %v23_v2 = vld [vmem:[%s177_s1 + $0x8] sm:$0xff]  ;;  %19 = vst.msk [vmem:[#allocation2] sm:$0xff] %vm18_vm0, %v137_v3  ;;  %127 = vmatprep.mubr.msk.f32.mxu0 %vm138_vm1, %v137_v3  ;;  %vm24_vm2 = vcmask 130048  }
   0x2   :  { %v131_v4 = vpack.c.bf16 %v23_v2, %v22_v1  ;;  %v21_v5 = vld [vmem:[%s178_s0] sm:$0xff] }
   0x3   :  { %v119_v10 = vld [vmem:[%s179_s2] ss:$0 sm:$0xff] }
   0x4   :  { %132 = vmatpush3.bf16.msra.mxu0 %v131_v4 }
   0x7   :  { %128 = vmatmul.mubr.msk.f32.vlgmr.msra.gmra.mrb[0].mxu0 %vm24_vm2, %v21_v5 }
   0x8   :  { %v20_v6 = vld [vmem:[#allocation2] sm:$0xff] }
  0xda   :  { %v94_v7 = vpop.f32.mrb[0].mxu0 }
  0xdb   :  { %v98_v8 = vadd.f32 %v94_v7, %v20_v6  ;;  %v129_v9 = vpop.f32.mrb[1].mxu0 }
  0xdd   :  { %100 = vst.msk [vmem:[#allocation2] sm:$0xff] %vm18_vm0, %v98_v8 }
  0xe4   :  { %v104_v11 = vld [vmem:[#allocation2] sm:$0xff] }
  0xe5   :  { %v112_v12 = vadd.f32 %v119_v10, %v104_v11 }
  0xe7   :  { %113 = vst.msk [vmem:[%s180_s3] sm:$0xff] %vm18_vm0, %v112_v12 }

// kernel: net_vgg_lstm_forward.36
= control target key start
LH: loop header
LB: loop body
LE: loop exit
PB: predicated region body
PF: predicated region fallthrough
CT: control target
= control target key end

     0   :  { %v1034_v0 = vmov 0.0   ;;  %vm1035_vm0 = vmmov 0   ;;  %s1036_s13 = smov 32   ;;  %s1037_s17 = smov 112   ;;  %vm219_vm1 = vcmask 58368   ;;  %vm15_vm2 = vcmask 64512   ;;  %s1211_s1 = inlined_call_operand.vmem [shape: f32[2,8,32], index: 1, kind: input, shape index: {}]   ;;  %s1212_s0 = inlined_call_operand.vmem [shape: f32[4,2,64], index: 0, kind: input, shape index: {}]   ;;  %s1213_s2 = inlined_call_operand.vmem [shape: f32[4,2,2,8], index: 2, kind: output, shape index: {}]  }
   0x1   :  { %927 = vmatprep.subr.mxu1 %v1034_v0  ;;  %v1061_v1 = vld [vmem:[%s1211_s1 + $0x8] sm:$0xff]  ;;  %929 = vmatprep.mubr.msk.f32.mxu1 %vm1035_vm0, %v1034_v0  ;;  %v1078_v2 = vld [vmem:[%s1211_s1] sm:$0xff]  ;;  %s1038_s18 = smov 8   ;;  %s1039_s19 = smov 16  }
   0x2   :  { %928 = vmatpush3.msra.mxu1 %v1061_v1  ;;  %922 = vmatprep.subr.mxu0 %v1034_v0  ;;  %v875_v7 = vld [vmem:[%s1212_s0 + $0x6] sm:$0x3]  ;;  %v11_v8 = vld [vmem:[%s1212_s0] sm:$0x3]  ;;  %s1040_s20 = smov 72   ;;  %s1041_s23 = smov 104  }
   0x3   :  { %930 = vmatmul.mubr.f32.vlgmr.msra.gmra.mrb[0].mxu1 %v1034_v0  ;;  %924 = vmatprep.mubr.msk.f32.mxu0 %vm1035_vm0, %v1034_v0  ;;  %v881_v42 = vld [vmem:[%s1212_s0 + $0x4] sm:$0x3]  ;;  %v880_v45 = vld [vmem:[%s1212_s0 + $0x2] sm:$0x3] }
   0x4   :  { %937 = vmatprep.subr.mxu1 %v1034_v0  ;;  %939 = vmatprep.mubr.msk.f32.mxu1 %vm1035_vm0, %v1034_v0 }
   0x5   :  { %938 = vmatpush3.msra.mxu1 %v1061_v1  ;;  %923 = vmatpush3.msra.mxu0 %v1078_v2 }
   0x6   :  { %947 = vmatprep.subr.mxu1 %v1034_v0  ;;  %925 = vmatmul.mubr.f32.vlgmr.msra.gmra.mrb[0].mxu0 %v1034_v0 }
   0x7   :  { %932 = vmatprep.subr.mxu0 %v1034_v0  ;;  %934 = vmatprep.mubr.msk.f32.mxu0 %vm1035_vm0, %v1034_v0 }
   0x8   :  { %933 = vmatpush3.msra.mxu0 %v1078_v2 }
   0x9   :  { %942 = vmatprep.subr.mxu0 %v1034_v0 }
  0xd6   :  { %v158_v3 = vpop.f32.mrb[0].mxu1 }
  0xd7   :  { %163 = vrot.lane.b32.xlu0 %v158_v3, %s1036_s13  ;;  %v931_v4 = vpop.f32.mrb[1].mxu1 }
  0xd9   :  { %v85_v5 = vpop.f32.mrb[0].mxu0 }
  0xda   :  { %v926_v6 = vpop.f32.mrb[1].mxu0  ;;  %v89_v11 = vadd.f32 %v85_v5, %v11_v8 }
  0xdc   :  { %v877_v15 = vmul.f32 -1.442695, %v89_v11 }
 0x149   :  { %v164_v9 = vpop.permute.xlu0 %163 }
 0x14a   :  { %v166_v10 = vadd.f32 %v875_v7, %v164_v9 }
 0x14c   :  { %970 = vtanh.f32 %v166_v10  ;;  %v878_v14 = vmul.f32 -1.442695, %v166_v10 }
 0x14d   :  { %972 = vtanh.f32 %v89_v11 }
 0x14e   :  { %974 = vpow2.f32 %v878_v14 }
 0x14f   :  { %976 = vpow2.f32 %v877_v15 }
 0x156   :  { %v971_v12 = vpop.eup %970 }
 0x157   :  { %200 = vrot.lane.b32.xlu0 %v971_v12, %s1037_s17  ;;  %v973_v13 = vpop.eup %972 }
 0x158   :  { %v975_v16 = vpop.eup %974 }
 0x159   :  { %v977_v17 = vpop.eup %976  ;;  %v194_v18 = vadd.f32 1.0, %v975_v16 }
 0x15a   :  { %v170_v19 = vadd.f32 1.0, %v977_v17  ;;  %v889_v17 = vld [vmem:[%s1212_s0 + $0x4] sm:$0x3] }
 0x15b   :  { %176 = vrot.lane.b32.xlu0 %v973_v13, %s1037_s17  ;;  %978 = vrcp.f32 %v194_v18 }
 0x15c   :  { %980 = vrcp.f32 %v170_v19 }
 0x165   :  { %v979_v20 = vpop.eup %978 }
 0x166   :  { %v981_v23 = vpop.eup %980  ;;  %v198_v26 = vmul.f32 0.0, %v979_v20 }
 0x167   :  { %v174_v30 = vmul.f32 0.0, %v981_v23 }
 0x1c9   :  { %v201_v21 = vpop.permute.xlu0 %200 }
 0x1ca   :  { %v203_v22 = vmul.f32 %v979_v20, %v201_v21 }
 0x1cc   :  { %205 = vrot.lane.b32.xlu1 %v203_v22, %s1038_s18 }
 0x1cd   :  { %v177_v24 = vpop.permute.xlu0 %176 }
 0x1ce   :  { %v179_v25 = vmul.f32 %v981_v23, %v177_v24 }
 0x1d0   :  { %181 = vrot.lane.b32.xlu0 %v179_v25, %s1038_s18 }
 0x23e   :  { %v206_v27 = vpop.permute.xlu1 %205 }
 0x23f   :  { %v1098_v28 = vadd.f32 %v206_v27, %v198_v26 }
 0x241   :  { %982 = vtanh.f32 %v1098_v28 }
 0x242   :  { %v182_v31 = vpop.permute.xlu0 %181 }
 0x243   :  { %v1102_v32 = vadd.f32 %v182_v31, %v174_v30 }
 0x245   :  { %984 = vtanh.f32 %v1102_v32 }
 0x24b   :  { %v983_v29 = vpop.eup %982 }
 0x24c   :  { %211 = vrot.lane.b32.xlu1 %v983_v29, %s1039_s19 }
 0x24f   :  { %v985_v35 = vpop.eup %984 }
 0x2be   :  { %v212_v33 = vpop.permute.xlu1 %211 }
 0x2bf   :  { %v214_v34 = vmul.f32 %v979_v20, %v212_v33 }
 0x2c1   :  { %222 = vrot.lane.b32.xlu1 %v214_v34, %s1040_s20 }
 0x2c5   :  { %187 = vrot.lane.b32.xlu1 %v985_v35, %s1039_s19 }
 0x333   :  { %v223_v36 = vpop.permute.xlu1 %222 }
 0x334   :  { %879 = vst.msk [vmem:[%s1213_s2 + $0xe] sm:$0x3] %vm219_vm1, %v223_v36  ;;  %940 = vmatmul.mubr.msk.f32.vlgmr.msra.gmra.mrb[2].mxu1 %vm15_vm2, %v223_v36 }
 0x335   :  { %948 = vmatpush3.msra.mxu1 %v1061_v1  ;;  %949 = vmatprep.mubr.msk.f32.mxu1 %vm1035_vm0, %v1034_v0 }
 0x336   :  { %957 = vmatprep.subr.mxu1 %v1034_v0 }
 0x337   :  { %v188_v37 = vpop.permute.xlu1 %187 }
 0x338   :  { %v190_v38 = vmul.f32 %v981_v23, %v188_v37 }
 0x33a   :  { %216 = vrot.lane.b32.xlu0 %v190_v38, %s1041_s23 }
 0x3ac   :  { %v217_v39 = vpop.permute.xlu0 %216 }
 0x3ad   :  { %220 = vst.msk [vmem:[%s1213_s2] sm:$0x3] %vm219_vm1, %v217_v39  ;;  %935 = vmatmul.mubr.msk.f32.vlgmr.msra.gmra.mrb[2].mxu0 %vm15_vm2, %v217_v39 }
 0x3ae   :  { %943 = vmatpush3.msra.mxu0 %v1078_v2  ;;  %944 = vmatprep.mubr.msk.f32.mxu0 %vm1035_vm0, %v1034_v0 }
 0x3af   :  { %952 = vmatprep.subr.mxu0 %v1034_v0 }
 0x407   :  { %v374_v40 = vpop.f32.mrb[2].mxu1 }
 0x408   :  { %v941_v41 = vpop.f32.mrb[3].mxu1  ;;  %379 = vrot.lane.b32.xlu1 %v374_v40, %s1036_s13 }
 0x47a   :  { %v380_v43 = vpop.permute.xlu1 %379 }
 0x47b   :  { %v382_v44 = vadd.f32 %v881_v42, %v380_v43 }
 0x47d   :  { %986 = vtanh.f32 %v382_v44  ;;  %v886_v51 = vmul.f32 -1.442695, %v382_v44 }
 0x480   :  { %v300_v46 = vpop.f32.mrb[2].mxu0 }
 0x481   :  { %v304_v47 = vadd.f32 %v880_v45, %v300_v46  ;;  %v936_v48 = vpop.f32.mrb[3].mxu0 }
 0x483   :  { %988 = vtanh.f32 %v304_v47  ;;  %v885_v52 = vmul.f32 -1.442695, %v304_v47 }
 0x484   :  { %990 = vpow2.f32 %v886_v51 }
 0x485   :  { %992 = vpow2.f32 %v885_v52 }
 0x487   :  { %v987_v49 = vpop.eup %986 }
 0x488   :  { %416 = vrot.lane.b32.xlu0 %v987_v49, %s1037_s17 }
 0x48d   :  { %v989_v50 = vpop.eup %988 }
 0x48e   :  { %392 = vrot.lane.b32.xlu0 %v989_v50, %s1037_s17  ;;  %v991_v53 = vpop.eup %990  ;;  %v898_v50 = vld [vmem:[%s1212_s0 + $0x6] sm:$0x3] }
 0x48f   :  { %v410_v54 = vadd.f32 1.0, %v991_v53  ;;  %v993_v55 = vpop.eup %992 }
 0x490   :  { %v386_v56 = vadd.f32 1.0, %v993_v55 }
 0x491   :  { %994 = vrcp.f32 %v410_v54 }
 0x492   :  { %996 = vrcp.f32 %v386_v56 }
 0x49b   :  { %v995_v57 = vpop.eup %994 }
 0x49c   :  { %v997_v60 = vpop.eup %996  ;;  %v414_v63 = vmul.f32 %v995_v57, %v1098_v28 }
 0x49d   :  { %v390_v5 = vmul.f32 %v997_v60, %v1102_v32 }
 0x4fa   :  { %v417_v58 = vpop.permute.xlu0 %416 }
 0x4fb   :  { %v419_v59 = vmul.f32 %v995_v57, %v417_v58 }
 0x4fd   :  { %421 = vrot.lane.b32.xlu1 %v419_v59, %s1038_s18 }
 0x500   :  { %v393_v61 = vpop.permute.xlu0 %392 }
 0x501   :  { %v395_v62 = vmul.f32 %v997_v60, %v393_v61 }
 0x503   :  { %397 = vrot.lane.b32.xlu0 %v395_v62, %s1038_s18 }
 0x56f   :  { %v422_v3 = vpop.permute.xlu1 %421 }
 0x570   :  { %v1138_v4 = vadd.f32 %v422_v3, %v414_v63  ;;  %v658_v63 = vld [vmem:[%s1212_s0] sm:$0x3] }
 0x572   :  { %998 = vtanh.f32 %v1138_v4 }
 0x575   :  { %v398_v6 = vpop.permute.xlu0 %397 }
 0x576   :  { %v400_v7 = vadd.f32 %v398_v6, %v390_v5 }
 0x578   :  { %1000 = vtanh.f32 %v400_v7 }
 0x57c   :  { %v999_v8 = vpop.eup %998 }
 0x57d   :  { %427 = vrot.lane.b32.xlu1 %v999_v8, %s1039_s19 }
 0x582   :  { %v1001_v9 = vpop.eup %1000 }
 0x583   :  { %403 = vrot.lane.b32.xlu0 %v1001_v9, %s1039_s19 }
 0x5ef   :  { %v428_v10 = vpop.permute.xlu1 %427 }
 0x5f0   :  { %v430_v11 = vmul.f32 %v995_v57, %v428_v10 }
 0x5f2   :  { %438 = vrot.lane.b32.xlu1 %v430_v11, %s1040_s20 }
 0x5f5   :  { %v404_v12 = vpop.permute.xlu0 %403 }
 0x5f6   :  { %v406_v13 = vmul.f32 %v997_v60, %v404_v12 }
 0x5f8   :  { %432 = vrot.lane.b32.xlu1 %v406_v13, %s1041_s23 }
 0x664   :  { %v439_v14 = vpop.permute.xlu1 %438 }
 0x665   :  { %888 = vst.msk [vmem:[%s1213_s2 + $0xa] sm:$0x3] %vm219_vm1, %v439_v14  ;;  %950 = vmatmul.mubr.msk.f32.vlgmr.msra.gmra.mrb[4].mxu1 %vm15_vm2, %v439_v14 }
 0x666   :  { %958 = vmatpush3.msra.mxu1 %v1061_v1  ;;  %959 = vmatprep.mubr.msk.f32.mxu1 %vm1035_vm0, %v1034_v0 }
 0x66a   :  { %v433_v15 = vpop.permute.xlu1 %432 }
 0x66b   :  { %887 = vst.msk [vmem:[%s1213_s2 + $0x4] sm:$0x3] %vm219_vm1, %v433_v15  ;;  %945 = vmatmul.mubr.msk.f32.vlgmr.msra.gmra.mrb[4].mxu0 %vm15_vm2, %v433_v15 }
 0x66c   :  { %953 = vmatpush3.msra.mxu0 %v1078_v2  ;;  %954 = vmatprep.mubr.msk.f32.mxu0 %vm1035_vm0, %v1034_v0  ;;  %v890_v0 = vld [vmem:[%s1212_s0 + $0x2] sm:$0x3] }
 0x738   :  { %v588_v16 = vpop.f32.mrb[4].mxu1 }
 0x739   :  { %593 = vrot.lane.b32.xlu0 %v588_v16, %s1036_s13  ;;  %v951_v1 = vpop.f32.mrb[5].mxu1 }
 0x73e   :  { %v514_v18 = vpop.f32.mrb[4].mxu0 }
 0x73f   :  { %v518_v19 = vadd.f32 %v889_v17, %v514_v18  ;;  %v946_v20 = vpop.f32.mrb[5].mxu0 }
 0x741   :  { %1002 = vtanh.f32 %v518_v19  ;;  %v894_v22 = vmul.f32 -1.442695, %v518_v19 }
 0x743   :  { %1004 = vpow2.f32 %v894_v22 }
 0x74b   :  { %v1003_v21 = vpop.eup %1002 }
 0x74c   :  { %606 = vrot.lane.b32.xlu0 %v1003_v21, %s1037_s17 }
 0x74d   :  { %v1005_v24 = vpop.eup %1004 }
 0x74e   :  { %v600_v25 = vadd.f32 1.0, %v1005_v24 }
 0x7ab   :  { %v594_v2 = vpop.permute.xlu0 %593 }
 0x7ac   :  { %v596_v23 = vadd.f32 %v890_v0, %v594_v2 }
 0x7ae   :  { %1006 = vtanh.f32 %v596_v23  ;;  %v895_v30 = vmul.f32 -1.442695, %v596_v23 }
 0x7af   :  { %1008 = vrcp.f32 %v600_v25 }
 0x7b0   :  { %1010 = vpow2.f32 %v895_v30 }
 0x7b8   :  { %v1007_v26 = vpop.eup %1006 }
 0x7b9   :  { %630 = vrot.lane.b32.xlu1 %v1007_v26, %s1037_s17  ;;  %v1009_v27 = vpop.eup %1008 }
 0x7ba   :  { %v1011_v31 = vpop.eup %1010  ;;  %v604_v36 = vmul.f32 %v1009_v27, %v400_v7 }
 0x7bb   :  { %v624_v32 = vadd.f32 1.0, %v1011_v31 }
 0x7bd   :  { %1012 = vrcp.f32 %v624_v32 }
 0x7be   :  { %v607_v28 = vpop.permute.xlu0 %606 }
 0x7bf   :  { %v609_v29 = vmul.f32 %v1009_v27, %v607_v28 }
 0x7c1   :  { %611 = vrot.lane.b32.xlu0 %v609_v29, %s1038_s18 }
 0x7c7   :  { %v1013_v33 = vpop.eup %1012 }
 0x7c8   :  { %v628_v40 = vmul.f32 %v1013_v33, %v1138_v4 }
 0x82b   :  { %v631_v34 = vpop.permute.xlu1 %630 }
 0x82c   :  { %v633_v35 = vmul.f32 %v1013_v33, %v631_v34 }
 0x82e   :  { %635 = vrot.lane.b32.xlu1 %v633_v35, %s1038_s18 }
 0x833   :  { %v612_v37 = vpop.permute.xlu0 %611 }
 0x834   :  { %v614_v38 = vadd.f32 %v612_v37, %v604_v36 }
 0x836   :  { %1014 = vtanh.f32 %v614_v38 }
 0x840   :  { %v1015_v39 = vpop.eup %1014 }
 0x841   :  { %617 = vrot.lane.b32.xlu0 %v1015_v39, %s1039_s19 }
 0x8a0   :  { %v636_v41 = vpop.permute.xlu1 %635 }
 0x8a1   :  { %v638_v42 = vadd.f32 %v636_v41, %v628_v40 }
 0x8a3   :  { %1016 = vtanh.f32 %v638_v42 }
 0x8ad   :  { %v1017_v43 = vpop.eup %1016 }
 0x8ae   :  { %641 = vrot.lane.b32.xlu1 %v1017_v43, %s1039_s19 }
 0x8b3   :  { %v618_v44 = vpop.permute.xlu0 %617 }
 0x8b4   :  { %v620_v45 = vmul.f32 %v1009_v27, %v618_v44 }
 0x8b6   :  { %646 = vrot.lane.b32.xlu0 %v620_v45, %s1041_s23 }
 0x920   :  { %v642_v46 = vpop.permute.xlu1 %641 }
 0x921   :  { %v644_v47 = vmul.f32 %v1013_v33, %v642_v46 }
 0x923   :  { %652 = vrot.lane.b32.xlu1 %v644_v47, %s1040_s20 }
 0x928   :  { %v647_v48 = vpop.permute.xlu0 %646 }
 0x929   :  { %896 = vst.msk [vmem:[%s1213_s2 + $0x8] sm:$0x3] %vm219_vm1, %v647_v48  ;;  %955 = vmatmul.mubr.msk.f32.vlgmr.msra.gmra.mrb[6].mxu0 %vm15_vm2, %v647_v48 }
 0x995   :  { %v653_v49 = vpop.permute.xlu1 %652 }
 0x996   :  { %897 = vst.msk [vmem:[%s1213_s2 + $0x6] sm:$0x3] %vm219_vm1, %v653_v49  ;;  %960 = vmatmul.mubr.msk.f32.vlgmr.msra.gmra.mrb[6].mxu1 %vm15_vm2, %v653_v49 }
 0x9fc   :  { %v728_v51 = vpop.f32.mrb[6].mxu0 }
 0x9fd   :  { %v732_v52 = vadd.f32 %v898_v50, %v728_v51  ;;  %v956_v53 = vpop.f32.mrb[7].mxu0 }
 0x9ff   :  { %1018 = vtanh.f32 %v732_v52  ;;  %v902_v55 = vmul.f32 -1.442695, %v732_v52 }
 0xa01   :  { %1020 = vpow2.f32 %v902_v55 }
 0xa09   :  { %v1019_v54 = vpop.eup %1018 }
 0xa0a   :  { %820 = vrot.lane.b32.xlu0 %v1019_v54, %s1037_s17 }
 0xa0b   :  { %v1021_v58 = vpop.eup %1020 }
 0xa0c   :  { %v814_v59 = vadd.f32 1.0, %v1021_v58 }
 0xa0e   :  { %1022 = vrcp.f32 %v814_v59 }
 0xa18   :  { %v1023_v60 = vpop.eup %1022 }
 0xa19   :  { %v818_v6 = vmul.f32 %v1023_v60, %v614_v38 }
 0xa69   :  { %v802_v56 = vpop.f32.mrb[6].mxu1 }
 0xa6a   :  { %807 = vrot.lane.b32.xlu1 %v802_v56, %s1036_s13  ;;  %v961_v57 = vpop.f32.mrb[7].mxu1 }
 0xa7c   :  { %v821_v61 = vpop.permute.xlu0 %820 }
 0xa7d   :  { %v823_v62 = vmul.f32 %v1023_v60, %v821_v61 }
 0xa7f   :  { %825 = vrot.lane.b32.xlu0 %v823_v62, %s1038_s18 }
 0xadc   :  { %v808_v3 = vpop.permute.xlu1 %807 }
 0xadd   :  { %v810_v4 = vadd.f32 %v808_v3, %v658_v63 }
 0xadf   :  { %1024 = vtanh.f32 %v810_v4  ;;  %v903_v10 = vmul.f32 -1.442695, %v810_v4 }
 0xae9   :  { %v1025_v5 = vpop.eup %1024 }
 0xaea   :  { %844 = vrot.lane.b32.xlu1 %v1025_v5, %s1037_s17 }
 0xaf1   :  { %v826_v7 = vpop.permute.xlu0 %825 }
 0xaf2   :  { %v828_v8 = vadd.f32 %v826_v7, %v818_v6 }
 0xaf4   :  { %1026 = vtanh.f32 %v828_v8 }
 0xaf5   :  { %1028 = vpow2.f32 %v903_v10 }
 0xafe   :  { %v1027_v9 = vpop.eup %1026 }
 0xaff   :  { %831 = vrot.lane.b32.xlu0 %v1027_v9, %s1039_s19  ;;  %v1029_v11 = vpop.eup %1028 }
 0xb00   :  { %v838_v12 = vadd.f32 1.0, %v1029_v11 }
 0xb02   :  { %1030 = vrcp.f32 %v838_v12 }
 0xb0c   :  { %v1031_v13 = vpop.eup %1030 }
 0xb0d   :  { %v842_v17 = vmul.f32 %v1031_v13, %v638_v42 }
 0xb5c   :  { %v845_v14 = vpop.permute.xlu1 %844 }
 0xb5d   :  { %v847_v15 = vmul.f32 %v1031_v13, %v845_v14 }
 0xb5f   :  { %849 = vrot.lane.b32.xlu1 %v847_v15, %s1038_s18 }
 0xb71   :  { %v832_v16 = vpop.permute.xlu0 %831 }
 0xb72   :  { %v834_v1 = vmul.f32 %v1023_v60, %v832_v16 }
 0xb74   :  { %860 = vrot.lane.b32.xlu0 %v834_v1, %s1041_s23 }
 0xbd1   :  { %v850_v18 = vpop.permute.xlu1 %849 }
 0xbd2   :  { %v852_v19 = vadd.f32 %v850_v18, %v842_v17 }
 0xbd4   :  { %1032 = vtanh.f32 %v852_v19 }
 0xbde   :  { %v1033_v20 = vpop.eup %1032 }
 0xbdf   :  { %855 = vrot.lane.b32.xlu1 %v1033_v20, %s1039_s19 }
 0xbe6   :  { %v861_v21 = vpop.permute.xlu0 %860 }
 0xbe7   :  { %904 = vst.msk [vmem:[%s1213_s2 + $0xc] sm:$0x3] %vm219_vm1, %v861_v21 }
 0xc51   :  { %v856_v22 = vpop.permute.xlu1 %855 }
 0xc52   :  { %v858_v0 = vmul.f32 %v1031_v13, %v856_v22 }
 0xc54   :  { %866 = vrot.lane.b32.xlu1 %v858_v0, %s1040_s20 }
 0xcc6   :  { %v867_v2 = vpop.permute.xlu1 %866 }
 0xcc7   :  { %905 = vst.msk [vmem:[%s1213_s2 + $0x2] sm:$0x3] %vm219_vm1, %v867_v2 }

// kernel: net_vgg_lstm_forward.40
= control target key start
LH: loop header
LB: loop body
LE: loop exit
PB: predicated region body
PF: predicated region fallthrough
CT: control target
= control target key end

     0   :  { %v526_v0 = vmov 0.0   ;;  %vm527_vm0 = vmmov 0   ;;  %s528_s15 = smov 32   ;;  %s530_s18 = smov 8   ;;  %vm219_vm1 = vcmask 58368   ;;  %vm15_vm2 = vcmask 64512   ;;  %s605_s1 = inlined_call_operand.vmem [shape: f32[2,8,32], index: 1, kind: input, shape index: {}]   ;;  %s606_s0 = inlined_call_operand.vmem [shape: f32[2,2,64], index: 0, kind: input, shape index: {}]   ;;  %s607_s2 = inlined_call_operand.vmem [shape: f32[2,2,2,8], index: 2, kind: output, shape index: {}]  }
   0x1   :  { %471 = vmatprep.subr.mxu1 %v526_v0  ;;  %v446_v1 = vld [vmem:[%s605_s1 + $0x8] sm:$0xff]  ;;  %473 = vmatprep.mubr.msk.f32.mxu1 %vm527_vm0, %v526_v0  ;;  %v14_v2 = vld [vmem:[%s605_s1] sm:$0xff]  ;;  %s529_s1 = smov 112   ;;  %s531_s19 = smov 16  }
   0x2   :  { %472 = vmatpush3.msra.mxu1 %v446_v1  ;;  %466 = vmatprep.subr.mxu0 %v526_v0  ;;  %v11_v4 = vld [vmem:[%s606_s0] sm:$0x3]  ;;  %v445_v13 = vld [vmem:[%s606_s0 + $0x2] sm:$0x3]  ;;  %s532_s20 = smov 104   ;;  %s533_s21 = smov 72  }
   0x3   :  { %474 = vmatmul.mubr.f32.vlgmr.msra.gmra.mrb[0].mxu1 %v526_v0  ;;  %467 = vmatpush3.msra.mxu0 %v14_v2  ;;  %v450_v40 = vld [vmem:[%s606_s0 + $0x2] sm:$0x3]  ;;  %v228_v53 = vld [vmem:[%s606_s0] sm:$0x3] }
   0x4   :  { %468 = vmatprep.mubr.msk.f32.mxu0 %vm527_vm0, %v526_v0  ;;  %476 = vmatprep.subr.mxu0 %v526_v0 }
   0x5   :  { %469 = vmatmul.mubr.f32.vlgmr.msra.gmra.mrb[0].mxu0 %v526_v0  ;;  %481 = vmatprep.subr.mxu1 %v526_v0 }
   0x6   :  { %477 = vmatpush3.msra.mxu0 %v14_v2  ;;  %478 = vmatprep.mubr.msk.f32.mxu0 %vm527_vm0, %v526_v0 }
   0x7   :  { %482 = vmatpush3.msra.mxu1 %v446_v1  ;;  %483 = vmatprep.mubr.msk.f32.mxu1 %vm527_vm0, %v526_v0 }
  0xd6   :  { %v158_v3 = vpop.f32.mrb[0].mxu1 }
  0xd7   :  { %163 = vrot.lane.b32.xlu0 %v158_v3, %s528_s15  ;;  %v475_v5 = vpop.f32.mrb[1].mxu1 }
  0xd8   :  { %v85_v6 = vpop.f32.mrb[0].mxu0 }
  0xd9   :  { %v89_v7 = vadd.f32 %v85_v6, %v11_v4  ;;  %v470_v8 = vpop.f32.mrb[1].mxu0 }
  0xdb   :  { %494 = vtanh.f32 %v89_v7  ;;  %v447_v10 = vmul.f32 -1.442695, %v89_v7 }
  0xdd   :  { %496 = vpow2.f32 %v447_v10 }
  0xe5   :  { %v495_v9 = vpop.eup %494 }
  0xe6   :  { %176 = vrot.lane.b32.xlu1 %v495_v9, %s529_s1 }
  0xe7   :  { %v497_v11 = vpop.eup %496 }
  0xe8   :  { %v170_v12 = vadd.f32 1.0, %v497_v11 }
  0xea   :  { %498 = vrcp.f32 %v170_v12 }
  0xf4   :  { %v499_v16 = vpop.eup %498 }
  0xf5   :  { %v174_v26 = vmul.f32 0.0, %v499_v16 }
 0x149   :  { %v164_v14 = vpop.permute.xlu0 %163 }
 0x14a   :  { %v166_v15 = vadd.f32 %v445_v13, %v164_v14 }
 0x14c   :  { %500 = vtanh.f32 %v166_v15  ;;  %v448_v20 = vmul.f32 -1.442695, %v166_v15 }
 0x14e   :  { %502 = vpow2.f32 %v448_v20 }
 0x156   :  { %v501_v17 = vpop.eup %500 }
 0x157   :  { %200 = vrot.lane.b32.xlu0 %v501_v17, %s529_s1 }
 0x158   :  { %v177_v18 = vpop.permute.xlu1 %176  ;;  %v503_v21 = vpop.eup %502 }
 0x159   :  { %v179_v19 = vmul.f32 %v499_v16, %v177_v18  ;;  %v194_v22 = vadd.f32 1.0, %v503_v21 }
 0x15b   :  { %181 = vrot.lane.b32.xlu0 %v179_v19, %s530_s18  ;;  %504 = vrcp.f32 %v194_v22 }
 0x165   :  { %v505_v23 = vpop.eup %504 }
 0x166   :  { %v198_v30 = vmul.f32 0.0, %v505_v23 }
 0x1c9   :  { %v201_v24 = vpop.permute.xlu0 %200 }
 0x1ca   :  { %v203_v25 = vmul.f32 %v505_v23, %v201_v24 }
 0x1cc   :  { %205 = vrot.lane.b32.xlu1 %v203_v25, %s530_s18 }
 0x1cd   :  { %v182_v27 = vpop.permute.xlu0 %181 }
 0x1ce   :  { %v184_v28 = vadd.f32 %v182_v27, %v174_v26 }
 0x1d0   :  { %506 = vtanh.f32 %v184_v28 }
 0x1da   :  { %v507_v29 = vpop.eup %506 }
 0x1db   :  { %187 = vrot.lane.b32.xlu0 %v507_v29, %s531_s19 }
 0x23e   :  { %v206_v31 = vpop.permute.xlu1 %205 }
 0x23f   :  { %v567_v32 = vadd.f32 %v206_v31, %v198_v30 }
 0x241   :  { %508 = vtanh.f32 %v567_v32 }
 0x24b   :  { %v509_v33 = vpop.eup %508 }
 0x24c   :  { %211 = vrot.lane.b32.xlu1 %v509_v33, %s531_s19 }
 0x24d   :  { %v188_v34 = vpop.permute.xlu0 %187 }
 0x24e   :  { %v190_v35 = vmul.f32 %v499_v16, %v188_v34 }
 0x250   :  { %216 = vrot.lane.b32.xlu0 %v190_v35, %s532_s20 }
 0x2be   :  { %v212_v36 = vpop.permute.xlu1 %211 }
 0x2bf   :  { %v214_v37 = vmul.f32 %v505_v23, %v212_v36 }
 0x2c1   :  { %222 = vrot.lane.b32.xlu1 %v214_v37, %s533_s21 }
 0x2c2   :  { %v217_v38 = vpop.permute.xlu0 %216 }
 0x2c3   :  { %220 = vst.msk [vmem:[%s607_s2] sm:$0x3] %vm219_vm1, %v217_v38  ;;  %479 = vmatmul.mubr.msk.f32.vlgmr.msra.gmra.mrb[2].mxu0 %vm15_vm2, %v217_v38 }
 0x333   :  { %v223_v39 = vpop.permute.xlu1 %222 }
 0x334   :  { %449 = vst.msk [vmem:[%s607_s2 + $0x6] sm:$0x3] %vm219_vm1, %v223_v39  ;;  %484 = vmatmul.mubr.msk.f32.vlgmr.msra.gmra.mrb[2].mxu1 %vm15_vm2, %v223_v39 }
 0x396   :  { %v298_v41 = vpop.f32.mrb[2].mxu0 }
 0x397   :  { %v302_v42 = vadd.f32 %v450_v40, %v298_v41  ;;  %v480_v43 = vpop.f32.mrb[3].mxu0 }
 0x399   :  { %510 = vtanh.f32 %v302_v42  ;;  %v454_v45 = vmul.f32 -1.442695, %v302_v42 }
 0x39b   :  { %512 = vpow2.f32 %v454_v45 }
 0x3a3   :  { %v511_v44 = vpop.eup %510 }
 0x3a4   :  { %390 = vrot.lane.b32.xlu0 %v511_v44, %s529_s1 }
 0x3a5   :  { %v513_v46 = vpop.eup %512 }
 0x3a6   :  { %v384_v48 = vadd.f32 1.0, %v513_v46 }
 0x3a8   :  { %514 = vrcp.f32 %v384_v48 }
 0x3b2   :  { %v515_v50 = vpop.eup %514 }
 0x3b3   :  { %v388_v57 = vmul.f32 %v515_v50, %v184_v28 }
 0x407   :  { %v372_v47 = vpop.f32.mrb[2].mxu1 }
 0x408   :  { %377 = vrot.lane.b32.xlu1 %v372_v47, %s528_s15  ;;  %v485_v49 = vpop.f32.mrb[3].mxu1 }
 0x416   :  { %v391_v51 = vpop.permute.xlu0 %390 }
 0x417   :  { %v393_v52 = vmul.f32 %v515_v50, %v391_v51 }
 0x419   :  { %395 = vrot.lane.b32.xlu0 %v393_v52, %s530_s18 }
 0x47a   :  { %v378_v54 = vpop.permute.xlu1 %377 }
 0x47b   :  { %v380_v55 = vadd.f32 %v378_v54, %v228_v53 }
 0x47d   :  { %516 = vtanh.f32 %v380_v55  ;;  %v455_v61 = vmul.f32 -1.442695, %v380_v55 }
 0x487   :  { %v517_v56 = vpop.eup %516 }
 0x488   :  { %414 = vrot.lane.b32.xlu1 %v517_v56, %s529_s1 }
 0x48b   :  { %v396_v58 = vpop.permute.xlu0 %395 }
 0x48c   :  { %v398_v59 = vadd.f32 %v396_v58, %v388_v57 }
 0x48e   :  { %518 = vtanh.f32 %v398_v59 }
 0x48f   :  { %520 = vpow2.f32 %v455_v61 }
 0x498   :  { %v519_v60 = vpop.eup %518 }
 0x499   :  { %401 = vrot.lane.b32.xlu0 %v519_v60, %s531_s19  ;;  %v521_v62 = vpop.eup %520 }
 0x49a   :  { %v408_v63 = vadd.f32 1.0, %v521_v62 }
 0x49c   :  { %522 = vrcp.f32 %v408_v63 }
 0x4a6   :  { %v523_v0 = vpop.eup %522 }
 0x4a7   :  { %v412_v5 = vmul.f32 %v523_v0, %v567_v32 }
 0x4fa   :  { %v415_v1 = vpop.permute.xlu1 %414 }
 0x4fb   :  { %v417_v2 = vmul.f32 %v523_v0, %v415_v1 }
 0x4fd   :  { %419 = vrot.lane.b32.xlu1 %v417_v2, %s530_s18 }
 0x50b   :  { %v402_v3 = vpop.permute.xlu0 %401 }
 0x50c   :  { %v404_v4 = vmul.f32 %v515_v50, %v402_v3 }
 0x50e   :  { %430 = vrot.lane.b32.xlu0 %v404_v4, %s532_s20 }
 0x56f   :  { %v420_v6 = vpop.permute.xlu1 %419 }
 0x570   :  { %v422_v7 = vadd.f32 %v420_v6, %v412_v5 }
 0x572   :  { %524 = vtanh.f32 %v422_v7 }
 0x57c   :  { %v525_v8 = vpop.eup %524 }
 0x57d   :  { %425 = vrot.lane.b32.xlu1 %v525_v8, %s531_s19 }
 0x580   :  { %v431_v9 = vpop.permute.xlu0 %430 }
 0x581   :  { %456 = vst.msk [vmem:[%s607_s2 + $0x4] sm:$0x3] %vm219_vm1, %v431_v9 }
 0x5ef   :  { %v426_v10 = vpop.permute.xlu1 %425 }
 0x5f0   :  { %v428_v11 = vmul.f32 %v523_v0, %v426_v10 }
 0x5f2   :  { %436 = vrot.lane.b32.xlu1 %v428_v11, %s533_s21 }
 0x664   :  { %v437_v12 = vpop.permute.xlu1 %436 }
 0x665   :  { %457 = vst.msk [vmem:[%s607_s2 + $0x2] sm:$0x3] %vm219_vm1, %v437_v12 }

// kernel: net_vgg_lstm_forward.31
= control target key start
LH: loop header
LB: loop body
LE: loop exit
PB: predicated region body
PF: predicated region fallthrough
CT: control target
= control target key end

     0   :  { %vm27_vm0 = vcmask 130048   ;;  %vm18_vm1 = vcmask 523264   ;;  %v153_v3 = vmov 0.0   ;;  %s201_s1 = inlined_call_operand.vmem [shape: f32[16,64], index: 1, kind: input, shape index: {}]   ;;  %s202_s0 = inlined_call_operand.vmem [shape: f32[16,16], index: 0, kind: input, shape index: {}]   ;;  %s203_s2 = inlined_call_operand.vmem [shape: f32[1,64], index: 2, kind: input, shape index: {}]   ;;  %s204_s3 = inlined_call_operand.vmem [shape: f32[16,64], index: 3, kind: output, shape index: {}]  }
   0x1   :  { %v25_v0 = vld [vmem:[%s201_s1] sm:$0xff]  ;;  %v26_v1 = vld [vmem:[%s201_s1 + $0x8] sm:$0xff]  ;;  %20 = vst.msk [vmem:[#allocation2 + $0x8] sm:$0xff] %vm18_vm1, %v153_v3  ;;  %19 = vst.msk [vmem:[#allocation2] sm:$0xff] %vm18_vm1, %v153_v3 }
   0x2   :  { %v23_v2 = vld [vmem:[%s202_s0] sm:$0xff]  ;;  %v148_v4 = vpack.c.bf16 %v26_v1, %v25_v0  ;;  %v24_v5 = vld [vmem:[%s202_s0 + $0x8] sm:$0xff] }
   0x3   :  { %145 = vmatprep.mubr.msk.f32.mxu0 %vm27_vm0, %v23_v2  ;;  %v136_v12 = vld [vmem:[%s203_s2] ss:$0 sm:$0xff] }
   0x4   :  { %149 = vmatprep.subr.bf16.mxu0 %v148_v4 }
   0x5   :  { %151 = vmatpush3.bf16.msra.mxu0 %v148_v4 }
   0x8   :  { %146 = vmatmul.mubr.msk.f32.vlgmr.msra.gmra.mrb[0].mxu0 %vm27_vm0, %v24_v5  ;;  %v22_v6 = vld [vmem:[#allocation2 + $0x8] sm:$0xff]  ;;  %v21_v7 = vld [vmem:[#allocation2] sm:$0xff] }
  0xdb   :  { %v147_v8 = vpop.f32.mrb[0].mxu0 }
  0xdc   :  { %v110_v9 = vadd.f32 %v147_v8, %v22_v6  ;;  %v100_v10 = vpop.f32.mrb[1].mxu0 }
  0xdd   :  { %v109_v11 = vadd.f32 %v100_v10, %v21_v7 }
  0xde   :  { %113 = vst.msk [vmem:[#allocation2 + $0x8] sm:$0xff] %vm18_vm1, %v110_v9 }
  0xdf   :  { %112 = vst.msk [vmem:[#allocation2] sm:$0xff] %vm18_vm1, %v109_v11 }
  0xe5   :  { %v118_v13 = vld [vmem:[#allocation2 + $0x8] sm:$0xff] }
  0xe6   :  { %v127_v14 = vadd.f32 %v136_v12, %v118_v13  ;;  %v117_v15 = vld [vmem:[#allocation2] sm:$0xff] }
  0xe7   :  { %v126_v16 = vadd.f32 %v136_v12, %v117_v15 }
  0xe8   :  { %129 = vst.msk [vmem:[%s204_s3 + $0x8] sm:$0xff] %vm18_vm1, %v127_v14 }
  0xe9   :  { %128 = vst.msk [vmem:[%s204_s3] sm:$0xff] %vm18_vm1, %v126_v16 }

// kernel: net_vgg_lstm_forward.45
= control target key start
LH: loop header
LB: loop body
LE: loop exit
PB: predicated region body
PF: predicated region fallthrough
CT: control target
= control target key end

     0   :  { %vm18_vm0 = vcmask 130048   ;;  %vm31_vm1 = vcmask 392192   ;;  %v183_v3 = vmov 0   ;;  %v184_v4 = vmov 0.0   ;;  %s249_s1 = inlined_call_operand.vmem [shape: f32[48,16], index: 1, kind: input, shape index: {}]   ;;  %s250_s0 = inlined_call_operand.vmem [shape: f32[16,48], index: 0, kind: input, shape index: {}]   ;;  %s251_s2 = inlined_call_operand.vmem [shape: f32[16,1], index: 2, kind: input, shape index: {}]   ;;  %s252_s3 = inlined_call_operand.vmem [shape: f32[16,16], index: 3, kind: output, shape index: {}]  }
   0x1   :  { %v25_v0 = vld [vmem:[%s249_s1] sm:$0xff]  ;;  %v26_v1 = vld [vmem:[%s249_s1 + $0x8] sm:$0xff]  ;;  %v27_v2 = vld [vmem:[%s249_s1 + $0x10] sm:$0xff]  ;;  %182 = vset.pattern.permute.xlu0 %v183_v3  ;;  %20 = vst.msk [vmem:[#allocation2 + $0x8] sm:$0xff] %vm18_vm0, %v184_v4 }
   0x2   :  { %19 = vst.msk [vmem:[#allocation2] sm:$0xff] %vm18_vm0, %v184_v4  ;;  %v168_v5 = vpack.c.bf16 %v26_v1, %v25_v0  ;;  %v28_v6 = vld [vmem:[%s249_s1 + $0x18] sm:$0xff]  ;;  %v29_v7 = vld [vmem:[%s249_s1 + $0x20] sm:$0xff]  ;;  %v30_v9 = vld [vmem:[%s249_s1 + $0x28] sm:$0xff] }
   0x3   :  { %v172_v8 = vpack.c.bf16 %v28_v6, %v27_v2  ;;  %v23_v10 = vld [vmem:[%s250_s0] sm:$0xff]  ;;  %v176_v12 = vpack.c.bf16 %v30_v9, %v29_v7  ;;  %v124_v13 = vld [vmem:[%s251_s2 + $0x8] sm:$0xff] }
   0x4   :  { %v123_v11 = vld [vmem:[%s251_s2] sm:$0xff]  ;;  %169 = vmatprep.subr.bf16.mxu0 %v168_v5  ;;  %165 = vmatprep.mubr.msk.f32.mxu0 %vm31_vm1, %v23_v10  ;;  %v24_v14 = vld [vmem:[%s250_s0 + $0x8] sm:$0xff] }
   0x5   :  { %171 = vmatpush3.bf16.msra.mxu0 %v168_v5  ;;  %127 = vperm.xlu0 %182, %v123_v11  }
   0x6   :  { %173 = vmatprep.subr.bf16.mxu0 %v172_v8 }
   0x8   :  { %v22_v15 = vld [vmem:[#allocation2 + $0x8] sm:$0xff] }
   0x9   :  { %175 = vmatpush3.bf16.msra.mxu0 %v172_v8  ;;  %132 = vperm.xlu0 %182, %v124_v13   ;;  %v21_v16 = vld [vmem:[#allocation2] sm:$0xff] }
   0xa   :  { %177 = vmatprep.subr.bf16.mxu0 %v176_v12 }
   0xd   :  { %179 = vmatpush3.bf16.msra.mxu0 %v176_v12 }
  0x10   :  { %166 = vmatmul.mubr.msk.f32.vlgmr.msra.gmra.mrb[0].mxu0 %vm31_vm1, %v24_v14 }
  0x84   :  { %v128_v21 = vpop.permute.xlu0 %127 }
  0x88   :  { %v133_v22 = vpop.permute.xlu0 %132 }
  0xe3   :  { %v167_v17 = vpop.f32.mrb[0].mxu0 }
  0xe4   :  { %v114_v18 = vadd.f32 %v167_v17, %v22_v15  ;;  %v104_v19 = vpop.f32.mrb[1].mxu0 }
  0xe5   :  { %v113_v20 = vadd.f32 %v104_v19, %v21_v16 }
  0xe6   :  { %117 = vst.msk [vmem:[#allocation2 + $0x8] sm:$0xff] %vm18_vm0, %v114_v18 }
  0xe7   :  { %116 = vst.msk [vmem:[#allocation2] sm:$0xff] %vm18_vm0, %v113_v20 }
  0xed   :  { %v122_v23 = vld [vmem:[#allocation2 + $0x8] sm:$0xff] }
  0xee   :  { %v121_v24 = vld [vmem:[#allocation2] sm:$0xff]  ;;  %v136_v25 = vadd.f32 %v133_v22, %v122_v23 }
  0xef   :  { %v135_v26 = vadd.f32 %v128_v21, %v121_v24 }
  0xf0   :  { %138 = vst.msk [vmem:[%s252_s3 + $0x8] sm:$0xff] %vm18_vm0, %v136_v25 }
  0xf1   :  { %137 = vst.msk [vmem:[%s252_s3] sm:$0xff] %vm18_vm0, %v135_v26 }

// kernel: net_vgg_lstm_forward.32
= control target key start
LH: loop header
LB: loop body
LE: loop exit
PB: predicated region body
PF: predicated region fallthrough
CT: control target
= control target key end

     0   :  { %v2050_v0 = vmov 0.0   ;;  %vm2051_vm0 = vmmov 0   ;;  %s2052_s11 = smov 32   ;;  %s2054_s16 = smov 8   ;;  %vm219_vm1 = vcmask 58368   ;;  %vm15_vm2 = vcmask 64512   ;;  %s2363_s1 = inlined_call_operand.vmem [shape: f32[2,8,32], index: 1, kind: input, shape index: {}]   ;;  %s2364_s0 = inlined_call_operand.vmem [shape: f32[8,2,64], index: 0, kind: input, shape index: {}]   ;;  %s2365_s2 = inlined_call_operand.vmem [shape: f32[8,2,2,8], index: 2, kind: output, shape index: {}]  }
   0x1   :  { %1839 = vmatprep.subr.mxu1 %v2050_v0  ;;  %v2077_v1 = vld [vmem:[%s2363_s1 + $0x8] sm:$0xff]  ;;  %1841 = vmatprep.mubr.msk.f32.mxu1 %vm2051_vm0, %v2050_v0  ;;  %v2095_v4 = vld [vmem:[%s2363_s1] sm:$0xff]  ;;  %s2053_s1 = smov 112   ;;  %s2055_s19 = smov 16  }
   0x2   :  { %1840 = vmatpush3.msra.mxu1 %v2077_v1  ;;  %1834 = vmatprep.subr.mxu0 %v2050_v0  ;;  %v1735_v5 = vld [vmem:[%s2364_s0 + $0xe] sm:$0x3]  ;;  %v11_v17 = vld [vmem:[%s2364_s0] sm:$0x3]  ;;  %s2056_s20 = smov 72   ;;  %s2057_s23 = smov 104  }
   0x3   :  { %1842 = vmatmul.mubr.f32.vlgmr.msra.gmra.mrb[0].mxu1 %v2050_v0  ;;  %1836 = vmatprep.mubr.msk.f32.mxu0 %vm2051_vm0, %v2050_v0  ;;  %v1741_v42 = vld [vmem:[%s2364_s0 + $0xc] sm:$0x3]  ;;  %v1740_v55 = vld [vmem:[%s2364_s0 + $0x2] sm:$0x3] }
   0x4   :  { %1849 = vmatprep.subr.mxu1 %v2050_v0  ;;  %1851 = vmatprep.mubr.msk.f32.mxu1 %vm2051_vm0, %v2050_v0 }
   0x5   :  { %1850 = vmatpush3.msra.mxu1 %v2077_v1  ;;  %1835 = vmatpush3.msra.mxu0 %v2095_v4 }
   0x6   :  { %1859 = vmatprep.subr.mxu1 %v2050_v0  ;;  %1837 = vmatmul.mubr.f32.vlgmr.msra.gmra.mrb[0].mxu0 %v2050_v0 }
   0x7   :  { %1844 = vmatprep.subr.mxu0 %v2050_v0  ;;  %1846 = vmatprep.mubr.msk.f32.mxu0 %vm2051_vm0, %v2050_v0 }
   0x8   :  { %1845 = vmatpush3.msra.mxu0 %v2095_v4 }
   0x9   :  { %1854 = vmatprep.subr.mxu0 %v2050_v0 }
  0xd6   :  { %v158_v2 = vpop.f32.mrb[0].mxu1 }
  0xd7   :  { %163 = vrot.lane.b32.xlu0 %v158_v2, %s2052_s11  ;;  %v1843_v3 = vpop.f32.mrb[1].mxu1 }
  0xd9   :  { %v85_v12 = vpop.f32.mrb[0].mxu0 }
  0xda   :  { %v1838_v13 = vpop.f32.mrb[1].mxu0  ;;  %v89_v21 = vadd.f32 %v85_v12, %v11_v17 }
  0xdc   :  { %v1737_v24 = vmul.f32 -1.442695, %v89_v21 }
 0x149   :  { %v164_v6 = vpop.permute.xlu0 %163 }
 0x14a   :  { %v166_v7 = vadd.f32 %v1735_v5, %v164_v6 }
 0x14c   :  { %1922 = vtanh.f32 %v166_v7  ;;  %v1738_v9 = vmul.f32 -1.442695, %v166_v7 }
 0x14e   :  { %1924 = vpow2.f32 %v1738_v9 }
 0x156   :  { %v1923_v8 = vpop.eup %1922 }
 0x157   :  { %200 = vrot.lane.b32.xlu0 %v1923_v8, %s2053_s1 }
 0x158   :  { %v1925_v10 = vpop.eup %1924 }
 0x159   :  { %v194_v11 = vadd.f32 1.0, %v1925_v10 }
 0x15b   :  { %1926 = vrcp.f32 %v194_v11 }
 0x165   :  { %v1927_v14 = vpop.eup %1926 }
 0x166   :  { %v198_v18 = vmul.f32 0.0, %v1927_v14 }
 0x1c9   :  { %v201_v15 = vpop.permute.xlu0 %200 }
 0x1ca   :  { %v203_v16 = vmul.f32 %v1927_v14, %v201_v15 }
 0x1cc   :  { %205 = vrot.lane.b32.xlu1 %v203_v16, %s2054_s16 }
 0x23e   :  { %v206_v19 = vpop.permute.xlu1 %205 }
 0x23f   :  { %v2112_v20 = vadd.f32 %v206_v19, %v198_v18  ;;  %v1750_v18 = vld [vmem:[%s2364_s0 + $0xa] sm:$0x3] }
 0x241   :  { %1928 = vtanh.f32 %v2112_v20 }
 0x242   :  { %1930 = vtanh.f32 %v89_v21 }
 0x243   :  { %1932 = vpow2.f32 %v1737_v24 }
 0x24b   :  { %v1929_v22 = vpop.eup %1928 }
 0x24c   :  { %211 = vrot.lane.b32.xlu1 %v1929_v22, %s2055_s19  ;;  %v1931_v23 = vpop.eup %1930 }
 0x24d   :  { %v1933_v25 = vpop.eup %1932 }
 0x24e   :  { %v170_v26 = vadd.f32 1.0, %v1933_v25 }
 0x250   :  { %176 = vrot.lane.b32.xlu1 %v1931_v23, %s2053_s1  ;;  %1934 = vrcp.f32 %v170_v26 }
 0x25a   :  { %v1935_v29 = vpop.eup %1934 }
 0x25b   :  { %v174_v33 = vmul.f32 0.0, %v1935_v29 }
 0x2be   :  { %v212_v27 = vpop.permute.xlu1 %211 }
 0x2bf   :  { %v214_v28 = vmul.f32 %v1927_v14, %v212_v27 }
 0x2c1   :  { %222 = vrot.lane.b32.xlu0 %v214_v28, %s2056_s20 }
 0x2c2   :  { %v177_v30 = vpop.permute.xlu1 %176 }
 0x2c3   :  { %v179_v31 = vmul.f32 %v1935_v29, %v177_v30 }
 0x2c5   :  { %181 = vrot.lane.b32.xlu1 %v179_v31, %s2054_s16  ;;  %v1749_v31 = vld [vmem:[%s2364_s0 + $0x4] sm:$0x3] }
 0x333   :  { %v223_v32 = vpop.permute.xlu0 %222 }
 0x334   :  { %1739 = vst.msk [vmem:[%s2365_s2 + $0x1e] sm:$0x3] %vm219_vm1, %v223_v32  ;;  %1852 = vmatmul.mubr.msk.f32.vlgmr.msra.gmra.mrb[2].mxu1 %vm15_vm2, %v223_v32 }
 0x335   :  { %1860 = vmatpush3.msra.mxu1 %v2077_v1  ;;  %1861 = vmatprep.mubr.msk.f32.mxu1 %vm2051_vm0, %v2050_v0 }
 0x336   :  { %1869 = vmatprep.subr.mxu1 %v2050_v0 }
 0x337   :  { %v182_v34 = vpop.permute.xlu1 %181 }
 0x338   :  { %v184_v35 = vadd.f32 %v182_v34, %v174_v33 }
 0x33a   :  { %1936 = vtanh.f32 %v184_v35 }
 0x344   :  { %v1937_v36 = vpop.eup %1936 }
 0x345   :  { %187 = vrot.lane.b32.xlu1 %v1937_v36, %s2055_s19 }
 0x3b7   :  { %v188_v37 = vpop.permute.xlu1 %187 }
 0x3b8   :  { %v190_v38 = vmul.f32 %v1935_v29, %v188_v37 }
 0x3ba   :  { %216 = vrot.lane.b32.xlu1 %v190_v38, %s2057_s23 }
 0x407   :  { %v374_v39 = vpop.f32.mrb[2].mxu1 }
 0x408   :  { %379 = vrot.lane.b32.xlu0 %v374_v39, %s2052_s11  ;;  %v1853_v40 = vpop.f32.mrb[3].mxu1 }
 0x42c   :  { %v217_v41 = vpop.permute.xlu1 %216 }
 0x42d   :  { %220 = vst.msk [vmem:[%s2365_s2] sm:$0x3] %vm219_vm1, %v217_v41  ;;  %1847 = vmatmul.mubr.msk.f32.vlgmr.msra.gmra.mrb[2].mxu0 %vm15_vm2, %v217_v41 }
 0x42e   :  { %1855 = vmatpush3.msra.mxu0 %v2095_v4  ;;  %1856 = vmatprep.mubr.msk.f32.mxu0 %vm2051_vm0, %v2050_v0 }
 0x42f   :  { %1864 = vmatprep.subr.mxu0 %v2050_v0 }
 0x47a   :  { %v380_v43 = vpop.permute.xlu0 %379 }
 0x47b   :  { %v382_v44 = vadd.f32 %v1741_v42, %v380_v43 }
 0x47d   :  { %1938 = vtanh.f32 %v382_v44  ;;  %v1746_v46 = vmul.f32 -1.442695, %v382_v44 }
 0x47f   :  { %1940 = vpow2.f32 %v1746_v46 }
 0x487   :  { %v1939_v45 = vpop.eup %1938 }
 0x488   :  { %416 = vrot.lane.b32.xlu0 %v1939_v45, %s2053_s1 }
 0x489   :  { %v1941_v47 = vpop.eup %1940 }
 0x48a   :  { %v410_v48 = vadd.f32 1.0, %v1941_v47 }
 0x48c   :  { %1942 = vrcp.f32 %v410_v48 }
 0x496   :  { %v1943_v49 = vpop.eup %1942 }
 0x497   :  { %v414_v54 = vmul.f32 %v1943_v49, %v2112_v20 }
 0x4fa   :  { %v417_v50 = vpop.permute.xlu0 %416 }
 0x4fb   :  { %v419_v51 = vmul.f32 %v1943_v49, %v417_v50 }
 0x4fd   :  { %421 = vrot.lane.b32.xlu0 %v419_v51, %s2054_s16 }
 0x500   :  { %v300_v52 = vpop.f32.mrb[2].mxu0 }
 0x501   :  { %v1848_v53 = vpop.f32.mrb[3].mxu0  ;;  %v304_v58 = vadd.f32 %v1740_v55, %v300_v52  ;;  %v1759_v55 = vld [vmem:[%s2364_s0 + $0x8] sm:$0x3] }
 0x503   :  { %v1745_v61 = vmul.f32 -1.442695, %v304_v58 }
 0x56f   :  { %v422_v56 = vpop.permute.xlu0 %421 }
 0x570   :  { %v424_v57 = vadd.f32 %v422_v56, %v414_v54 }
 0x572   :  { %1944 = vtanh.f32 %v424_v57 }
 0x573   :  { %1946 = vtanh.f32 %v304_v58 }
 0x574   :  { %1948 = vpow2.f32 %v1745_v61 }
 0x57c   :  { %v1945_v59 = vpop.eup %1944 }
 0x57d   :  { %427 = vrot.lane.b32.xlu0 %v1945_v59, %s2055_s19  ;;  %v1947_v60 = vpop.eup %1946 }
 0x57e   :  { %v1949_v62 = vpop.eup %1948 }
 0x57f   :  { %v386_v63 = vadd.f32 1.0, %v1949_v62 }
 0x581   :  { %392 = vrot.lane.b32.xlu0 %v1947_v60, %s2053_s1  ;;  %1950 = vrcp.f32 %v386_v63 }
 0x58b   :  { %v1951_v5 = vpop.eup %1950 }
 0x58c   :  { %v390_v9 = vmul.f32 %v1951_v5, %v184_v35 }
 0x5ef   :  { %v428_v2 = vpop.permute.xlu0 %427 }
 0x5f0   :  { %v430_v3 = vmul.f32 %v1943_v49, %v428_v2 }
 0x5f2   :  { %438 = vrot.lane.b32.xlu1 %v430_v3, %s2056_s20 }
 0x5f3   :  { %v393_v6 = vpop.permute.xlu0 %392 }
 0x5f4   :  { %v395_v7 = vmul.f32 %v1951_v5, %v393_v6 }
 0x5f6   :  { %397 = vrot.lane.b32.xlu1 %v395_v7, %s2054_s16  ;;  %v1758_v7 = vld [vmem:[%s2364_s0 + $0x6] sm:$0x3] }
 0x664   :  { %v439_v8 = vpop.permute.xlu1 %438 }
 0x665   :  { %1748 = vst.msk [vmem:[%s2365_s2 + $0x1a] sm:$0x3] %vm219_vm1, %v439_v8  ;;  %1862 = vmatmul.mubr.msk.f32.vlgmr.msra.gmra.mrb[4].mxu1 %vm15_vm2, %v439_v8 }
 0x666   :  { %1870 = vmatpush3.msra.mxu1 %v2077_v1  ;;  %1871 = vmatprep.mubr.msk.f32.mxu1 %vm2051_vm0, %v2050_v0 }
 0x667   :  { %1879 = vmatprep.subr.mxu1 %v2050_v0 }
 0x668   :  { %v398_v10 = vpop.permute.xlu1 %397 }
 0x669   :  { %v400_v11 = vadd.f32 %v398_v10, %v390_v9 }
 0x66b   :  { %1952 = vtanh.f32 %v400_v11 }
 0x675   :  { %v1953_v12 = vpop.eup %1952 }
 0x676   :  { %403 = vrot.lane.b32.xlu1 %v1953_v12, %s2055_s19 }
 0x6e8   :  { %v404_v13 = vpop.permute.xlu1 %403 }
 0x6e9   :  { %v406_v14 = vmul.f32 %v1951_v5, %v404_v13 }
 0x6eb   :  { %432 = vrot.lane.b32.xlu1 %v406_v14, %s2057_s23 }
 0x738   :  { %v590_v15 = vpop.f32.mrb[4].mxu1 }
 0x739   :  { %595 = vrot.lane.b32.xlu0 %v590_v15, %s2052_s11  ;;  %v1863_v16 = vpop.f32.mrb[5].mxu1 }
 0x75d   :  { %v433_v17 = vpop.permute.xlu1 %432 }
 0x75e   :  { %1747 = vst.msk [vmem:[%s2365_s2 + $0x4] sm:$0x3] %vm219_vm1, %v433_v17  ;;  %1857 = vmatmul.mubr.msk.f32.vlgmr.msra.gmra.mrb[4].mxu0 %vm15_vm2, %v433_v17 }
 0x75f   :  { %1865 = vmatpush3.msra.mxu0 %v2095_v4  ;;  %1866 = vmatprep.mubr.msk.f32.mxu0 %vm2051_vm0, %v2050_v0 }
 0x760   :  { %1874 = vmatprep.subr.mxu0 %v2050_v0 }
 0x7ab   :  { %v596_v19 = vpop.permute.xlu0 %595 }
 0x7ac   :  { %v598_v20 = vadd.f32 %v1750_v18, %v596_v19 }
 0x7ae   :  { %1954 = vtanh.f32 %v598_v20  ;;  %v1755_v22 = vmul.f32 -1.442695, %v598_v20 }
 0x7b0   :  { %1956 = vpow2.f32 %v1755_v22 }
 0x7b8   :  { %v1955_v21 = vpop.eup %1954 }
 0x7b9   :  { %632 = vrot.lane.b32.xlu0 %v1955_v21, %s2053_s1 }
 0x7ba   :  { %v1957_v23 = vpop.eup %1956 }
 0x7bb   :  { %v626_v24 = vadd.f32 1.0, %v1957_v23 }
 0x7bd   :  { %1958 = vrcp.f32 %v626_v24 }
 0x7c7   :  { %v1959_v25 = vpop.eup %1958 }
 0x7c8   :  { %v630_v30 = vmul.f32 %v1959_v25, %v424_v57 }
 0x82b   :  { %v633_v26 = vpop.permute.xlu0 %632 }
 0x82c   :  { %v635_v27 = vmul.f32 %v1959_v25, %v633_v26 }
 0x82e   :  { %637 = vrot.lane.b32.xlu0 %v635_v27, %s2054_s16 }
 0x831   :  { %v516_v28 = vpop.f32.mrb[4].mxu0 }
 0x832   :  { %v1858_v29 = vpop.f32.mrb[5].mxu0  ;;  %v520_v34 = vadd.f32 %v1749_v31, %v516_v28  ;;  %v1768_v31 = vld [vmem:[%s2364_s0 + $0x6] sm:$0x3] }
 0x834   :  { %v1754_v37 = vmul.f32 -1.442695, %v520_v34 }
 0x8a0   :  { %v638_v32 = vpop.permute.xlu0 %637 }
 0x8a1   :  { %v640_v33 = vadd.f32 %v638_v32, %v630_v30 }
 0x8a3   :  { %1960 = vtanh.f32 %v640_v33 }
 0x8a4   :  { %1962 = vtanh.f32 %v520_v34 }
 0x8a5   :  { %1964 = vpow2.f32 %v1754_v37 }
 0x8ad   :  { %v1961_v35 = vpop.eup %1960 }
 0x8ae   :  { %643 = vrot.lane.b32.xlu1 %v1961_v35, %s2055_s19  ;;  %v1963_v36 = vpop.eup %1962 }
 0x8af   :  { %v1965_v38 = vpop.eup %1964 }
 0x8b0   :  { %v602_v39 = vadd.f32 1.0, %v1965_v38 }
 0x8b2   :  { %608 = vrot.lane.b32.xlu1 %v1963_v36, %s2053_s1  ;;  %1966 = vrcp.f32 %v602_v39 }
 0x8bc   :  { %v1967_v42 = vpop.eup %1966 }
 0x8bd   :  { %v606_v46 = vmul.f32 %v1967_v42, %v400_v11 }
 0x920   :  { %v644_v40 = vpop.permute.xlu1 %643 }
 0x921   :  { %v646_v41 = vmul.f32 %v1959_v25, %v644_v40 }
 0x923   :  { %654 = vrot.lane.b32.xlu0 %v646_v41, %s2056_s20  ;;  %v1767_v41 = vld [vmem:[%s2364_s0 + $0x8] sm:$0x3] }
 0x924   :  { %v609_v43 = vpop.permute.xlu1 %608 }
 0x925   :  { %v611_v44 = vmul.f32 %v1967_v42, %v609_v43 }
 0x927   :  { %613 = vrot.lane.b32.xlu0 %v611_v44, %s2054_s16 }
 0x995   :  { %v655_v45 = vpop.permute.xlu0 %654 }
 0x996   :  { %1757 = vst.msk [vmem:[%s2365_s2 + $0x16] sm:$0x3] %vm219_vm1, %v655_v45  ;;  %1872 = vmatmul.mubr.msk.f32.vlgmr.msra.gmra.mrb[6].mxu1 %vm15_vm2, %v655_v45 }
 0x997   :  { %1880 = vmatpush3.msra.mxu1 %v2077_v1  ;;  %1881 = vmatprep.mubr.msk.f32.mxu1 %vm2051_vm0, %v2050_v0 }
 0x998   :  { %1889 = vmatprep.subr.mxu1 %v2050_v0 }
 0x999   :  { %v614_v47 = vpop.permute.xlu0 %613 }
 0x99a   :  { %v616_v48 = vadd.f32 %v614_v47, %v606_v46 }
 0x99c   :  { %1968 = vtanh.f32 %v616_v48 }
 0x9a6   :  { %v1969_v49 = vpop.eup %1968 }
 0x9a7   :  { %619 = vrot.lane.b32.xlu1 %v1969_v49, %s2055_s19 }
 0xa19   :  { %v620_v50 = vpop.permute.xlu1 %619 }
 0xa1a   :  { %v622_v51 = vmul.f32 %v1967_v42, %v620_v50 }
 0xa1c   :  { %648 = vrot.lane.b32.xlu1 %v622_v51, %s2057_s23 }
 0xa69   :  { %v806_v52 = vpop.f32.mrb[6].mxu1 }
 0xa6a   :  { %v1873_v53 = vpop.f32.mrb[7].mxu1  ;;  %811 = vrot.lane.b32.xlu0 %v806_v52, %s2052_s11 }
 0xa8e   :  { %v649_v54 = vpop.permute.xlu1 %648 }
 0xa8f   :  { %1756 = vst.msk [vmem:[%s2365_s2 + $0x8] sm:$0x3] %vm219_vm1, %v649_v54  ;;  %1867 = vmatmul.mubr.msk.f32.vlgmr.msra.gmra.mrb[6].mxu0 %vm15_vm2, %v649_v54 }
 0xa90   :  { %1875 = vmatpush3.msra.mxu0 %v2095_v4  ;;  %1876 = vmatprep.mubr.msk.f32.mxu0 %vm2051_vm0, %v2050_v0 }
 0xa91   :  { %1884 = vmatprep.subr.mxu0 %v2050_v0 }
 0xadc   :  { %v812_v56 = vpop.permute.xlu0 %811 }
 0xadd   :  { %v814_v57 = vadd.f32 %v1759_v55, %v812_v56 }
 0xadf   :  { %1970 = vtanh.f32 %v814_v57  ;;  %v1764_v59 = vmul.f32 -1.442695, %v814_v57 }
 0xae1   :  { %1972 = vpow2.f32 %v1764_v59 }
 0xae9   :  { %v1971_v58 = vpop.eup %1970 }
 0xaea   :  { %848 = vrot.lane.b32.xlu0 %v1971_v58, %s2053_s1 }
 0xaeb   :  { %v1973_v60 = vpop.eup %1972 }
 0xaec   :  { %v842_v61 = vadd.f32 1.0, %v1973_v60 }
 0xaee   :  { %1974 = vrcp.f32 %v842_v61 }
 0xaf8   :  { %v1975_v62 = vpop.eup %1974 }
 0xaf9   :  { %v846_v6 = vmul.f32 %v1975_v62, %v640_v33 }
 0xb5c   :  { %v849_v63 = vpop.permute.xlu0 %848 }
 0xb5d   :  { %v851_v2 = vmul.f32 %v1975_v62, %v849_v63 }
 0xb5f   :  { %853 = vrot.lane.b32.xlu1 %v851_v2, %s2054_s16 }
 0xb62   :  { %v732_v3 = vpop.f32.mrb[6].mxu0 }
 0xb63   :  { %v1868_v5 = vpop.f32.mrb[7].mxu0  ;;  %v736_v10 = vadd.f32 %v1758_v7, %v732_v3  ;;  %v1777_v7 = vld [vmem:[%s2364_s0 + $0x4] sm:$0x3] }
 0xb65   :  { %v1763_v13 = vmul.f32 -1.442695, %v736_v10 }
 0xbd1   :  { %v854_v8 = vpop.permute.xlu1 %853 }
 0xbd2   :  { %v2215_v9 = vadd.f32 %v854_v8, %v846_v6 }
 0xbd4   :  { %1976 = vtanh.f32 %v2215_v9 }
 0xbd5   :  { %1978 = vtanh.f32 %v736_v10 }
 0xbd6   :  { %1980 = vpow2.f32 %v1763_v13 }
 0xbde   :  { %v1977_v11 = vpop.eup %1976 }
 0xbdf   :  { %859 = vrot.lane.b32.xlu0 %v1977_v11, %s2055_s19  ;;  %v1979_v12 = vpop.eup %1978  ;;  %v1776_v11 = vld [vmem:[%s2364_s0 + $0xa] sm:$0x3] }
 0xbe0   :  { %v1981_v14 = vpop.eup %1980 }
 0xbe1   :  { %v818_v15 = vadd.f32 1.0, %v1981_v14 }
 0xbe3   :  { %824 = vrot.lane.b32.xlu0 %v1979_v12, %s2053_s1  ;;  %1982 = vrcp.f32 %v818_v15 }
 0xbed   :  { %v1983_v18 = vpop.eup %1982 }
 0xbee   :  { %v822_v22 = vmul.f32 %v1983_v18, %v616_v48 }
 0xc51   :  { %v860_v16 = vpop.permute.xlu0 %859 }
 0xc52   :  { %v862_v17 = vmul.f32 %v1975_v62, %v860_v16 }
 0xc54   :  { %870 = vrot.lane.b32.xlu1 %v862_v17, %s2056_s20 }
 0xc55   :  { %v825_v19 = vpop.permute.xlu0 %824 }
 0xc56   :  { %v827_v20 = vmul.f32 %v1983_v18, %v825_v19 }
 0xc58   :  { %829 = vrot.lane.b32.xlu1 %v827_v20, %s2054_s16 }
 0xcc6   :  { %v871_v21 = vpop.permute.xlu1 %870 }
 0xcc7   :  { %1766 = vst.msk [vmem:[%s2365_s2 + $0x12] sm:$0x3] %vm219_vm1, %v871_v21  ;;  %1882 = vmatmul.mubr.msk.f32.vlgmr.msra.gmra.mrb[8].mxu1 %vm15_vm2, %v871_v21 }
 0xcc8   :  { %1890 = vmatpush3.msra.mxu1 %v2077_v1  ;;  %1891 = vmatprep.mubr.msk.f32.mxu1 %vm2051_vm0, %v2050_v0 }
 0xcc9   :  { %1899 = vmatprep.subr.mxu1 %v2050_v0 }
 0xcca   :  { %v830_v23 = vpop.permute.xlu1 %829 }
 0xccb   :  { %v832_v24 = vadd.f32 %v830_v23, %v822_v22 }
 0xccd   :  { %1984 = vtanh.f32 %v832_v24 }
 0xcd7   :  { %v1985_v25 = vpop.eup %1984 }
 0xcd8   :  { %835 = vrot.lane.b32.xlu0 %v1985_v25, %s2055_s19 }
 0xd4a   :  { %v836_v26 = vpop.permute.xlu0 %835 }
 0xd4b   :  { %v838_v27 = vmul.f32 %v1983_v18, %v836_v26 }
 0xd4d   :  { %864 = vrot.lane.b32.xlu1 %v838_v27, %s2057_s23 }
 0xd9a   :  { %v1020_v28 = vpop.f32.mrb[8].mxu1 }
 0xd9b   :  { %v1883_v29 = vpop.f32.mrb[9].mxu1  ;;  %1025 = vrot.lane.b32.xlu0 %v1020_v28, %s2052_s11 }
 0xdbf   :  { %v865_v30 = vpop.permute.xlu1 %864 }
 0xdc0   :  { %1765 = vst.msk [vmem:[%s2365_s2 + $0xc] sm:$0x3] %vm219_vm1, %v865_v30  ;;  %1877 = vmatmul.mubr.msk.f32.vlgmr.msra.gmra.mrb[8].mxu0 %vm15_vm2, %v865_v30 }
 0xdc1   :  { %1885 = vmatpush3.msra.mxu0 %v2095_v4  ;;  %1886 = vmatprep.mubr.msk.f32.mxu0 %vm2051_vm0, %v2050_v0 }
 0xdc2   :  { %1894 = vmatprep.subr.mxu0 %v2050_v0 }
 0xe0d   :  { %v1026_v32 = vpop.permute.xlu0 %1025 }
 0xe0e   :  { %v1028_v33 = vadd.f32 %v1768_v31, %v1026_v32 }
 0xe10   :  { %1986 = vtanh.f32 %v1028_v33  ;;  %v1773_v35 = vmul.f32 -1.442695, %v1028_v33 }
 0xe12   :  { %1988 = vpow2.f32 %v1773_v35 }
 0xe1a   :  { %v1987_v34 = vpop.eup %1986 }
 0xe1b   :  { %1062 = vrot.lane.b32.xlu1 %v1987_v34, %s2053_s1 }
 0xe1c   :  { %v1989_v36 = vpop.eup %1988 }
 0xe1d   :  { %v1056_v37 = vadd.f32 1.0, %v1989_v36 }
 0xe1f   :  { %1990 = vrcp.f32 %v1056_v37 }
 0xe29   :  { %v1991_v38 = vpop.eup %1990 }
 0xe2a   :  { %v1060_v47 = vmul.f32 %v1991_v38, %v2215_v9 }
 0xe8d   :  { %v1063_v39 = vpop.permute.xlu1 %1062 }
 0xe8e   :  { %v1065_v40 = vmul.f32 %v1991_v38, %v1063_v39 }
 0xe90   :  { %1067 = vrot.lane.b32.xlu0 %v1065_v40, %s2054_s16 }
 0xe93   :  { %v946_v42 = vpop.f32.mrb[8].mxu0 }
 0xe94   :  { %v950_v43 = vadd.f32 %v1767_v41, %v946_v42  ;;  %v1878_v44 = vpop.f32.mrb[9].mxu0 }
 0xe96   :  { %1992 = vtanh.f32 %v950_v43  ;;  %v1772_v46 = vmul.f32 -1.442695, %v950_v43  ;;  %v1785_v43 = vld [vmem:[%s2364_s0 + $0xc] sm:$0x3] }
 0xe98   :  { %1994 = vpow2.f32 %v1772_v46 }
 0xea0   :  { %v1993_v45 = vpop.eup %1992 }
 0xea1   :  { %1038 = vrot.lane.b32.xlu0 %v1993_v45, %s2053_s1 }
 0xea2   :  { %v1995_v48 = vpop.eup %1994 }
 0xea3   :  { %v1032_v51 = vadd.f32 1.0, %v1995_v48 }
 0xf02   :  { %v1068_v49 = vpop.permute.xlu0 %1067 }
 0xf03   :  { %v2253_v50 = vadd.f32 %v1068_v49, %v1060_v47 }
 0xf05   :  { %1996 = vtanh.f32 %v2253_v50 }
 0xf06   :  { %1998 = vrcp.f32 %v1032_v51 }
 0xf0f   :  { %v1997_v52 = vpop.eup %1996 }
 0xf10   :  { %1073 = vrot.lane.b32.xlu1 %v1997_v52, %s2055_s19  ;;  %v1999_v53 = vpop.eup %1998 }
 0xf11   :  { %v1036_v58 = vmul.f32 %v1999_v53, %v832_v24 }
 0xf13   :  { %v1039_v54 = vpop.permute.xlu0 %1038 }
 0xf14   :  { %v1041_v55 = vmul.f32 %v1999_v53, %v1039_v54 }
 0xf16   :  { %1043 = vrot.lane.b32.xlu0 %v1041_v55, %s2054_s16 }
 0xf82   :  { %v1074_v56 = vpop.permute.xlu1 %1073 }
 0xf83   :  { %v1076_v57 = vmul.f32 %v1991_v38, %v1074_v56 }
 0xf85   :  { %1084 = vrot.lane.b32.xlu1 %v1076_v57, %s2056_s20 }
 0xf88   :  { %v1044_v59 = vpop.permute.xlu0 %1043 }
 0xf89   :  { %v1046_v60 = vadd.f32 %v1044_v59, %v1036_v58 }
 0xf8b   :  { %2000 = vtanh.f32 %v1046_v60 }
 0xf95   :  { %v2001_v61 = vpop.eup %2000 }
 0xf96   :  { %1049 = vrot.lane.b32.xlu1 %v2001_v61, %s2055_s19 }
 0xff7   :  { %v1085_v62 = vpop.permute.xlu1 %1084 }
 0xff8   :  { %1775 = vst.msk [vmem:[%s2365_s2 + $0xe] sm:$0x3] %vm219_vm1, %v1085_v62  ;;  %1892 = vmatmul.mubr.msk.f32.vlgmr.msra.gmra.mrb[10].mxu1 %vm15_vm2, %v1085_v62 }
 0xff9   :  { %1900 = vmatpush3.msra.mxu1 %v2077_v1  ;;  %1901 = vmatprep.mubr.msk.f32.mxu1 %vm2051_vm0, %v2050_v0 }
 0xffa   :  { %1909 = vmatprep.subr.mxu1 %v2050_v0 }
0x1008   :  { %v1050_v63 = vpop.permute.xlu1 %1049 }
0x1009   :  { %v1052_v2 = vmul.f32 %v1999_v53, %v1050_v63 }
0x100b   :  { %1078 = vrot.lane.b32.xlu0 %v1052_v2, %s2057_s23 }
0x107d   :  { %v1079_v3 = vpop.permute.xlu0 %1078 }
0x107e   :  { %1774 = vst.msk [vmem:[%s2365_s2 + $0x10] sm:$0x3] %vm219_vm1, %v1079_v3  ;;  %1887 = vmatmul.mubr.msk.f32.vlgmr.msra.gmra.mrb[10].mxu0 %vm15_vm2, %v1079_v3 }
0x107f   :  { %1895 = vmatpush3.msra.mxu0 %v2095_v4  ;;  %1896 = vmatprep.mubr.msk.f32.mxu0 %vm2051_vm0, %v2050_v0 }
0x1080   :  { %1904 = vmatprep.subr.mxu0 %v2050_v0 }
0x10cb   :  { %v1234_v5 = vpop.f32.mrb[10].mxu1 }
0x10cc   :  { %1239 = vrot.lane.b32.xlu1 %v1234_v5, %s2052_s11  ;;  %v1893_v6 = vpop.f32.mrb[11].mxu1 }
0x113e   :  { %v1240_v8 = vpop.permute.xlu1 %1239 }
0x113f   :  { %v1242_v9 = vadd.f32 %v1777_v7, %v1240_v8 }
0x1141   :  { %2002 = vtanh.f32 %v1242_v9  ;;  %v1782_v16 = vmul.f32 -1.442695, %v1242_v9 }
0x114b   :  { %v2003_v10 = vpop.eup %2002 }
0x114c   :  { %1276 = vrot.lane.b32.xlu0 %v2003_v10, %s2053_s1 }
0x1151   :  { %v1160_v12 = vpop.f32.mrb[10].mxu0 }
0x1152   :  { %v1164_v13 = vadd.f32 %v1776_v11, %v1160_v12  ;;  %v1888_v14 = vpop.f32.mrb[11].mxu0 }
0x1154   :  { %2004 = vtanh.f32 %v1164_v13  ;;  %v1781_v19 = vmul.f32 -1.442695, %v1164_v13 }
0x1155   :  { %2006 = vpow2.f32 %v1782_v16 }
0x115e   :  { %v2005_v15 = vpop.eup %2004 }
0x115f   :  { %1252 = vrot.lane.b32.xlu0 %v2005_v15, %s2053_s1  ;;  %v2007_v17 = vpop.eup %2006  ;;  %v1794_v15 = vld [vmem:[%s2364_s0 + $0xe] sm:$0x3] }
0x1160   :  { %v1270_v18 = vadd.f32 1.0, %v2007_v17 }
0x1162   :  { %2008 = vrcp.f32 %v1270_v18 }
0x1163   :  { %2010 = vpow2.f32 %v1781_v19 }
0x116c   :  { %v2009_v20 = vpop.eup %2008 }
0x116d   :  { %v2011_v23 = vpop.eup %2010  ;;  %v1274_v28 = vmul.f32 %v2009_v20, %v2253_v50 }
0x116e   :  { %v1246_v24 = vadd.f32 1.0, %v2011_v23 }
0x1170   :  { %2012 = vrcp.f32 %v1246_v24 }
0x117a   :  { %v2013_v25 = vpop.eup %2012 }
0x117b   :  { %v1250_v32 = vmul.f32 %v2013_v25, %v1046_v60 }
0x11be   :  { %v1277_v21 = vpop.permute.xlu0 %1276 }
0x11bf   :  { %v1279_v22 = vmul.f32 %v2009_v20, %v1277_v21 }
0x11c1   :  { %1281 = vrot.lane.b32.xlu1 %v1279_v22, %s2054_s16 }
0x11d1   :  { %v1253_v26 = vpop.permute.xlu0 %1252 }
0x11d2   :  { %v1255_v27 = vmul.f32 %v2013_v25, %v1253_v26 }
0x11d4   :  { %1257 = vrot.lane.b32.xlu0 %v1255_v27, %s2054_s16 }
0x1233   :  { %v1282_v29 = vpop.permute.xlu1 %1281 }
0x1234   :  { %v2291_v30 = vadd.f32 %v1282_v29, %v1274_v28  ;;  %v1518_v28 = vld [vmem:[%s2364_s0] sm:$0x3] }
0x1236   :  { %2014 = vtanh.f32 %v2291_v30 }
0x1240   :  { %v2015_v31 = vpop.eup %2014 }
0x1241   :  { %1287 = vrot.lane.b32.xlu1 %v2015_v31, %s2055_s19 }
0x1246   :  { %v1258_v33 = vpop.permute.xlu0 %1257 }
0x1247   :  { %v1260_v34 = vadd.f32 %v1258_v33, %v1250_v32 }
0x1249   :  { %2016 = vtanh.f32 %v1260_v34 }
0x1253   :  { %v2017_v35 = vpop.eup %2016 }
0x1254   :  { %1263 = vrot.lane.b32.xlu0 %v2017_v35, %s2055_s19 }
0x12b3   :  { %v1288_v36 = vpop.permute.xlu1 %1287 }
0x12b4   :  { %v1290_v37 = vmul.f32 %v2009_v20, %v1288_v36 }
0x12b6   :  { %1298 = vrot.lane.b32.xlu1 %v1290_v37, %s2056_s20 }
0x12c6   :  { %v1264_v38 = vpop.permute.xlu0 %1263 }
0x12c7   :  { %v1266_v39 = vmul.f32 %v2013_v25, %v1264_v38 }
0x12c9   :  { %1292 = vrot.lane.b32.xlu1 %v1266_v39, %s2057_s23 }
0x1328   :  { %v1299_v40 = vpop.permute.xlu1 %1298 }
0x1329   :  { %1784 = vst.msk [vmem:[%s2365_s2 + $0xa] sm:$0x3] %vm219_vm1, %v1299_v40  ;;  %1902 = vmatmul.mubr.msk.f32.vlgmr.msra.gmra.mrb[12].mxu1 %vm15_vm2, %v1299_v40 }
0x132a   :  { %1910 = vmatpush3.msra.mxu1 %v2077_v1  ;;  %1911 = vmatprep.mubr.msk.f32.mxu1 %vm2051_vm0, %v2050_v0 }
0x133b   :  { %v1293_v41 = vpop.permute.xlu1 %1292 }
0x133c   :  { %1783 = vst.msk [vmem:[%s2365_s2 + $0x14] sm:$0x3] %vm219_vm1, %v1293_v41  ;;  %1897 = vmatmul.mubr.msk.f32.vlgmr.msra.gmra.mrb[12].mxu0 %vm15_vm2, %v1293_v41 }
0x133d   :  { %1905 = vmatpush3.msra.mxu0 %v2095_v4  ;;  %1906 = vmatprep.mubr.msk.f32.mxu0 %vm2051_vm0, %v2050_v0  ;;  %v1786_v4 = vld [vmem:[%s2364_s0 + $0x2] sm:$0x3] }
0x13fc   :  { %v1448_v42 = vpop.f32.mrb[12].mxu1 }
0x13fd   :  { %1453 = vrot.lane.b32.xlu0 %v1448_v42, %s2052_s11  ;;  %v1903_v1 = vpop.f32.mrb[13].mxu1 }
0x140f   :  { %v1374_v44 = vpop.f32.mrb[12].mxu0 }
0x1410   :  { %v1378_v45 = vadd.f32 %v1785_v43, %v1374_v44  ;;  %v1898_v46 = vpop.f32.mrb[13].mxu0 }
0x1412   :  { %2018 = vtanh.f32 %v1378_v45  ;;  %v1790_v48 = vmul.f32 -1.442695, %v1378_v45 }
0x141c   :  { %v2019_v47 = vpop.eup %2018 }
0x141d   :  { %1466 = vrot.lane.b32.xlu0 %v2019_v47, %s2053_s1 }
0x146f   :  { %v1454_v0 = vpop.permute.xlu0 %1453 }
0x1470   :  { %v1456_v49 = vadd.f32 %v1786_v4, %v1454_v0 }
0x1472   :  { %2020 = vtanh.f32 %v1456_v49  ;;  %v1791_v56 = vmul.f32 -1.442695, %v1456_v49 }
0x1473   :  { %2022 = vpow2.f32 %v1790_v48 }
0x147c   :  { %v2021_v50 = vpop.eup %2020 }
0x147d   :  { %1490 = vrot.lane.b32.xlu1 %v2021_v50, %s2053_s1  ;;  %v2023_v51 = vpop.eup %2022 }
0x147e   :  { %v1460_v52 = vadd.f32 1.0, %v2023_v51 }
0x1480   :  { %2024 = vrcp.f32 %v1460_v52 }
0x1481   :  { %2026 = vpow2.f32 %v1791_v56 }
0x148a   :  { %v2025_v53 = vpop.eup %2024 }
0x148b   :  { %v2027_v57 = vpop.eup %2026  ;;  %v1464_v62 = vmul.f32 %v2025_v53, %v1260_v34 }
0x148c   :  { %v1484_v58 = vadd.f32 1.0, %v2027_v57 }
0x148e   :  { %2028 = vrcp.f32 %v1484_v58 }
0x148f   :  { %v1467_v54 = vpop.permute.xlu0 %1466 }
0x1490   :  { %v1469_v55 = vmul.f32 %v2025_v53, %v1467_v54 }
0x1492   :  { %1471 = vrot.lane.b32.xlu0 %v1469_v55, %s2054_s16 }
0x1498   :  { %v2029_v59 = vpop.eup %2028 }
0x1499   :  { %v1488_v5 = vmul.f32 %v2029_v59, %v2291_v30 }
0x14ef   :  { %v1491_v60 = vpop.permute.xlu1 %1490 }
0x14f0   :  { %v1493_v61 = vmul.f32 %v2029_v59, %v1491_v60 }
0x14f2   :  { %1495 = vrot.lane.b32.xlu1 %v1493_v61, %s2054_s16 }
0x1504   :  { %v1472_v63 = vpop.permute.xlu0 %1471 }
0x1505   :  { %v1474_v2 = vadd.f32 %v1472_v63, %v1464_v62 }
0x1507   :  { %2030 = vtanh.f32 %v1474_v2 }
0x1511   :  { %v2031_v3 = vpop.eup %2030 }
0x1512   :  { %1477 = vrot.lane.b32.xlu0 %v2031_v3, %s2055_s19 }
0x1564   :  { %v1496_v6 = vpop.permute.xlu1 %1495 }
0x1565   :  { %v1498_v7 = vadd.f32 %v1496_v6, %v1488_v5 }
0x1567   :  { %2032 = vtanh.f32 %v1498_v7 }
0x1571   :  { %v2033_v8 = vpop.eup %2032 }
0x1572   :  { %1501 = vrot.lane.b32.xlu1 %v2033_v8, %s2055_s19 }
0x1584   :  { %v1478_v9 = vpop.permute.xlu0 %1477 }
0x1585   :  { %v1480_v10 = vmul.f32 %v2025_v53, %v1478_v9 }
0x1587   :  { %1506 = vrot.lane.b32.xlu0 %v1480_v10, %s2057_s23 }
0x15e4   :  { %v1502_v11 = vpop.permute.xlu1 %1501 }
0x15e5   :  { %v1504_v12 = vmul.f32 %v2029_v59, %v1502_v11 }
0x15e7   :  { %1512 = vrot.lane.b32.xlu1 %v1504_v12, %s2056_s20 }
0x15f9   :  { %v1507_v13 = vpop.permute.xlu0 %1506 }
0x15fa   :  { %1792 = vst.msk [vmem:[%s2365_s2 + $0x18] sm:$0x3] %vm219_vm1, %v1507_v13  ;;  %1907 = vmatmul.mubr.msk.f32.vlgmr.msra.gmra.mrb[14].mxu0 %vm15_vm2, %v1507_v13 }
0x1659   :  { %v1513_v14 = vpop.permute.xlu1 %1512 }
0x165a   :  { %1793 = vst.msk [vmem:[%s2365_s2 + $0x6] sm:$0x3] %vm219_vm1, %v1513_v14  ;;  %1912 = vmatmul.mubr.msk.f32.vlgmr.msra.gmra.mrb[14].mxu1 %vm15_vm2, %v1513_v14 }
0x16cd   :  { %v1588_v16 = vpop.f32.mrb[14].mxu0 }
0x16ce   :  { %v1592_v17 = vadd.f32 %v1794_v15, %v1588_v16  ;;  %v1908_v18 = vpop.f32.mrb[15].mxu0 }
0x16d0   :  { %2034 = vtanh.f32 %v1592_v17  ;;  %v1798_v21 = vmul.f32 -1.442695, %v1592_v17 }
0x16d2   :  { %2036 = vpow2.f32 %v1798_v21 }
0x16da   :  { %v2035_v19 = vpop.eup %2034 }
0x16db   :  { %1680 = vrot.lane.b32.xlu0 %v2035_v19, %s2053_s1 }
0x16dc   :  { %v2037_v23 = vpop.eup %2036 }
0x16dd   :  { %v1674_v24 = vadd.f32 1.0, %v2037_v23 }
0x16df   :  { %2038 = vrcp.f32 %v1674_v24 }
0x16e9   :  { %v2039_v25 = vpop.eup %2038 }
0x16ea   :  { %v1678_v32 = vmul.f32 %v2039_v25, %v1474_v2 }
0x172d   :  { %v1662_v20 = vpop.f32.mrb[14].mxu1 }
0x172e   :  { %1667 = vrot.lane.b32.xlu1 %v1662_v20, %s2052_s11  ;;  %v1913_v22 = vpop.f32.mrb[15].mxu1 }
0x174d   :  { %v1681_v26 = vpop.permute.xlu0 %1680 }
0x174e   :  { %v1683_v27 = vmul.f32 %v2039_v25, %v1681_v26 }
0x1750   :  { %1685 = vrot.lane.b32.xlu0 %v1683_v27, %s2054_s16 }
0x17a0   :  { %v1668_v29 = vpop.permute.xlu1 %1667 }
0x17a1   :  { %v1670_v30 = vadd.f32 %v1668_v29, %v1518_v28 }
0x17a3   :  { %2040 = vtanh.f32 %v1670_v30  ;;  %v1799_v36 = vmul.f32 -1.442695, %v1670_v30 }
0x17ad   :  { %v2041_v31 = vpop.eup %2040 }
0x17ae   :  { %1704 = vrot.lane.b32.xlu1 %v2041_v31, %s2053_s1 }
0x17c2   :  { %v1686_v33 = vpop.permute.xlu0 %1685 }
0x17c3   :  { %v1688_v34 = vadd.f32 %v1686_v33, %v1678_v32 }
0x17c5   :  { %2042 = vtanh.f32 %v1688_v34 }
0x17c6   :  { %2044 = vpow2.f32 %v1799_v36 }
0x17cf   :  { %v2043_v35 = vpop.eup %2042 }
0x17d0   :  { %1691 = vrot.lane.b32.xlu0 %v2043_v35, %s2055_s19  ;;  %v2045_v37 = vpop.eup %2044 }
0x17d1   :  { %v1698_v38 = vadd.f32 1.0, %v2045_v37 }
0x17d3   :  { %2046 = vrcp.f32 %v1698_v38 }
0x17dd   :  { %v2047_v39 = vpop.eup %2046 }
0x17de   :  { %v1702_v43 = vmul.f32 %v2047_v39, %v1498_v7 }
0x1820   :  { %v1705_v40 = vpop.permute.xlu1 %1704 }
0x1821   :  { %v1707_v41 = vmul.f32 %v2047_v39, %v1705_v40 }
0x1823   :  { %1709 = vrot.lane.b32.xlu1 %v1707_v41, %s2054_s16 }
0x1842   :  { %v1692_v42 = vpop.permute.xlu0 %1691 }
0x1843   :  { %v1694_v1 = vmul.f32 %v2039_v25, %v1692_v42 }
0x1845   :  { %1720 = vrot.lane.b32.xlu0 %v1694_v1, %s2057_s23 }
0x1895   :  { %v1710_v44 = vpop.permute.xlu1 %1709 }
0x1896   :  { %v1712_v45 = vadd.f32 %v1710_v44, %v1702_v43 }
0x1898   :  { %2048 = vtanh.f32 %v1712_v45 }
0x18a2   :  { %v2049_v46 = vpop.eup %2048 }
0x18a3   :  { %1715 = vrot.lane.b32.xlu1 %v2049_v46, %s2055_s19 }
0x18b7   :  { %v1721_v47 = vpop.permute.xlu0 %1720 }
0x18b8   :  { %1800 = vst.msk [vmem:[%s2365_s2 + $0x1c] sm:$0x3] %vm219_vm1, %v1721_v47 }
0x1915   :  { %v1716_v4 = vpop.permute.xlu1 %1715 }
0x1916   :  { %v1718_v0 = vmul.f32 %v2047_v39, %v1716_v4 }
0x1918   :  { %1726 = vrot.lane.b32.xlu1 %v1718_v0, %s2056_s20 }
0x198a   :  { %v1727_v48 = vpop.permute.xlu1 %1726 }
0x198b   :  { %1801 = vst.msk [vmem:[%s2365_s2 + $0x2] sm:$0x3] %vm219_vm1, %v1727_v48 }

</bundles_post_ra>
